<compile_context>
chip_gen: v6e
topology: v6e:2x2x1
jax: 0.10.0
libtpu: 0.0.40
codegen_flags: <defaults>
</compile_context>

<pallas_src>
import functools

import jax
import jax.numpy as jnp
from jax.experimental import pallas as pl
from jax.experimental.pallas import tpu as pltpu

EPS = 1e-5  # nn.BatchNorm2d default eps


# --------------------------------------------------------------------------
# Helpers
# --------------------------------------------------------------------------
def _round_up(x, m):
    return (x + m - 1) // m * m


def _vmem_limit_bytes():
    """Generation-aware scoped VMEM limit with headroom for compiler scratch."""
    cap = 128 * 1024 * 1024  # v5e/v6e physical VMEM
    try:
        info = pltpu.get_tpu_info()
        cap = int(getattr(info, "vmem_capacity_bytes", cap))
    except Exception:
        pass
    # ~40 MiB on v7x (64 MiB/TC), capped at 64 MiB on v5e/v6e (128 MiB).
    return min(int(cap * 5 // 8), 64 * 1024 * 1024)


def _compiler_params():
    return pltpu.CompilerParams(
        dimension_semantics=("parallel",),
        vmem_limit_bytes=_vmem_limit_bytes(),
    )


# --------------------------------------------------------------------------
# Kernels (one batch image per grid step)
# --------------------------------------------------------------------------
def _conv_bn_stats_kernel(x_ref, w_ref, y_ref, part_ref, *, k):
    """KxK conv as k*k shifted matmuls (bf16 in, f32 acc); bf16 pre-BN output
    plus BN partials: row0 = sum, row1 = mean-centered sum of squares."""
    _, ho, wo, cp = y_ref.shape
    cin = x_ref.shape[-1]
    x = x_ref[0]                                            # (ho+k-1, wo+k-1, cin)
    acc = jnp.zeros((ho * wo, cp), jnp.float32)
    for kh in range(k):
        for kw in range(k):
            patch = x[kh:kh + ho, kw:kw + wo, :].reshape(ho * wo, cin)
            acc = acc + jnp.dot(patch, w_ref[kh * k + kw],
                                preferred_element_type=jnp.float32)
    y_ref[0] = acc.reshape(ho, wo, cp).astype(y_ref.dtype)
    s = jnp.sum(acc, axis=0, keepdims=True)                 # (1, cp)
    d = acc - s / float(ho * wo)
    m2 = jnp.sum(d * d, axis=0, keepdims=True)              # (1, cp)
    part_ref[...] = jnp.concatenate(
        [s, m2, jnp.zeros((6, cp), jnp.float32)], axis=0)


def _bn_relu_conv_bn_stats_kernel(y1_ref, w_ref, scale_ref, shift_ref,
                                  y2_ref, part_ref, pad_ref, *, k):
    """Fused: act = relu(BN1(y1)) (bf16), zero-pad into VMEM scratch, then
    conv2 as k*k shifted matmuls; bf16 pre-BN2 output + BN2 partials."""
    _, ho, wo, cp = y2_ref.shape
    pad = (k - 1) // 2
    act = jnp.maximum(
        y1_ref[0].astype(jnp.float32) * scale_ref[...] + shift_ref[...], 0.0
    ).astype(y1_ref.dtype)                                  # (ho, wo, cp) bf16
    pad_ref[...] = jnp.zeros_like(pad_ref)
    pad_ref[pad:pad + ho, pad:pad + wo, :] = act
    xp = pad_ref[...]                                       # (ho+2p, wo+2p, cp)
    acc = jnp.zeros((ho * wo, cp), jnp.float32)
    for kh in range(k):
        for kw in range(k):
            patch = xp[kh:kh + ho, kw:kw + wo, :].reshape(ho * wo, cp)
            acc = acc + jnp.dot(patch, w_ref[kh * k + kw],
                                preferred_element_type=jnp.float32)
    y2_ref[0] = acc.reshape(ho, wo, cp).astype(y2_ref.dtype)
    s = jnp.sum(acc, axis=0, keepdims=True)
    d = acc - s / float(ho * wo)
    m2 = jnp.sum(d * d, axis=0, keepdims=True)
    part_ref[...] = jnp.concatenate(
        [s, m2, jnp.zeros((6, cp), jnp.float32)], axis=0)


def _bn_shortcut_relu_kernel(y2_ref, x_ref, ws_ref, scale_ref, shift_ref, o_ref):
    """relu(BN2(y2) + x @ Wsc) — f32 math, f32 NHWC output (module semantics)."""
    _, ho, wo, cp = y2_ref.shape
    cin = x_ref.shape[-1]
    sc = jnp.dot(x_ref[0].reshape(ho * wo, cin), ws_ref[...],
                 preferred_element_type=jnp.float32)
    y = y2_ref[0].astype(jnp.float32).reshape(ho * wo, cp)
    out = jnp.maximum(y * scale_ref[...] + shift_ref[...] + sc, 0.0)
    o_ref[0] = out.reshape(ho, wo, cp).astype(o_ref.dtype)


# --------------------------------------------------------------------------
# pallas_call wrappers
# --------------------------------------------------------------------------
def _conv_pass(x_pad, w, h_out, w_out, k):
    n = x_pad.shape[0]
    cin = x_pad.shape[-1]
    cp = w.shape[-1]
    cost = pl.CostEstimate(
        flops=int(2 * n * h_out * w_out * k * k * cin * cp),
        transcendentals=0,
        bytes_accessed=int(x_pad.size * x_pad.dtype.itemsize
                           + w.size * w.dtype.itemsize
                           + n * h_out * w_out * cp * 2 + n * 8 * cp * 4),
    )
    return pl.pallas_call(
        functools.partial(_conv_bn_stats_kernel, k=k),
        grid=(n,),
        in_specs=[
            pl.BlockSpec((1,) + tuple(x_pad.shape[1:]), lambda i: (i, 0, 0, 0)),
            pl.BlockSpec(tuple(w.shape), lambda i: (0, 0, 0)),   # weights resident
        ],
        out_specs=(
            pl.BlockSpec((1, h_out, w_out, cp), lambda i: (i, 0, 0, 0)),
            pl.BlockSpec((8, cp), lambda i: (i, 0)),
        ),
        out_shape=(
            jax.ShapeDtypeStruct((n, h_out, w_out, cp), jnp.bfloat16),
            jax.ShapeDtypeStruct((n * 8, cp), jnp.float32),
        ),
        compiler_params=_compiler_params(),
        cost_estimate=cost,
    )(x_pad, w)


def _conv2_pass(y1, w, scale, shift, k):
    n, ho, wo, cp = y1.shape
    pad = (k - 1) // 2
    cost = pl.CostEstimate(
        flops=int(2 * n * ho * wo * k * k * cp * cp),
        transcendentals=0,
        bytes_accessed=int(2 * y1.size * 2 + w.size * 2 + n * 8 * cp * 4),
    )
    return pl.pallas_call(
        functools.partial(_bn_relu_conv_bn_stats_kernel, k=k),
        grid=(n,),
        in_specs=[
            pl.BlockSpec((1, ho, wo, cp), lambda i: (i, 0, 0, 0)),
            pl.BlockSpec(tuple(w.shape), lambda i: (0, 0, 0)),   # weights resident
            pl.BlockSpec((1, cp), lambda i: (0, 0)),             # scale1 resident
            pl.BlockSpec((1, cp), lambda i: (0, 0)),             # shift1 resident
        ],
        out_specs=(
            pl.BlockSpec((1, ho, wo, cp), lambda i: (i, 0, 0, 0)),
            pl.BlockSpec((8, cp), lambda i: (i, 0)),
        ),
        out_shape=(
            jax.ShapeDtypeStruct((n, ho, wo, cp), jnp.bfloat16),
            jax.ShapeDtypeStruct((n * 8, cp), jnp.float32),
        ),
        scratch_shapes=[pltpu.VMEM((ho + 2 * pad, wo + 2 * pad, cp), jnp.bfloat16)],
        compiler_params=_compiler_params(),
        cost_estimate=cost,
    )(y1, w, scale, shift)


def _bn_shortcut_pass(y2, xs, ws, scale, shift, out_dtype=jnp.float32):
    n, ho, wo, cp = y2.shape
    cin = xs.shape[-1]
    return pl.pallas_call(
        _bn_shortcut_relu_kernel,
        grid=(n,),
        in_specs=[
            pl.BlockSpec((1, ho, wo, cp), lambda i: (i, 0, 0, 0)),
            pl.BlockSpec((1, ho, wo, cin), lambda i: (i, 0, 0, 0)),
            pl.BlockSpec(tuple(ws.shape), lambda i: (0, 0)),     # 1x1 weight resident
            pl.BlockSpec((1, cp), lambda i: (0, 0)),
            pl.BlockSpec((1, cp), lambda i: (0, 0)),
        ],
        out_specs=pl.BlockSpec((1, ho, wo, cp), lambda i: (i, 0, 0, 0)),
        out_shape=jax.ShapeDtypeStruct((n, ho, wo, cp), out_dtype),
        compiler_params=_compiler_params(),
    )(y2, xs, ws, scale, shift)


# --------------------------------------------------------------------------
# Tiny JAX glue: fold per-image partials into BN scale/shift (Welford merge)
# --------------------------------------------------------------------------
def _bn_scale_shift(partials, rows_per_image, gamma_pad, beta_pad):
    cp = partials.shape[-1]
    p = partials.reshape(-1, 8, cp)
    s = p[:, 0, :]                                  # per-image sums        (T, cp)
    m2 = p[:, 1, :]                                 # per-image centered SSQ (T, cp)
    total = float(p.shape[0] * rows_per_image)
    mean = jnp.sum(s, axis=0) / total
    tile_mean = s / float(rows_per_image)
    var = (jnp.sum(m2, axis=0)
           + float(rows_per_image) * jnp.sum((tile_mean - mean) ** 2, axis=0)) / total
    scale = gamma_pad * jax.lax.rsqrt(var + EPS)
    shift = beta_pad - mean * scale
    return scale.reshape(1, cp), shift.reshape(1, cp)


# --------------------------------------------------------------------------
# Forward
# --------------------------------------------------------------------------
def basic_block_forward(x_nchw, params, kernel_size, stride=1):
    """Pallas implementation of BasicBlock.forward (stride=1 configuration)."""
    if stride != 1:
        # TODO(synk): stride != 1 branch (1x1 stride-2 shortcut conv + BatchNorm).
        raise NotImplementedError("Only stride=1 BasicBlock is implemented.")
    k = kernel_size
    assert k % 2 == 1, "same-shape residual add requires odd kernel_size"
    pad = (k - 1) // 2

    x = jnp.transpose(x_nchw, (0, 2, 3, 1)).astype(jnp.float32)   # NCHW -> NHWC
    n, h, w, cin = x.shape
    cout = params["w1"].shape[-1]
    cp = _round_up(cout, 128)       # lane-dense output channels
    # Realistic ResNet channel counts (64/128/...) are already 128-aligned; for
    # tiny cin we only pad to a sublane multiple to avoid inflating HBM traffic.
    cinp = _round_up(cin, 8)

    x_bf = x.astype(jnp.bfloat16)
    x_pad = jnp.pad(x_bf, ((0, 0), (pad, pad), (pad, pad), (0, cinp - cin)))
    xs = jnp.pad(x_bf, ((0, 0), (0, 0), (0, 0), (0, cinp - cin)))

    w1 = jnp.pad(params["w1"].reshape(k * k, cin, cout).astype(jnp.bfloat16),
                 ((0, 0), (0, cinp - cin), (0, cp - cout)))
    w2 = jnp.pad(params["w2"].reshape(k * k, cout, cout).astype(jnp.bfloat16),
                 ((0, 0), (0, cp - cout), (0, cp - cout)))
    ws = jnp.pad(params["wsc"].reshape(cin, cout).astype(jnp.bfloat16),
                 ((0, cinp - cin), (0, cp - cout)))
    g1 = jnp.pad(params["g1"], (0, cp - cout))
    b1 = jnp.pad(params["b1"], (0, cp - cout))
    g2 = jnp.pad(params["g2"], (0, cp - cout))
    b2 = jnp.pad(params["b2"], (0, cp - cout))

    # Pass A: conv1 (bf16 pre-BN output) + BN1 partial stats.
    y1, part1 = _conv_pass(x_pad, w1, h, w, k)
    scale1, shift1 = _bn_scale_shift(part1, h * w, g1, b1)

    # Pass B: fused relu(BN1(.)) -> conv2 (bf16 pre-BN output) + BN2 partials.
    y2, part2 = _conv2_pass(y1, w2, scale1, shift1, k)
    scale2, shift2 = _bn_scale_shift(part2, h * w, g2, b2)

    # Pass C: BN2 apply + 1x1 shortcut conv + add + ReLU.
    out = _bn_shortcut_pass(y2, xs, ws, scale2, shift2)

    out = out[:, :, :, :cout]
    return jnp.transpose(out, (0, 3, 1, 2))   # NHWC -> NCHW (module semantics)


# --------------------------------------------------------------------------
# Pure-JAX reference (training-mode BatchNorm, f32 everywhere)
# --------------------------------------------------------------------------
def _reference_forward(x_nchw, params, k):
    pad = (k - 1) // 2
    x = jnp.transpose(x_nchw, (0, 2, 3, 1)).astype(jnp.float32)

    def conv(inp, w, padding):
        return jax.lax.conv_general_dilated(
            inp, w, (1, 1), [(padding, padding)] * 2,
            dimension_numbers=("NHWC", "HWIO", "NHWC"))

    def bn(y, g, b):
        mean = jnp.mean(y, axis=(0, 1, 2), keepdims=True)
        var = jnp.mean((y - mean) ** 2, axis=(0, 1, 2), keepdims=True)
        return (y - mean) * (g / jnp.sqrt(var + EPS)) + b

    y = jax.nn.relu(bn(conv(x, params["w1"], pad), params["g1"], params["b1"]))
    y = bn(conv(y, params["w2"], pad), params["g2"], params["b2"])
    sc = conv(x, params["wsc"], 0)
    out = jax.nn.relu(y + sc)
    return jnp.transpose(out, (0, 3, 1, 2))


if __name__ == "__main__":
    key = jax.random.PRNGKey(0)
    k = 3
    in_planes, planes = 4, 8
    N, H, W = 2, 16, 16
    keys = jax.random.split(key, 8)

    # Deterministic synthetic parameters (shapes from BasicBlock.__init__), HWIO.
    params = {
        "w1": jax.random.normal(keys[0], (k, k, in_planes, planes), jnp.float32) * 0.1,
        "g1": jax.random.uniform(keys[1], (planes,), jnp.float32, 0.5, 1.5),
        "b1": jax.random.normal(keys[2], (planes,), jnp.float32) * 0.1,
        "w2": jax.random.normal(keys[3], (k, k, planes, planes), jnp.float32) * 0.1,
        "g2": jax.random.uniform(keys[4], (planes,), jnp.float32, 0.5, 1.5),
        "b2": jax.random.normal(keys[5], (planes,), jnp.float32) * 0.1,
        "wsc": jax.random.normal(keys[6], (1, 1, in_planes, planes), jnp.float32) * 0.1,
    }
    x = jax.random.normal(keys[7], (N, in_planes, H, W), jnp.float32)  # NCHW like PyTorch

    fwd = jax.jit(basic_block_forward, static_argnames=("kernel_size", "stride"))
    out = jax.block_until_ready(fwd(x, params, kernel_size=k, stride=1))
    ref = jax.block_until_ready(_reference_forward(x, params, k))

    assert out.shape == (N, planes, H, W), out.shape
    # bf16 MXU operands / bf16 intermediates (f32 accumulation & BN stats) vs f32
    # reference -> relaxed tolerance.
    assert jnp.allclose(out, ref, rtol=5e-2, atol=5e-2), float(jnp.max(jnp.abs(out - ref)))
    print("KERNEL_OK")
</pallas_src>

<mosaic_0001>
module attributes {stable_mosaic.version = 11 : i64} {
  func.func @_conv_bn_stats_kernel(%arg0: i32, %arg1: memref<1x18x18x8xbf16, #tpu.memory_space<vmem>>, %arg2: memref<9x8x128xbf16, #tpu.memory_space<vmem>>, %arg3: memref<1x16x16x128xbf16, #tpu.memory_space<vmem>>, %arg4: memref<8x128xf32, #tpu.memory_space<vmem>>) attributes {dimension_semantics = [#tpu.dimension_semantics<parallel>], iteration_bounds = array<i64: 2>, scalar_prefetch = 0 : i64, scratch_operands = 0 : i64, tpu.core_type = #tpu.core_type<tc>, window_params = [{transform_indices = @transform_0, window_bounds = array<i64: 1, 18, 18, 8>}, {pipeline_mode = #tpu.pipeline_mode<synchronous>, transform_indices = @transform_1, window_bounds = array<i64: 9, 8, 128>}, {transform_indices = @transform_2, window_bounds = array<i64: 1, 16, 16, 128>}, {transform_indices = @transform_3, window_bounds = array<i64: 8, 128>}]} {
    %c0 = arith.constant 0 : index
    %c0_0 = arith.constant 0 : index
    %c0_1 = arith.constant 0 : index
    %c0_2 = arith.constant 0 : index
    %0 = vector.load %arg1[%c0, %c0_0, %c0_1, %c0_2] : memref<1x18x18x8xbf16, #tpu.memory_space<vmem>>, vector<1x18x18x8xbf16>
    %1 = vector.shape_cast %0 : vector<1x18x18x8xbf16> to vector<18x18x8xbf16>
    %cst = arith.constant 0.000000e+00 : f32
    %2 = vector.broadcast %cst : f32 to vector<256x128xf32>
    %3 = vector.extract_strided_slice %1 {offsets = [0, 0, 0], sizes = [16, 16, 8], strides = [1, 1, 1]} : vector<18x18x8xbf16> to vector<16x16x8xbf16>
    %4 = vector.shape_cast %3 : vector<16x16x8xbf16> to vector<256x8xbf16>
    %c0_3 = arith.constant 0 : index
    %c0_4 = arith.constant 0 : index
    %c0_5 = arith.constant 0 : index
    %5 = vector.load %arg2[%c0_3, %c0_4, %c0_5] : memref<9x8x128xbf16, #tpu.memory_space<vmem>>, vector<1x8x128xbf16>
    %6 = vector.shape_cast %5 : vector<1x8x128xbf16> to vector<8x128xbf16>
    %cst_6 = arith.constant dense<0.000000e+00> : vector<256x128xf32>
    %7 = tpu.matmul %4, %6, %cst_6 {dimension_numbers = #tpu.dot_dimension_numbers<[1], [0], [0], [1], [0, 0, 1, 1], [], []>} : vector<256x8xbf16>, vector<8x128xbf16>, vector<256x128xf32> -> vector<256x128xf32>
    %8 = arith.addf %2, %7 : vector<256x128xf32>
    %9 = vector.extract_strided_slice %1 {offsets = [0, 1, 0], sizes = [16, 16, 8], strides = [1, 1, 1]} : vector<18x18x8xbf16> to vector<16x16x8xbf16>
    %10 = vector.shape_cast %9 : vector<16x16x8xbf16> to vector<256x8xbf16>
    %c1 = arith.constant 1 : index
    %c0_7 = arith.constant 0 : index
    %c0_8 = arith.constant 0 : index
    %11 = vector.load %arg2[%c1, %c0_7, %c0_8] : memref<9x8x128xbf16, #tpu.memory_space<vmem>>, vector<1x8x128xbf16>
    %12 = vector.shape_cast %11 : vector<1x8x128xbf16> to vector<8x128xbf16>
    %cst_9 = arith.constant dense<0.000000e+00> : vector<256x128xf32>
    %13 = tpu.matmul %10, %12, %cst_9 {dimension_numbers = #tpu.dot_dimension_numbers<[1], [0], [0], [1], [0, 0, 1, 1], [], []>} : vector<256x8xbf16>, vector<8x128xbf16>, vector<256x128xf32> -> vector<256x128xf32>
    %14 = arith.addf %8, %13 : vector<256x128xf32>
    %15 = vector.extract_strided_slice %1 {offsets = [0, 2, 0], sizes = [16, 16, 8], strides = [1, 1, 1]} : vector<18x18x8xbf16> to vector<16x16x8xbf16>
    %16 = vector.shape_cast %15 : vector<16x16x8xbf16> to vector<256x8xbf16>
    %c2 = arith.constant 2 : index
    %c0_10 = arith.constant 0 : index
    %c0_11 = arith.constant 0 : index
    %17 = vector.load %arg2[%c2, %c0_10, %c0_11] : memref<9x8x128xbf16, #tpu.memory_space<vmem>>, vector<1x8x128xbf16>
    %18 = vector.shape_cast %17 : vector<1x8x128xbf16> to vector<8x128xbf16>
    %cst_12 = arith.constant dense<0.000000e+00> : vector<256x128xf32>
    %19 = tpu.matmul %16, %18, %cst_12 {dimension_numbers = #tpu.dot_dimension_numbers<[1], [0], [0], [1], [0, 0, 1, 1], [], []>} : vector<256x8xbf16>, vector<8x128xbf16>, vector<256x128xf32> -> vector<256x128xf32>
    %20 = arith.addf %14, %19 : vector<256x128xf32>
    %21 = vector.extract_strided_slice %1 {offsets = [1, 0, 0], sizes = [16, 16, 8], strides = [1, 1, 1]} : vector<18x18x8xbf16> to vector<16x16x8xbf16>
    %22 = vector.shape_cast %21 : vector<16x16x8xbf16> to vector<256x8xbf16>
    %c3 = arith.constant 3 : index
    %c0_13 = arith.constant 0 : index
    %c0_14 = arith.constant 0 : index
    %23 = vector.load %arg2[%c3, %c0_13, %c0_14] : memref<9x8x128xbf16, #tpu.memory_space<vmem>>, vector<1x8x128xbf16>
    %24 = vector.shape_cast %23 : vector<1x8x128xbf16> to vector<8x128xbf16>
    %cst_15 = arith.constant dense<0.000000e+00> : vector<256x128xf32>
    %25 = tpu.matmul %22, %24, %cst_15 {dimension_numbers = #tpu.dot_dimension_numbers<[1], [0], [0], [1], [0, 0, 1, 1], [], []>} : vector<256x8xbf16>, vector<8x128xbf16>, vector<256x128xf32> -> vector<256x128xf32>
    %26 = arith.addf %20, %25 : vector<256x128xf32>
    %27 = vector.extract_strided_slice %1 {offsets = [1, 1, 0], sizes = [16, 16, 8], strides = [1, 1, 1]} : vector<18x18x8xbf16> to vector<16x16x8xbf16>
    %28 = vector.shape_cast %27 : vector<16x16x8xbf16> to vector<256x8xbf16>
    %c4 = arith.constant 4 : index
    %c0_16 = arith.constant 0 : index
    %c0_17 = arith.constant 0 : index
    %29 = vector.load %arg2[%c4, %c0_16, %c0_17] : memref<9x8x128xbf16, #tpu.memory_space<vmem>>, vector<1x8x128xbf16>
    %30 = vector.shape_cast %29 : vector<1x8x128xbf16> to vector<8x128xbf16>
    %cst_18 = arith.constant dense<0.000000e+00> : vector<256x128xf32>
    %31 = tpu.matmul %28, %30, %cst_18 {dimension_numbers = #tpu.dot_dimension_numbers<[1], [0], [0], [1], [0, 0, 1, 1], [], []>} : vector<256x8xbf16>, vector<8x128xbf16>, vector<256x128xf32> -> vector<256x128xf32>
    %32 = arith.addf %26, %31 : vector<256x128xf32>
    %33 = vector.extract_strided_slice %1 {offsets = [1, 2, 0], sizes = [16, 16, 8], strides = [1, 1, 1]} : vector<18x18x8xbf16> to vector<16x16x8xbf16>
    %34 = vector.shape_cast %33 : vector<16x16x8xbf16> to vector<256x8xbf16>
    %c5 = arith.constant 5 : index
    %c0_19 = arith.constant 0 : index
    %c0_20 = arith.constant 0 : index
    %35 = vector.load %arg2[%c5, %c0_19, %c0_20] : memref<9x8x128xbf16, #tpu.memory_space<vmem>>, vector<1x8x128xbf16>
    %36 = vector.shape_cast %35 : vector<1x8x128xbf16> to vector<8x128xbf16>
    %cst_21 = arith.constant dense<0.000000e+00> : vector<256x128xf32>
    %37 = tpu.matmul %34, %36, %cst_21 {dimension_numbers = #tpu.dot_dimension_numbers<[1], [0], [0], [1], [0, 0, 1, 1], [], []>} : vector<256x8xbf16>, vector<8x128xbf16>, vector<256x128xf32> -> vector<256x128xf32>
    %38 = arith.addf %32, %37 : vector<256x128xf32>
    %39 = vector.extract_strided_slice %1 {offsets = [2, 0, 0], sizes = [16, 16, 8], strides = [1, 1, 1]} : vector<18x18x8xbf16> to vector<16x16x8xbf16>
    %40 = vector.shape_cast %39 : vector<16x16x8xbf16> to vector<256x8xbf16>
    %c6 = arith.constant 6 : index
    %c0_22 = arith.constant 0 : index
    %c0_23 = arith.constant 0 : index
    %41 = vector.load %arg2[%c6, %c0_22, %c0_23] : memref<9x8x128xbf16, #tpu.memory_space<vmem>>, vector<1x8x128xbf16>
    %42 = vector.shape_cast %41 : vector<1x8x128xbf16> to vector<8x128xbf16>
    %cst_24 = arith.constant dense<0.000000e+00> : vector<256x128xf32>
    %43 = tpu.matmul %40, %42, %cst_24 {dimension_numbers = #tpu.dot_dimension_numbers<[1], [0], [0], [1], [0, 0, 1, 1], [], []>} : vector<256x8xbf16>, vector<8x128xbf16>, vector<256x128xf32> -> vector<256x128xf32>
    %44 = arith.addf %38, %43 : vector<256x128xf32>
    %45 = vector.extract_strided_slice %1 {offsets = [2, 1, 0], sizes = [16, 16, 8], strides = [1, 1, 1]} : vector<18x18x8xbf16> to vector<16x16x8xbf16>
    %46 = vector.shape_cast %45 : vector<16x16x8xbf16> to vector<256x8xbf16>
    %c7 = arith.constant 7 : index
    %c0_25 = arith.constant 0 : index
    %c0_26 = arith.constant 0 : index
    %47 = vector.load %arg2[%c7, %c0_25, %c0_26] : memref<9x8x128xbf16, #tpu.memory_space<vmem>>, vector<1x8x128xbf16>
    %48 = vector.shape_cast %47 : vector<1x8x128xbf16> to vector<8x128xbf16>
    %cst_27 = arith.constant dense<0.000000e+00> : vector<256x128xf32>
    %49 = tpu.matmul %46, %48, %cst_27 {dimension_numbers = #tpu.dot_dimension_numbers<[1], [0], [0], [1], [0, 0, 1, 1], [], []>} : vector<256x8xbf16>, vector<8x128xbf16>, vector<256x128xf32> -> vector<256x128xf32>
    %50 = arith.addf %44, %49 : vector<256x128xf32>
    %51 = vector.extract_strided_slice %1 {offsets = [2, 2, 0], sizes = [16, 16, 8], strides = [1, 1, 1]} : vector<18x18x8xbf16> to vector<16x16x8xbf16>
    %52 = vector.shape_cast %51 : vector<16x16x8xbf16> to vector<256x8xbf16>
    %c8 = arith.constant 8 : index
    %c0_28 = arith.constant 0 : index
    %c0_29 = arith.constant 0 : index
    %53 = vector.load %arg2[%c8, %c0_28, %c0_29] : memref<9x8x128xbf16, #tpu.memory_space<vmem>>, vector<1x8x128xbf16>
    %54 = vector.shape_cast %53 : vector<1x8x128xbf16> to vector<8x128xbf16>
    %cst_30 = arith.constant dense<0.000000e+00> : vector<256x128xf32>
    %55 = tpu.matmul %52, %54, %cst_30 {dimension_numbers = #tpu.dot_dimension_numbers<[1], [0], [0], [1], [0, 0, 1, 1], [], []>} : vector<256x8xbf16>, vector<8x128xbf16>, vector<256x128xf32> -> vector<256x128xf32>
    %56 = arith.addf %50, %55 : vector<256x128xf32>
    %57 = vector.shape_cast %56 : vector<256x128xf32> to vector<16x16x128xf32>
    %58 = arith.truncf %57 : vector<16x16x128xf32> to vector<16x16x128xbf16>
    %c0_31 = arith.constant 0 : index
    %c0_32 = arith.constant 0 : index
    %c0_33 = arith.constant 0 : index
    %c0_34 = arith.constant 0 : index
    %59 = vector.load %arg3[%c0_31, %c0_32, %c0_33, %c0_34] : memref<1x16x16x128xbf16, #tpu.memory_space<vmem>>, vector<1x16x16x128xbf16>
    %60 = vector.shape_cast %59 : vector<1x16x16x128xbf16> to vector<16x16x128xbf16>
    %61 = vector.shape_cast %58 : vector<16x16x128xbf16> to vector<1x16x16x128xbf16>
    tpu.vector_store %arg3[%c0_31, %c0_32, %c0_33, %c0_34], %61 {strides = array<i32>} : memref<1x16x16x128xbf16, #tpu.memory_space<vmem>>, vector<1x16x16x128xbf16>,
    %cst_35 = arith.constant dense<0.000000e+00> : vector<128xf32>
    %62 = vector.multi_reduction <add>, %56, %cst_35 [0] : vector<256x128xf32> to vector<128xf32>
    %63 = vector.shape_cast %62 : vector<128xf32> to vector<1x128xf32>
    %cst_36 = arith.constant 2.560000e+02 : f32
    %64 = vector.broadcast %cst_36 : f32 to vector<1x128xf32>
    %65 = arith.divf %63, %64 : vector<1x128xf32>
    %66 = vector.broadcast %65 : vector<1x128xf32> to vector<256x128xf32>
    %67 = arith.subf %56, %66 : vector<256x128xf32>
    %68 = arith.mulf %67, %67 : vector<256x128xf32>
    %cst_37 = arith.constant dense<0.000000e+00> : vector<128xf32>
    %69 = vector.multi_reduction <add>, %68, %cst_37 [0] : vector<256x128xf32> to vector<128xf32>
    %70 = vector.shape_cast %69 : vector<128xf32> to vector<1x128xf32>
    %cst_38 = arith.constant 0.000000e+00 : f32
    %71 = vector.broadcast %cst_38 : f32 to vector<6x128xf32>
    %72 = tpu.concatenate %63, %70, %71 in 0 : vector<1x128xf32>, vector<1x128xf32>, vector<6x128xf32> -> vector<8x128xf32>
    %c0_39 = arith.constant 0 : index
    %c0_40 = arith.constant 0 : index
    %73 = vector.load %arg4[%c0_39, %c0_40] : memref<8x128xf32, #tpu.memory_space<vmem>>, vector<8x128xf32>
    tpu.vector_store %arg4[%c0_39, %c0_40], %72 {strides = array<i32>} : memref<8x128xf32, #tpu.memory_space<vmem>>, vector<8x128xf32>,
    return
  }
  func.func @transform_0(%arg0: i32) -> (i32, i32, i32, i32) {
    %c0_i32 = arith.constant 0 : i32
    %c0_i32_0 = arith.constant 0 : i32
    %c0_i32_1 = arith.constant 0 : i32
    %c0_i32_2 = arith.constant 0 : i32
    return %arg0, %c0_i32, %c0_i32_0, %c0_i32_1 : i32, i32, i32, i32
  }
  func.func @transform_1(%arg0: i32) -> (i32, i32, i32) {
    %c0_i32 = arith.constant 0 : i32
    %c0_i32_0 = arith.constant 0 : i32
    %c0_i32_1 = arith.constant 0 : i32
    %c0_i32_2 = arith.constant 0 : i32
    return %c0_i32, %c0_i32_0, %c0_i32_1 : i32, i32, i32
  }
  func.func @transform_2(%arg0: i32) -> (i32, i32, i32, i32) {
    %c0_i32 = arith.constant 0 : i32
    %c0_i32_0 = arith.constant 0 : i32
    %c0_i32_1 = arith.constant 0 : i32
    %c0_i32_2 = arith.constant 0 : i32
    return %arg0, %c0_i32, %c0_i32_0, %c0_i32_1 : i32, i32, i32, i32
  }
  func.func @transform_3(%arg0: i32) -> (i32, i32) {
    %c0_i32 = arith.constant 0 : i32
    %c0_i32_0 = arith.constant 0 : i32
    return %arg0, %c0_i32 : i32, i32
  }
}

module attributes {stable_mosaic.version = 11 : i64} {
  func.func @_bn_relu_conv_bn_stats_kernel(%arg0: i32, %arg1: memref<1x16x16x128xbf16, #tpu.memory_space<vmem>>, %arg2: memref<9x128x128xbf16, #tpu.memory_space<vmem>>, %arg3: memref<1x128xf32, #tpu.memory_space<vmem>>, %arg4: memref<1x128xf32, #tpu.memory_space<vmem>>, %arg5: memref<1x16x16x128xbf16, #tpu.memory_space<vmem>>, %arg6: memref<8x128xf32, #tpu.memory_space<vmem>>, %arg7: memref<18x18x128xbf16, #tpu.memory_space<vmem>>) attributes {dimension_semantics = [#tpu.dimension_semantics<parallel>], iteration_bounds = array<i64: 2>, scalar_prefetch = 0 : i64, scratch_operands = 1 : i64, tpu.core_type = #tpu.core_type<tc>, window_params = [{transform_indices = @transform_0, window_bounds = array<i64: 1, 16, 16, 128>}, {pipeline_mode = #tpu.pipeline_mode<synchronous>, transform_indices = @transform_1, window_bounds = array<i64: 9, 128, 128>}, {pipeline_mode = #tpu.pipeline_mode<synchronous>, transform_indices = @transform_2, window_bounds = array<i64: 1, 128>}, {pipeline_mode = #tpu.pipeline_mode<synchronous>, transform_indices = @transform_3, window_bounds = array<i64: 1, 128>}, {transform_indices = @transform_4, window_bounds = array<i64: 1, 16, 16, 128>}, {transform_indices = @transform_5, window_bounds = array<i64: 8, 128>}]} {
    %c0 = arith.constant 0 : index
    %c0_0 = arith.constant 0 : index
    %c0_1 = arith.constant 0 : index
    %c0_2 = arith.constant 0 : index
    %0 = vector.load %arg1[%c0, %c0_0, %c0_1, %c0_2] : memref<1x16x16x128xbf16, #tpu.memory_space<vmem>>, vector<1x16x16x128xbf16>
    %1 = vector.shape_cast %0 : vector<1x16x16x128xbf16> to vector<16x16x128xbf16>
    %2 = arith.extf %1 : vector<16x16x128xbf16> to vector<16x16x128xf32>
    %c0_3 = arith.constant 0 : index
    %c0_4 = arith.constant 0 : index
    %3 = vector.load %arg3[%c0_3, %c0_4] : memref<1x128xf32, #tpu.memory_space<vmem>>, vector<1x128xf32>
    %4 = vector.shape_cast %3 : vector<1x128xf32> to vector<1x1x128xf32>
    %5 = vector.broadcast %4 : vector<1x1x128xf32> to vector<16x16x128xf32>
    %6 = arith.mulf %2, %5 : vector<16x16x128xf32>
    %c0_5 = arith.constant 0 : index
    %c0_6 = arith.constant 0 : index
    %7 = vector.load %arg4[%c0_5, %c0_6] : memref<1x128xf32, #tpu.memory_space<vmem>>, vector<1x128xf32>
    %8 = vector.shape_cast %7 : vector<1x128xf32> to vector<1x1x128xf32>
    %9 = vector.broadcast %8 : vector<1x1x128xf32> to vector<16x16x128xf32>
    %10 = arith.addf %6, %9 : vector<16x16x128xf32>
    %cst = arith.constant 0.000000e+00 : f32
    %11 = vector.broadcast %cst : f32 to vector<16x16x128xf32>
    %12 = arith.maximumf %10, %11 : vector<16x16x128xf32>
    %13 = arith.truncf %12 : vector<16x16x128xf32> to vector<16x16x128xbf16>
    %cst_7 = arith.constant 0.000000e+00 : bf16
    %14 = vector.broadcast %cst_7 : bf16 to vector<18x18x128xbf16>
    %c0_8 = arith.constant 0 : index
    %c0_9 = arith.constant 0 : index
    %c0_10 = arith.constant 0 : index
    %15 = vector.load %arg7[%c0_8, %c0_9, %c0_10] : memref<18x18x128xbf16, #tpu.memory_space<vmem>>, vector<18x18x128xbf16>
    tpu.vector_store %arg7[%c0_8, %c0_9, %c0_10], %14 {strides = array<i32>} : memref<18x18x128xbf16, #tpu.memory_space<vmem>>, vector<18x18x128xbf16>,
    %c1 = arith.constant 1 : index
    %c1_11 = arith.constant 1 : index
    %c0_12 = arith.constant 0 : index
    %16 = vector.load %arg7[%c1, %c1_11, %c0_12] : memref<18x18x128xbf16, #tpu.memory_space<vmem>>, vector<16x16x128xbf16>
    tpu.vector_store %arg7[%c1, %c1_11, %c0_12], %13 {strides = array<i32>} : memref<18x18x128xbf16, #tpu.memory_space<vmem>>, vector<16x16x128xbf16>,
    %c0_13 = arith.constant 0 : index
    %c0_14 = arith.constant 0 : index
    %c0_15 = arith.constant 0 : index
    %17 = vector.load %arg7[%c0_13, %c0_14, %c0_15] : memref<18x18x128xbf16, #tpu.memory_space<vmem>>, vector<18x18x128xbf16>
    %cst_16 = arith.constant 0.000000e+00 : f32
    %18 = vector.broadcast %cst_16 : f32 to vector<256x128xf32>
    %19 = vector.extract_strided_slice %17 {offsets = [0, 0, 0], sizes = [16, 16, 128], strides = [1, 1, 1]} : vector<18x18x128xbf16> to vector<16x16x128xbf16>
    %20 = vector.shape_cast %19 : vector<16x16x128xbf16> to vector<256x128xbf16>
    %c0_17 = arith.constant 0 : index
    %c0_18 = arith.constant 0 : index
    %c0_19 = arith.constant 0 : index
    %21 = vector.load %arg2[%c0_17, %c0_18, %c0_19] : memref<9x128x128xbf16, #tpu.memory_space<vmem>>, vector<1x128x128xbf16>
    %22 = vector.shape_cast %21 : vector<1x128x128xbf16> to vector<128x128xbf16>
    %cst_20 = arith.constant dense<0.000000e+00> : vector<256x128xf32>
    %23 = tpu.matmul %20, %22, %cst_20 {dimension_numbers = #tpu.dot_dimension_numbers<[1], [0], [0], [1], [0, 0, 1, 1], [], []>} : vector<256x128xbf16>, vector<128x128xbf16>, vector<256x128xf32> -> vector<256x128xf32>
    %24 = arith.addf %18, %23 : vector<256x128xf32>
    %25 = vector.extract_strided_slice %17 {offsets = [0, 1, 0], sizes = [16, 16, 128], strides = [1, 1, 1]} : vector<18x18x128xbf16> to vector<16x16x128xbf16>
    %26 = vector.shape_cast %25 : vector<16x16x128xbf16> to vector<256x128xbf16>
    %c1_21 = arith.constant 1 : index
    %c0_22 = arith.constant 0 : index
    %c0_23 = arith.constant 0 : index
    %27 = vector.load %arg2[%c1_21, %c0_22, %c0_23] : memref<9x128x128xbf16, #tpu.memory_space<vmem>>, vector<1x128x128xbf16>
    %28 = vector.shape_cast %27 : vector<1x128x128xbf16> to vector<128x128xbf16>
    %cst_24 = arith.constant dense<0.000000e+00> : vector<256x128xf32>
    %29 = tpu.matmul %26, %28, %cst_24 {dimension_numbers = #tpu.dot_dimension_numbers<[1], [0], [0], [1], [0, 0, 1, 1], [], []>} : vector<256x128xbf16>, vector<128x128xbf16>, vector<256x128xf32> -> vector<256x128xf32>
    %30 = arith.addf %24, %29 : vector<256x128xf32>
    %31 = vector.extract_strided_slice %17 {offsets = [0, 2, 0], sizes = [16, 16, 128], strides = [1, 1, 1]} : vector<18x18x128xbf16> to vector<16x16x128xbf16>
    %32 = vector.shape_cast %31 : vector<16x16x128xbf16> to vector<256x128xbf16>
    %c2 = arith.constant 2 : index
    %c0_25 = arith.constant 0 : index
    %c0_26 = arith.constant 0 : index
    %33 = vector.load %arg2[%c2, %c0_25, %c0_26] : memref<9x128x128xbf16, #tpu.memory_space<vmem>>, vector<1x128x128xbf16>
    %34 = vector.shape_cast %33 : vector<1x128x128xbf16> to vector<128x128xbf16>
    %cst_27 = arith.constant dense<0.000000e+00> : vector<256x128xf32>
    %35 = tpu.matmul %32, %34, %cst_27 {dimension_numbers = #tpu.dot_dimension_numbers<[1], [0], [0], [1], [0, 0, 1, 1], [], []>} : vector<256x128xbf16>, vector<128x128xbf16>, vector<256x128xf32> -> vector<256x128xf32>
    %36 = arith.addf %30, %35 : vector<256x128xf32>
    %37 = vector.extract_strided_slice %17 {offsets = [1, 0, 0], sizes = [16, 16, 128], strides = [1, 1, 1]} : vector<18x18x128xbf16> to vector<16x16x128xbf16>
    %38 = vector.shape_cast %37 : vector<16x16x128xbf16> to vector<256x128xbf16>
    %c3 = arith.constant 3 : index
    %c0_28 = arith.constant 0 : index
    %c0_29 = arith.constant 0 : index
    %39 = vector.load %arg2[%c3, %c0_28, %c0_29] : memref<9x128x128xbf16, #tpu.memory_space<vmem>>, vector<1x128x128xbf16>
    %40 = vector.shape_cast %39 : vector<1x128x128xbf16> to vector<128x128xbf16>
    %cst_30 = arith.constant dense<0.000000e+00> : vector<256x128xf32>
    %41 = tpu.matmul %38, %40, %cst_30 {dimension_numbers = #tpu.dot_dimension_numbers<[1], [0], [0], [1], [0, 0, 1, 1], [], []>} : vector<256x128xbf16>, vector<128x128xbf16>, vector<256x128xf32> -> vector<256x128xf32>
    %42 = arith.addf %36, %41 : vector<256x128xf32>
    %43 = vector.extract_strided_slice %17 {offsets = [1, 1, 0], sizes = [16, 16, 128], strides = [1, 1, 1]} : vector<18x18x128xbf16> to vector<16x16x128xbf16>
    %44 = vector.shape_cast %43 : vector<16x16x128xbf16> to vector<256x128xbf16>
    %c4 = arith.constant 4 : index
    %c0_31 = arith.constant 0 : index
    %c0_32 = arith.constant 0 : index
    %45 = vector.load %arg2[%c4, %c0_31, %c0_32] : memref<9x128x128xbf16, #tpu.memory_space<vmem>>, vector<1x128x128xbf16>
    %46 = vector.shape_cast %45 : vector<1x128x128xbf16> to vector<128x128xbf16>
    %cst_33 = arith.constant dense<0.000000e+00> : vector<256x128xf32>
    %47 = tpu.matmul %44, %46, %cst_33 {dimension_numbers = #tpu.dot_dimension_numbers<[1], [0], [0], [1], [0, 0, 1, 1], [], []>} : vector<256x128xbf16>, vector<128x128xbf16>, vector<256x128xf32> -> vector<256x128xf32>
    %48 = arith.addf %42, %47 : vector<256x128xf32>
    %49 = vector.extract_strided_slice %17 {offsets = [1, 2, 0], sizes = [16, 16, 128], strides = [1, 1, 1]} : vector<18x18x128xbf16> to vector<16x16x128xbf16>
    %50 = vector.shape_cast %49 : vector<16x16x128xbf16> to vector<256x128xbf16>
    %c5 = arith.constant 5 : index
    %c0_34 = arith.constant 0 : index
    %c0_35 = arith.constant 0 : index
    %51 = vector.load %arg2[%c5, %c0_34, %c0_35] : memref<9x128x128xbf16, #tpu.memory_space<vmem>>, vector<1x128x128xbf16>
    %52 = vector.shape_cast %51 : vector<1x128x128xbf16> to vector<128x128xbf16>
    %cst_36 = arith.constant dense<0.000000e+00> : vector<256x128xf32>
    %53 = tpu.matmul %50, %52, %cst_36 {dimension_numbers = #tpu.dot_dimension_numbers<[1], [0], [0], [1], [0, 0, 1, 1], [], []>} : vector<256x128xbf16>, vector<128x128xbf16>, vector<256x128xf32> -> vector<256x128xf32>
    %54 = arith.addf %48, %53 : vector<256x128xf32>
    %55 = vector.extract_strided_slice %17 {offsets = [2, 0, 0], sizes = [16, 16, 128], strides = [1, 1, 1]} : vector<18x18x128xbf16> to vector<16x16x128xbf16>
    %56 = vector.shape_cast %55 : vector<16x16x128xbf16> to vector<256x128xbf16>
    %c6 = arith.constant 6 : index
    %c0_37 = arith.constant 0 : index
    %c0_38 = arith.constant 0 : index
    %57 = vector.load %arg2[%c6, %c0_37, %c0_38] : memref<9x128x128xbf16, #tpu.memory_space<vmem>>, vector<1x128x128xbf16>
    %58 = vector.shape_cast %57 : vector<1x128x128xbf16> to vector<128x128xbf16>
    %cst_39 = arith.constant dense<0.000000e+00> : vector<256x128xf32>
    %59 = tpu.matmul %56, %58, %cst_39 {dimension_numbers = #tpu.dot_dimension_numbers<[1], [0], [0], [1], [0, 0, 1, 1], [], []>} : vector<256x128xbf16>, vector<128x128xbf16>, vector<256x128xf32> -> vector<256x128xf32>
    %60 = arith.addf %54, %59 : vector<256x128xf32>
    %61 = vector.extract_strided_slice %17 {offsets = [2, 1, 0], sizes = [16, 16, 128], strides = [1, 1, 1]} : vector<18x18x128xbf16> to vector<16x16x128xbf16>
    %62 = vector.shape_cast %61 : vector<16x16x128xbf16> to vector<256x128xbf16>
    %c7 = arith.constant 7 : index
    %c0_40 = arith.constant 0 : index
    %c0_41 = arith.constant 0 : index
    %63 = vector.load %arg2[%c7, %c0_40, %c0_41] : memref<9x128x128xbf16, #tpu.memory_space<vmem>>, vector<1x128x128xbf16>
    %64 = vector.shape_cast %63 : vector<1x128x128xbf16> to vector<128x128xbf16>
    %cst_42 = arith.constant dense<0.000000e+00> : vector<256x128xf32>
    %65 = tpu.matmul %62, %64, %cst_42 {dimension_numbers = #tpu.dot_dimension_numbers<[1], [0], [0], [1], [0, 0, 1, 1], [], []>} : vector<256x128xbf16>, vector<128x128xbf16>, vector<256x128xf32> -> vector<256x128xf32>
    %66 = arith.addf %60, %65 : vector<256x128xf32>
    %67 = vector.extract_strided_slice %17 {offsets = [2, 2, 0], sizes = [16, 16, 128], strides = [1, 1, 1]} : vector<18x18x128xbf16> to vector<16x16x128xbf16>
    %68 = vector.shape_cast %67 : vector<16x16x128xbf16> to vector<256x128xbf16>
    %c8 = arith.constant 8 : index
    %c0_43 = arith.constant 0 : index
    %c0_44 = arith.constant 0 : index
    %69 = vector.load %arg2[%c8, %c0_43, %c0_44] : memref<9x128x128xbf16, #tpu.memory_space<vmem>>, vector<1x128x128xbf16>
    %70 = vector.shape_cast %69 : vector<1x128x128xbf16> to vector<128x128xbf16>
    %cst_45 = arith.constant dense<0.000000e+00> : vector<256x128xf32>
    %71 = tpu.matmul %68, %70, %cst_45 {dimension_numbers = #tpu.dot_dimension_numbers<[1], [0], [0], [1], [0, 0, 1, 1], [], []>} : vector<256x128xbf16>, vector<128x128xbf16>, vector<256x128xf32> -> vector<256x128xf32>
    %72 = arith.addf %66, %71 : vector<256x128xf32>
    %73 = vector.shape_cast %72 : vector<256x128xf32> to vector<16x16x128xf32>
    %74 = arith.truncf %73 : vector<16x16x128xf32> to vector<16x16x128xbf16>
    %c0_46 = arith.constant 0 : index
    %c0_47 = arith.constant 0 : index
    %c0_48 = arith.constant 0 : index
    %c0_49 = arith.constant 0 : index
    %75 = vector.load %arg5[%c0_46, %c0_47, %c0_48, %c0_49] : memref<1x16x16x128xbf16, #tpu.memory_space<vmem>>, vector<1x16x16x128xbf16>
    %76 = vector.shape_cast %75 : vector<1x16x16x128xbf16> to vector<16x16x128xbf16>
    %77 = vector.shape_cast %74 : vector<16x16x128xbf16> to vector<1x16x16x128xbf16>
    tpu.vector_store %arg5[%c0_46, %c0_47, %c0_48, %c0_49], %77 {strides = array<i32>} : memref<1x16x16x128xbf16, #tpu.memory_space<vmem>>, vector<1x16x16x128xbf16>,
    %cst_50 = arith.constant dense<0.000000e+00> : vector<128xf32>
    %78 = vector.multi_reduction <add>, %72, %cst_50 [0] : vector<256x128xf32> to vector<128xf32>
    %79 = vector.shape_cast %78 : vector<128xf32> to vector<1x128xf32>
    %cst_51 = arith.constant 2.560000e+02 : f32
    %80 = vector.broadcast %cst_51 : f32 to vector<1x128xf32>
    %81 = arith.divf %79, %80 : vector<1x128xf32>
    %82 = vector.broadcast %81 : vector<1x128xf32> to vector<256x128xf32>
    %83 = arith.subf %72, %82 : vector<256x128xf32>
    %84 = arith.mulf %83, %83 : vector<256x128xf32>
    %cst_52 = arith.constant dense<0.000000e+00> : vector<128xf32>
    %85 = vector.multi_reduction <add>, %84, %cst_52 [0] : vector<256x128xf32> to vector<128xf32>
    %86 = vector.shape_cast %85 : vector<128xf32> to vector<1x128xf32>
    %cst_53 = arith.constant 0.000000e+00 : f32
    %87 = vector.broadcast %cst_53 : f32 to vector<6x128xf32>
    %88 = tpu.concatenate %79, %86, %87 in 0 : vector<1x128xf32>, vector<1x128xf32>, vector<6x128xf32> -> vector<8x128xf32>
    %c0_54 = arith.constant 0 : index
    %c0_55 = arith.constant 0 : index
    %89 = vector.load %arg6[%c0_54, %c0_55] : memref<8x128xf32, #tpu.memory_space<vmem>>, vector<8x128xf32>
    tpu.vector_store %arg6[%c0_54, %c0_55], %88 {strides = array<i32>} : memref<8x128xf32, #tpu.memory_space<vmem>>, vector<8x128xf32>,
    return
  }
  func.func @transform_0(%arg0: i32) -> (i32, i32, i32, i32) {
    %c0_i32 = arith.constant 0 : i32
    %c0_i32_0 = arith.constant 0 : i32
    %c0_i32_1 = arith.constant 0 : i32
    %c0_i32_2 = arith.constant 0 : i32
    return %arg0, %c0_i32, %c0_i32_0, %c0_i32_1 : i32, i32, i32, i32
  }
  func.func @transform_1(%arg0: i32) -> (i32, i32, i32) {
    %c0_i32 = arith.constant 0 : i32
    %c0_i32_0 = arith.constant 0 : i32
    %c0_i32_1 = arith.constant 0 : i32
    %c0_i32_2 = arith.constant 0 : i32
    return %c0_i32, %c0_i32_0, %c0_i32_1 : i32, i32, i32
  }
  func.func @transform_2(%arg0: i32) -> (i32, i32) {
    %c0_i32 = arith.constant 0 : i32
    %c0_i32_0 = arith.constant 0 : i32
    %c0_i32_1 = arith.constant 0 : i32
    return %c0_i32, %c0_i32_0 : i32, i32
  }
  func.func @transform_3(%arg0: i32) -> (i32, i32) {
    %c0_i32 = arith.constant 0 : i32
    %c0_i32_0 = arith.constant 0 : i32
    %c0_i32_1 = arith.constant 0 : i32
    return %c0_i32, %c0_i32_0 : i32, i32
  }
  func.func @transform_4(%arg0: i32) -> (i32, i32, i32, i32) {
    %c0_i32 = arith.constant 0 : i32
    %c0_i32_0 = arith.constant 0 : i32
    %c0_i32_1 = arith.constant 0 : i32
    %c0_i32_2 = arith.constant 0 : i32
    return %arg0, %c0_i32, %c0_i32_0, %c0_i32_1 : i32, i32, i32, i32
  }
  func.func @transform_5(%arg0: i32) -> (i32, i32) {
    %c0_i32 = arith.constant 0 : i32
    %c0_i32_0 = arith.constant 0 : i32
    return %arg0, %c0_i32 : i32, i32
  }
}

module attributes {stable_mosaic.version = 11 : i64} {
  func.func @_bn_shortcut_relu_kernel(%arg0: i32, %arg1: memref<1x16x16x128xbf16, #tpu.memory_space<vmem>>, %arg2: memref<1x16x16x8xbf16, #tpu.memory_space<vmem>>, %arg3: memref<8x128xbf16, #tpu.memory_space<vmem>>, %arg4: memref<1x128xf32, #tpu.memory_space<vmem>>, %arg5: memref<1x128xf32, #tpu.memory_space<vmem>>, %arg6: memref<1x16x16x128xf32, #tpu.memory_space<vmem>>) attributes {dimension_semantics = [#tpu.dimension_semantics<parallel>], iteration_bounds = array<i64: 2>, scalar_prefetch = 0 : i64, scratch_operands = 0 : i64, tpu.core_type = #tpu.core_type<tc>, window_params = [{transform_indices = @transform_0, window_bounds = array<i64: 1, 16, 16, 128>}, {transform_indices = @transform_1, window_bounds = array<i64: 1, 16, 16, 8>}, {pipeline_mode = #tpu.pipeline_mode<synchronous>, transform_indices = @transform_2, window_bounds = array<i64: 8, 128>}, {pipeline_mode = #tpu.pipeline_mode<synchronous>, transform_indices = @transform_3, window_bounds = array<i64: 1, 128>}, {pipeline_mode = #tpu.pipeline_mode<synchronous>, transform_indices = @transform_4, window_bounds = array<i64: 1, 128>}, {transform_indices = @transform_5, window_bounds = array<i64: 1, 16, 16, 128>}]} {
    %c0 = arith.constant 0 : index
    %c0_0 = arith.constant 0 : index
    %c0_1 = arith.constant 0 : index
    %c0_2 = arith.constant 0 : index
    %0 = vector.load %arg2[%c0, %c0_0, %c0_1, %c0_2] : memref<1x16x16x8xbf16, #tpu.memory_space<vmem>>, vector<1x16x16x8xbf16>
    %1 = vector.shape_cast %0 : vector<1x16x16x8xbf16> to vector<16x16x8xbf16>
    %2 = vector.shape_cast %1 : vector<16x16x8xbf16> to vector<256x8xbf16>
    %c0_3 = arith.constant 0 : index
    %c0_4 = arith.constant 0 : index
    %3 = vector.load %arg3[%c0_3, %c0_4] : memref<8x128xbf16, #tpu.memory_space<vmem>>, vector<8x128xbf16>
    %cst = arith.constant dense<0.000000e+00> : vector<256x128xf32>
    %4 = tpu.matmul %2, %3, %cst {dimension_numbers = #tpu.dot_dimension_numbers<[1], [0], [0], [1], [0, 0, 1, 1], [], []>} : vector<256x8xbf16>, vector<8x128xbf16>, vector<256x128xf32> -> vector<256x128xf32>
    %c0_5 = arith.constant 0 : index
    %c0_6 = arith.constant 0 : index
    %c0_7 = arith.constant 0 : index
    %c0_8 = arith.constant 0 : index
    %5 = vector.load %arg1[%c0_5, %c0_6, %c0_7, %c0_8] : memref<1x16x16x128xbf16, #tpu.memory_space<vmem>>, vector<1x16x16x128xbf16>
    %6 = vector.shape_cast %5 : vector<1x16x16x128xbf16> to vector<16x16x128xbf16>
    %7 = arith.extf %6 : vector<16x16x128xbf16> to vector<16x16x128xf32>
    %8 = vector.shape_cast %7 : vector<16x16x128xf32> to vector<256x128xf32>
    %c0_9 = arith.constant 0 : index
    %c0_10 = arith.constant 0 : index
    %9 = vector.load %arg4[%c0_9, %c0_10] : memref<1x128xf32, #tpu.memory_space<vmem>>, vector<1x128xf32>
    %10 = vector.broadcast %9 : vector<1x128xf32> to vector<256x128xf32>
    %11 = arith.mulf %8, %10 : vector<256x128xf32>
    %c0_11 = arith.constant 0 : index
    %c0_12 = arith.constant 0 : index
    %12 = vector.load %arg5[%c0_11, %c0_12] : memref<1x128xf32, #tpu.memory_space<vmem>>, vector<1x128xf32>
    %13 = vector.broadcast %12 : vector<1x128xf32> to vector<256x128xf32>
    %14 = arith.addf %11, %13 : vector<256x128xf32>
    %15 = arith.addf %14, %4 : vector<256x128xf32>
    %cst_13 = arith.constant 0.000000e+00 : f32
    %16 = vector.broadcast %cst_13 : f32 to vector<256x128xf32>
    %17 = arith.maximumf %15, %16 : vector<256x128xf32>
    %18 = vector.shape_cast %17 : vector<256x128xf32> to vector<16x16x128xf32>
    %c0_14 = arith.constant 0 : index
    %c0_15 = arith.constant 0 : index
    %c0_16 = arith.constant 0 : index
    %c0_17 = arith.constant 0 : index
    %19 = vector.load %arg6[%c0_14, %c0_15, %c0_16, %c0_17] : memref<1x16x16x128xf32, #tpu.memory_space<vmem>>, vector<1x16x16x128xf32>
    %20 = vector.shape_cast %19 : vector<1x16x16x128xf32> to vector<16x16x128xf32>
    %21 = vector.shape_cast %18 : vector<16x16x128xf32> to vector<1x16x16x128xf32>
    tpu.vector_store %arg6[%c0_14, %c0_15, %c0_16, %c0_17], %21 {strides = array<i32>} : memref<1x16x16x128xf32, #tpu.memory_space<vmem>>, vector<1x16x16x128xf32>,
    return
  }
  func.func @transform_0(%arg0: i32) -> (i32, i32, i32, i32) {
    %c0_i32 = arith.constant 0 : i32
    %c0_i32_0 = arith.constant 0 : i32
    %c0_i32_1 = arith.constant 0 : i32
    %c0_i32_2 = arith.constant 0 : i32
    return %arg0, %c0_i32, %c0_i32_0, %c0_i32_1 : i32, i32, i32, i32
  }
  func.func @transform_1(%arg0: i32) -> (i32, i32, i32, i32) {
    %c0_i32 = arith.constant 0 : i32
    %c0_i32_0 = arith.constant 0 : i32
    %c0_i32_1 = arith.constant 0 : i32
    %c0_i32_2 = arith.constant 0 : i32
    return %arg0, %c0_i32, %c0_i32_0, %c0_i32_1 : i32, i32, i32, i32
  }
  func.func @transform_2(%arg0: i32) -> (i32, i32) {
    %c0_i32 = arith.constant 0 : i32
    %c0_i32_0 = arith.constant 0 : i32
    %c0_i32_1 = arith.constant 0 : i32
    return %c0_i32, %c0_i32_0 : i32, i32
  }
  func.func @transform_3(%arg0: i32) -> (i32, i32) {
    %c0_i32 = arith.constant 0 : i32
    %c0_i32_0 = arith.constant 0 : i32
    %c0_i32_1 = arith.constant 0 : i32
    return %c0_i32, %c0_i32_0 : i32, i32
  }
  func.func @transform_4(%arg0: i32) -> (i32, i32) {
    %c0_i32 = arith.constant 0 : i32
    %c0_i32_0 = arith.constant 0 : i32
    %c0_i32_1 = arith.constant 0 : i32
    return %c0_i32, %c0_i32_0 : i32, i32
  }
  func.func @transform_5(%arg0: i32) -> (i32, i32, i32, i32) {
    %c0_i32 = arith.constant 0 : i32
    %c0_i32_0 = arith.constant 0 : i32
    %c0_i32_1 = arith.constant 0 : i32
    %c0_i32_2 = arith.constant 0 : i32
    return %arg0, %c0_i32, %c0_i32_0, %c0_i32_1 : i32, i32, i32, i32
  }
}

</mosaic_0001>

<bundles_post_ra>
// kernel: basic_block_forward.5
= control target key start
LH: loop header
LB: loop body
LE: loop exit
PB: predicated region body
PF: predicated region fallthrough
CT: control target
= control target key end

     0   :  { %s1124_s18 = smov 0   ;;  %s1356_s0 = inlined_call_operand.vmem [shape: bf16[2,16,16,128], index: 0, kind: input, shape index: {}]   ;;  %s1357_s1 = inlined_call_operand.vmem [shape: bf16[2,16,16,8], index: 1, kind: input, shape index: {}]   ;;  %s1358_s2 = inlined_call_operand.vmem [shape: bf16[8,128], index: 2, kind: input, shape index: {}]   ;;  %s1359_s3 = inlined_call_operand.vmem [shape: f32[1,128], index: 3, kind: input, shape index: {}]   ;;  %s1360_s4 = inlined_call_operand.vmem [shape: f32[1,128], index: 4, kind: input, shape index: {}]   ;;  %s1361_s5 = inlined_call_operand.vmem [shape: f32[2,16,16,128], index: 5, kind: output, shape index: {}]  }
   0x1 LB: > { %s878_s19 = sadd.s32 4294967295, %s1092_s18   ;;  %p882_p0 = scmp.ge.s32.totalorder %s1092_s18, 1  ;;  %s1092_s18 = sphi %s1124_s18, %s15_s18  }
   0x2   : > { %p197_p1 = scmp.lt.s32.totalorder %s1092_s18, 3 }
   0x4   : > { %p198_p2 = pnand %p882_p0, %p197_p1 }
   0x5   : > { %p230_p3 = scmp.lt.s32.totalorder (!%p198_p2), %s878_s19, 1 }
   0x6   : > { %201 = sbr.rel (%p198_p2) target bundleno = 245 (0xf5), region = 40 }
   0xb   : > { %v278_v0 = vld [vmem:[%s1358_s2] sm:$0xf]  ;;  %vm408_vm0 = vcmask 1043456   ;;  %s1363_s19 = smov (!%p230_p3, %s878_s19), 1  ;;  %vm359_vm1 = vcmask 64512  }
   0xc   : > { %1060 = vmatprep.subr.msk.bf16.mxu0 %vm408_vm0, %v278_v0  ;;  %1061 = vmatprep.subr.msk.bf16.mxu1 %vm408_vm0, %v278_v0  ;;  %v410_v1 = vsel %vm408_vm0, %v278_v0, 0  ;;  %s925_s22 = sshll.u32 %s1363_s19, 7  ;;  %v1191_v24 = vld [vmem:[%s1359_s3] ss:$0 sm:$0xff]  ;;  %s927_s8 = sshll.u32 %s1363_s19, 8 }
   0xd   : > { %1025 = vmatpush3.bf16.msra.mxu0 %v410_v1  ;;  %1059 = vmatpush3.bf16.msra.mxu1 %v410_v1  ;;  %s1143_s25 = scalar_lea.vmem %s1357_s1, %s925_s22  ;;  %s1182_s28 = scalar_lea.vmem %s1356_s0, %s925_s22  ;;  %v1202_v39 = vld [vmem:[%s1360_s4] ss:$0 sm:$0xff] }
   0xe   : > { %v1070_v2 = vld [vmem:[%s1143_s25] sm:$0xff]   ;;  %v1072_v4 = vld [vmem:[%s1143_s25 + $0x8] sm:$0xff]   ;;  %v1074_v6 = vld [vmem:[%s1143_s25 + $0x10] sm:$0xff]   ;;  %s1249_s11 = scalar_lea.vmem %s1361_s5, %s927_s8 }
   0xf   : > { %v1071_v3 = vld [vmem:[%s1143_s25 + $0x40] sm:$0xff]   ;;  %1026 = vmatprep.mubr.msk.bf16.mxu0 %vm359_vm1, %v1070_v2  ;;  %v1073_v5 = vld [vmem:[%s1143_s25 + $0x48] sm:$0xff]   ;;  %v1075_v7 = vld [vmem:[%s1143_s25 + $0x50] sm:$0xff]  }
  0x10   : > { %1042 = vmatprep.mubr.msk.bf16.mxu1 %vm359_vm1, %v1071_v3  ;;  %1027 = vmatmul.mubr.msk.bf16.vlgmr.msra.gmra.mxu0 %vm359_vm1, %v1072_v4  ;;  %v1076_v8 = vld [vmem:[%s1143_s25 + $0x18] sm:$0xff]   ;;  %v1078_v10 = vld [vmem:[%s1143_s25 + $0x20] sm:$0xff]   ;;  %v1080_v12 = vld [vmem:[%s1143_s25 + $0x28] sm:$0xff]  }
  0x11   : > { %1043 = vmatmul.mubr.msk.bf16.vlgmr.msra.gmra.mxu1 %vm359_vm1, %v1073_v5  ;;  %1030 = vmatprep.mubr.msk.bf16.mxu0 %vm359_vm1, %v1074_v6  ;;  %v1077_v9 = vld [vmem:[%s1143_s25 + $0x58] sm:$0xff]   ;;  %v1079_v11 = vld [vmem:[%s1143_s25 + $0x60] sm:$0xff]   ;;  %v1081_v13 = vld [vmem:[%s1143_s25 + $0x68] sm:$0xff]  }
  0x12   : > { %1046 = vmatprep.mubr.msk.bf16.mxu1 %vm359_vm1, %v1075_v7  ;;  %v1082_v14 = vld [vmem:[%s1143_s25 + $0x30] sm:$0xff]   ;;  %v1084_v16 = vld [vmem:[%s1143_s25 + $0x38] sm:$0xff]   ;;  %v992_v18 = vld [vmem:[%s1182_s28 + $0x8] sm:$0xff]  }
  0x13   : > { %v1083_v15 = vld [vmem:[%s1143_s25 + $0x70] sm:$0xff]   ;;  %v1085_v17 = vld [vmem:[%s1143_s25 + $0x78] sm:$0xff]   ;;  %v1000_v19 = vld [vmem:[%s1182_s28 + $0x48] sm:$0xff]   ;;  %v934_v22 = vunpack.c.l.bf16 %v992_v18  ;;  %v935_v31 = vunpack.c.h.bf16 %v992_v18 }
  0x14   : > { %v929_v20 = vld [vmem:[%s1182_s28] sm:$0xff]   ;;  %v966_v23 = vunpack.c.l.bf16 %v1000_v19  ;;  %v994_v26 = vld [vmem:[%s1182_s28 + $0x18] sm:$0xff]   ;;  %v993_v29 = vld [vmem:[%s1182_s28 + $0x10] sm:$0xff]   ;;  %v967_v32 = vunpack.c.h.bf16 %v1000_v19 }
  0x15   : > { %v999_v21 = vld [vmem:[%s1182_s28 + $0x40] sm:$0xff]   ;;  %v930_v25 = vunpack.c.l.bf16 %v929_v20  ;;  %v1002_v27 = vld [vmem:[%s1182_s28 + $0x58] sm:$0xff]   ;;  %v1001_v30 = vld [vmem:[%s1182_s28 + $0x50] sm:$0xff]   ;;  %v931_v33 = vunpack.c.h.bf16 %v929_v20  ;;  %v646_v35 = vmul.f32 %v934_v22, %v1191_v24  ;;  %v942_v37 = vunpack.c.l.bf16 %v994_v26 }
  0x16   : > { %v962_v28 = vunpack.c.l.bf16 %v999_v21  ;;  %v963_v34 = vunpack.c.h.bf16 %v999_v21  ;;  %v662_v36 = vmul.f32 %v966_v23, %v1191_v24  ;;  %v974_v38 = vunpack.c.l.bf16 %v1002_v27  ;;  %v1218_v58 = vld [vmem:[%s1182_s28 + $0x28] sm:$0xff]  }
  0x17   : > { %v644_v40 = vmul.f32 %v930_v25, %v1191_v24  ;;  %v938_v41 = vunpack.c.l.bf16 %v993_v29  ;;  %v970_v42 = vunpack.c.l.bf16 %v1001_v30  ;;  %v943_v44 = vunpack.c.h.bf16 %v994_v26  ;;  %v1221_v59 = vld [vmem:[%s1182_s28 + $0x68] sm:$0xff]  }
  0x18   : > { %1031 = vmatmul.mubr.msk.bf16.gmra.mxu0 %vm359_vm1, %v1076_v8  ;;  %v660_v43 = vmul.f32 %v962_v28, %v1191_v24  ;;  %v975_v45 = vunpack.c.h.bf16 %v1002_v27  ;;  %v647_v46 = vmul.f32 %v935_v31, %v1191_v24  ;;  %v663_v47 = vmul.f32 %v967_v32, %v1191_v24 }
  0x19   : > { %1047 = vmatmul.mubr.msk.bf16.gmra.mxu1 %vm359_vm1, %v1077_v9  ;;  %1034 = vmatprep.mubr.msk.bf16.mxu0 %vm359_vm1, %v1078_v10  ;;  %v645_v48 = vmul.f32 %v931_v33, %v1191_v24  ;;  %v661_v49 = vmul.f32 %v963_v34, %v1191_v24  ;;  %v685_v50 = vadd.f32 %v1202_v39, %v646_v35  ;;  %v939_v57 = vunpack.c.h.bf16 %v993_v29  ;;  %v1236_v9 = vld [vmem:[%s1182_s28 + $0x20] sm:$0xff]  }
  0x1a   : > { %1050 = vmatprep.mubr.msk.bf16.mxu1 %vm359_vm1, %v1079_v11  ;;  %v701_v51 = vadd.f32 %v1202_v39, %v662_v36  ;;  %v650_v52 = vmul.f32 %v942_v37, %v1191_v24  ;;  %v666_v53 = vmul.f32 %v974_v38, %v1191_v24  ;;  %v683_v54 = vadd.f32 %v1202_v39, %v644_v40  ;;  %v1239_v10 = vld [vmem:[%s1182_s28 + $0x60] sm:$0xff]  }
  0x1b   : > { %v648_v55 = vmul.f32 %v938_v41, %v1191_v24  ;;  %v664_v56 = vmul.f32 %v970_v42, %v1191_v24  ;;  %v699_v60 = vadd.f32 %v1202_v39, %v660_v43  ;;  %v651_v61 = vmul.f32 %v943_v44, %v1191_v24 }
  0x1c   : > { %v667_v62 = vmul.f32 %v975_v45, %v1191_v24  ;;  %v971_v63 = vunpack.c.h.bf16 %v1001_v30  ;;  %v686_v0 = vadd.f32 %v1202_v39, %v647_v46  ;;  %v702_v1 = vadd.f32 %v1202_v39, %v663_v47 }
  0x1d   : > { %v684_v2 = vadd.f32 %v1202_v39, %v645_v48  ;;  %v700_v3 = vadd.f32 %v1202_v39, %v661_v49  ;;  %v689_v5 = vadd.f32 %v1202_v39, %v650_v52  ;;  %v705_v6 = vadd.f32 %v1202_v39, %v666_v53  ;;  %v1275_v53 = vld [vmem:[%s1182_s28 + $0x38] sm:$0xff]  }
  0x1e   : > { %v950_v7 = vunpack.c.l.bf16 %v1218_v58  ;;  %v982_v8 = vunpack.c.l.bf16 %v1221_v59  ;;  %v1252_v18 = vadd.f32 %v1202_v39, %v651_v61  ;;  %v1255_v19 = vadd.f32 %v1202_v39, %v667_v62 }
  0x1f   : > { %v665_v20 = vmul.f32 %v971_v63, %v1191_v24  ;;  %v946_v25 = vunpack.c.l.bf16 %v1236_v9  ;;  %v978_v26 = vunpack.c.l.bf16 %v1239_v10  ;;  %v951_v36 = vunpack.c.h.bf16 %v1218_v58 }
  0x20   : > { %1035 = vmatmul.mubr.msk.bf16.gmra.mxu0 %vm359_vm1, %v1080_v12  ;;  %v654_v30 = vmul.f32 %v950_v7, %v1191_v24  ;;  %v670_v31 = vmul.f32 %v982_v8, %v1191_v24  ;;  %v983_v42 = vunpack.c.h.bf16 %v1221_v59  ;;  %v947_v58 = vunpack.c.h.bf16 %v1236_v9  ;;  %v1281_v59 = vld [vmem:[%s1182_s28 + $0x78] sm:$0xff]  }
  0x21   : > { %1051 = vmatmul.mubr.msk.bf16.gmra.mxu1 %vm359_vm1, %v1081_v13  ;;  %1038 = vmatprep.mubr.msk.bf16.mxu0 %vm359_vm1, %v1082_v14  ;;  %v687_v13 = vadd.f32 %v1202_v39, %v648_v55  ;;  %v1243_v14 = vadd.f32 %v1202_v39, %v664_v56  ;;  %v704_v41 = vadd.f32 %v1202_v39, %v665_v20  ;;  %v1301_v20 = vld [vmem:[%s1182_s28 + $0x70] sm:$0xff]  }
  0x22   : > { %1054 = vmatprep.mubr.msk.bf16.mxu1 %vm359_vm1, %v1083_v15  ;;  %v649_v15 = vmul.f32 %v939_v57, %v1191_v24  ;;  %v652_v46 = vmul.f32 %v946_v25, %v1191_v24  ;;  %v668_v47 = vmul.f32 %v978_v26, %v1191_v24  ;;  %v709_v52 = vadd.f32 %v1202_v39, %v670_v31 }
  0x23   : > { %v655_v57 = vmul.f32 %v951_v36, %v1191_v24  ;;  %v671_v63 = vmul.f32 %v983_v42, %v1191_v24 }
  0x24   : > { %v688_v35 = vadd.f32 %v1202_v39, %v649_v15  ;;  %v707_v9 = vadd.f32 %v1202_v39, %v668_v47 }
  0x28   : > { %1039 = vmatmul.mubr.msk.bf16.gmra.mxu0 %vm359_vm1, %v1084_v16 }
  0x29   : > { %1055 = vmatmul.mubr.msk.bf16.gmra.mxu1 %vm359_vm1, %v1085_v17 }
  0xd0   : > { %v1028_v4 = vpop.f32.mrf.mxu0 }
  0xd1   : > { %v717_v11 = vadd.f32 %v1028_v4, %v685_v50  ;;  %v1044_v12 = vpop.f32.mrf.mxu1  ;;  %v691_v4 = vadd.f32 %v1202_v39, %v652_v46 }
  0xd2   : > { %v733_v16 = vadd.f32 %v1044_v12, %v701_v51  ;;  %v446_v17 = vpop.f32.mrf.mxu0  ;;  %v693_v51 = vadd.f32 %v1202_v39, %v654_v30 }
  0xd3   : > { %v749_v21 = vmax.f32 %v717_v11, 0.0  ;;  %v715_v22 = vadd.f32 %v683_v54, %v446_v17  ;;  %v510_v23 = vpop.f32.mrf.mxu1  ;;  %v1294_v11 = vld [vmem:[%s1182_s28 + $0x30] sm:$0xff]   ;;  %v653_v17 = vmul.f32 %v947_v58, %v1191_v24 }
  0xd4   : > { %v765_v27 = vmax.f32 %v733_v16, 0.0  ;;  %v731_v28 = vadd.f32 %v699_v60, %v510_v23  ;;  %v1029_v29 = vpop.f32.mrf.mxu0  ;;  %v694_v16 = vadd.f32 %v1202_v39, %v655_v57  ;;  %v710_v23 = vadd.f32 %v1202_v39, %v671_v63 }
  0xd5   : > { %781 = vst [vmem:[%s1249_s11 + $0x10] sm:$0xff] %v749_v21  ;;  %v747_v32 = vmax.f32 %v715_v22, 0.0  ;;  %v718_v33 = vadd.f32 %v1029_v29, %v686_v0  ;;  %v1045_v34 = vpop.f32.mrf.mxu1  ;;  %v979_v0 = vunpack.c.h.bf16 %v1239_v10  ;;  %v990_v10 = vunpack.c.l.bf16 %v1281_v59 }
  0xd6   : > { %797 = vst [vmem:[%s1249_s11 + $0x90] sm:$0xff] %v765_v27  ;;  %v763_v37 = vmax.f32 %v731_v28, 0.0  ;;  %v734_v38 = vadd.f32 %v1045_v34, %v702_v1  ;;  %v449_v40 = vpop.f32.mrf.mxu0  ;;  %v954_v29 = vunpack.c.l.bf16 %v1294_v11 }
  0xd7   : > { %779 = vst [vmem:[%s1249_s11] sm:$0xff] %v747_v32  ;;  %v750_v43 = vmax.f32 %v718_v33, 0.0  ;;  %v716_v44 = vadd.f32 %v684_v2, %v449_v40  ;;  %v513_v45 = vpop.f32.mrf.mxu1  ;;  %v669_v25 = vmul.f32 %v979_v0, %v1191_v24  ;;  %v674_v32 = vmul.f32 %v990_v10, %v1191_v24 }
  0xd8   : > { %795 = vst [vmem:[%s1249_s11 + $0x80] sm:$0xff] %v763_v37  ;;  %v766_v48 = vmax.f32 %v734_v38, 0.0  ;;  %v732_v49 = vadd.f32 %v700_v3, %v513_v45  ;;  %v1032_v50 = vpop.f32.mrf.mxu0  ;;  %v986_v33 = vunpack.c.l.bf16 %v1301_v20  ;;  %v692_v37 = vadd.f32 %v1202_v39, %v653_v17 }
  0xd9   : > { %782 = vst [vmem:[%s1249_s11 + $0x18] sm:$0xff] %v750_v43  ;;  %v748_v54 = vmax.f32 %v716_v44, 0.0  ;;  %v721_v55 = vadd.f32 %v1032_v50, %v689_v5  ;;  %v1048_v56 = vpop.f32.mrf.mxu1  ;;  %v958_v5 = vunpack.c.l.bf16 %v1275_v53  ;;  %v959_v38 = vunpack.c.h.bf16 %v1275_v53 }
  0xda   : > { %798 = vst [vmem:[%s1249_s11 + $0x98] sm:$0xff] %v766_v48  ;;  %v764_v60 = vmax.f32 %v732_v49, 0.0  ;;  %v737_v61 = vadd.f32 %v1048_v56, %v705_v6  ;;  %v462_v62 = vpop.f32.mrf.mxu0  ;;  %v708_v43 = vadd.f32 %v1202_v39, %v669_v25  ;;  %v991_v44 = vunpack.c.h.bf16 %v1281_v59 }
  0xdb   : > { %780 = vst [vmem:[%s1249_s11 + $0x8] sm:$0xff] %v748_v54  ;;  %v753_v1 = vmax.f32 %v721_v55, 0.0  ;;  %v719_v2 = vadd.f32 %v687_v13, %v462_v62  ;;  %v526_v3 = vpop.f32.mrf.mxu1  ;;  %v658_v28 = vmul.f32 %v958_v5, %v1191_v24  ;;  %v656_v48 = vmul.f32 %v954_v29, %v1191_v24 }
  0xdc   : > { %796 = vst [vmem:[%s1249_s11 + $0x88] sm:$0xff] %v764_v60  ;;  %v769_v7 = vmax.f32 %v737_v61, 0.0  ;;  %v735_v6 = vadd.f32 %v1243_v14, %v526_v3  ;;  %v1033_v8 = vpop.f32.mrf.mxu0  ;;  %v955_v49 = vunpack.c.h.bf16 %v1294_v11  ;;  %v672_v53 = vmul.f32 %v986_v33, %v1191_v24 }
  0xdd   : > { %785 = vst [vmem:[%s1249_s11 + $0x30] sm:$0xff] %v753_v1  ;;  %v751_v12 = vmax.f32 %v719_v2, 0.0  ;;  %v722_v13 = vadd.f32 %v1033_v8, %v1252_v18  ;;  %v1049_v15 = vpop.f32.mrf.mxu1  ;;  %v987_v54 = vunpack.c.h.bf16 %v1301_v20  ;;  %v697_v58 = vadd.f32 %v1202_v39, %v658_v28 }
  0xde   : > { %801 = vst [vmem:[%s1249_s11 + $0xb0] sm:$0xff] %v769_v7  ;;  %v767_v14 = vmax.f32 %v735_v6, 0.0  ;;  %v738_v21 = vadd.f32 %v1049_v15, %v1255_v19  ;;  %v465_v22 = vpop.f32.mrf.mxu0  ;;  %v659_v59 = vmul.f32 %v959_v38, %v1191_v24  ;;  %v713_v63 = vadd.f32 %v1202_v39, %v674_v32 }
  0xdf   : > { %783 = vst [vmem:[%s1249_s11 + $0x20] sm:$0xff] %v751_v12  ;;  %v754_v18 = vmax.f32 %v722_v13, 0.0  ;;  %v720_v26 = vadd.f32 %v688_v35, %v465_v22  ;;  %v529_v27 = vpop.f32.mrf.mxu1  ;;  %v675_v0 = vmul.f32 %v991_v44, %v1191_v24  ;;  %v657_v5 = vmul.f32 %v955_v49, %v1191_v24 }
  0xe0   : > { %799 = vst [vmem:[%s1249_s11 + $0xa0] sm:$0xff] %v767_v14  ;;  %v770_v30 = vmax.f32 %v738_v21, 0.0  ;;  %v736_v31 = vadd.f32 %v704_v41, %v529_v27  ;;  %v1036_v19 = vpop.f32.mrf.mxu0  ;;  %v673_v10 = vmul.f32 %v987_v54, %v1191_v24  ;;  %v698_v15 = vadd.f32 %v1202_v39, %v659_v59 }
  0xe1   : > { %786 = vst [vmem:[%s1249_s11 + $0x38] sm:$0xff] %v754_v18  ;;  %v752_v34 = vmax.f32 %v720_v26, 0.0  ;;  %v725_v36 = vadd.f32 %v1036_v19, %v693_v51  ;;  %v1052_v35 = vpop.f32.mrf.mxu1  ;;  %v714_v14 = vadd.f32 %v1202_v39, %v675_v0 }
  0xe2   : > { %802 = vst [vmem:[%s1249_s11 + $0xb8] sm:$0xff] %v770_v30  ;;  %v768_v40 = vmax.f32 %v736_v31, 0.0  ;;  %v741_v42 = vadd.f32 %v1052_v35, %v709_v52  ;;  %v478_v41 = vpop.f32.mrf.mxu0  ;;  %v712_v27 = vadd.f32 %v1202_v39, %v673_v10 }
  0xe3   : > { %784 = vst [vmem:[%s1249_s11 + $0x28] sm:$0xff] %v752_v34  ;;  %v757_v45 = vmax.f32 %v725_v36, 0.0  ;;  %v723_v46 = vadd.f32 %v691_v4, %v478_v41  ;;  %v542_v47 = vpop.f32.mrf.mxu1  ;;  %v695_v4 = vadd.f32 %v1202_v39, %v656_v48 }
  0xe4   : > { %800 = vst [vmem:[%s1249_s11 + $0xa8] sm:$0xff] %v768_v40  ;;  %v773_v50 = vmax.f32 %v741_v42, 0.0  ;;  %v739_v51 = vadd.f32 %v707_v9, %v542_v47  ;;  %v1037_v52 = vpop.f32.mrf.mxu0  ;;  %v711_v9 = vadd.f32 %v1202_v39, %v672_v53 }
  0xe5   : > { %789 = vst [vmem:[%s1249_s11 + $0x50] sm:$0xff] %v757_v45  ;;  %v755_v55 = vmax.f32 %v723_v46, 0.0  ;;  %v726_v56 = vadd.f32 %v1037_v52, %v694_v16  ;;  %v1053_v57 = vpop.f32.mrf.mxu1 }
  0xe6   : > { %805 = vst [vmem:[%s1249_s11 + $0xd0] sm:$0xff] %v773_v50  ;;  %v771_v60 = vmax.f32 %v739_v51, 0.0  ;;  %v742_v61 = vadd.f32 %v1053_v57, %v710_v23  ;;  %v481_v62 = vpop.f32.mrf.mxu0  ;;  %v696_v23 = vadd.f32 %v1202_v39, %v657_v5 }
  0xe7   : > { %787 = vst [vmem:[%s1249_s11 + $0x40] sm:$0xff] %v755_v55  ;;  %v758_v1 = vmax.f32 %v726_v56, 0.0  ;;  %v724_v2 = vadd.f32 %v692_v37, %v481_v62  ;;  %v545_v3 = vpop.f32.mrf.mxu1 }
  0xe8   : > { %803 = vst [vmem:[%s1249_s11 + $0xc0] sm:$0xff] %v771_v60  ;;  %v774_v7 = vmax.f32 %v742_v61, 0.0  ;;  %v740_v6 = vadd.f32 %v708_v43, %v545_v3  ;;  %v1040_v8 = vpop.f32.mrf.mxu0 }
  0xe9   : > { %790 = vst [vmem:[%s1249_s11 + $0x58] sm:$0xff] %v758_v1  ;;  %v756_v11 = vmax.f32 %v724_v2, 0.0  ;;  %v729_v12 = vadd.f32 %v1040_v8, %v697_v58  ;;  %v1056_v13 = vpop.f32.mrf.mxu1 }
  0xea   : > { %806 = vst [vmem:[%s1249_s11 + $0xd8] sm:$0xff] %v774_v7  ;;  %v772_v16 = vmax.f32 %v740_v6, 0.0  ;;  %v745_v17 = vadd.f32 %v1056_v13, %v713_v63  ;;  %v494_v20 = vpop.f32.mrf.mxu0 }
  0xeb   : > { %788 = vst [vmem:[%s1249_s11 + $0x48] sm:$0xff] %v756_v11  ;;  %v761_v21 = vmax.f32 %v729_v12, 0.0  ;;  %v727_v22 = vadd.f32 %v695_v4, %v494_v20  ;;  %v558_v24 = vpop.f32.mrf.mxu1 }
  0xec   : > { %804 = vst [vmem:[%s1249_s11 + $0xc8] sm:$0xff] %v772_v16  ;;  %v777_v25 = vmax.f32 %v745_v17, 0.0  ;;  %v743_v18 = vadd.f32 %v711_v9, %v558_v24  ;;  %v1041_v26 = vpop.f32.mrf.mxu0 }
  0xed   : > { %793 = vst [vmem:[%s1249_s11 + $0x70] sm:$0xff] %v761_v21  ;;  %v759_v28 = vmax.f32 %v727_v22, 0.0  ;;  %v730_v29 = vadd.f32 %v1041_v26, %v698_v15  ;;  %v1057_v30 = vpop.f32.mrf.mxu1 }
  0xee   : > { %809 = vst [vmem:[%s1249_s11 + $0xf0] sm:$0xff] %v777_v25  ;;  %v775_v31 = vmax.f32 %v743_v18, 0.0  ;;  %v746_v19 = vadd.f32 %v1057_v30, %v714_v14  ;;  %v497_v32 = vpop.f32.mrf.mxu0 }
  0xef   : > { %791 = vst [vmem:[%s1249_s11 + $0x60] sm:$0xff] %v759_v28  ;;  %v762_v33 = vmax.f32 %v730_v29, 0.0  ;;  %v728_v34 = vadd.f32 %v696_v23, %v497_v32  ;;  %v561_v36 = vpop.f32.mrf.mxu1 }
  0xf0   : > { %807 = vst [vmem:[%s1249_s11 + $0xe0] sm:$0xff] %v775_v31  ;;  %v778_v35 = vmax.f32 %v746_v19, 0.0  ;;  %v744_v37 = vadd.f32 %v712_v27, %v561_v36 }
  0xf1   : > { %794 = vst [vmem:[%s1249_s11 + $0x78] sm:$0xff] %v762_v33  ;;  %v760_v39 = vmax.f32 %v728_v34, 0.0 }
  0xf2   : > { %810 = vst [vmem:[%s1249_s11 + $0xf8] sm:$0xff] %v778_v35  ;;  %v776_v38 = vmax.f32 %v744_v37, 0.0 }
  0xf3   : > { %792 = vst [vmem:[%s1249_s11 + $0x68] sm:$0xff] %v760_v39 }
  0xf4   : > { %808 = vst [vmem:[%s1249_s11 + $0xe8] sm:$0xff] %v776_v38 }
  0xf5 PF: > { %s15_s18 = sadd.s32 1, %s1092_s18  }
  0xf6   : > { %p12_p4 = scmp.ge.s32.totalorder %s15_s18, 4  }
  0xf8   :  { %14 = sbr.rel (!%p12_p4) target bundleno = 1 (0x1), region = 73 }

// kernel: basic_block_forward.3
= control target key start
LH: loop header
LB: loop body
LE: loop exit
PB: predicated region body
PF: predicated region fallthrough
CT: control target
= control target key end

     0   :  { %s4210_s12 = smov 0   ;;  %s5828_s0 = inlined_call_operand.vmem [shape: bf16[2,18,18,8], index: 0, kind: input, shape index: {}]   ;;  %s5829_s1 = inlined_call_operand.vmem [shape: bf16[9,8,128], index: 1, kind: input, shape index: {}]   ;;  %s5830_s2 = inlined_call_operand.vmem [shape: bf16[2,16,16,128], index: 2, kind: output, shape index: {0}]   ;;  %s5831_s3 = inlined_call_operand.vmem [shape: f32[16,128], index: 3, kind: output, shape index: {1}]  }
   0x1 LB: > { %s3289_s13 = sadd.s32 4294967295, %s4188_s12   ;;  %p3293_p0 = scmp.ge.s32.totalorder %s4188_s12, 1  ;;  %s4188_s12 = sphi %s4210_s12, %s14_s12  }
   0x2   : > { %p140_p1 = scmp.lt.s32.totalorder %s4188_s12, 3 }
   0x4   : > { %p141_p2 = pnand %p3293_p0, %p140_p1 }
   0x6   : > { %144 = sbr.rel (%p141_p2) target bundleno = 652 (0x28c), region = 28 }
   0xb   : > { %v3298_v0 = vld [vmem:[%s5829_s1 + $0x4] sm:$0xf]  ;;  %vm724_vm0 = vcmask 1043456   ;;  %p168_p3 = scmp.lt.s32.totalorder %s3289_s13, 1  ;;  %v237_v2 = vld [vmem:[%s5829_s1] sm:$0xf] }
   0xc   : > { %4146 = vmatprep.subr.msk.bf16.mxu1 %vm724_vm0, %v3298_v0  ;;  %4145 = vmatprep.subr.msk.bf16.mxu0 %vm724_vm0, %v3298_v0  ;;  %v726_v1 = vsel %vm724_vm0, %v3298_v0, 0  ;;  %v3379_v3 = vld [vmem:[%s5829_s1 + $0x8] sm:$0xf]  ;;  %vm238_vm1 = vsmask.f32 3328  ;;  %v4241_v4 = vsel %vm724_vm0, %v237_v2, 0 }
   0xd   : > { %4144 = vmatpush3.bf16.msra.mxu1 %v726_v1  ;;  %3838 = vmatpush3.bf16.msra.mxu0 %v726_v1  ;;  %s5981_s13 = smov (!%p168_p3, %s3289_s13), 1  ;;  %vm239_vm2 = vsmask.f32 7440  ;;  %v4244_v5 = vsel %vm724_vm0, %v3379_v3, 0  ;;  %vm675_vm3 = vcmask 64512   ;;  %v5875_v32 = vmov 0 }
   0xe   : > { %4147 = vmatprep.subr.msk.bf16.mxu1 %vm724_vm0, %v237_v2  ;;  %4148 = vmatprep.subr.msk.bf16.mxu0 %vm724_vm0, %v3379_v3  ;;  %s4155_s20 = smul.u32 216, %s5981_s13  ;;  %vm4283_vm4 = vmor %vm238_vm1, %vm239_vm2  ;;  %vm1197_vm5 = vcmask 1042432   ;;  %vm1198_vm6 = vcmask 1046532   ;;  %s3556_s9 = sshll.u32 %s5981_s13, 7  ;;  %vm3198_vm8 = vcmask 1040384   ;;  %vm3200_vm9 = vcmask 1041408  }
   0xf   : > { %v5876_v32 = vsel %vm4283_vm4, 4294967295, %v5875_v32  ;;  %vm4606_vm7 = vmor %vm1197_vm5, %vm1198_vm6  ;;  %s5555_s14 = scalar_lea.vmem %s5830_s2, %s3556_s9  ;;  %s3297_s15 = sshll.u32 %s5981_s13, 3 }
  0x10   : > { %s4238_s23 = scalar_lea.vmem %s5828_s0, %s4155_s20  ;;  %5877 = vst [vmem:[#allocation2_spill] sm:$0xff] %v5876_v32  ;;  %s181_s18 = scalar_lea.vmem %s5831_s3, %s3297_s15 }
  0x11   : > { %v4247_v6 = vld [vmem:[%s4238_s23] sm:$0xf]  ;;  %v4250_v7 = vld [vmem:[%s4238_s23 + $0x4] sm:$0xf]  ;;  %v4253_v8 = vld [vmem:[%s4238_s23 + $0x8] sm:$0x1] }
  0x12   : > { %v242_v9 = vshrl.u32 %v4247_v6, 16  ;;  %v245_v10 = vshll.u32 %v4247_v6, 16  ;;  %v251_v11 = vshll.u32 %v4250_v7, 16  ;;  %v255_v12 = vshrl.u32 %v4250_v7, 16  ;;  %v4260_v13 = vld [vmem:[%s4238_s23 + $0x60] sm:$0xf] }
  0x13   : > { %v261_v14 = vshll.u32 %v4253_v8, 16  ;;  %v4265_v16 = vld [vmem:[%s4238_s23 + $0x64] sm:$0xf]  ;;  %v4268_v17 = vld [vmem:[%s4238_s23 + $0x68] sm:$0x1]  ;;  %v434_v23 = vshrl.u32 %v4260_v13, 16 }
  0x14   : > { %v244_v18 = vrot.slane %v242_v9, 4  ;;  %v247_v19 = vrot.slane %v245_v10, 5  ;;  %v253_v20 = vrot.slane %v251_v11, 5  ;;  %v257_v21 = vrot.slane %v255_v12, 4  ;;  %v4276_v30 = vld [vmem:[%s4238_s23 + $0xc] sm:$0xf] }
  0x15   : > { %v263_v22 = vrot.slane %v261_v14, 5  ;;  %v437_v24 = vshll.u32 %v4260_v13, 16  ;;  %v443_v25 = vshll.u32 %v4265_v16, 16  ;;  %v447_v28 = vshrl.u32 %v4265_v16, 16  ;;  %v4279_v31 = vld [vmem:[%s4238_s23 + $0x10] sm:$0xf] }
  0x16   : > { %v248_v26 = vor.u32 %v247_v19, %v244_v18  ;;  %v258_v27 = vor.u32 %v257_v21, %v253_v20  ;;  %v453_v29 = vshll.u32 %v4268_v17, 16  ;;  %v436_v33 = vrot.slane %v434_v23, 4  ;;  %v4290_v42 = vld [vmem:[%s4238_s23 + $0x14] sm:$0x1]  ;;  %v4301_v54 = vld [vmem:[%s4238_s23 + $0x6c] sm:$0xf] }
  0x17   : > { %v439_v34 = vrot.slane %v437_v24, 5  ;;  %v445_v35 = vrot.slane %v443_v25, 5  ;;  %v449_v39 = vrot.slane %v447_v28, 4  ;;  %v266_v43 = vshrl.u32 %v4276_v30, 16  ;;  %5878 = vst [vmem:[#allocation3_spill] sm:$0xff] %v4301_v54 }
  0x18   : > { %v249_v37 = vrot.slane %v248_v26, 4  ;;  %v259_v38 = vrot.slane %v258_v27, 4  ;;  %v455_v40 = vrot.slane %v453_v29, 5  ;;  %v269_v44 = vshll.u32 %v4276_v30, 16  ;;  %v4305_v59 = vld [vmem:[%s4238_s23 + $0x70] sm:$0xf] }
  0x19   : > { %v440_v41 = vor.u32 %v439_v34, %v436_v33  ;;  %v275_v45 = vshll.u32 %v4279_v31, 16  ;;  %v450_v48 = vor.u32 %v449_v39, %v445_v35  ;;  %v279_v49 = vshrl.u32 %v4279_v31, 16  ;;  %v4313_v0 = vld [vmem:[%s4238_s23 + $0x74] sm:$0x1]  ;;  %v4319_v10 = vld [vmem:[%s4238_s23 + $0x18] sm:$0xf] }
  0x1a   : > { %v254_v46 = vsel %vm4283_vm4, %v249_v37, %v253_v20  ;;  %v264_v47 = vsel %vm4283_vm4, %v259_v38, %v263_v22  ;;  %v268_v52 = vrot.slane %v266_v43, 4  ;;  %v271_v53 = vrot.slane %v269_v44, 5  ;;  %5879 = vst [vmem:[#allocation4_spill] sm:$0xff] %v4313_v0  ;;  %v4328_v23 = vld [vmem:[%s4238_s23 + $0x1c] sm:$0xf] }
  0x1b   : > { %v3299_v50 = vcombine.low %v254_v46, %v264_v47  ;;  %v441_v51 = vrot.slane %v440_v41, 4  ;;  %v451_v55 = vrot.slane %v450_v48, 4  ;;  %v277_v56 = vrot.slane %v275_v45, 5  ;;  %v4335_v27 = vld [vmem:[%s4238_s23 + $0x20] sm:$0x1] }
  0x1c   : > { %v281_v57 = vrot.slane %v279_v49, 4  ;;  %v285_v58 = vshll.u32 %v4290_v42, 16  ;;  %v272_v61 = vor.u32 %v271_v53, %v268_v52  ;;  %v458_v9 = vshrl.u32 %v4301_v54, 16  ;;  %v4342_v37 = vld [vmem:[%s4238_s23 + $0x78] sm:$0xf] }
  0x1d   : > { %3839 = vmatprep.mubr.msk.bf16.mxu0 %vm675_vm3, %v3299_v50  ;;  %v446_v60 = vsel %vm4283_vm4, %v441_v51, %v445_v35  ;;  %v456_v1 = vsel %vm4283_vm4, %v451_v55, %v455_v40  ;;  %v461_v14 = vshll.u32 %v4301_v54, 16  ;;  %v467_v18 = vshll.u32 %v4305_v59, 16  ;;  %5881 = vst [vmem:[#allocation6_spill] sm:$0xff] %v4342_v37  ;;  %v4350_v43 = vld [vmem:[%s5829_s1 + $0x10] sm:$0xf] }
  0x1e   : > { %v282_v2 = vor.u32 %v281_v57, %v277_v56  ;;  %v287_v3 = vrot.slane %v285_v58, 5  ;;  %v4321_v11 = vcombine.low %v446_v60, %v456_v1  ;;  %v273_v12 = vrot.slane %v272_v61, 4  ;;  %v4355_v48 = vld [vmem:[%s4238_s23 + $0x7c] sm:$0xf]  ;;  %v4363_v58 = vld [vmem:[%s4238_s23 + $0x80] sm:$0x1] }
  0x1f   : > { %v460_v20 = vrot.slane %v458_v9, 4  ;;  %v471_v21 = vshrl.u32 %v4305_v59, 16  ;;  %v477_v22 = vshll.u32 %v4313_v0, 16  ;;  %v463_v25 = vrot.slane %v461_v14, 5  ;;  %5883 = vst [vmem:[#allocation8_spill] sm:$0xff] %v4355_v48  ;;  %5884 = vst [vmem:[#allocation9_spill] sm:$0xff] %v4363_v58 }
  0x20   : > { %5880 = vst [vmem:[#allocation5_spill] sm:$0xff] %v4321_v11  ;;  %v283_v19 = vrot.slane %v282_v2, 4  ;;  %3855 = vmatprep.mubr.msk.bf16.mxu1 %vm675_vm3, %v4321_v11  ;;  %v278_v24 = vsel %vm4283_vm4, %v273_v12, %v277_v56  ;;  %v469_v26 = vrot.slane %v467_v18, 5  ;;  %v290_v28 = vshrl.u32 %v4319_v10, 16  ;;  %v4377_v18 = vld [vmem:[%s4238_s23 + $0x28] sm:$0xf] }
  0x21   : > { %v473_v33 = vrot.slane %v471_v21, 4  ;;  %v479_v34 = vrot.slane %v477_v22, 5  ;;  %v293_v35 = vshll.u32 %v4319_v10, 16  ;;  %v464_v39 = vor.u32 %v463_v25, %v460_v20 }
  0x22   : > { %v288_v29 = vsel %vm4283_vm4, %v283_v19, %v287_v3  ;;  %v292_v40 = vrot.slane %v290_v28, 4  ;;  %v299_v41 = vshll.u32 %v4328_v23, 16  ;;  %v303_v46 = vshrl.u32 %v4328_v23, 16  ;;  %v4369_v3 = vld [vmem:[%s4238_s23 + $0x24] sm:$0xf] }
  0x23   : > { %v4344_v38 = vcombine.low %v278_v24, %v288_v29  ;;  %v474_v44 = vor.u32 %v473_v33, %v469_v26  ;;  %v295_v45 = vrot.slane %v293_v35, 5  ;;  %v309_v47 = vshll.u32 %v4335_v27, 16  ;;  %v4385_v24 = vld [vmem:[%s5829_s1 + $0xc] sm:$0xf] }
  0x24   : > { %v465_v49 = vrot.slane %v464_v39, 4  ;;  %v301_v50 = vrot.slane %v299_v41, 5  ;;  %v482_v51 = vshrl.u32 %v4342_v37, 16  ;;  %v485_v52 = vshll.u32 %v4342_v37, 16  ;;  %v4390_v29 = vld [vmem:[%s4238_s23 + $0x2c] sm:$0x1] }
  0x25   : > { %5882 = vst [vmem:[#allocation7_spill] sm:$0xff] %v4344_v38  ;;  %3840 = vmatmul.mubr.msk.bf16.vlgmr.msra.gmra.mxu0 %vm675_vm3, %v4344_v38  ;;  %v475_v53 = vrot.slane %v474_v44, 4  ;;  %v296_v55 = vor.u32 %v295_v45, %v292_v40  ;;  %v305_v56 = vrot.slane %v303_v46, 4  ;;  %v311_v57 = vrot.slane %v309_v47, 5  ;;  %v4398_v41 = vld [vmem:[%s4238_s23 + $0x84] sm:$0xf] }
  0x26   : > { %3906 = vmatpush3.bf16.msra.mxu0 %v4244_v5  ;;  %v470_v60 = vsel %vm4283_vm4, %v465_v49, %v469_v26  ;;  %v484_v61 = vrot.slane %v482_v51, 4  ;;  %v487_v1 = vrot.slane %v485_v52, 5  ;;  %v491_v2 = vshll.u32 %v4355_v48, 16  ;;  %v4405_v49 = vld [vmem:[%s4238_s23 + $0x88] sm:$0xf] }
  0x27   : > { %4150 = vmatprep.subr.msk.bf16.mxu0 %vm724_vm0, %v4350_v43  ;;  %v480_v5 = vsel %vm4283_vm4, %v475_v53, %v479_v34  ;;  %v297_v9 = vrot.slane %v296_v55, 4  ;;  %v306_v12 = vor.u32 %v305_v56, %v301_v50  ;;  %v495_v14 = vshrl.u32 %v4355_v48, 16  ;;  %v4545_v38 = vld [vmem:[%s4238_s23 + $0xb0] sm:$0x1]  ;;  %v4567_v48 = vld [vmem:[%s4238_s23 + $0x5c] sm:$0x1] }
  0x28   : > { %v4379_v19 = vcombine.low %v470_v60, %v480_v5  ;;  %v488_v20 = vor.u32 %v487_v1, %v484_v61  ;;  %v493_v21 = vrot.slane %v491_v2, 5  ;;  %v501_v22 = vshll.u32 %v4363_v58, 16  ;;  %5896 = vst [vmem:[#allocation21_spill] sm:$0xff] %v4545_v38 }
  0x29   : > { %v302_v25 = vsel %vm4283_vm4, %v297_v9, %v301_v50  ;;  %v307_v26 = vrot.slane %v306_v12, 4  ;;  %v497_v28 = vrot.slane %v495_v14, 4  ;;  %v314_v33 = vshrl.u32 %v4369_v3, 16  ;;  %v4424_v9 = vld [vmem:[%s4238_s23 + $0x30] sm:$0xf] }
  0x2a   : > { %5885 = vst [vmem:[#allocation10_spill] sm:$0xff] %v4379_v19  ;;  %3856 = vmatmul.mubr.msk.bf16.vlgmr.msra.gmra.mxu1 %vm675_vm3, %v4379_v19  ;;  %v489_v34 = vrot.slane %v488_v20, 4  ;;  %v503_v35 = vrot.slane %v501_v22, 5  ;;  %v317_v39 = vshll.u32 %v4369_v3, 16  ;;  %v323_v40 = vshll.u32 %v4377_v18, 16 }
  0x2b   : > { %3872 = vmatpush3.bf16.msra.mxu1 %v4241_v4  ;;  %v312_v44 = vsel %vm4283_vm4, %v307_v26, %v311_v57  ;;  %v498_v45 = vor.u32 %v497_v28, %v493_v21  ;;  %v316_v46 = vrot.slane %v314_v33, 4  ;;  %v327_v47 = vshrl.u32 %v4377_v18, 16  ;;  %v4415_v57 = vld [vmem:[%s4238_s23 + $0x8c] sm:$0x1]  ;;  %v4429_v22 = vld [vmem:[%s4238_s23 + $0x34] sm:$0xf] }
  0x2c   : > { %v4407_v50 = vcombine.low %v302_v25, %v312_v44  ;;  %v494_v51 = vsel %vm4283_vm4, %v489_v34, %v493_v21  ;;  %v319_v52 = vrot.slane %v317_v39, 5  ;;  %v325_v53 = vrot.slane %v323_v40, 5  ;;  %4149 = vmatprep.subr.msk.bf16.mxu1 %vm724_vm0, %v4385_v24 }
  0x2d   : > { %v499_v4 = vrot.slane %v498_v45, 4  ;;  %v329_v55 = vrot.slane %v327_v47, 4  ;;  %v333_v56 = vshll.u32 %v4390_v29, 16  ;;  %v506_v60 = vshrl.u32 %v4398_v41, 16 }
  0x2e   : > { %5886 = vst [vmem:[#allocation11_spill] sm:$0xff] %v4407_v50  ;;  %3843 = vmatprep.mubr.msk.bf16.mxu0 %vm675_vm3, %v4407_v50  ;;  %v320_v61 = vor.u32 %v319_v52, %v316_v46  ;;  %v509_v1 = vshll.u32 %v4398_v41, 16  ;;  %v515_v2 = vshll.u32 %v4405_v49, 16  ;;  %v519_v5 = vshrl.u32 %v4405_v49, 16  ;;  %v4440_v46 = vld [vmem:[%s4238_s23 + $0x38] sm:$0x1] }
  0x2f   : > { %v504_v12 = vsel %vm4283_vm4, %v499_v4, %v503_v35  ;;  %v330_v14 = vor.u32 %v329_v55, %v325_v53  ;;  %v335_v20 = vrot.slane %v333_v56, 5  ;;  %v508_v21 = vrot.slane %v506_v60, 4  ;;  %v4445_v52 = vld [vmem:[%s4238_s23 + $0x90] sm:$0xf] }
  0x30   : > { %v4431_v25 = vcombine.low %v494_v51, %v504_v12  ;;  %v321_v26 = vrot.slane %v320_v61, 4  ;;  %v511_v28 = vrot.slane %v509_v1, 5  ;;  %v517_v33 = vrot.slane %v515_v2, 5  ;;  %v4450_v61 = vld [vmem:[%s4238_s23 + $0x94] sm:$0xf] }
  0x31   : > { %v331_v34 = vrot.slane %v330_v14, 4  ;;  %v521_v39 = vrot.slane %v519_v5, 4  ;;  %v525_v40 = vshll.u32 %v4415_v57, 16  ;;  %v338_v44 = vshrl.u32 %v4424_v9, 16 }
  0x32   : > { %5887 = vst [vmem:[#allocation12_spill] sm:$0xff] %v4431_v25  ;;  %3859 = vmatprep.mubr.msk.bf16.mxu1 %vm675_vm3, %v4431_v25  ;;  %v326_v35 = vsel %vm4283_vm4, %v321_v26, %v325_v53  ;;  %v512_v45 = vor.u32 %v511_v28, %v508_v21  ;;  %v341_v47 = vshll.u32 %v4424_v9, 16  ;;  %v347_v51 = vshll.u32 %v4429_v22, 16  ;;  %v4496_v25 = vld [vmem:[%s4238_s23 + $0xa0] sm:$0xf] }
  0x33   : > { %v336_v4 = vsel %vm4283_vm4, %v331_v34, %v335_v20  ;;  %v522_v55 = vor.u32 %v521_v39, %v517_v33  ;;  %v527_v56 = vrot.slane %v525_v40, 5  ;;  %v340_v60 = vrot.slane %v338_v44, 4  ;;  %v4462_v34 = vld [vmem:[%s4238_s23 + $0x98] sm:$0x1]  ;;  %v4467_v44 = vld [vmem:[%s4238_s23 + $0x3c] sm:$0xf] }
  0x34   : > { %v4452_v53 = vcombine.low %v326_v35, %v336_v4  ;;  %v513_v1 = vrot.slane %v512_v45, 4  ;;  %v343_v2 = vrot.slane %v341_v47, 5  ;;  %v349_v5 = vrot.slane %v347_v51, 5  ;;  %v4472_v4 = vld [vmem:[%s4238_s23 + $0x40] sm:$0xf] }
  0x35   : > { %v523_v12 = vrot.slane %v522_v55, 4  ;;  %v351_v14 = vshrl.u32 %v4429_v22, 16  ;;  %v357_v21 = vshll.u32 %v4440_v46, 16  ;;  %v530_v20 = vshrl.u32 %v4445_v52, 16 }
  0x36   : > { %5888 = vst [vmem:[#allocation13_spill] sm:$0xff] %v4452_v53  ;;  %3844 = vmatmul.mubr.msk.bf16.gmra.mxu0 %vm675_vm3, %v4452_v53  ;;  %v518_v26 = vsel %vm4283_vm4, %v513_v1, %v517_v33  ;;  %v344_v28 = vor.u32 %v343_v2, %v340_v60  ;;  %v533_v39 = vshll.u32 %v4445_v52, 16  ;;  %v539_v40 = vshll.u32 %v4450_v61, 16 }
  0x37   : > { %v528_v35 = vsel %vm4283_vm4, %v523_v12, %v527_v56  ;;  %v353_v45 = vrot.slane %v351_v14, 4  ;;  %v359_v47 = vrot.slane %v357_v21, 5  ;;  %v532_v51 = vrot.slane %v530_v20, 4  ;;  %v4484_v14 = vld [vmem:[%s4238_s23 + $0x44] sm:$0x1] }
  0x38   : > { %v4474_v33 = vcombine.low %v518_v26, %v528_v35  ;;  %v345_v55 = vrot.slane %v344_v28, 4  ;;  %v535_v60 = vrot.slane %v533_v39, 5  ;;  %v541_v1 = vrot.slane %v539_v40, 5  ;;  %v4489_v26 = vld [vmem:[%s4238_s23 + $0x9c] sm:$0xf] }
  0x39   : > { %v354_v2 = vor.u32 %v353_v45, %v349_v5  ;;  %v543_v36 = vshrl.u32 %v4450_v61, 16  ;;  %v549_v63 = vshll.u32 %v4462_v34, 16  ;;  %v362_v15 = vshrl.u32 %v4467_v44, 16 }
  0x3a   : > { %5889 = vst [vmem:[#allocation14_spill] sm:$0xff] %v4474_v33  ;;  %3860 = vmatmul.mubr.msk.bf16.gmra.mxu1 %vm675_vm3, %v4474_v33  ;;  %v350_v56 = vsel %vm4283_vm4, %v345_v55, %v349_v5  ;;  %v536_v12 = vor.u32 %v535_v60, %v532_v51  ;;  %v365_v21 = vshll.u32 %v4467_v44, 16  ;;  %v371_v20 = vshll.u32 %v4472_v4, 16 }
  0x3b   : > { %v355_v28 = vrot.slane %v354_v2, 4  ;;  %v545_v39 = vrot.slane %v543_v36, 4  ;;  %v551_v40 = vrot.slane %v549_v63, 5  ;;  %v364_v35 = vrot.slane %v362_v15, 4 }
  0x3c   : > { %v537_v45 = vrot.slane %v536_v12, 4  ;;  %v367_v62 = vrot.slane %v365_v21, 5  ;;  %v373_v33 = vrot.slane %v371_v20, 5  ;;  %v375_v5 = vshrl.u32 %v4472_v4, 16  ;;  %v4504_v21 = vld [vmem:[%s4238_s23 + $0xa4] sm:$0x1] }
  0x3d   : > { %v360_v51 = vsel %vm4283_vm4, %v355_v28, %v359_v47  ;;  %v546_v55 = vor.u32 %v545_v39, %v541_v1  ;;  %v381_v60 = vshll.u32 %v4484_v14, 16  ;;  %v554_v2 = vshrl.u32 %v4489_v26, 16  ;;  %5891 = vst [vmem:[#allocation16_spill] sm:$0xff] %v4504_v21  ;;  %v4507_v20 = vld [vmem:[%s4238_s23 + $0x48] sm:$0xf] }
  0x3e   : > { %v4499_v36 = vcombine.low %v350_v56, %v360_v51  ;;  %v542_v15 = vsel %vm4283_vm4, %v537_v45, %v541_v1  ;;  %v368_v63 = vor.u32 %v367_v62, %v364_v35  ;;  %v377_v12 = vrot.slane %v375_v5, 4 }
  0x3f   : > { %v547_v47 = vrot.slane %v546_v55, 4  ;;  %v383_v28 = vrot.slane %v381_v60, 5  ;;  %v556_v39 = vrot.slane %v554_v2, 4  ;;  %v557_v19 = vshll.u32 %v4489_v26, 16  ;;  %v4518_v55 = vld [vmem:[%s4238_s23 + $0x4c] sm:$0xf] }
  0x40   : > { %5890 = vst [vmem:[#allocation15_spill] sm:$0xff] %v4499_v36  ;;  %3847 = vmatprep.mubr.msk.bf16.mxu0 %vm675_vm3, %v4499_v36  ;;  %v369_v56 = vrot.slane %v368_v63, 4  ;;  %v378_v51 = vor.u32 %v377_v12, %v373_v33  ;;  %v563_v1 = vshll.u32 %v4496_v25, 16  ;;  %v567_v62 = vshrl.u32 %v4496_v25, 16  ;;  %v4526_v36 = vld [vmem:[%s4238_s23 + $0x50] sm:$0x1] }
  0x41   : > { %v552_v35 = vsel %vm4283_vm4, %v547_v47, %v551_v40  ;;  %v559_v45 = vrot.slane %v557_v19, 5  ;;  %v573_v5 = vshll.u32 %v4504_v21, 16  ;;  %v386_v60 = vshrl.u32 %v4507_v20, 16  ;;  %v4529_v47 = vld [vmem:[%s4238_s23 + $0xa8] sm:$0xf] }
  0x42   : > { %v4521_v2 = vcombine.low %v542_v15, %v552_v35  ;;  %v374_v63 = vsel %vm4283_vm4, %v369_v56, %v373_v33  ;;  %v379_v12 = vrot.slane %v378_v51, 4  ;;  %v565_v11 = vrot.slane %v563_v1, 5  ;;  %5893 = vst [vmem:[#allocation18_spill] sm:$0xff] %v4529_v47 }
  0x43   : > { %v560_v53 = vor.u32 %v559_v45, %v556_v39  ;;  %v569_v50 = vrot.slane %v567_v62, 4  ;;  %v575_v40 = vrot.slane %v573_v5, 5  ;;  %v388_v19 = vrot.slane %v386_v60, 4  ;;  %v4542_v45 = vld [vmem:[%s4238_s23 + $0xac] sm:$0xf] }
  0x44   : > { %5892 = vst [vmem:[#allocation17_spill] sm:$0xff] %v4521_v2  ;;  %3863 = vmatprep.mubr.msk.bf16.mxu1 %vm675_vm3, %v4521_v2  ;;  %v384_v15 = vsel %vm4283_vm4, %v379_v12, %v383_v28  ;;  %v389_v33 = vshll.u32 %v4507_v20, 16  ;;  %v395_v56 = vshll.u32 %v4518_v55, 16  ;;  %v399_v51 = vshrl.u32 %v4518_v55, 16  ;;  %5895 = vst [vmem:[#allocation20_spill] sm:$0xff] %v4542_v45 }
  0x45   : > { %v4538_v1 = vcombine.low %v374_v63, %v384_v15  ;;  %v561_v39 = vrot.slane %v560_v53, 4  ;;  %v570_v62 = vor.u32 %v569_v50, %v565_v11  ;;  %v405_v35 = vshll.u32 %v4526_v36, 16 }
  0x46   : > { %v391_v5 = vrot.slane %v389_v33, 5  ;;  %v397_v60 = vrot.slane %v395_v56, 5  ;;  %v401_v2 = vrot.slane %v399_v51, 4  ;;  %v578_v28 = vshrl.u32 %v4529_v47, 16  ;;  %v4555_v51 = vld [vmem:[%s4238_s23 + $0x54] sm:$0xf] }
  0x47   : > { %5894 = vst [vmem:[#allocation19_spill] sm:$0xff] %v4538_v1  ;;  %3848 = vmatmul.mubr.msk.bf16.gmra.mxu0 %vm675_vm3, %v4538_v1  ;;  %v566_v53 = vsel %vm4283_vm4, %v561_v39, %v565_v11  ;;  %v571_v50 = vrot.slane %v570_v62, 4  ;;  %v407_v63 = vrot.slane %v405_v35, 5  ;;  %v581_v12 = vshll.u32 %v4529_v47, 16  ;;  %v4562_v62 = vld [vmem:[%s4238_s23 + $0x58] sm:$0xf] }
  0x48   : > { %v392_v15 = vor.u32 %v391_v5, %v388_v19  ;;  %v402_v58 = vor.u32 %v401_v2, %v397_v60  ;;  %v580_v33 = vrot.slane %v578_v28, 4  ;;  %v587_v56 = vshll.u32 %v4542_v45, 16 }
  0x49   : > { %v576_v1 = vsel %vm4283_vm4, %v571_v50, %v575_v40  ;;  %v583_v37 = vrot.slane %v581_v12, 5  ;;  %v591_v11 = vshrl.u32 %v4542_v45, 16  ;;  %v597_v39 = vshll.u32 %v4545_v38, 16 }
  0x4a   : > { %v4564_v2 = vcombine.low %v566_v53, %v576_v1  ;;  %v393_v19 = vrot.slane %v392_v15, 4  ;;  %v403_v35 = vrot.slane %v402_v58, 4  ;;  %v589_v5 = vrot.slane %v587_v56, 5 }
  0x4b   : > { %v584_v28 = vor.u32 %v583_v37, %v580_v33  ;;  %v593_v0 = vrot.slane %v591_v11, 4  ;;  %v599_v54 = vrot.slane %v597_v39, 5  ;;  %v410_v40 = vshrl.u32 %v4555_v51, 16  ;;  %v4579_v37 = vld [vmem:[%s4238_s23 + $0xb4] sm:$0xf] }
  0x4c   : > { %5897 = vst [vmem:[#allocation22_spill] sm:$0xff] %v4564_v2  ;;  %3864 = vmatmul.mubr.msk.bf16.gmra.mxu1 %vm675_vm3, %v4564_v2  ;;  %v398_v50 = vsel %vm4283_vm4, %v393_v19, %v397_v60  ;;  %v408_v1 = vsel %vm4283_vm4, %v403_v35, %v407_v63  ;;  %v413_v58 = vshll.u32 %v4555_v51, 16  ;;  %v419_v53 = vshll.u32 %v4562_v62, 16  ;;  %5898 = vst [vmem:[#allocation23_spill] sm:$0xff] %v4579_v37  ;;  %v4584_v11 = vld [vmem:[%s4238_s23 + $0xb8] sm:$0xf] }
  0x4d   : > { %v4581_v12 = vcombine.low %v398_v50, %v408_v1  ;;  %v585_v15 = vrot.slane %v584_v28, 4  ;;  %v594_v33 = vor.u32 %v593_v0, %v589_v5  ;;  %v412_v56 = vrot.slane %v410_v40, 4 }
  0x4e   : > { %v415_v39 = vrot.slane %v413_v58, 5  ;;  %v421_v2 = vrot.slane %v419_v53, 5  ;;  %v423_v60 = vshrl.u32 %v4562_v62, 16  ;;  %v429_v63 = vshll.u32 %v4567_v48, 16  ;;  %v4595_v58 = vld [vmem:[%s4238_s23 + $0xbc] sm:$0x1] }
  0x4f   : > { %5899 = vst [vmem:[#allocation24_spill] sm:$0xff] %v4581_v12  ;;  %3851 = vmatprep.mubr.msk.bf16.mxu0 %vm675_vm3, %v4581_v12  ;;  %v590_v19 = vsel %vm4283_vm4, %v585_v15, %v589_v5  ;;  %v595_v35 = vrot.slane %v594_v33, 4  ;;  %v602_v28 = vshrl.u32 %v4579_v37, 16  ;;  %v605_v0 = vshll.u32 %v4579_v37, 16 }
  0x50   : > { %v416_v40 = vor.u32 %v415_v39, %v412_v56  ;;  %v425_v50 = vrot.slane %v423_v60, 4  ;;  %v431_v1 = vrot.slane %v429_v63, 5  ;;  %v611_v53 = vshll.u32 %v4584_v11, 16 }
  0x51   : > { %v600_v38 = vsel %vm4283_vm4, %v595_v35, %v599_v54  ;;  %v604_v47 = vrot.slane %v602_v28, 4  ;;  %v607_v12 = vrot.slane %v605_v0, 5  ;;  %v615_v45 = vshrl.u32 %v4584_v11, 16 }
  0x52   : > { %v4601_v5 = vcombine.low %v590_v19, %v600_v38  ;;  %v417_v15 = vrot.slane %v416_v40, 4  ;;  %v426_v33 = vor.u32 %v425_v50, %v421_v2  ;;  %v613_v21 = vrot.slane %v611_v53, 5 }
  0x53   : > { %v608_v37 = vor.u32 %v607_v12, %v604_v47  ;;  %v617_v56 = vrot.slane %v615_v45, 4  ;;  %v621_v39 = vshll.u32 %v4595_v58, 16  ;;  %v3363_v54 = vrot.slane %v4247_v6, 9 }
  0x54   : > { %3867 = vmatprep.mubr.msk.bf16.mxu1 %vm675_vm3, %v4601_v5  ;;  %v422_v38 = vsel %vm4283_vm4, %v417_v15, %v421_v2  ;;  %v427_v63 = vrot.slane %v426_v33, 4  ;;  %v1202_v47 = vrot.slane %v4250_v7, 5  ;;  %v4618_v45 = vcombine.low %v4276_v30, %v4279_v31 }
  0x55   : > { %v609_v12 = vrot.slane %v608_v37, 4  ;;  %v618_v19 = vor.u32 %v617_v56, %v613_v21  ;;  %v623_v35 = vrot.slane %v621_v39, 5  ;;  %v3364_v28 = vrot.slane %v4276_v30, 9 }
  0x56   : > { %v432_v0 = vsel %vm4283_vm4, %v427_v63, %v431_v1  ;;  %v1203_v40 = vsel %vm4606_vm7, %v3363_v54, %v1202_v47  ;;  %v1204_v50 = vrot.slane %v1202_v47, 4  ;;  %v5902_v2 = vrot.slane %v4279_v31, 5 }
  0x57   : > { %v4627_v15 = vcombine.low %v422_v38, %v432_v0  ;;  %v614_v33 = vsel %vm4283_vm4, %v609_v12, %v613_v21  ;;  %v619_v37 = vrot.slane %v618_v19, 4  ;;  %v5904_v1 = vrot.slane %v4253_v8, 5 }
  0x58   : > { %v1211_v53 = vrot.slane %v5902_v2, 4  ;;  %v5903_v56 = vmov %v5902_v2  ;;  %v5905_v54 = vrot.slane %v4290_v42, 5  ;;  %v4645_v63 = vcombine.low %v4319_v10, %v4328_v23 }
  0x59   : > { %v1210_v30 = vsel %vm4606_vm7, %v3364_v28, %v5903_v56  ;;  %v1206_v39 = vsel %vm4606_vm7, %v1204_v50, %v5904_v1  ;;  %v3365_v21 = vrot.slane %v4319_v10, 9  ;;  %3852 = vmatmul.mubr.msk.bf16.gmra.mxu0 %vm675_vm3, %v4627_v15  ;;  %v624_v8 = vsel %vm4283_vm4, %v619_v37, %v623_v35 }
  0x5a   : > { %v1213_v38 = vsel %vm4606_vm7, %v1211_v53, %v5905_v54  ;;  %v3380_v31 = vcombine.low %v1203_v40, %v1206_v39  ;;  %v1216_v42 = vrot.slane %v4328_v23, 5  ;;  %v4655_v12 = vcombine.low %v614_v33, %v624_v8 }
  0x5b   : > { %v4652_v47 = vcombine.low %v1210_v30, %v1213_v38  ;;  %v1219_v19 = vrot.slane %v4335_v27, 5  ;;  %v1223_v0 = vrot.slane %v4377_v18, 5  ;;  %v3366_v35 = vrot.slane %v4369_v3, 9 }
  0x5c   : > { %5906 = vst [vmem:[#allocation25_spill] sm:$0xff] %v4655_v12  ;;  %3907 = vmatprep.mubr.msk.bf16.mxu0 %vm675_vm3, %v3380_v31  ;;  %v1217_v10 = vsel %vm4606_vm7, %v3365_v21, %v1216_v42  ;;  %v1218_v28 = vrot.slane %v1216_v42, 4  ;;  %3868 = vmatmul.mubr.msk.bf16.gmra.mxu1 %vm675_vm3, %v4655_v12  ;;  %v3367_v40 = vrot.slane %v4424_v9, 9  ;;  %v1230_v23 = vrot.slane %v4429_v22, 5 }
  0x5d   : > { %v5907_v27 = vcombine.low %v4247_v6, %v4250_v7  ;;  %v1225_v2 = vrot.slane %v1223_v0, 4  ;;  %v1226_v53 = vrot.slane %v4390_v29, 5  ;;  %v1233_v33 = vrot.slane %v4440_v46, 5  ;;  %v4690_v46 = vld [vmem:[%s5829_s1 + $0x18] sm:$0xf] }
  0x5e   : > { %v1220_v50 = vsel %vm4606_vm7, %v1218_v28, %v1219_v19  ;;  %v1232_v56 = vrot.slane %v1230_v23, 4  ;;  %v1845_v30 = vsel %vm724_vm0, %v4350_v43, 0  ;;  %v1237_v1 = vrot.slane %v4472_v4, 5  ;;  %v4707_v19 = vld [vmem:[%s5829_s1 + $0x14] sm:$0xf] }
  0x5f   : > { %3873 = vmatprep.mubr.msk.bf16.mxu1 %vm675_vm3, %v5907_v27  ;;  %v4675_v37 = vcombine.low %v1217_v10, %v1220_v50  ;;  %v1617_v6 = vsel %vm724_vm0, %v4385_v24, 0  ;;  %v1224_v7 = vsel %vm4606_vm7, %v3366_v35, %v1223_v0  ;;  %v1231_v39 = vsel %vm4606_vm7, %v3367_v40, %v1230_v23 }
  0x60   : > { %v1244_v29 = vrot.slane %v4518_v55, 5  ;;  %v1227_v43 = vsel %vm4606_vm7, %v1225_v2, %v1226_v53  ;;  %v1234_v24 = vsel %vm4606_vm7, %v1232_v56, %v1233_v33  ;;  %v3368_v54 = vrot.slane %v4467_v44, 9 }
  0x61   : > { %3908 = vmatmul.mubr.msk.bf16.vlgmr.msra.gmra.mxu0 %vm675_vm3, %v4652_v47  ;;  %v1240_v38 = vrot.slane %v4484_v14, 5  ;;  %v1239_v21 = vrot.slane %v1237_v1, 4  ;;  %v3369_v8 = vrot.slane %v4507_v20, 9  ;;  %v1247_v42 = vrot.slane %v4526_v36, 5 }
  0x62   : > { %3974 = vmatpush3.bf16.msra.mxu0 %v1845_v30  ;;  %3911 = vmatprep.mubr.msk.bf16.mxu0 %vm675_vm3, %v4675_v37  ;;  %v1246_v31 = vrot.slane %v1244_v29, 4  ;;  %v4715_v14 = vcombine.low %v1224_v7, %v1227_v43  ;;  %v4717_v10 = vcombine.low %v1231_v39, %v1234_v24  ;;  %v1238_v36 = vsel %vm4606_vm7, %v3368_v54, %v1237_v1 }
  0x63   : > { %4152 = vmatprep.subr.msk.bf16.mxu0 %vm724_vm0, %v4690_v46  ;;  %v1241_v28 = vsel %vm4606_vm7, %v1239_v21, %v1240_v38  ;;  %v1245_v0 = vsel %vm4606_vm7, %v3369_v8, %v1244_v29  ;;  %v1251_v40 = vrot.slane %v4562_v62, 5  ;;  %v1261_v23 = vrot.slane %v4268_v17, 5  ;;  %v5908_v8 = vld [vmem:[#allocation16_spill] sm:$0xff] }
  0x64   : > { %3874 = vmatmul.mubr.msk.bf16.vlgmr.msra.gmra.mxu1 %vm675_vm3, %v4618_v45  ;;  %v1248_v35 = vsel %vm4606_vm7, %v1246_v31, %v1247_v42  ;;  %v3370_v27 = vrot.slane %v4555_v51, 9  ;;  %v3371_v50 = vrot.slane %v4260_v13, 9  ;;  %v1258_v2 = vrot.slane %v4265_v16, 5  ;;  %v5909_v42 = vld [vmem:[#allocation20_spill] sm:$0xff] }
  0x65   : > { %3940 = vmatpush3.bf16.msra.mxu1 %v1617_v6  ;;  %3877 = vmatprep.mubr.msk.bf16.mxu1 %vm675_vm3, %v4645_v63  ;;  %v4736_v53 = vcombine.low %v4369_v3, %v4377_v18  ;;  %v4740_v33 = vcombine.low %v4424_v9, %v4429_v22  ;;  %v4744_v56 = vcombine.low %v4467_v44, %v4472_v4  ;;  %v1254_v3 = vrot.slane %v4567_v48, 5 }
  0x66   : > { %4151 = vmatprep.subr.msk.bf16.mxu1 %vm724_vm0, %v4707_v19  ;;  %v4748_v17 = vcombine.low %v4507_v20, %v4518_v55  ;;  %v4752_v30 = vcombine.low %v1238_v36, %v1241_v28  ;;  %v4754_v1 = vcombine.low %v1245_v0, %v1248_v35  ;;  %v4759_v18 = vcombine.low %v4398_v41, %v4405_v49  ;;  %v5910_v36 = vld [vmem:[#allocation18_spill] sm:$0xff] }
  0x67   : > { %v1253_v9 = vrot.slane %v1251_v40, 4  ;;  %v3374_v22 = vrot.slane %v4398_v41, 9  ;;  %v1279_v44 = vrot.slane %v4405_v49, 5  ;;  %v1282_v4 = vrot.slane %v4415_v57, 5 }
  0x68   : > { %v1252_v20 = vsel %vm4606_vm7, %v3370_v27, %v1251_v40  ;;  %v1259_v48 = vsel %vm4606_vm7, %v3371_v50, %v1258_v2  ;;  %v1260_v55 = vrot.slane %v1258_v2, 4  ;;  %v4772_v6 = vcombine.low %v4445_v52, %v4450_v61  ;;  %v5911_v40 = vld [vmem:[#allocation21_spill] sm:$0xff] }
  0x69   : > { %3912 = vmatmul.mubr.msk.bf16.gmra.mxu0 %vm675_vm3, %v4715_v14  ;;  %v1280_v41 = vsel %vm4606_vm7, %v3374_v22, %v1279_v44  ;;  %v1281_v49 = vrot.slane %v1279_v44, 4  ;;  %v3375_v57 = vrot.slane %v4445_v52, 9  ;;  %v1286_v7 = vrot.slane %v4450_v61, 5 }
  0x6a   : > { %3915 = vmatprep.mubr.msk.bf16.mxu0 %vm675_vm3, %v4717_v10  ;;  %v1265_v39 = vrot.slane %v4305_v59, 5  ;;  %v1289_v29 = vrot.slane %v4462_v34, 5  ;;  %v4786_v43 = vcombine.low %v4489_v26, %v4496_v25  ;;  %v3376_v24 = vrot.slane %v4489_v26, 9 }
  0x6b   : > { %v1255_v54 = vsel %vm4606_vm7, %v1253_v9, %v1254_v3  ;;  %v1283_v52 = vsel %vm4606_vm7, %v1281_v49, %v1282_v4  ;;  %v1287_v61 = vsel %vm4606_vm7, %v3375_v57, %v1286_v7  ;;  %v1288_v38 = vrot.slane %v1286_v7, 4  ;;  %v5912_v3 = vld [vmem:[#allocation23_spill] sm:$0xff]  ;;  %v5913_v57 = vld [vmem:[#allocation8_spill] sm:$0xff] }
  0x6c   : > { %3878 = vmatmul.mubr.msk.bf16.gmra.mxu1 %vm675_vm3, %v4736_v53  ;;  %v4795_v21 = vcombine.low %v1280_v41, %v1283_v52  ;;  %v1293_v34 = vrot.slane %v4496_v25, 5  ;;  %v1296_v31 = vrot.slane %v5908_v8, 5  ;;  %v4801_v28 = vcombine.low %v5910_v36, %v5909_v42 }
  0x6d   : > { %3881 = vmatprep.mubr.msk.bf16.mxu1 %vm675_vm3, %v4740_v33  ;;  %v1290_v26 = vsel %vm4606_vm7, %v1288_v38, %v1289_v29  ;;  %v3377_v0 = vrot.slane %v5910_v36, 9  ;;  %v1300_v35 = vrot.slane %v5909_v42, 5  ;;  %v1303_v27 = vrot.slane %v5911_v40, 5  ;;  %v5915_v42 = vld [vmem:[#allocation4_spill] sm:$0xff] }
  0x6e   : > { %v4810_v50 = vcombine.low %v1287_v61, %v1290_v26  ;;  %v1294_v25 = vsel %vm4606_vm7, %v3376_v24, %v1293_v34  ;;  %v1295_v2 = vrot.slane %v1293_v34, 4  ;;  %v4816_v9 = vcombine.low %v5912_v3, %v4584_v11 }
  0x6f   : > { %v1301_v22 = vsel %vm4606_vm7, %v3377_v0, %v1300_v35  ;;  %v1302_v44 = vrot.slane %v1300_v35, 4  ;;  %v3378_v4 = vrot.slane %v5912_v3, 9  ;;  %v1307_v41 = vrot.slane %v4584_v11, 5  ;;  %v5916_v0 = vld [vmem:[#allocation6_spill] sm:$0xff] }
  0x70   : > { %v1262_v49 = vsel %vm4606_vm7, %v1260_v55, %v1261_v23  ;;  %v1272_v7 = vrot.slane %v5913_v57, 5  ;;  %v1297_v29 = vsel %vm4606_vm7, %v1295_v2, %v1296_v31  ;;  %v1310_v24 = vrot.slane %v4595_v58, 5  ;;  %v5914_v55 = vld [vmem:[#allocation3_spill] sm:$0xff] }
  0x71   : > { %3916 = vmatmul.mubr.msk.bf16.gmra.mxu0 %vm675_vm3, %v4752_v30  ;;  %v4832_v52 = vcombine.low %v1294_v25, %v1297_v29  ;;  %v1304_v61 = vsel %vm4606_vm7, %v1302_v44, %v1303_v27  ;;  %v1308_v11 = vsel %vm4606_vm7, %v3378_v4, %v1307_v41  ;;  %v1309_v38 = vrot.slane %v1307_v41, 4  ;;  %v5917_v27 = vld [vmem:[#allocation9_spill] sm:$0xff]  ;;  %v4919_v4 = vld [vmem:[%s4238_s23 + $0xc0] sm:$0xf]  ;;  %v233_v41 = vld [vmem:[%s4238_s23 + $0xc8] sm:$0x1] }
  0x72   : > { %3919 = vmatprep.mubr.msk.bf16.mxu0 %vm675_vm3, %v4754_v1  ;;  %v4840_v23 = vcombine.low %v1252_v20, %v1255_v54  ;;  %v3372_v34 = vrot.slane %v5914_v55, 9  ;;  %v4843_v58 = vcombine.low %v1301_v22, %v1304_v61  ;;  %v4845_v8 = vcombine.low %v1259_v48, %v1262_v49  ;;  %v5918_v61 = vld [vmem:[#allocation7_spill] sm:$0xff] }
  0x73   : > { %v1267_v31 = vrot.slane %v1265_v39, 4  ;;  %v1268_v36 = vrot.slane %v5915_v42, 5  ;;  %v1311_v26 = vsel %vm4606_vm7, %v1309_v38, %v1310_v24  ;;  %v3373_v35 = vrot.slane %v5916_v0, 9  ;;  %v5920_v42 = vld [vmem:[#allocation13_spill] sm:$0xff] }
  0x74   : > { %3882 = vmatmul.mubr.msk.bf16.gmra.mxu1 %vm675_vm3, %v4744_v56  ;;  %v1274_v40 = vrot.slane %v1272_v7, 4  ;;  %v1275_v25 = vrot.slane %v5917_v27, 5  ;;  %v4852_v2 = vcombine.low %v1308_v11, %v1311_v26  ;;  %v4856_v20 = vcombine.low %v4555_v51, %v4562_v62  ;;  %v5924_v26 = vld [vmem:[#allocation5_spill] sm:$0xff] }
  0x75   : > { %3885 = vmatprep.mubr.msk.bf16.mxu1 %vm675_vm3, %v4748_v17  ;;  %v4862_v48 = vcombine.low %v4260_v13, %v4265_v16  ;;  %v1266_v54 = vsel %vm4606_vm7, %v3372_v34, %v1265_v39  ;;  %v1269_v3 = vsel %vm4606_vm7, %v1267_v31, %v1268_v36  ;;  %v1273_v51 = vsel %vm4606_vm7, %v3373_v35, %v1272_v7  ;;  %v5919_v34 = vld [vmem:[#allocation11_spill] sm:$0xff]  ;;  %v5923_v36 = vld [vmem:[#allocation24_spill] sm:$0xff] }
  0x76   : > { %v1276_v62 = vsel %vm4606_vm7, %v1274_v40, %v1275_v25  ;;  %v4878_v13 = vcombine.low %v1266_v54, %v1269_v3  ;;  %v4884_v39 = vcombine.low %v5914_v55, %v4305_v59  ;;  %v4890_v22 = vcombine.low %v5916_v0, %v5913_v57  ;;  %v4913_v59 = vld [vmem:[%s4238_s23 + $0xc4] sm:$0xf]  ;;  %v3504_v55 = vld [vmem:[%s5829_s1 + $0x20] sm:$0xf]  ;;  %v5926_v35 = vld [vmem:[#allocation12_spill] sm:$0xff] }
  0x77   : > { %v4880_v16 = vcombine.low %v1273_v51, %v1276_v62  ;;  %v2043_v44 = vrot.slane %v4913_v59, 5  ;;  %v3448_v49 = vrot.slane %v4919_v4, 9  ;;  %v2046_v7 = vrot.slane %v233_v41, 5  ;;  %v5925_v0 = vld [vmem:[#allocation10_spill] sm:$0xff] }
  0x78   : > { %v2263_v38 = vsel %vm724_vm0, %v4690_v46, 0  ;;  %v2057_v31 = vsel %vm724_vm0, %v4707_v19, 0  ;;  %v5921_v46 = vld [vmem:[#allocation15_spill] sm:$0xff]  ;;  %v5927_v40 = vld [vmem:[#allocation14_spill] sm:$0xff]  ;;  %v1813_v27 = vshrl.u32 %v4919_v4, 16  ;;  %v1816_v25 = vshll.u32 %v4919_v4, 16 }
  0x79   : > { %3920 = vmatmul.mubr.msk.bf16.gmra.mxu0 %vm675_vm3, %v4840_v23  ;;  %v2045_v57 = vrot.slane %v2043_v44, 4  ;;  %v2044_v29 = vsel %vm4606_vm7, %v3448_v49, %v2043_v44  ;;  %v5922_v19 = vld [vmem:[#allocation19_spill] sm:$0xff]  ;;  %v1826_v54 = vshrl.u32 %v4913_v59, 16  ;;  %v1822_v3 = vshll.u32 %v4913_v59, 16 }
  0x7a   : > { %3923 = vmatprep.mubr.msk.bf16.mxu0 %vm675_vm3, %v4845_v8  ;;  %v1815_v51 = vrot.slane %v1813_v27, 4  ;;  %v1818_v62 = vrot.slane %v1816_v25, 5 }
  0x7b   : > { %v2047_v24 = vsel %vm4606_vm7, %v2045_v57, %v2046_v7  ;;  %v1824_v44 = vrot.slane %v1822_v3, 5  ;;  %v1828_v49 = vrot.slane %v1826_v54, 4  ;;  %v5928_v57 = vld [vmem:[#allocation17_spill] sm:$0xff]  ;;  %v5929_v7 = vld [vmem:[#allocation22_spill] sm:$0xff]  ;;  %v3413_v3 = vcombine.low %v4919_v4, %v4913_v59 }
  0x7c   : > { %3886 = vmatmul.mubr.msk.bf16.gmra.mxu1 %vm675_vm3, %v4856_v20  ;;  %v4931_v11 = vcombine.low %v2044_v29, %v2047_v24  ;;  %v1819_v29 = vor.u32 %v1818_v62, %v1815_v51  ;;  %v2703_v51 = vsel %vm724_vm0, %v3504_v55, 0 }
  0x7d   : > { %3889 = vmatprep.mubr.msk.bf16.mxu1 %vm675_vm3, %v4862_v48  ;;  %v1829_v24 = vor.u32 %v1828_v49, %v1824_v44 }
  0x81   : > { %3924 = vmatmul.mubr.msk.bf16.gmra.mxu0 %vm675_vm3, %v4878_v13 }
  0x82   : > { %3927 = vmatprep.mubr.msk.bf16.mxu0 %vm675_vm3, %v4880_v16 }
  0x84   : > { %3890 = vmatmul.mubr.msk.bf16.gmra.mxu1 %vm675_vm3, %v4884_v39 }
  0x85   : > { %3893 = vmatprep.mubr.msk.bf16.mxu1 %vm675_vm3, %v4890_v22 }
  0x89   : > { %3928 = vmatmul.mubr.msk.bf16.gmra.mxu0 %vm675_vm3, %v4795_v21 }
  0x8a   : > { %3931 = vmatprep.mubr.msk.bf16.mxu0 %vm675_vm3, %v4810_v50 }
  0x8c   : > { %3894 = vmatmul.mubr.msk.bf16.gmra.mxu1 %vm675_vm3, %v4759_v18 }
  0x8d   : > { %3897 = vmatprep.mubr.msk.bf16.mxu1 %vm675_vm3, %v4772_v6 }
  0x91   : > { %3932 = vmatmul.mubr.msk.bf16.gmra.mxu0 %vm675_vm3, %v4832_v52 }
  0x92   : > { %3935 = vmatprep.mubr.msk.bf16.mxu0 %vm675_vm3, %v4843_v58 }
  0x94   : > { %3898 = vmatmul.mubr.msk.bf16.gmra.mxu1 %vm675_vm3, %v4786_v43 }
  0x95   : > { %3901 = vmatprep.mubr.msk.bf16.mxu1 %vm675_vm3, %v4801_v28 }
  0x99   : > { %3936 = vmatmul.mubr.msk.bf16.gmra.mxu0 %vm675_vm3, %v4852_v2 }
  0x9a   : > { %3975 = vmatprep.mubr.msk.bf16.mxu0 %vm675_vm3, %v5918_v61  ;;  %v1832_v61 = vshll.u32 %v233_v41, 16 }
  0x9c   : > { %3902 = vmatmul.mubr.msk.bf16.gmra.mxu1 %vm675_vm3, %v4816_v9  ;;  %v1834_v27 = vrot.slane %v1832_v61, 5  ;;  %v5123_v61 = vld [vmem:[%s4238_s23 + $0xd0] sm:$0xf] }
  0x9d   : > { %3941 = vmatprep.mubr.msk.bf16.mxu1 %vm675_vm3, %v4618_v45  ;;  %v3485_v45 = vld [vmem:[%s5829_s1 + $0x1c] sm:$0xf] }
  0x9e   : > { %v2491_v62 = vsel %vm724_vm0, %v3485_v45, 0 }
  0xa1   : > { %3976 = vmatmul.mubr.msk.bf16.vlgmr.msra.gmra.mxu0 %vm675_vm3, %v5919_v34 }
  0xa2   : > { %4042 = vmatpush3.bf16.msra.mxu0 %v2263_v38  ;;  %3979 = vmatprep.mubr.msk.bf16.mxu0 %vm675_vm3, %v5920_v42  ;;  %v1820_v38 = vrot.slane %v1819_v29, 4 }
  0xa3   : > { %4154 = vmatprep.subr.msk.bf16.mxu0 %vm724_vm0, %v3504_v55 }
  0xa4   : > { %3942 = vmatmul.mubr.msk.bf16.vlgmr.msra.gmra.mxu1 %vm675_vm3, %v4645_v63  ;;  %v1825_v25 = vsel %vm4283_vm4, %v1820_v38, %v1824_v44 }
  0xa5   : > { %4008 = vmatpush3.bf16.msra.mxu1 %v2057_v31  ;;  %3945 = vmatprep.mubr.msk.bf16.mxu1 %vm675_vm3, %v4736_v53  ;;  %v1830_v31 = vrot.slane %v1829_v24, 4 }
  0xa6   : > { %4153 = vmatprep.subr.msk.bf16.mxu1 %vm724_vm0, %v3485_v45 }
  0xa7   : > { %v1835_v41 = vsel %vm4283_vm4, %v1830_v31, %v1834_v27 }
  0xa8   : > { %v5013_v54 = vcombine.low %v1825_v25, %v1835_v41 }
  0xa9   : > { %3980 = vmatmul.mubr.msk.bf16.gmra.mxu0 %vm675_vm3, %v5921_v46 }
  0xaa   : > { %3983 = vmatprep.mubr.msk.bf16.mxu0 %vm675_vm3, %v5922_v19  ;;  %5930 = vst [vmem:[#allocation16_spill] sm:$0xff] %v5013_v54 }
  0xac   : > { %3946 = vmatmul.mubr.msk.bf16.gmra.mxu1 %vm675_vm3, %v4740_v33 }
  0xad   : > { %3949 = vmatprep.mubr.msk.bf16.mxu1 %vm675_vm3, %v4744_v56 }
  0xb1   : > { %3984 = vmatmul.mubr.msk.bf16.gmra.mxu0 %vm675_vm3, %v5923_v36 }
  0xb2   : > { %3987 = vmatprep.mubr.msk.bf16.mxu0 %vm675_vm3, %v4627_v15 }
  0xb4   : > { %3950 = vmatmul.mubr.msk.bf16.gmra.mxu1 %vm675_vm3, %v4748_v17 }
  0xb5   : > { %3953 = vmatprep.mubr.msk.bf16.mxu1 %vm675_vm3, %v4856_v20 }
  0xb9   : > { %3988 = vmatmul.mubr.msk.bf16.gmra.mxu0 %vm675_vm3, %v5924_v26 }
  0xba   : > { %3991 = vmatprep.mubr.msk.bf16.mxu0 %vm675_vm3, %v5925_v0 }
  0xbc   : > { %3954 = vmatmul.mubr.msk.bf16.gmra.mxu1 %vm675_vm3, %v4862_v48 }
  0xbd   : > { %3957 = vmatprep.mubr.msk.bf16.mxu1 %vm675_vm3, %v4884_v39 }
  0xc1   : > { %3992 = vmatmul.mubr.msk.bf16.gmra.mxu0 %vm675_vm3, %v5926_v35 }
  0xc2   : > { %3995 = vmatprep.mubr.msk.bf16.mxu0 %vm675_vm3, %v5927_v40 }
  0xc4   : > { %3958 = vmatmul.mubr.msk.bf16.gmra.mxu1 %vm675_vm3, %v4890_v22 }
  0xc5   : > { %3961 = vmatprep.mubr.msk.bf16.mxu1 %vm675_vm3, %v4759_v18 }
  0xc9   : > { %3996 = vmatmul.mubr.msk.bf16.gmra.mxu0 %vm675_vm3, %v5928_v57 }
  0xca   : > { %3999 = vmatprep.mubr.msk.bf16.mxu0 %vm675_vm3, %v5929_v7 }
  0xcc   : > { %3962 = vmatmul.mubr.msk.bf16.gmra.mxu1 %vm675_vm3, %v4772_v6 }
  0xcd   : > { %3965 = vmatprep.mubr.msk.bf16.mxu1 %vm675_vm3, %v4786_v43 }
  0xd1   : > { %4000 = vmatmul.mubr.msk.bf16.gmra.mxu0 %vm675_vm3, %v4601_v5 }
  0xd2   : > { %4003 = vmatprep.mubr.msk.bf16.mxu0 %vm675_vm3, %v4655_v12 }
  0xd4   : > { %3966 = vmatmul.mubr.msk.bf16.gmra.mxu1 %vm675_vm3, %v4801_v28 }
  0xd5   : > { %3969 = vmatprep.mubr.msk.bf16.mxu1 %vm675_vm3, %v4816_v9 }
  0xd9   : > { %4004 = vmatmul.mubr.msk.bf16.gmra.mxu0 %vm675_vm3, %v5013_v54 }
  0xda   : > { %4043 = vmatprep.mubr.msk.bf16.mxu0 %vm675_vm3, %v4645_v63 }
  0xdc   : > { %3970 = vmatmul.mubr.msk.bf16.gmra.mxu1 %vm675_vm3, %v3413_v3 }
  0xdd   : > { %4009 = vmatprep.mubr.msk.bf16.mxu1 %vm675_vm3, %v4652_v47 }
  0xe1   : > { %4044 = vmatmul.mubr.msk.bf16.vlgmr.msra.gmra.mxu0 %vm675_vm3, %v4736_v53 }
  0xe2   : > { %4110 = vmatpush3.bf16.msra.mxu0 %v2703_v51  ;;  %4047 = vmatprep.mubr.msk.bf16.mxu0 %vm675_vm3, %v4740_v33 }
  0xe4   : > { %4010 = vmatmul.mubr.msk.bf16.vlgmr.msra.gmra.mxu1 %vm675_vm3, %v4675_v37 }
  0xe5   : > { %4076 = vmatpush3.bf16.msra.mxu1 %v2491_v62  ;;  %4013 = vmatprep.mubr.msk.bf16.mxu1 %vm675_vm3, %v4715_v14  ;;  %v5036_v63 = vpop.f32.mrf.mxu0 }
  0xe7   : > { %v5046_v53 = vpop.f32.mrf.mxu0 }
  0xe9   : > { %4048 = vmatmul.mubr.msk.bf16.gmra.mxu0 %vm675_vm3, %v4744_v56  ;;  %v5052_v56 = vpop.f32.mrf.mxu0 }
  0xea   : > { %4051 = vmatprep.mubr.msk.bf16.mxu0 %vm675_vm3, %v4748_v17  ;;  %v5042_v47 = vpop.f32.mrf.mxu1 }
  0xeb   : > { %v5062_v59 = vpop.f32.mrf.mxu0 }
  0xec   : > { %4014 = vmatmul.mubr.msk.bf16.gmra.mxu1 %vm675_vm3, %v4717_v10  ;;  %v5048_v33 = vpop.f32.mrf.mxu1 }
  0xed   : > { %4017 = vmatprep.mubr.msk.bf16.mxu1 %vm675_vm3, %v4752_v30 }
  0xee   : > { %v5058_v17 = vpop.f32.mrf.mxu1 }
  0xf0   : > { %v5064_v4 = vpop.f32.mrf.mxu1 }
  0xf1   : > { %4052 = vmatmul.mubr.msk.bf16.gmra.mxu0 %vm675_vm3, %v4856_v20 }
  0xf2   : > { %4055 = vmatprep.mubr.msk.bf16.mxu0 %vm675_vm3, %v4862_v48 }
  0xf4   : > { %4018 = vmatmul.mubr.msk.bf16.gmra.mxu1 %vm675_vm3, %v4754_v1 }
  0xf5   : > { %4021 = vmatprep.mubr.msk.bf16.mxu1 %vm675_vm3, %v4840_v23 }
  0xf6   : > { %v5068_v20 = vpop.f32.mrf.mxu0 }
  0xf8   : > { %v5078_v55 = vpop.f32.mrf.mxu0 }
  0xf9   : > { %4056 = vmatmul.mubr.msk.bf16.gmra.mxu0 %vm675_vm3, %v4884_v39 }
  0xfa   : > { %4059 = vmatprep.mubr.msk.bf16.mxu0 %vm675_vm3, %v4890_v22  ;;  %v5074_v48 = vpop.f32.mrf.mxu1  ;;  %v5084_v39 = vpop.f32.mrf.mxu0 }
  0xfc   : > { %4022 = vmatmul.mubr.msk.bf16.gmra.mxu1 %vm675_vm3, %v4845_v8  ;;  %v5080_v45 = vpop.f32.mrf.mxu1  ;;  %v5094_v44 = vpop.f32.mrf.mxu0 }
  0xfd   : > { %4025 = vmatprep.mubr.msk.bf16.mxu1 %vm675_vm3, %v4878_v13 }
  0xfe   : > { %v5090_v22 = vpop.f32.mrf.mxu1 }
 0x100   : > { %v5096_v49 = vpop.f32.mrf.mxu1 }
 0x101   : > { %4060 = vmatmul.mubr.msk.bf16.gmra.mxu0 %vm675_vm3, %v4759_v18 }
 0x102   : > { %4063 = vmatprep.mubr.msk.bf16.mxu0 %vm675_vm3, %v4772_v6 }
 0x104   : > { %4026 = vmatmul.mubr.msk.bf16.gmra.mxu1 %vm675_vm3, %v4880_v16 }
 0x105   : > { %4029 = vmatprep.mubr.msk.bf16.mxu1 %vm675_vm3, %v4795_v21 }
 0x107   : > { %v5100_v18 = vpop.f32.mrf.mxu0 }
 0x109   : > { %4064 = vmatmul.mubr.msk.bf16.gmra.mxu0 %vm675_vm3, %v4786_v43  ;;  %v5110_v29 = vpop.f32.mrf.mxu0 }
 0x10a   : > { %4067 = vmatprep.mubr.msk.bf16.mxu0 %vm675_vm3, %v4801_v28  ;;  %v5120_v28 = vld [vmem:[%s4238_s23 + $0xcc] sm:$0xf] }
 0x10b   : > { %v5116_v43 = vpop.f32.mrf.mxu0 }
 0x10c   : > { %4030 = vmatmul.mubr.msk.bf16.gmra.mxu1 %vm675_vm3, %v4810_v50  ;;  %v5106_v6 = vpop.f32.mrf.mxu1 }
 0x10d   : > { %5931 = vst [vmem:[#allocation20_spill] sm:$0xff] %v5106_v6  ;;  %4033 = vmatprep.mubr.msk.bf16.mxu1 %vm675_vm3, %v4832_v52  ;;  %v5129_v31 = vpop.f32.mrf.mxu0 }
 0x10e   : > { %v5112_v24 = vpop.f32.mrf.mxu1 }
 0x10f   : > { %5932 = vst [vmem:[#allocation18_spill] sm:$0xff] %v5112_v24 }
 0x110   : > { %v5127_v38 = vpop.f32.mrf.mxu1 }
 0x111   : > { %4068 = vmatmul.mubr.msk.bf16.gmra.mxu0 %vm675_vm3, %v4816_v9  ;;  %5933 = vst [vmem:[#allocation21_spill] sm:$0xff] %v5127_v38  ;;  %v3468_v9 = vcombine.low %v5120_v28, %v5123_v61 }
 0x112   : > { %4071 = vmatprep.mubr.msk.bf16.mxu0 %vm675_vm3, %v3413_v3  ;;  %v5135_v27 = vpop.f32.mrf.mxu1 }
 0x113   : > { %5934 = vst [vmem:[#allocation23_spill] sm:$0xff] %v5135_v27 }
 0x114   : > { %4034 = vmatmul.mubr.msk.bf16.gmra.mxu1 %vm675_vm3, %v4843_v58 }
 0x115   : > { %4037 = vmatprep.mubr.msk.bf16.mxu1 %vm675_vm3, %v4852_v2 }
 0x119   : > { %v5137_v25 = vpop.f32.mrf.mxu0  ;;  %4072 = vmatmul.mubr.msk.bf16.gmra.mxu0 %vm675_vm3, %v3468_v9 }
 0x11a   : > { %4111 = vmatprep.mubr.msk.bf16.mxu0 %vm675_vm3, %v4675_v37 }
 0x11b   : > { %v5142_v41 = vpop.f32.mrf.mxu0 }
 0x11c   : > { %v5144_v3 = vpop.f32.mrf.mxu1  ;;  %4038 = vmatmul.mubr.msk.bf16.gmra.mxu1 %vm675_vm3, %v4931_v11 }
 0x11d   : > { %5935 = vst [vmem:[#allocation8_spill] sm:$0xff] %v5144_v3  ;;  %v5148_v51 = vpop.f32.mrf.mxu0  ;;  %4077 = vmatprep.mubr.msk.bf16.mxu1 %vm675_vm3, %v5919_v34 }
 0x11e   : > { %v5152_v62 = vpop.f32.mrf.mxu1 }
 0x11f   : > { %5936 = vst [vmem:[#allocation3_spill] sm:$0xff] %v5152_v62  ;;  %v5154_v27 = vpop.f32.mrf.mxu0 }
 0x120   : > { %v5156_v9 = vpop.f32.mrf.mxu1 }
 0x121   : > { %5937 = vst [vmem:[#allocation4_spill] sm:$0xff] %v5156_v9  ;;  %v3909_v38 = vpop.f32.mrf.mxu0  ;;  %4112 = vmatmul.mubr.msk.bf16.vlgmr.msra.gmra.mxu0 %vm675_vm3, %v4715_v14 }
 0x122   : > { %v5160_v37 = vpop.f32.mrf.mxu1  ;;  %4115 = vmatprep.mubr.msk.bf16.mxu0 %vm675_vm3, %v4717_v10 }
 0x123   : > { %5938 = vst [vmem:[#allocation6_spill] sm:$0xff] %v5160_v37  ;;  %v1447_v3 = vpop.f32.mrf.mxu0 }
 0x124   : > { %v3875_v24 = vpop.f32.mrf.mxu1  ;;  %4078 = vmatmul.mubr.msk.bf16.vlgmr.msra.gmra.mxu1 %vm675_vm3, %v5920_v42 }
 0x125   : > { %v1063_v34 = vadd.f32 %v3875_v24, %v5036_v63  ;;  %v3910_v62 = vpop.f32.mrf.mxu0  ;;  %4081 = vmatprep.mubr.msk.bf16.mxu1 %vm675_vm3, %v5921_v46 }
 0x126   : > { %v1054_v9 = vpop.f32.mrf.mxu1 }
 0x127   : > { %v5169_v54 = vadd.f32 %v3909_v38, %v1063_v34  ;;  %v1055_v14 = vadd.f32 %v1054_v9, %v5046_v53  ;;  %v1450_v37 = vpop.f32.mrf.mxu0 }
 0x128   : > { %v3876_v6 = vpop.f32.mrf.mxu1 }
 0x129   : > { %v5172_v32 = vadd.f32 %v1447_v3, %v1055_v14  ;;  %v1066_v10 = vadd.f32 %v3876_v6, %v5052_v56  ;;  %v3913_v12 = vpop.f32.mrf.mxu0  ;;  %4116 = vmatmul.mubr.msk.bf16.gmra.mxu0 %vm675_vm3, %v4752_v30 }
 0x12a   : > { %v1057_v42 = vpop.f32.mrf.mxu1  ;;  %4119 = vmatprep.mubr.msk.bf16.mxu0 %vm675_vm3, %v4754_v1 }
 0x12b   : > { %v5179_v46 = vadd.f32 %v3910_v62, %v1066_v10  ;;  %v1058_v63 = vadd.f32 %v1057_v42, %v5062_v59  ;;  %v1463_v24 = vpop.f32.mrf.mxu0 }
 0x12c   : > { %v3879_v53 = vpop.f32.mrf.mxu1  ;;  %4082 = vmatmul.mubr.msk.bf16.gmra.mxu1 %vm675_vm3, %v5922_v19 }
 0x12d   : > { %v5184_v38 = vadd.f32 %v1450_v37, %v1058_v63  ;;  %v1079_v56 = vadd.f32 %v3879_v53, %v5068_v20  ;;  %v3914_v6 = vpop.f32.mrf.mxu0  ;;  %4085 = vmatprep.mubr.msk.bf16.mxu1 %vm675_vm3, %v5923_v36 }
 0x12e   : > { %v1070_v30 = vpop.f32.mrf.mxu1 }
 0x12f   : > { %v5189_v3 = vadd.f32 %v3913_v12, %v1079_v56  ;;  %v1071_v1 = vadd.f32 %v1070_v30, %v5078_v55  ;;  %v1466_v62 = vpop.f32.mrf.mxu0 }
 0x130   : > { %v3880_v59 = vpop.f32.mrf.mxu1 }
 0x131   : > { %v5192_v9 = vadd.f32 %v1463_v24, %v1071_v1  ;;  %v1082_v34 = vadd.f32 %v3880_v59, %v5084_v39  ;;  %v3917_v19 = vpop.f32.mrf.mxu0  ;;  %4120 = vmatmul.mubr.msk.bf16.gmra.mxu0 %vm675_vm3, %v4840_v23 }
 0x132   : > { %v1073_v20 = vpop.f32.mrf.mxu1  ;;  %4123 = vmatprep.mubr.msk.bf16.mxu0 %vm675_vm3, %v4845_v8 }
 0x133   : > { %v5199_v36 = vadd.f32 %v3914_v6, %v1082_v34  ;;  %v1074_v12 = vadd.f32 %v1073_v20, %v5094_v44  ;;  %v1479_v37 = vpop.f32.mrf.mxu0 }
 0x134   : > { %v3883_v55 = vpop.f32.mrf.mxu1  ;;  %4086 = vmatmul.mubr.msk.bf16.gmra.mxu1 %vm675_vm3, %v4627_v15 }
 0x135   : > { %v5204_v14 = vadd.f32 %v1466_v62, %v1074_v12  ;;  %v1095_v39 = vadd.f32 %v3883_v55, %v5100_v18  ;;  %v3918_v10 = vpop.f32.mrf.mxu0  ;;  %4089 = vmatprep.mubr.msk.bf16.mxu1 %vm675_vm3, %v5924_v26 }
 0x136   : > { %v1086_v23 = vpop.f32.mrf.mxu1 }
 0x137   : > { %v5209_v42 = vadd.f32 %v3917_v19, %v1095_v39  ;;  %v1087_v8 = vadd.f32 %v1086_v23, %v5110_v29  ;;  %v1482_v63 = vpop.f32.mrf.mxu0 }
 0x138   : > { %v3884_v44 = vpop.f32.mrf.mxu1 }
 0x139   : > { %v5212_v24 = vadd.f32 %v1479_v37, %v1087_v8  ;;  %v1098_v53 = vadd.f32 %v3884_v44, %v5116_v43  ;;  %v3921_v15 = vpop.f32.mrf.mxu0  ;;  %4124 = vmatmul.mubr.msk.bf16.gmra.mxu0 %vm675_vm3, %v4878_v13  ;;  %v2462_v37 = vshll.u32 %v5120_v28, 16 }
 0x13a   : > { %v1089_v18 = vpop.f32.mrf.mxu1  ;;  %4127 = vmatprep.mubr.msk.bf16.mxu0 %vm675_vm3, %v4880_v16 }
 0x13b   : > { %v5219_v26 = vadd.f32 %v3918_v10, %v1098_v53  ;;  %v1090_v56 = vadd.f32 %v1089_v18, %v5129_v31  ;;  %v1495_v6 = vpop.f32.mrf.mxu0  ;;  %v2464_v44 = vrot.slane %v2462_v37, 5 }
 0x13c   : > { %v3887_v29 = vpop.f32.mrf.mxu1  ;;  %4090 = vmatmul.mubr.msk.bf16.gmra.mxu1 %vm675_vm3, %v5925_v0 }
 0x13d   : > { %v5224_v30 = vadd.f32 %v1482_v63, %v1090_v56  ;;  %v1111_v43 = vadd.f32 %v3887_v29, %v5137_v25  ;;  %v3922_v1 = vpop.f32.mrf.mxu0  ;;  %4093 = vmatprep.mubr.msk.bf16.mxu1 %vm675_vm3, %v5926_v35 }
 0x13e   : > { %v1102_v13 = vpop.f32.mrf.mxu1 }
 0x13f   : > { %v5229_v62 = vadd.f32 %v3921_v15, %v1111_v43  ;;  %v1103_v16 = vadd.f32 %v1102_v13, %v5142_v41  ;;  %v1498_v59 = vpop.f32.mrf.mxu0  ;;  %v2459_v41 = vshrl.u32 %v5120_v28, 16 }
 0x140   : > { %v3888_v31 = vpop.f32.mrf.mxu1 }
 0x141   : > { %v5232_v34 = vadd.f32 %v1495_v6, %v1103_v16  ;;  %v1114_v19 = vadd.f32 %v3888_v31, %v5148_v51  ;;  %v3925_v0 = vpop.f32.mrf.mxu0  ;;  %4128 = vmatmul.mubr.msk.bf16.gmra.mxu0 %vm675_vm3, %v4795_v21  ;;  %v2468_v51 = vshll.u32 %v5123_v61, 16  ;;  %v2472_v21 = vshrl.u32 %v5123_v61, 16 }
 0x142   : > { %v1105_v25 = vpop.f32.mrf.mxu1  ;;  %4131 = vmatprep.mubr.msk.bf16.mxu0 %vm675_vm3, %v4810_v50 }
 0x143   : > { %v5239_v35 = vadd.f32 %v3922_v1, %v1114_v19  ;;  %v1106_v20 = vadd.f32 %v1105_v25, %v5154_v27  ;;  %v1511_v12 = vpop.f32.mrf.mxu0  ;;  %v2470_v15 = vrot.slane %v2468_v51, 5  ;;  %v2474_v18 = vrot.slane %v2472_v21, 4 }
 0x144   : > { %v3891_v55 = vpop.f32.mrf.mxu1  ;;  %4094 = vmatmul.mubr.msk.bf16.gmra.mxu1 %vm675_vm3, %v5927_v40  ;;  %v2461_v40 = vrot.slane %v2459_v41, 4  ;;  %v3503_v19 = vrot.slane %v5120_v28, 9 }
 0x145   : > { %v5248_v39 = vadd.f32 %v1498_v59, %v1106_v20  ;;  %v1127_v50 = vadd.f32 %v3891_v55, %v5042_v47  ;;  %v3926_v10 = vpop.f32.mrf.mxu0  ;;  %4097 = vmatprep.mubr.msk.bf16.mxu1 %vm675_vm3, %v5928_v57  ;;  %v2689_v57 = vrot.slane %v5123_v61, 5 }
 0x146   : > { %v1118_v27 = vpop.f32.mrf.mxu1 }
 0x147   : > { %v5253_v23 = vadd.f32 %v3925_v0, %v1127_v50  ;;  %v1119_v8 = vadd.f32 %v1118_v27, %v5048_v33  ;;  %v1514_v63 = vpop.f32.mrf.mxu0  ;;  %v236_v33 = vld [vmem:[%s4238_s23 + $0xd4] sm:$0x1] }
 0x148   : > { %v3892_v53 = vpop.f32.mrf.mxu1  ;;  %v2478_v31 = vshll.u32 %v236_v33, 16  ;;  %v2692_v25 = vrot.slane %v236_v33, 5 }
 0x149   : > { %v5256_v56 = vadd.f32 %v1511_v12, %v1119_v8  ;;  %v1130_v47 = vadd.f32 %v3892_v53, %v5058_v17  ;;  %v3929_v6 = vpop.f32.mrf.mxu0  ;;  %4132 = vmatmul.mubr.msk.bf16.gmra.mxu0 %vm675_vm3, %v4832_v52  ;;  %v2465_v17 = vor.u32 %v2464_v44, %v2461_v40 }
 0x14a   : > { %v1121_v29 = vpop.f32.mrf.mxu1  ;;  %4135 = vmatprep.mubr.msk.bf16.mxu0 %vm675_vm3, %v4843_v58  ;;  %v2475_v58 = vor.u32 %v2474_v18, %v2470_v15  ;;  %v2480_v28 = vrot.slane %v2478_v31, 5 }
 0x14b   : > { %v5265_v43 = vadd.f32 %v3926_v10, %v1130_v47  ;;  %v1122_v1 = vadd.f32 %v1121_v29, %v5064_v4  ;;  %v1527_v13 = vpop.f32.mrf.mxu0  ;;  %v2691_v4 = vrot.slane %v2689_v57, 4  ;;  %v2466_v37 = vrot.slane %v2465_v17, 4  ;;  %v5942_v47 = vld [vmem:[#allocation16_spill] sm:$0xff]  ;;  %v5943_v29 = vld [vmem:[#allocation18_spill] sm:$0xff]  ;;  %v5944_v17 = vld [vmem:[#allocation21_spill] sm:$0xff] }
 0x14c   : > { %v3895_v16 = vpop.f32.mrf.mxu1  ;;  %4098 = vmatmul.mubr.msk.bf16.gmra.mxu1 %vm675_vm3, %v5929_v7 }
 0x14d   : > { %v5270_v59 = vadd.f32 %v1514_v63, %v1122_v1  ;;  %v1143_v52 = vadd.f32 %v3895_v16, %v5074_v48  ;;  %v3930_v61 = vpop.f32.mrf.mxu0  ;;  %4101 = vmatprep.mubr.msk.bf16.mxu1 %vm675_vm3, %v4601_v5  ;;  %v2476_v5 = vrot.slane %v2475_v58, 4  ;;  %v2693_v50 = vsel %vm4606_vm7, %v2691_v4, %v2692_v25  ;;  %v5939_v63 = vld [vmem:[#allocation25_spill] sm:$0xff] }
 0x14e   : > { %v1134_v0 = vpop.f32.mrf.mxu1  ;;  %v2471_v40 = vsel %vm4283_vm4, %v2466_v37, %v2470_v15 }
 0x14f   : > { %v5276_v20 = vadd.f32 %v3929_v6, %v1143_v52  ;;  %v1135_v7 = vadd.f32 %v1134_v0, %v5080_v45  ;;  %v1530_v12 = vpop.f32.mrf.mxu0  ;;  %v2690_v45 = vsel %vm4606_vm7, %v3503_v19, %v2689_v57  ;;  %v2481_v60 = vsel %vm4283_vm4, %v2476_v5, %v2480_v28  ;;  %v5945_v19 = vld [vmem:[#allocation23_spill] sm:$0xff] }
 0x150   : > { %v3896_v41 = vpop.f32.mrf.mxu1  ;;  %v3486_v15 = vcombine.low %v2471_v40, %v2481_v60  ;;  %v5947_v5 = vld [vmem:[#allocation3_spill] sm:$0xff]  ;;  %v5949_v40 = vld [vmem:[#allocation6_spill] sm:$0xff] }
 0x151   : > { %v5279_v55 = vadd.f32 %v1527_v13, %v1135_v7  ;;  %v1146_v48 = vadd.f32 %v3896_v41, %v5090_v22  ;;  %v3933_v51 = vpop.f32.mrf.mxu0  ;;  %4136 = vmatmul.mubr.msk.bf16.gmra.mxu0 %vm675_vm3, %v4852_v2 }
 0x152   : > { %v1137_v21 = vpop.f32.mrf.mxu1  ;;  %4139 = vmatprep.mubr.msk.bf16.mxu0 %vm675_vm3, %v4931_v11  ;;  %v5941_v11 = vld [vmem:[#allocation20_spill] sm:$0xff] }
 0x153   : > { %v5290_v10 = vadd.f32 %v3930_v61, %v1146_v48  ;;  %v1138_v22 = vadd.f32 %v1137_v21, %v5096_v49  ;;  %v1543_v27 = vpop.f32.mrf.mxu0  ;;  %v3505_v49 = vcombine.low %v2690_v45, %v2693_v50 }
 0x154   : > { %v3899_v8 = vpop.f32.mrf.mxu1  ;;  %4102 = vmatmul.mubr.msk.bf16.gmra.mxu1 %vm675_vm3, %v5939_v63 }
 0x155   : > { %v5297_v44 = vadd.f32 %v1530_v12, %v1138_v22  ;;  %v1159_v53 = vadd.f32 %v3899_v8, %v5941_v11  ;;  %v3934_v18 = vpop.f32.mrf.mxu0  ;;  %4105 = vmatprep.mubr.msk.bf16.mxu1 %vm675_vm3, %v5942_v47  ;;  %v5946_v12 = vld [vmem:[#allocation8_spill] sm:$0xff] }
 0x156   : > { %v1150_v6 = vpop.f32.mrf.mxu1  ;;  %v5948_v22 = vld [vmem:[#allocation4_spill] sm:$0xff] }
 0x157   : > { %v5304_v57 = vadd.f32 %v3933_v51, %v1159_v53  ;;  %v1151_v33 = vadd.f32 %v1150_v6, %v5943_v29  ;;  %v1546_v1 = vpop.f32.mrf.mxu0 }
 0x158   : > { %v3900_v13 = vpop.f32.mrf.mxu1 }
 0x159   : > { %v5307_v16 = vadd.f32 %v1543_v27, %v1151_v33  ;;  %v1162_v52 = vadd.f32 %v3900_v13, %v5944_v17  ;;  %v3937_v61 = vpop.f32.mrf.mxu0  ;;  %4140 = vmatmul.mubr.msk.bf16.gmra.mxu0 %vm675_vm3, %v3505_v49 }
 0x15a   : > { %v1153_v58 = vpop.f32.mrf.mxu1 }
 0x15b   : > { %v5311_v31 = vadd.f32 %v3934_v18, %v1162_v52  ;;  %v1154_v0 = vadd.f32 %v1153_v58, %v5945_v19  ;;  %v1559_v4 = vpop.f32.mrf.mxu0 }
 0x15c   : > { %v3903_v25 = vpop.f32.mrf.mxu1  ;;  %4106 = vmatmul.mubr.msk.bf16.gmra.mxu1 %vm675_vm3, %v3486_v15 }
 0x15d   : > { %v5315_v7 = vadd.f32 %v1546_v1, %v1154_v0  ;;  %v1175_v41 = vadd.f32 %v3903_v25, %v5946_v12  ;;  %v3938_v37 = vpop.f32.mrf.mxu0 }
 0x15e   : > { %v1166_v48 = vpop.f32.mrf.mxu1 }
 0x15f   : > { %v5318_v51 = vadd.f32 %v3937_v61, %v1175_v41  ;;  %v1167_v28 = vadd.f32 %v1166_v48, %v5947_v5  ;;  %v1562_v21 = vpop.f32.mrf.mxu0 }
 0x160   : > { %v3904_v45 = vpop.f32.mrf.mxu1 }
 0x161   : > { %v5321_v50 = vadd.f32 %v1559_v4, %v1167_v28  ;;  %v1178_v27 = vadd.f32 %v3904_v45, %v5948_v22  ;;  %v3977_v8 = vpop.f32.mrf.mxu0 }
 0x162   : > { %v1169_v63 = vpop.f32.mrf.mxu1 }
 0x163   : > { %v5324_v2 = vadd.f32 %v3938_v37, %v1178_v27  ;;  %v1170_v11 = vadd.f32 %v1169_v63, %v5949_v40  ;;  %v1881_v53 = vpop.f32.mrf.mxu0 }
 0x164   : > { %v3943_v18 = vpop.f32.mrf.mxu1 }
 0x165   : > { %v5327_v47 = vadd.f32 %v1562_v21, %v1170_v11  ;;  %v1782_v60 = vadd.f32 %v3943_v18, %v5169_v54  ;;  %v3978_v49 = vpop.f32.mrf.mxu0 }
 0x166   : > { %v1653_v6 = vpop.f32.mrf.mxu1 }
 0x167   : > { %v5330_v29 = vadd.f32 %v3977_v8, %v1782_v60  ;;  %v1780_v33 = vadd.f32 %v1653_v6, %v5172_v32  ;;  %v1884_v1 = vpop.f32.mrf.mxu0 }
 0x168   : > { %v3944_v13 = vpop.f32.mrf.mxu1 }
 0x169   : > { %v5333_v15 = vadd.f32 %v1881_v53, %v1780_v33  ;;  %v1783_v17 = vadd.f32 %v3944_v13, %v5179_v46  ;;  %v3981_v52 = vpop.f32.mrf.mxu0 }
 0x16a   : > { %v1656_v61 = vpop.f32.mrf.mxu1 }
 0x16b   : > { %v5336_v58 = vadd.f32 %v3978_v49, %v1783_v17  ;;  %v1781_v19 = vadd.f32 %v1656_v61, %v5184_v38  ;;  %v1897_v0 = vpop.f32.mrf.mxu0 }
 0x16c   : > { %v3947_v54 = vpop.f32.mrf.mxu1 }
 0x16d   : > { %v5339_v4 = vadd.f32 %v1884_v1, %v1781_v19  ;;  %v1786_v25 = vadd.f32 %v3947_v54, %v5189_v3  ;;  %v3982_v12 = vpop.f32.mrf.mxu0 }
 0x16e   : > { %v1669_v32 = vpop.f32.mrf.mxu1 }
 0x16f   : > { %v5342_v41 = vadd.f32 %v3981_v52, %v1786_v25  ;;  %v1784_v37 = vadd.f32 %v1669_v32, %v5192_v9  ;;  %v1900_v48 = vpop.f32.mrf.mxu0 }
 0x170   : > { %v3948_v46 = vpop.f32.mrf.mxu1 }
 0x171   : > { %v5345_v5 = vadd.f32 %v1897_v0, %v1784_v37  ;;  %v1787_v28 = vadd.f32 %v3948_v46, %v5199_v36  ;;  %v3985_v21 = vpop.f32.mrf.mxu0 }
 0x172   : > { %v1672_v38 = vpop.f32.mrf.mxu1 }
 0x173   : > { %v5348_v45 = vadd.f32 %v3982_v12, %v1787_v28  ;;  %v1785_v22 = vadd.f32 %v1672_v38, %v5204_v14  ;;  %v1913_v27 = vpop.f32.mrf.mxu0 }
 0x174   : > { %v3951_v3 = vpop.f32.mrf.mxu1 }
 0x175   : > { %v5351_v8 = vadd.f32 %v1900_v48, %v1785_v22  ;;  %v1790_v63 = vadd.f32 %v3951_v3, %v5209_v42  ;;  %v3986_v40 = vpop.f32.mrf.mxu0 }
 0x176   : > { %v1685_v9 = vpop.f32.mrf.mxu1 }
 0x177   : > { %v5354_v11 = vadd.f32 %v3985_v21, %v1790_v63  ;;  %v1788_v53 = vadd.f32 %v1685_v9, %v5212_v24  ;;  %v1916_v18 = vpop.f32.mrf.mxu0 }
 0x178   : > { %v3952_v36 = vpop.f32.mrf.mxu1 }
 0x179   : > { %v5357_v60 = vadd.f32 %v1913_v27, %v1788_v53  ;;  %v1791_v49 = vadd.f32 %v3952_v36, %v5219_v26  ;;  %v3989_v6 = vpop.f32.mrf.mxu0 }
 0x17a   : > { %v1688_v14 = vpop.f32.mrf.mxu1 }
 0x17b   : > { %v5360_v33 = vadd.f32 %v3986_v40, %v1791_v49  ;;  %v1789_v1 = vadd.f32 %v1688_v14, %v5224_v30  ;;  %v1929_v13 = vpop.f32.mrf.mxu0 }
 0x17c   : > { %v3955_v42 = vpop.f32.mrf.mxu1 }
 0x17d   : > { %v5363_v17 = vadd.f32 %v1916_v18, %v1789_v1  ;;  %v1794_v52 = vadd.f32 %v3955_v42, %v5229_v62  ;;  %v3990_v61 = vpop.f32.mrf.mxu0 }
 0x17e   : > { %v1701_v24 = vpop.f32.mrf.mxu1 }
 0x17f   : > { %v5366_v19 = vadd.f32 %v3989_v6, %v1794_v52  ;;  %v1792_v0 = vadd.f32 %v1701_v24, %v5232_v34  ;;  %v1932_v54 = vpop.f32.mrf.mxu0 }
 0x180   : > { %v3956_v26 = vpop.f32.mrf.mxu1 }
 0x181   : > { %v5369_v25 = vadd.f32 %v1929_v13, %v1792_v0  ;;  %v1795_v12 = vadd.f32 %v3956_v26, %v5239_v35  ;;  %v3993_v32 = vpop.f32.mrf.mxu0 }
 0x182   : > { %v1704_v30 = vpop.f32.mrf.mxu1 }
 0x183   : > { %v5372_v37 = vadd.f32 %v3990_v61, %v1795_v12  ;;  %v1793_v48 = vadd.f32 %v1704_v30, %v5248_v39  ;;  %v1945_v46 = vpop.f32.mrf.mxu0 }
 0x184   : > { %v3959_v62 = vpop.f32.mrf.mxu1 }
 0x185   : > { %v5375_v28 = vadd.f32 %v1932_v54, %v1793_v48  ;;  %v1798_v21 = vadd.f32 %v3959_v62, %v5253_v23  ;;  %v3994_v38 = vpop.f32.mrf.mxu0 }
 0x186   : > { %v1717_v34 = vpop.f32.mrf.mxu1 }
 0x187   : > { %v5378_v22 = vadd.f32 %v3993_v32, %v1798_v21  ;;  %v1796_v27 = vadd.f32 %v1717_v34, %v5256_v56  ;;  %v1948_v3 = vpop.f32.mrf.mxu0 }
 0x188   : > { %v3960_v35 = vpop.f32.mrf.mxu1 }
 0x189   : > { %v5381_v63 = vadd.f32 %v1945_v46, %v1796_v27  ;;  %v1799_v40 = vadd.f32 %v3960_v35, %v5265_v43  ;;  %v3997_v9 = vpop.f32.mrf.mxu0 }
 0x18a   : > { %v1720_v39 = vpop.f32.mrf.mxu1 }
 0x18b   : > { %v5384_v53 = vadd.f32 %v3994_v38, %v1799_v40  ;;  %v1797_v18 = vadd.f32 %v1720_v39, %v5270_v59  ;;  %v1961_v36 = vpop.f32.mrf.mxu0 }
 0x18c   : > { %v3963_v23 = vpop.f32.mrf.mxu1 }
 0x18d   : > { %v5387_v49 = vadd.f32 %v1948_v3, %v1797_v18  ;;  %v1802_v6 = vadd.f32 %v3963_v23, %v5276_v20  ;;  %v3998_v14 = vpop.f32.mrf.mxu0 }
 0x18e   : > { %v1733_v56 = vpop.f32.mrf.mxu1 }
 0x18f   : > { %v5390_v1 = vadd.f32 %v3997_v9, %v1802_v6  ;;  %v1800_v13 = vadd.f32 %v1733_v56, %v5279_v55  ;;  %v1964_v42 = vpop.f32.mrf.mxu0 }
 0x190   : > { %v3964_v43 = vpop.f32.mrf.mxu1 }
 0x191   : > { %v5393_v52 = vadd.f32 %v1961_v36, %v1800_v13  ;;  %v1803_v61 = vadd.f32 %v3964_v43, %v5290_v10  ;;  %v4001_v24 = vpop.f32.mrf.mxu0 }
 0x192   : > { %v1736_v59 = vpop.f32.mrf.mxu1 }
 0x193   : > { %v5396_v0 = vadd.f32 %v3998_v14, %v1803_v61  ;;  %v1801_v54 = vadd.f32 %v1736_v59, %v5297_v44  ;;  %v1977_v26 = vpop.f32.mrf.mxu0 }
 0x194   : > { %v3967_v20 = vpop.f32.mrf.mxu1 }
 0x195   : > { %v5399_v12 = vadd.f32 %v1964_v42, %v1801_v54  ;;  %v1806_v32 = vadd.f32 %v3967_v20, %v5304_v57  ;;  %v4002_v30 = vpop.f32.mrf.mxu0 }
 0x196   : > { %v1749_v55 = vpop.f32.mrf.mxu1 }
 0x197   : > { %v5402_v48 = vadd.f32 %v4001_v24, %v1806_v32  ;;  %v1804_v46 = vadd.f32 %v1749_v55, %v5307_v16  ;;  %v1980_v62 = vpop.f32.mrf.mxu0 }
 0x198   : > { %v3968_v10 = vpop.f32.mrf.mxu1 }
 0x199   : > { %v5405_v21 = vadd.f32 %v1977_v26, %v1804_v46  ;;  %v1807_v38 = vadd.f32 %v3968_v10, %v5311_v31  ;;  %v4005_v34 = vpop.f32.mrf.mxu0 }
 0x19a   : > { %v1752_v44 = vpop.f32.mrf.mxu1 }
 0x19b   : > { %v5408_v27 = vadd.f32 %v4002_v30, %v1807_v38  ;;  %v1805_v3 = vadd.f32 %v1752_v44, %v5315_v7  ;;  %v1993_v35 = vpop.f32.mrf.mxu0 }
 0x19c   : > { %v3971_v57 = vpop.f32.mrf.mxu1 }
 0x19d   : > { %5950 = vst [vmem:[#allocation9_spill] sm:$0xff] %v5408_v27  ;;  %v5411_v40 = vadd.f32 %v1980_v62, %v1805_v3  ;;  %v1810_v9 = vadd.f32 %v3971_v57, %v5318_v51  ;;  %v4006_v39 = vpop.f32.mrf.mxu0 }
 0x19e   : > { %v1765_v16 = vpop.f32.mrf.mxu1 }
 0x19f   : > { %5951 = vst [vmem:[#allocation7_spill] sm:$0xff] %v5411_v40  ;;  %v5414_v18 = vadd.f32 %v4005_v34, %v1810_v9  ;;  %v1808_v36 = vadd.f32 %v1765_v16, %v5321_v50  ;;  %v1996_v23 = vpop.f32.mrf.mxu0 }
 0x1a0   : > { %v3972_v31 = vpop.f32.mrf.mxu1 }
 0x1a1   : > { %v5417_v6 = vadd.f32 %v1993_v35, %v1808_v36  ;;  %v1811_v14 = vadd.f32 %v3972_v31, %v5324_v2  ;;  %v4045_v56 = vpop.f32.mrf.mxu0 }
 0x1a2   : > { %v1768_v7 = vpop.f32.mrf.mxu1 }
 0x1a3   : > { %v5420_v13 = vadd.f32 %v4006_v39, %v1811_v14  ;;  %v1809_v42 = vadd.f32 %v1768_v7, %v5327_v47  ;;  %v2299_v43 = vpop.f32.mrf.mxu0 }
 0x1a4   : > { %v4011_v51 = vpop.f32.mrf.mxu1 }
 0x1a5   : > { %5952 = vst [vmem:[#allocation11_spill] sm:$0xff] %v5420_v13  ;;  %v5423_v61 = vadd.f32 %v1996_v23, %v1809_v42  ;;  %v2222_v24 = vadd.f32 %v4011_v51, %v5330_v29  ;;  %v5426_v59 = vpop.f32.mrf.mxu0 }
 0x1a6   : > { %v2093_v50 = vpop.f32.mrf.mxu1 }
 0x1a7   : > { %5953 = vst [vmem:[#allocation13_spill] sm:$0xff] %v5423_v61  ;;  %v5428_v54 = vadd.f32 %v4045_v56, %v2222_v24  ;;  %v2220_v26 = vadd.f32 %v2093_v50, %v5333_v15  ;;  %v5431_v2 = vpop.f32.mrf.mxu0 }
 0x1a8   : > { %v5433_v20 = vpop.f32.mrf.mxu1 }
 0x1a9   : > { %v5435_v32 = vadd.f32 %v2299_v43, %v2220_v26  ;;  %v4049_v47 = vpop.f32.mrf.mxu0 }
 0x1aa   : > { %v5437_v30 = vpop.f32.mrf.mxu1 }
 0x1ab   : > { %v2315_v55 = vpop.f32.mrf.mxu0 }
 0x1ac   : > { %v4015_v46 = vpop.f32.mrf.mxu1 }
 0x1ad   : > { %v2226_v29 = vadd.f32 %v4015_v46, %v5342_v41  ;;  %v5440_v62 = vpop.f32.mrf.mxu0 }
 0x1ae   : > { %v2109_v10 = vpop.f32.mrf.mxu1 }
 0x1af   : > { %v5442_v38 = vadd.f32 %v4049_v47, %v2226_v29  ;;  %v2224_v15 = vadd.f32 %v2109_v10, %v5345_v5  ;;  %v5445_v34 = vpop.f32.mrf.mxu0 }
 0x1b0   : > { %v5447_v44 = vpop.f32.mrf.mxu1 }
 0x1b1   : > { %v5449_v3 = vadd.f32 %v2315_v55, %v2224_v15  ;;  %v4053_v35 = vpop.f32.mrf.mxu0 }
 0x1b2   : > { %v5451_v57 = vpop.f32.mrf.mxu1 }
 0x1b3   : > { %v2331_v9 = vpop.f32.mrf.mxu0 }
 0x1b4   : > { %v4019_v39 = vpop.f32.mrf.mxu1 }
 0x1b5   : > { %v2230_v41 = vadd.f32 %v4019_v39, %v5354_v11  ;;  %v5454_v16 = vpop.f32.mrf.mxu0 }
 0x1b6   : > { %v2125_v36 = vpop.f32.mrf.mxu1 }
 0x1b7   : > { %v5456_v23 = vadd.f32 %v4053_v35, %v2230_v41  ;;  %v2228_v5 = vadd.f32 %v2125_v36, %v5357_v60  ;;  %v5459_v31 = vpop.f32.mrf.mxu0 }
 0x1b8   : > { %v5461_v14 = vpop.f32.mrf.mxu1 }
 0x1b9   : > { %v5463_v56 = vadd.f32 %v2331_v9, %v2228_v5  ;;  %v4057_v7 = vpop.f32.mrf.mxu0 }
 0x1ba   : > { %v5465_v42 = vpop.f32.mrf.mxu1 }
 0x1bb   : > { %v2347_v43 = vpop.f32.mrf.mxu0 }
 0x1bc   : > { %v4023_v51 = vpop.f32.mrf.mxu1 }
 0x1bd   : > { %v2234_v11 = vadd.f32 %v4023_v51, %v5366_v19  ;;  %v5468_v24 = vpop.f32.mrf.mxu0 }
 0x1be   : > { %v2141_v50 = vpop.f32.mrf.mxu1 }
 0x1bf   : > { %v5470_v26 = vadd.f32 %v4057_v7, %v2234_v11  ;;  %v2232_v60 = vadd.f32 %v2141_v50, %v5369_v25  ;;  %v5473_v47 = vpop.f32.mrf.mxu0 }
 0x1c0   : > { %v5475_v55 = vpop.f32.mrf.mxu1 }
 0x1c1   : > { %v5477_v46 = vadd.f32 %v2347_v43, %v2232_v60  ;;  %v4061_v29 = vpop.f32.mrf.mxu0 }
 0x1c2   : > { %v5479_v10 = vpop.f32.mrf.mxu1 }
 0x1c3   : > { %v2363_v15 = vpop.f32.mrf.mxu0 }
 0x1c4   : > { %v4027_v35 = vpop.f32.mrf.mxu1 }
 0x1c5   : > { %v2238_v19 = vadd.f32 %v4027_v35, %v5378_v22  ;;  %v5482_v9 = vpop.f32.mrf.mxu0 }
 0x1c6   : > { %v2157_v39 = vpop.f32.mrf.mxu1 }
 0x1c7   : > { %v5484_v41 = vadd.f32 %v4061_v29, %v2238_v19  ;;  %v2236_v25 = vadd.f32 %v2157_v39, %v5381_v63  ;;  %v5487_v36 = vpop.f32.mrf.mxu0 }
 0x1c8   : > { %v5489_v5 = vpop.f32.mrf.mxu1 }
 0x1c9   : > { %v5491_v7 = vadd.f32 %v2363_v15, %v2236_v25  ;;  %v4065_v43 = vpop.f32.mrf.mxu0 }
 0x1ca   : > { %v5493_v51 = vpop.f32.mrf.mxu1 }
 0x1cb   : > { %v2379_v11 = vpop.f32.mrf.mxu0 }
 0x1cc   : > { %v4031_v50 = vpop.f32.mrf.mxu1 }
 0x1cd   : > { %v2242_v22 = vadd.f32 %v4031_v50, %v5390_v1  ;;  %v5496_v60 = vpop.f32.mrf.mxu0 }
 0x1ce   : > { %5954 = vst [vmem:[#allocation15_spill] sm:$0xff] %v5496_v60  ;;  %v2173_v35 = vpop.f32.mrf.mxu1 }
 0x1cf   : > { %v5498_v29 = vadd.f32 %v4065_v43, %v2242_v22  ;;  %v2240_v63 = vadd.f32 %v2173_v35, %v5393_v52  ;;  %v5501_v19 = vpop.f32.mrf.mxu0 }
 0x1d0   : > { %5955 = vst [vmem:[#allocation19_spill] sm:$0xff] %v5501_v19  ;;  %v5503_v39 = vpop.f32.mrf.mxu1 }
 0x1d1   : > { %v5505_v15 = vadd.f32 %v2379_v11, %v2240_v63  ;;  %v4069_v25 = vpop.f32.mrf.mxu0 }
 0x1d2   : > { %v5507_v61 = vpop.f32.mrf.mxu1 }
 0x1d3   : > { %5956 = vst [vmem:[#allocation24_spill] sm:$0xff] %v5505_v15  ;;  %v2395_v13 = vpop.f32.mrf.mxu0 }
 0x1d4   : > { %v4035_v40 = vpop.f32.mrf.mxu1 }
 0x1d5   : > { %v2246_v1 = vadd.f32 %v4035_v40, %v5402_v48  ;;  %v5510_v50 = vpop.f32.mrf.mxu0 }
 0x1d6   : > { %5957 = vst [vmem:[#allocation5_spill] sm:$0xff] %v5510_v50  ;;  %v2189_v27 = vpop.f32.mrf.mxu1 }
 0x1d7   : > { %v5512_v43 = vadd.f32 %v4069_v25, %v2246_v1  ;;  %v2244_v52 = vadd.f32 %v2189_v27, %v5405_v21  ;;  %v5515_v22 = vpop.f32.mrf.mxu0 }
 0x1d8   : > { %5958 = vst [vmem:[#allocation10_spill] sm:$0xff] %v5515_v22  ;;  %v5517_v35 = vpop.f32.mrf.mxu1 }
 0x1d9   : > { %v5519_v11 = vadd.f32 %v2395_v13, %v2244_v52  ;;  %v4073_v63 = vpop.f32.mrf.mxu0 }
 0x1da   : > { %v5521_v19 = vpop.f32.mrf.mxu1 }
 0x1db   : > { %v2411_v15 = vpop.f32.mrf.mxu0 }
 0x1dc   : > { %v4039_v60 = vpop.f32.mrf.mxu1 }
 0x1dd   : > { %v2250_v48 = vadd.f32 %v4039_v60, %v5414_v18  ;;  %v5524_v40 = vpop.f32.mrf.mxu0  ;;  %v2223_v18 = vadd.f32 %v5433_v20, %v5336_v58 }
 0x1de   : > { %5959 = vst [vmem:[#allocation12_spill] sm:$0xff] %v5524_v40  ;;  %v2205_v50 = vpop.f32.mrf.mxu1 }
 0x1df   : > { %v5526_v25 = vadd.f32 %v4073_v63, %v2250_v48  ;;  %v2248_v21 = vadd.f32 %v2205_v50, %v5417_v6  ;;  %v5529_v27 = vpop.f32.mrf.mxu0  ;;  %v2221_v63 = vadd.f32 %v5437_v30, %v5339_v4  ;;  %v2429_v50 = vadd.f32 %v5426_v59, %v2223_v18 }
 0x1e0   : > { %5961 = vst [vmem:[#allocation17_spill] sm:$0xff] %v5529_v27  ;;  %v5531_v1 = vpop.f32.mrf.mxu1 }
 0x1e1   : > { %5960 = vst [vmem:[#allocation14_spill] sm:$0xff] %v5526_v25  ;;  %5962 = vst [vmem:[#allocation22_spill] sm:$0xff] %v5531_v1  ;;  %v5533_v13 = vadd.f32 %v2411_v15, %v2248_v21  ;;  %v4113_v52 = vpop.f32.mrf.mxu0  ;;  %v2227_v1 = vadd.f32 %v5447_v44, %v5348_v45 }
 0x1e2   : > { %v5535_v22 = vpop.f32.mrf.mxu1 }
 0x1e3   : > { %5963 = vst [vmem:[#allocation25_spill] sm:$0xff] %v5533_v13  ;;  %5964 = vst [vmem:[#allocation2_spill] sm:$0xff] %v5535_v22  ;;  %v2739_v60 = vpop.f32.mrf.mxu0  ;;  %v2427_v13 = vadd.f32 %v5431_v2, %v2221_v63  ;;  %v2225_v2 = vadd.f32 %v5451_v57, %v5351_v8 }
 0x1e4   : > { %v4079_v40 = vpop.f32.mrf.mxu1 }
 0x1e5   : > { %v4114_v48 = vpop.f32.mrf.mxu0  ;;  %v2656_v27 = vadd.f32 %v4079_v40, %v5428_v54  ;;  %v2431_v63 = vadd.f32 %v5445_v34, %v2225_v2 }
 0x1e6   : > { %v2527_v6 = vpop.f32.mrf.mxu1 }
 0x1e7   : > { %v2742_v15 = vpop.f32.mrf.mxu0  ;;  %v2654_v25 = vadd.f32 %v2527_v6, %v5435_v32  ;;  %v5548_v4 = vadd.f32 %v4113_v52, %v2656_v27 }
 0x1e8   : > { %v4080_v21 = vpop.f32.mrf.mxu1 }
 0x1e9   : > { %v2657_v22 = vadd.f32 %v4080_v21, %v2429_v50  ;;  %v4117_v58 = vpop.f32.mrf.mxu0  ;;  %v5559_v32 = vadd.f32 %v2739_v60, %v2654_v25 }
 0x1ea   : > { %v2530_v20 = vpop.f32.mrf.mxu1 }
 0x1eb   : > { %v5550_v30 = vadd.f32 %v4114_v48, %v2657_v22  ;;  %v2655_v59 = vadd.f32 %v2530_v20, %v2427_v13  ;;  %v2755_v18 = vpop.f32.mrf.mxu0  ;;  %v2433_v13 = vadd.f32 %v5440_v62, %v2227_v1  ;;  %v2231_v62 = vadd.f32 %v5461_v14, %v5360_v33 }
 0x1ec   : > { %v4083_v54 = vpop.f32.mrf.mxu1 }
 0x1ed   : > { %v3597_v45 = vpack.c.bf16 %v5550_v30, %v5548_v4  ;;  %v5563_v44 = vadd.f32 %v2742_v15, %v2655_v59  ;;  %v4118_v22 = vpop.f32.mrf.mxu0  ;;  %v2660_v40 = vadd.f32 %v4083_v54, %v5442_v38  ;;  %v2229_v54 = vadd.f32 %v5465_v42, %v5363_v17 }
 0x1ee   : > { %v2543_v27 = vpop.f32.mrf.mxu1 }
 0x1ef   : > { %3669 = vst [vmem:[%s5555_s14 + $0x8] sm:$0xff] %v3597_v45   ;;  %v3592_v52 = vpack.c.bf16 %v5563_v44, %v5559_v32  ;;  %v3058_v8 = vadd.f32 %v5563_v44, %v5559_v32  ;;  %v2658_v57 = vadd.f32 %v2543_v27, %v5449_v3  ;;  %v2758_v25 = vpop.f32.mrf.mxu0  ;;  %v5578_v1 = vadd.f32 %v4117_v58, %v2660_v40 }
 0x1f0   : > { %v4084_v60 = vpop.f32.mrf.mxu1 }
 0x1f1   : > { %3593 = vst [vmem:[%s5555_s14] sm:$0xff] %v3592_v52   ;;  %v3059_v48 = vadd.f32 %v3058_v8, %v5548_v4  ;;  %v2661_v38 = vadd.f32 %v4084_v60, %v2433_v13  ;;  %v4121_v6 = vpop.f32.mrf.mxu0  ;;  %v5580_v15 = vadd.f32 %v2755_v18, %v2658_v57  ;;  %v2435_v52 = vadd.f32 %v5459_v31, %v2229_v54 }
 0x1f2   : > { %v2546_v50 = vpop.f32.mrf.mxu1 }
 0x1f3   : > { %v3060_v3 = vadd.f32 %v3059_v48, %v5550_v30  ;;  %v5583_v21 = vadd.f32 %v4118_v22, %v2661_v38  ;;  %v2659_v20 = vadd.f32 %v2546_v50, %v2431_v63  ;;  %v2771_v34 = vpop.f32.mrf.mxu0  ;;  %v2437_v22 = vadd.f32 %v5454_v16, %v2231_v62 }
 0x1f4   : > { %v4087_v59 = vpop.f32.mrf.mxu1  ;;  %v2235_v16 = vadd.f32 %v5475_v55, %v5372_v37  ;;  %v2233_v50 = vadd.f32 %v5479_v10, %v5375_v28 }
 0x1f5   : > { %v3061_v2 = vadd.f32 %v3060_v3, %v5580_v15  ;;  %v3607_v33 = vpack.c.bf16 %v5583_v21, %v5578_v1  ;;  %v5590_v14 = vadd.f32 %v2758_v25, %v2659_v20  ;;  %v4122_v58 = vpop.f32.mrf.mxu0  ;;  %v2664_v18 = vadd.f32 %v4087_v59, %v5456_v23 }
 0x1f6   : > { %v2559_v45 = vpop.f32.mrf.mxu1  ;;  %v2441_v59 = vadd.f32 %v5468_v24, %v2235_v16  ;;  %v2239_v24 = vadd.f32 %v5489_v5, %v5384_v53 }
 0x1f7   : > { %3671 = vst [vmem:[%s5555_s14 + $0x18] sm:$0xff] %v3607_v33   ;;  %v3602_v40 = vpack.c.bf16 %v5590_v14, %v5580_v15  ;;  %v3062_v27 = vadd.f32 %v3061_v2, %v5590_v14  ;;  %v2662_v17 = vadd.f32 %v2559_v45, %v5463_v56  ;;  %v2774_v42 = vpop.f32.mrf.mxu0  ;;  %v5604_v25 = vadd.f32 %v4121_v6, %v2664_v18 }
 0x1f8   : > { %v4088_v13 = vpop.f32.mrf.mxu1 }
 0x1f9   : > { %3670 = vst [vmem:[%s5555_s14 + $0x10] sm:$0xff] %v3602_v40   ;;  %v3063_v8 = vadd.f32 %v3062_v27, %v5578_v1  ;;  %v2665_v57 = vadd.f32 %v4088_v13, %v2437_v22  ;;  %v4125_v23 = vpop.f32.mrf.mxu0  ;;  %v5606_v63 = vadd.f32 %v2771_v34, %v2662_v17 }
 0x1fa   : > { %v2562_v60 = vpop.f32.mrf.mxu1 }
 0x1fb   : > { %v3064_v56 = vadd.f32 %v3063_v8, %v5583_v21  ;;  %v5609_v48 = vadd.f32 %v4122_v58, %v2665_v57  ;;  %v2663_v38 = vadd.f32 %v2562_v60, %v2435_v52  ;;  %v2787_v31 = vpop.f32.mrf.mxu0  ;;  %v2439_v58 = vadd.f32 %v5473_v47, %v2233_v50 }
 0x1fc   : > { %v4091_v62 = vpop.f32.mrf.mxu1  ;;  %v2237_v52 = vadd.f32 %v5493_v51, %v5387_v49  ;;  %v2445_v60 = vadd.f32 %v5482_v9, %v2239_v24  ;;  %v2243_v9 = vadd.f32 %v5503_v39, %v5396_v0 }
 0x1fd   : > { %v3065_v3 = vadd.f32 %v3064_v56, %v5606_v63  ;;  %v3617_v37 = vpack.c.bf16 %v5609_v48, %v5604_v25  ;;  %v5616_v55 = vadd.f32 %v2774_v42, %v2663_v38  ;;  %v4126_v6 = vpop.f32.mrf.mxu0  ;;  %v2668_v20 = vadd.f32 %v4091_v62, %v5470_v26 }
 0x1fe   : > { %v2575_v34 = vpop.f32.mrf.mxu1  ;;  %v2443_v62 = vadd.f32 %v5487_v36, %v2237_v52 }
 0x1ff   : > { %3673 = vst [vmem:[%s5555_s14 + $0x28] sm:$0xff] %v3617_v37   ;;  %v3612_v54 = vpack.c.bf16 %v5616_v55, %v5606_v63  ;;  %v3066_v2 = vadd.f32 %v3065_v3, %v5616_v55  ;;  %v2666_v28 = vadd.f32 %v2575_v34, %v5477_v46  ;;  %v2790_v10 = vpop.f32.mrf.mxu0  ;;  %v5630_v22 = vadd.f32 %v4125_v23, %v2668_v20 }
 0x200   : > { %v4092_v33 = vpop.f32.mrf.mxu1 }
 0x201   : > { %3672 = vst [vmem:[%s5555_s14 + $0x20] sm:$0xff] %v3612_v54   ;;  %v3067_v18 = vadd.f32 %v3066_v2, %v5604_v25  ;;  %v2669_v45 = vadd.f32 %v4092_v33, %v2441_v59  ;;  %v4129_v26 = vpop.f32.mrf.mxu0  ;;  %v5632_v27 = vadd.f32 %v2787_v31, %v2666_v28  ;;  %v2241_v2 = vadd.f32 %v5507_v61, %v5399_v12  ;;  %v5966_v12 = vld [vmem:[#allocation24_spill] sm:$0xff] }
 0x202   : > { %v2578_v40 = vpop.f32.mrf.mxu1 }
 0x203   : > { %v3068_v46 = vadd.f32 %v3067_v18, %v5609_v48  ;;  %v5635_v17 = vadd.f32 %v4126_v6, %v2669_v45  ;;  %v2667_v42 = vadd.f32 %v2578_v40, %v2439_v58  ;;  %v2803_v47 = vpop.f32.mrf.mxu0  ;;  %v5965_v18 = vld [vmem:[#allocation15_spill] sm:$0xff] }
 0x204   : > { %v4095_v13 = vpop.f32.mrf.mxu1  ;;  %v2449_v45 = vadd.f32 %v5965_v18, %v2243_v9  ;;  %v5972_v18 = vld [vmem:[#allocation11_spill] sm:$0xff] }
 0x205   : > { %v3069_v8 = vadd.f32 %v3068_v46, %v5632_v27  ;;  %v3627_v53 = vpack.c.bf16 %v5635_v17, %v5630_v22  ;;  %v5642_v5 = vadd.f32 %v2790_v10, %v2667_v42  ;;  %v4130_v57 = vpop.f32.mrf.mxu0  ;;  %v2672_v23 = vadd.f32 %v4095_v13, %v5484_v41  ;;  %v5967_v42 = vld [vmem:[#allocation19_spill] sm:$0xff] }
 0x206   : > { %v2591_v16 = vpop.f32.mrf.mxu1 }
 0x207   : > { %3675 = vst [vmem:[%s5555_s14 + $0x38] sm:$0xff] %v3627_v53   ;;  %v3622_v56 = vpack.c.bf16 %v5642_v5, %v5632_v27  ;;  %v3070_v38 = vadd.f32 %v3069_v8, %v5642_v5  ;;  %v2670_v49 = vadd.f32 %v2591_v16, %v5491_v7  ;;  %v2806_v51 = vpop.f32.mrf.mxu0  ;;  %v5656_v37 = vadd.f32 %v4129_v26, %v2672_v23  ;;  %v5968_v8 = vld [vmem:[#allocation9_spill] sm:$0xff] }
 0x208   : > { %v4096_v31 = vpop.f32.mrf.mxu1  ;;  %v2247_v53 = vadd.f32 %v5517_v35, %v5968_v8 }
 0x209   : > { %3674 = vst [vmem:[%s5555_s14 + $0x30] sm:$0xff] %v3622_v56   ;;  %v3071_v50 = vadd.f32 %v3070_v38, %v5630_v22  ;;  %v2673_v3 = vadd.f32 %v4096_v31, %v2445_v60  ;;  %v4133_v41 = vpop.f32.mrf.mxu0  ;;  %v5658_v20 = vadd.f32 %v2803_v47, %v2670_v49  ;;  %v2447_v47 = vadd.f32 %v5967_v42, %v2241_v2  ;;  %v5969_v31 = vld [vmem:[#allocation7_spill] sm:$0xff] }
 0x20a   : > { %v2594_v6 = vpop.f32.mrf.mxu1 }
 0x20b   : > { %v3072_v7 = vadd.f32 %v3071_v50, %v5635_v17  ;;  %v5661_v34 = vadd.f32 %v4130_v57, %v2673_v3  ;;  %v2671_v59 = vadd.f32 %v2594_v6, %v2443_v62  ;;  %v2819_v36 = vpop.f32.mrf.mxu0  ;;  %v2245_v62 = vadd.f32 %v5521_v19, %v5969_v31 }
 0x20c   : > { %v4099_v54 = vpop.f32.mrf.mxu1 }
 0x20d   : > { %v3073_v28 = vadd.f32 %v3072_v7, %v5658_v20  ;;  %v3637_v0 = vpack.c.bf16 %v5661_v34, %v5656_v37  ;;  %v5668_v39 = vadd.f32 %v2806_v51, %v2671_v59  ;;  %v4134_v10 = vpop.f32.mrf.mxu0  ;;  %v2676_v33 = vadd.f32 %v4099_v54, %v5498_v29  ;;  %v5970_v7 = vld [vmem:[#allocation5_spill] sm:$0xff] }
 0x20e   : > { %v2607_v58 = vpop.f32.mrf.mxu1  ;;  %v2453_v59 = vadd.f32 %v5970_v7, %v2247_v53  ;;  %v5979_v7 = vld [vmem:[#allocation17_spill] sm:$0xff] }
 0x20f   : > { %3677 = vst [vmem:[%s5555_s14 + $0x48] sm:$0xff] %v3637_v0   ;;  %v3632_v26 = vpack.c.bf16 %v5668_v39, %v5658_v20  ;;  %v3074_v24 = vadd.f32 %v3073_v28, %v5668_v39  ;;  %v2674_v61 = vadd.f32 %v2607_v58, %v5966_v12  ;;  %v2822_v40 = vpop.f32.mrf.mxu0  ;;  %v5682_v57 = vadd.f32 %v4133_v41, %v2676_v33  ;;  %v5971_v0 = vld [vmem:[#allocation10_spill] sm:$0xff] }
 0x210   : > { %v4100_v46 = vpop.f32.mrf.mxu1 }
 0x211   : > { %3676 = vst [vmem:[%s5555_s14 + $0x40] sm:$0xff] %v3632_v26   ;;  %v3075_v13 = vadd.f32 %v3074_v24, %v5656_v37  ;;  %v2677_v52 = vadd.f32 %v4100_v46, %v2449_v45  ;;  %v4137_v29 = vpop.f32.mrf.mxu0  ;;  %v5684_v16 = vadd.f32 %v2819_v36, %v2674_v61  ;;  %v5973_v45 = vld [vmem:[#allocation22_spill] sm:$0xff] }
 0x212   : > { %v2610_v23 = vpop.f32.mrf.mxu1  ;;  %v2251_v26 = vadd.f32 %v5973_v45, %v5972_v18 }
 0x213   : > { %v3076_v60 = vadd.f32 %v3075_v13, %v5661_v34  ;;  %v5687_v56 = vadd.f32 %v4134_v10, %v2677_v52  ;;  %v2675_v38 = vadd.f32 %v2610_v23, %v2447_v47  ;;  %v2835_v49 = vpop.f32.mrf.mxu0  ;;  %v2451_v10 = vadd.f32 %v5971_v0, %v2245_v62  ;;  %v5974_v13 = vld [vmem:[#allocation13_spill] sm:$0xff]  ;;  %v5975_v52 = vld [vmem:[#allocation2_spill] sm:$0xff] }
 0x214   : > { %v4103_v51 = vpop.f32.mrf.mxu1  ;;  %v2249_v8 = vadd.f32 %v5975_v52, %v5974_v13 }
 0x215   : > { %v3077_v50 = vadd.f32 %v3076_v60, %v5684_v16  ;;  %v3647_v35 = vpack.c.bf16 %v5687_v56, %v5682_v57  ;;  %v5694_v3 = vadd.f32 %v2822_v40, %v2675_v38  ;;  %v4138_v41 = vpop.f32.mrf.mxu0  ;;  %v2680_v9 = vadd.f32 %v4103_v51, %v5512_v43  ;;  %v5976_v60 = vld [vmem:[#allocation14_spill] sm:$0xff]  ;;  %v5977_v51 = vld [vmem:[#allocation12_spill] sm:$0xff] }
 0x216   : > { %v2623_v6 = vpop.f32.mrf.mxu1  ;;  %v2457_v31 = vadd.f32 %v5977_v51, %v2251_v26 }
 0x217   : > { %3679 = vst [vmem:[%s5555_s14 + $0x58] sm:$0xff] %v3647_v35   ;;  %v3642_v36 = vpack.c.bf16 %v5694_v3, %v5684_v16  ;;  %v3078_v54 = vadd.f32 %v3077_v50, %v5694_v3  ;;  %v2678_v19 = vadd.f32 %v2623_v6, %v5519_v11  ;;  %v2838_v2 = vpop.f32.mrf.mxu0  ;;  %v5708_v24 = vadd.f32 %v4137_v29, %v2680_v9  ;;  %v5978_v35 = vld [vmem:[#allocation25_spill] sm:$0xff] }
 0x218   : > { %v4104_v28 = vpop.f32.mrf.mxu1 }
 0x219   : > { %3678 = vst [vmem:[%s5555_s14 + $0x50] sm:$0xff] %v3642_v36   ;;  %v3079_v33 = vadd.f32 %v3078_v54, %v5682_v57  ;;  %v2681_v58 = vadd.f32 %v4104_v28, %v2453_v59  ;;  %v4141_v43 = vpop.f32.mrf.mxu0  ;;  %v5710_v61 = vadd.f32 %v2835_v49, %v2678_v19  ;;  %v2455_v59 = vadd.f32 %v5979_v7, %v2249_v8 }
 0x21a   : > { %v2626_v12 = vpop.f32.mrf.mxu1 }
 0x21b   : > { %v3080_v11 = vadd.f32 %v3079_v33, %v5687_v56  ;;  %v5713_v40 = vadd.f32 %v4138_v41, %v2681_v58  ;;  %v2679_v46 = vadd.f32 %v2626_v12, %v2451_v10  ;;  %v2851_v47 = vpop.f32.mrf.mxu0 }
 0x21c   : > { %v4107_v42 = vpop.f32.mrf.mxu1 }
 0x21d   : > { %v3081_v53 = vadd.f32 %v3080_v11, %v5710_v61  ;;  %v3657_v29 = vpack.c.bf16 %v5713_v40, %v5708_v24  ;;  %v5720_v23 = vadd.f32 %v2838_v2, %v2679_v46  ;;  %v2684_v38 = vadd.f32 %v4107_v42, %v5976_v60  ;;  %v4142_v6 = vpop.f32.mrf.mxu0 }
 0x21e   : > { %v2639_v49 = vpop.f32.mrf.mxu1 }
 0x21f   : > { %3681 = vst [vmem:[%s5555_s14 + $0x68] sm:$0xff] %v3657_v29   ;;  %v3652_v62 = vpack.c.bf16 %v5720_v23, %v5710_v61  ;;  %v3082_v50 = vadd.f32 %v3081_v53, %v5720_v23  ;;  %v2682_v41 = vadd.f32 %v2639_v49, %v5978_v35  ;;  %v5732_v19 = vadd.f32 %v4141_v43, %v2684_v38  ;;  %v2854_v58 = vpop.f32.mrf.mxu0 }
 0x220   : > { %v4108_v9 = vpop.f32.mrf.mxu1 }
 0x221   : > { %3680 = vst [vmem:[%s5555_s14 + $0x60] sm:$0xff] %v3652_v62   ;;  %v3083_v36 = vadd.f32 %v3082_v50, %v5708_v24  ;;  %v2685_v54 = vadd.f32 %v4108_v9, %v2457_v31  ;;  %v5734_v28 = vadd.f32 %v2851_v47, %v2682_v41 }
 0x222   : > { %v2642_v2 = vpop.f32.mrf.mxu1 }
 0x223   : > { %v3084_v0 = vadd.f32 %v3083_v36, %v5713_v40  ;;  %v5737_v10 = vadd.f32 %v4142_v6, %v2685_v54  ;;  %v2683_v33 = vadd.f32 %v2642_v2, %v2455_v59 }
 0x225   : > { %v3085_v18 = vadd.f32 %v3084_v0, %v5734_v28  ;;  %v3667_v45 = vpack.c.bf16 %v5737_v10, %v5732_v19  ;;  %v5742_v26 = vadd.f32 %v2854_v58, %v2683_v33 }
 0x227   : > { %3683 = vst [vmem:[%s5555_s14 + $0x78] sm:$0xff] %v3667_v45   ;;  %v3662_v43 = vpack.c.bf16 %v5742_v26, %v5734_v28  ;;  %v3086_v12 = vadd.f32 %v3085_v18, %v5742_v26 }
 0x229   : > { %3682 = vst [vmem:[%s5555_s14 + $0x70] sm:$0xff] %v3662_v43   ;;  %v3087_v11 = vadd.f32 %v3086_v12, %v5732_v19 }
 0x22b   : > { %v3088_v46 = vadd.f32 %v3087_v11, %v5737_v10 }
 0x22d   : > { %v3089_v42 = vrot.slane %v3088_v46, 4 }
 0x22f   : > { %v3090_v47 = vadd.f32 %v3089_v42, %v3088_v46 }
 0x231   : > { %v3091_v13 = vrot.slane %v3090_v47, 2 }
 0x233   : > { %v3092_v52 = vadd.f32 %v3091_v13, %v3090_v47 }
 0x235   : > { %v3093_v8 = vrot.slane %v3092_v52, 1 }
 0x237   : > { %v5751_v53 = vadd.f32 %v3093_v8, %v3092_v52 }
 0x239   : > { %v5754_v29 = vmul.f32 0.00390625, %v5751_v53 }
 0x23b   : > { %v3097_v60 = vsub.f32 %v5559_v32, %v5754_v29  ;;  %v3098_v38 = vsub.f32 %v5563_v44, %v5754_v29  ;;  %v3099_v49 = vsub.f32 %v5548_v4, %v5754_v29  ;;  %v3100_v62 = vsub.f32 %v5550_v30, %v5754_v29 }
 0x23c   : > { %v3101_v50 = vsub.f32 %v5580_v15, %v5754_v29  ;;  %v3102_v9 = vsub.f32 %v5590_v14, %v5754_v29  ;;  %v3103_v44 = vsub.f32 %v5578_v1, %v5754_v29  ;;  %v3104_v59 = vsub.f32 %v5583_v21, %v5754_v29 }
 0x23d   : > { %v3129_v51 = vmul.f32 %v3097_v60, %v3097_v60  ;;  %v3130_v31 = vmul.f32 %v3098_v38, %v3098_v38  ;;  %v3131_v35 = vmul.f32 %v3099_v49, %v3099_v49  ;;  %v3132_v32 = vmul.f32 %v3100_v62, %v3100_v62 }
 0x23e   : > { %v3133_v7 = vmul.f32 %v3101_v50, %v3101_v50  ;;  %v3134_v36 = vmul.f32 %v3102_v9, %v3102_v9  ;;  %v3105_v15 = vsub.f32 %v5606_v63, %v5754_v29  ;;  %v3135_v54 = vmul.f32 %v3103_v44, %v3103_v44 }
 0x23f   : > { %v3161_v41 = vadd.f32 %v3130_v31, %v3129_v51  ;;  %v3106_v14 = vsub.f32 %v5616_v55, %v5754_v29  ;;  %v3136_v0 = vmul.f32 %v3104_v59, %v3104_v59  ;;  %v3107_v1 = vsub.f32 %v5604_v25, %v5754_v29 }
 0x240   : > { %v3137_v58 = vmul.f32 %v3105_v15, %v3105_v15  ;;  %v3108_v21 = vsub.f32 %v5609_v48, %v5754_v29  ;;  %v3109_v63 = vsub.f32 %v5632_v27, %v5754_v29  ;;  %v3110_v55 = vsub.f32 %v5642_v5, %v5754_v29 }
 0x241   : > { %v3162_v6 = vadd.f32 %v3161_v41, %v3131_v35  ;;  %v3138_v45 = vmul.f32 %v3106_v14, %v3106_v14  ;;  %v3139_v12 = vmul.f32 %v3107_v1, %v3107_v1  ;;  %v3111_v25 = vsub.f32 %v5630_v22, %v5754_v29 }
 0x242   : > { %v3140_v46 = vmul.f32 %v3108_v21, %v3108_v21  ;;  %v3141_v47 = vmul.f32 %v3109_v63, %v3109_v63  ;;  %v3112_v48 = vsub.f32 %v5635_v17, %v5754_v29  ;;  %v3142_v52 = vmul.f32 %v3110_v55, %v3110_v55 }
 0x243   : > { %v3163_v4 = vadd.f32 %v3162_v6, %v3132_v32  ;;  %v3113_v27 = vsub.f32 %v5658_v20, %v5754_v29  ;;  %v3143_v60 = vmul.f32 %v3111_v25, %v3111_v25  ;;  %v3114_v5 = vsub.f32 %v5668_v39, %v5754_v29 }
 0x244   : > { %v3144_v49 = vmul.f32 %v3112_v48, %v3112_v48  ;;  %v3115_v22 = vsub.f32 %v5656_v37, %v5754_v29  ;;  %v3116_v17 = vsub.f32 %v5661_v34, %v5754_v29  ;;  %v3117_v20 = vsub.f32 %v5684_v16, %v5754_v29 }
 0x245   : > { %v3164_v30 = vadd.f32 %v3163_v4, %v3133_v7  ;;  %v3145_v31 = vmul.f32 %v3113_v27, %v3113_v27  ;;  %v3146_v50 = vmul.f32 %v3114_v5, %v3114_v5  ;;  %v3118_v39 = vsub.f32 %v5694_v3, %v5754_v29 }
 0x246   : > { %v3147_v41 = vmul.f32 %v3115_v22, %v3115_v22  ;;  %v3148_v32 = vmul.f32 %v3116_v17, %v3116_v17  ;;  %v3119_v37 = vsub.f32 %v5682_v57, %v5754_v29  ;;  %v3149_v44 = vmul.f32 %v3117_v20, %v3117_v20 }
 0x247   : > { %v3165_v2 = vadd.f32 %v3164_v30, %v3134_v36  ;;  %v3120_v34 = vsub.f32 %v5687_v56, %v5754_v29  ;;  %v3150_v4 = vmul.f32 %v3118_v39, %v3118_v39  ;;  %v3121_v16 = vsub.f32 %v5710_v61, %v5754_v29 }
 0x248   : > { %v3151_v36 = vmul.f32 %v3119_v37, %v3119_v37  ;;  %v3122_v3 = vsub.f32 %v5720_v23, %v5754_v29  ;;  %v3123_v57 = vsub.f32 %v5708_v24, %v5754_v29  ;;  %v3124_v56 = vsub.f32 %v5713_v40, %v5754_v29 }
 0x249   : > { %v3166_v33 = vadd.f32 %v3165_v2, %v3135_v54  ;;  %v3152_v15 = vmul.f32 %v3120_v34, %v3120_v34  ;;  %v3153_v2 = vmul.f32 %v3121_v16, %v3121_v16  ;;  %v3125_v61 = vsub.f32 %v5734_v28, %v5754_v29 }
 0x24a   : > { %v3155_v1 = vmul.f32 %v3123_v57, %v3123_v57  ;;  %v3126_v23 = vsub.f32 %v5742_v26, %v5754_v29  ;;  %v3127_v24 = vsub.f32 %v5732_v19, %v5754_v29  ;;  %v3128_v40 = vsub.f32 %v5737_v10, %v5754_v29 }
 0x24b   : > { %v3167_v18 = vadd.f32 %v3166_v33, %v3136_v0  ;;  %v3154_v0 = vmul.f32 %v3122_v3, %v3122_v3 }
 0x24c   : > { %v3158_v63 = vmul.f32 %v3126_v23, %v3126_v23  ;;  %v3160_v55 = vmul.f32 %v3128_v40, %v3128_v40 }
 0x24d   : > { %v3168_v43 = vadd.f32 %v3167_v18, %v3137_v58  ;;  %v3156_v18 = vmul.f32 %v3124_v56, %v3124_v56 }
 0x24f   : > { %v3169_v11 = vadd.f32 %v3168_v43, %v3138_v45  ;;  %v3157_v45 = vmul.f32 %v3125_v61, %v3125_v61 }
 0x251   : > { %v3170_v42 = vadd.f32 %v3169_v11, %v3139_v12  ;;  %v3159_v11 = vmul.f32 %v3127_v24, %v3127_v24 }
 0x253   : > { %v3171_v13 = vadd.f32 %v3170_v42, %v3140_v46 }
 0x255   : > { %v3172_v8 = vadd.f32 %v3171_v13, %v3141_v47 }
 0x257   : > { %v3173_v38 = vadd.f32 %v3172_v8, %v3142_v52 }
 0x259   : > { %v3174_v51 = vadd.f32 %v3173_v38, %v3143_v60 }
 0x25b   : > { %v3175_v62 = vadd.f32 %v3174_v51, %v3144_v49 }
 0x25d   : > { %v3176_v35 = vadd.f32 %v3175_v62, %v3145_v31 }
 0x25f   : > { %v3177_v9 = vadd.f32 %v3176_v35, %v3146_v50 }
 0x261   : > { %v3178_v6 = vadd.f32 %v3177_v9, %v3147_v41 }
 0x263   : > { %v3179_v7 = vadd.f32 %v3178_v6, %v3148_v32 }
 0x265   : > { %v3180_v59 = vadd.f32 %v3179_v7, %v3149_v44 }
 0x267   : > { %v3181_v30 = vadd.f32 %v3180_v59, %v3150_v4 }
 0x269   : > { %v3182_v54 = vadd.f32 %v3181_v30, %v3151_v36 }
 0x26b   : > { %v3183_v14 = vadd.f32 %v3182_v54, %v3152_v15 }
 0x26d   : > { %v3184_v33 = vadd.f32 %v3183_v14, %v3153_v2 }
 0x26f   : > { %v3185_v58 = vadd.f32 %v3184_v33, %v3154_v0 }
 0x271   : > { %v3186_v21 = vadd.f32 %v3185_v58, %v3155_v1 }
 0x273   : > { %v3187_v43 = vadd.f32 %v3186_v21, %v3156_v18 }
 0x275   : > { %v3188_v12 = vadd.f32 %v3187_v43, %v3157_v45 }
 0x277   : > { %v3189_v28 = vadd.f32 %v3188_v12, %v3158_v63 }
 0x279   : > { %v3190_v46 = vadd.f32 %v3189_v28, %v3159_v11 }
 0x27b   : > { %v3191_v42 = vadd.f32 %v3190_v46, %v3160_v55 }
 0x27d   : > { %v3192_v25 = vrot.slane %v3191_v42, 4 }
 0x27f   : > { %v3193_v26 = vadd.f32 %v3192_v25, %v3191_v42 }
 0x281   : > { %v3194_v47 = vrot.slane %v3193_v26, 2 }
 0x283   : > { %v3195_v13 = vadd.f32 %v3194_v47, %v3193_v26 }
 0x285   : > { %v3196_v48 = vrot.slane %v3195_v13, 1 }
 0x287   : > { %v3197_v19 = vadd.f32 %v3196_v48, %v3195_v13 }
 0x289   : > { %v3199_v10 = vsel %vm3198_vm8, %v5751_v53, %v3197_v19 }
 0x28a   : > { %v3201_v29 = vsel %vm3200_vm9, %v3199_v10, 0.0 }
 0x28b   : > { %3202 = vst [vmem:[%s181_s18] sm:$0xff] %v3201_v29 }
 0x28c PF: > { %s14_s12 = sadd.s32 1, %s4188_s12  }
 0x28d   : > { %p11_p4 = scmp.ge.s32.totalorder %s14_s12, 4  }
 0x28f   :  { %13 = sbr.rel (!%p11_p4) target bundleno = 1 (0x1), region = 78 }

// kernel: basic_block_forward.4
= control target key start
LH: loop header
LB: loop body
LE: loop exit
PB: predicated region body
PF: predicated region fallthrough
CT: control target
= control target key end

     0   :  { %s5959_s18 = smov 0   ;;  %s7862_s0 = inlined_call_operand.vmem [shape: bf16[2,16,16,128], index: 0, kind: input, shape index: {}]   ;;  %s7863_s1 = inlined_call_operand.vmem [shape: bf16[9,128,128], index: 1, kind: input, shape index: {}]   ;;  %s7864_s2 = inlined_call_operand.vmem [shape: f32[1,128], index: 2, kind: input, shape index: {}]   ;;  %s7865_s3 = inlined_call_operand.vmem [shape: f32[1,128], index: 3, kind: input, shape index: {}]   ;;  %s7866_s4 = inlined_call_operand.vmem [shape: bf16[2,16,16,128], index: 4, kind: output, shape index: {0}]   ;;  %s7867_s5 = inlined_call_operand.vmem [shape: f32[16,128], index: 5, kind: output, shape index: {1}]  }
   0x1 LB: > { %s4538_s19 = sadd.s32 4294967295, %s5926_s18   ;;  %p4542_p0 = scmp.ge.s32.totalorder %s5926_s18, 1  ;;  %s5926_s18 = sphi %s5959_s18, %s16_s18  }
   0x2   : > { %p190_p1 = scmp.lt.s32.totalorder %s5926_s18, 3 }
   0x4   : > { %p191_p2 = pnand %p4542_p0, %p190_p1 }
   0x6   : > { %194 = sbr.rel (%p191_p2) target bundleno = 759 (0x2f7), region = 36 }
   0xb   : > { %v5801_v0 = vld [vmem:[%s7863_s1 + $0x78] sm:$0xff]   ;;  %v5973_v1 = vld [vmem:[%s7863_s1 + $0x70] sm:$0xff]   ;;  %v5928_v2 = vmov 0   ;;  %p222_p3 = scmp.lt.s32.totalorder %s4538_s19, 1  ;;  %v5803_v3 = vld [vmem:[%s7863_s1 + $0x68] sm:$0xff]   ;;  %vm885_vm2 = vcmask 1043456  }
   0xc   : > { %427 = vst [vmem:[#allocation2] sm:$0xf] %v5928_v2  ;;  %428 = vst [vmem:[#allocation2 + $0x4] sm:$0xf] %v5928_v2  ;;  %5344 = vmatprep.subr.bf16.mxu0 %v5801_v0  ;;  %5776 = vmatprep.subr.bf16.mxu1 %v5801_v0  ;;  %v5804_v4 = vld [vmem:[%s7863_s1 + $0x60] sm:$0xff]   ;;  %v5805_v20 = vld [vmem:[%s7863_s1 + $0x58] sm:$0xff]  }
   0xd   : > { %429 = vst [vmem:[#allocation2 + $0x8] sm:$0x1] %v5928_v2  ;;  %430 = vst [vmem:[#allocation2 + $0xc] sm:$0xf] %v5928_v2  ;;  %5345 = vmatpush3.bf16.msra.mxu0 %v5801_v0  ;;  %5784 = vmatpush3.bf16.msra.mxu1 %v5801_v0  ;;  %s8028_s19 = smov (!%p222_p3, %s4538_s19), 1  ;;  %vm892_vm5 = vcmask 1040384  }
   0xe   : > { %431 = vst [vmem:[#allocation2 + $0x10] sm:$0xf] %v5928_v2  ;;  %432 = vst [vmem:[#allocation2 + $0x14] sm:$0x1] %v5928_v2  ;;  %5346 = vmatprep.subr.bf16.mxu0 %v5973_v1  ;;  %5777 = vmatprep.subr.bf16.mxu1 %v5973_v1  ;;  %s4888_s26 = sshll.u32 %s8028_s19, 7  ;;  %v5806_v35 = vld [vmem:[%s7863_s1 + $0x50] sm:$0xff]  }
   0xf   : > { %433 = vst [vmem:[#allocation2 + $0x18] sm:$0xf] %v5928_v2  ;;  %434 = vst [vmem:[#allocation2 + $0x1c] sm:$0xf] %v5928_v2  ;;  %s5997_s6 = scalar_lea.vmem %s7862_s0, %s4888_s26  ;;  %vm1072_vm0 = vsmask.f32 3328  ;;  %s7559_s10 = scalar_lea.vmem %s7866_s4, %s4888_s26 }
  0x10   : > { %435 = vst [vmem:[#allocation2 + $0x20] sm:$0x1] %v5928_v2  ;;  %436 = vst [vmem:[#allocation2 + $0x24] sm:$0xf] %v5928_v2  ;;  %vm1073_vm1 = vsmask.f32 7440 }
  0x11   : > { %437 = vst [vmem:[#allocation2 + $0x28] sm:$0xf] %v5928_v2  ;;  %438 = vst [vmem:[#allocation2 + $0x2c] sm:$0x1] %v5928_v2  ;;  %5347 = vmatpush3.bf16.msra.mxu0 %v5973_v1  ;;  %5785 = vmatpush3.bf16.msra.mxu1 %v5973_v1  ;;  %v4955_v13 = vld [vmem:[%s5997_s6] sm:$0xff]   ;;  %v5104_v19 = vld [vmem:[%s5997_s6 + $0x38] sm:$0xff]  }
  0x12   : > { %439 = vst [vmem:[#allocation2 + $0x30] sm:$0xf] %v5928_v2  ;;  %440 = vst [vmem:[#allocation2 + $0x34] sm:$0xf] %v5928_v2  ;;  %5348 = vmatprep.subr.bf16.mxu0 %v5803_v3  ;;  %5778 = vmatprep.subr.bf16.mxu1 %v5803_v3  ;;  %v4956_v16 = vunpack.c.l.bf16 %v4955_v13  ;;  %v4957_v17 = vunpack.c.h.bf16 %v4955_v13  ;;  %v6006_v18 = vld [vmem:[%s7864_s2] ss:$0 sm:$0xff]  ;;  %v4984_v30 = vunpack.c.l.bf16 %v5104_v19  ;;  %v4985_v31 = vunpack.c.h.bf16 %v5104_v19 }
  0x13   : > { %441 = vst [vmem:[#allocation2 + $0x38] sm:$0x1] %v5928_v2  ;;  %442 = vst [vmem:[#allocation2 + $0x3c] sm:$0xf] %v5928_v2  ;;  %v1002_v5 = vld [vmem:[#allocation2] sm:$0xf] }
  0x14   : > { %443 = vst [vmem:[#allocation2 + $0x40] sm:$0xf] %v5928_v2  ;;  %444 = vst [vmem:[#allocation2 + $0x44] sm:$0x1] %v5928_v2  ;;  %v1003_v6 = vld [vmem:[#allocation2 + $0x4] sm:$0xf]  ;;  %v308_v26 = vmul.f32 %v4956_v16, %v6006_v18  ;;  %v309_v27 = vmul.f32 %v4957_v17, %v6006_v18  ;;  %v322_v37 = vmul.f32 %v4984_v30, %v6006_v18 }
  0x15   : > { %445 = vst [vmem:[#allocation2 + $0x48] sm:$0xf] %v5928_v2  ;;  %446 = vst [vmem:[#allocation2 + $0x4c] sm:$0xf] %v5928_v2  ;;  %v5999_v7 = vld [vmem:[#allocation2 + $0x8] sm:$0x1]  ;;  %5349 = vmatpush3.bf16.msra.mxu0 %v5803_v3  ;;  %5786 = vmatpush3.bf16.msra.mxu1 %v5803_v3  ;;  %v323_v38 = vmul.f32 %v4985_v31, %v6006_v18 }
  0x16   : > { %447 = vst [vmem:[#allocation2 + $0x50] sm:$0x1] %v5928_v2  ;;  %448 = vst [vmem:[#allocation2 + $0x54] sm:$0xf] %v5928_v2  ;;  %v1076_v8 = vshrl.u32 %v1002_v5, 16  ;;  %v1079_v9 = vshll.u32 %v1002_v5, 16  ;;  %5350 = vmatprep.subr.bf16.mxu0 %v5804_v4  ;;  %5779 = vmatprep.subr.bf16.mxu1 %v5804_v4 }
  0x17   : > { %449 = vst [vmem:[#allocation2 + $0x58] sm:$0xf] %v5928_v2  ;;  %450 = vst [vmem:[#allocation2 + $0x5c] sm:$0x1] %v5928_v2  ;;  %v1085_v10 = vshll.u32 %v1003_v6, 16  ;;  %v1089_v11 = vshrl.u32 %v1003_v6, 16 }
  0x18   : > { %451 = vst [vmem:[#allocation2 + $0x60] sm:$0xf] %v5928_v2  ;;  %452 = vst [vmem:[#allocation2 + $0x64] sm:$0xf] %v5928_v2  ;;  %v1095_v12 = vshll.u32 %v5999_v7, 16  ;;  %v1078_v14 = vrot.slane %v1076_v8, 4 }
  0x19   : > { %453 = vst [vmem:[#allocation2 + $0x68] sm:$0x1] %v5928_v2  ;;  %454 = vst [vmem:[#allocation2 + $0x6c] sm:$0xf] %v5928_v2  ;;  %v1081_v15 = vrot.slane %v1079_v9, 5  ;;  %v1087_v21 = vrot.slane %v1085_v10, 5  ;;  %5351 = vmatpush3.bf16.msra.mxu0 %v5804_v4  ;;  %5787 = vmatpush3.bf16.msra.mxu1 %v5804_v4 }
  0x1a   : > { %455 = vst [vmem:[#allocation2 + $0x70] sm:$0xf] %v5928_v2  ;;  %456 = vst [vmem:[#allocation2 + $0x74] sm:$0x1] %v5928_v2  ;;  %v1091_v22 = vrot.slane %v1089_v11, 4  ;;  %v1097_v25 = vrot.slane %v1095_v12, 5  ;;  %5352 = vmatprep.subr.bf16.mxu0 %v5805_v20  ;;  %5780 = vmatprep.subr.bf16.mxu1 %v5805_v20 }
  0x1b   : > { %457 = vst [vmem:[#allocation2 + $0x78] sm:$0xf] %v5928_v2  ;;  %458 = vst [vmem:[#allocation2 + $0x7c] sm:$0xf] %v5928_v2  ;;  %v6015_v23 = vld [vmem:[%s7865_s3] ss:$0 sm:$0xff]  ;;  %v1082_v24 = vor.u32 %v1081_v15, %v1078_v14 }
  0x1c   : > { %459 = vst [vmem:[#allocation2 + $0x80] sm:$0x1] %v5928_v2  ;;  %460 = vst [vmem:[#allocation2 + $0x84] sm:$0xf] %v5928_v2  ;;  %v1092_v29 = vor.u32 %v1091_v22, %v1087_v21  ;;  %vm561_vm4 = vsmask.f32 256  ;;  %v347_v33 = vadd.f32 %v6015_v23, %v308_v26  ;;  %v348_v34 = vadd.f32 %v6015_v23, %v309_v27 }
  0x1d   : > { %461 = vst [vmem:[#allocation2 + $0x88] sm:$0xf] %v5928_v2  ;;  %462 = vst [vmem:[#allocation2 + $0x8c] sm:$0x1] %v5928_v2  ;;  %v1083_v32 = vrot.slane %v1082_v24, 4  ;;  %v5105_v42 = vld [vmem:[%s5997_s6 + $0x40] sm:$0xff]   ;;  %v361_v44 = vadd.f32 %v6015_v23, %v322_v37  ;;  %v362_v45 = vadd.f32 %v6015_v23, %v323_v38  ;;  %5353 = vmatpush3.bf16.msra.mxu0 %v5805_v20  ;;  %5788 = vmatpush3.bf16.msra.mxu1 %v5805_v20 }
  0x1e   : > { %463 = vst [vmem:[#allocation2 + $0x90] sm:$0xf] %v5928_v2  ;;  %464 = vst [vmem:[#allocation2 + $0x94] sm:$0xf] %v5928_v2  ;;  %v1093_v36 = vrot.slane %v1092_v29, 4  ;;  %v379_v40 = vmax.f32 %v347_v33, 0.0  ;;  %v4988_v46 = vunpack.c.l.bf16 %v5105_v42  ;;  %v4989_v50 = vunpack.c.h.bf16 %v5105_v42  ;;  %5354 = vmatprep.subr.bf16.mxu0 %v5806_v35  ;;  %5781 = vmatprep.subr.bf16.mxu1 %v5806_v35 }
  0x1f   : > { %465 = vst [vmem:[#allocation2 + $0x98] sm:$0x1] %v5928_v2  ;;  %466 = vst [vmem:[#allocation2 + $0x9c] sm:$0xf] %v5928_v2  ;;  %v380_v41 = vmax.f32 %v348_v34, 0.0  ;;  %v5807_v51 = vld [vmem:[%s7863_s1 + $0x48] sm:$0xff]  }
  0x20   : > { %467 = vst [vmem:[#allocation2 + $0xa0] sm:$0xf] %v5928_v2  ;;  %468 = vst [vmem:[#allocation2 + $0xa4] sm:$0x1] %v5928_v2  ;;  %vm562_vm6 = vsmask.f32 4368  ;;  %v4890_v48 = vpack.c.bf16 %v379_v40, %v379_v40  ;;  %v324_v54 = vmul.f32 %v4988_v46, %v6006_v18  ;;  %v325_v1 = vmul.f32 %v4989_v50, %v6006_v18 }
  0x21   : > { %469 = vst [vmem:[#allocation2 + $0xa8] sm:$0xf] %v5928_v2  ;;  %470 = vst [vmem:[#allocation2 + $0xac] sm:$0xf] %v5928_v2  ;;  %v4891_v49 = vpack.c.bf16 %v380_v41, %v380_v41  ;;  %vm886_vm7 = vsmask.f32 7938  ;;  %5355 = vmatpush3.bf16.msra.mxu0 %v5806_v35  ;;  %5789 = vmatpush3.bf16.msra.mxu1 %v5806_v35 }
  0x22   : > { %471 = vst [vmem:[#allocation2 + $0xb0] sm:$0x1] %v5928_v2  ;;  %472 = vst [vmem:[#allocation2 + $0xb4] sm:$0xf] %v5928_v2  ;;  %v393_v52 = vmax.f32 %v361_v44, 0.0  ;;  %v394_v53 = vmax.f32 %v362_v45, 0.0  ;;  %5356 = vmatprep.subr.bf16.mxu0 %v5807_v51  ;;  %5782 = vmatprep.subr.bf16.mxu1 %v5807_v51  ;;  %v364_v26 = vadd.f32 %v6015_v23, %v325_v1 }
  0x23   : > { %473 = vst [vmem:[#allocation2 + $0xb8] sm:$0xf] %v5928_v2  ;;  %474 = vst [vmem:[#allocation2 + $0xbc] sm:$0x1] %v5928_v2  ;;  %v5098_v55 = vld [vmem:[%s5997_s6 + $0x8] sm:$0xff]   ;;  %v565_v56 = vshrl.u32 %v4890_v48, 16 }
  0x24   : > { %475 = vst [vmem:[#allocation2 + $0xc0] sm:$0xf] %v5928_v2  ;;  %476 = vst [vmem:[#allocation2 + $0xc4] sm:$0xf] %v5928_v2  ;;  %v568_v57 = vshll.u32 %v4890_v48, 16  ;;  %v573_v58 = vshrl.u32 %v4891_v49, 16  ;;  %v4904_v63 = vpack.c.bf16 %v393_v52, %v393_v52  ;;  %v4905_v0 = vpack.c.bf16 %v394_v53, %v394_v53 }
  0x25   : > { %477 = vst [vmem:[#allocation2 + $0xc8] sm:$0x1] %v5928_v2  ;;  %478 = vst [vmem:[#allocation2 + $0xcc] sm:$0xf] %v5928_v2  ;;  %v576_v59 = vshll.u32 %v4891_v49, 16  ;;  %v5808_v60 = vld [vmem:[%s7863_s1 + $0x40] sm:$0xff]   ;;  %v4960_v8 = vunpack.c.l.bf16 %v5098_v55  ;;  %v4961_v9 = vunpack.c.h.bf16 %v5098_v55  ;;  %5357 = vmatpush3.bf16.msra.mxu0 %v5807_v51  ;;  %5790 = vmatpush3.bf16.msra.mxu1 %v5807_v51 }
  0x26   : > { %479 = vst [vmem:[#allocation2 + $0xd0] sm:$0xf] %v5928_v2  ;;  %480 = vst [vmem:[#allocation2 + $0xd4] sm:$0x1] %v5928_v2  ;;  %v888_v61 = vld [vmem:[#allocation2 + $0xc] sm:$0xf]  ;;  %v363_v2 = vadd.f32 %v6015_v23, %v324_v54  ;;  %5358 = vmatprep.subr.bf16.mxu0 %v5808_v60  ;;  %5783 = vmatprep.subr.bf16.mxu1 %v5808_v60 }
  0x27   : > { %vm6021_vm3 = vmor %vm1072_vm0, %vm1073_vm1  ;;  %v567_v4 = vrot.slane %v565_v56, 7  ;;  %v575_v5 = vrot.slane %v573_v58, 7  ;;  %v894_v6 = vld [vmem:[#allocation2 + $0x14] sm:$0x1]  ;;  %v684_v12 = vshrl.u32 %v4904_v63, 16  ;;  %v687_v13 = vshll.u32 %v4904_v63, 16 }
  0x28   : > { %v1088_v39 = vsel %vm6021_vm3, %v1083_v32, %v1087_v21  ;;  %v1098_v43 = vsel %vm6021_vm3, %v1093_v36, %v1097_v25  ;;  %vm6049_vm8 = vmand %vm892_vm5, %vm561_vm4  ;;  %v5099_v10 = vld [vmem:[%s5997_s6 + $0x10] sm:$0xff]   ;;  %v692_v14 = vshrl.u32 %v4905_v0, 16  ;;  %v695_v15 = vshll.u32 %v4905_v0, 16  ;;  %v939_v21 = vld [vmem:[#allocation2 + $0x60] sm:$0xf]  ;;  %s4547_s26 = sshll.u32 %s8028_s19, 3 }
  0x29   : > { %v4598_v47 = vcombine.low %v1088_v39, %v1098_v43  ;;  %vm6057_vm9 = vmor %vm561_vm4, %vm562_vm6  ;;  %v570_v16 = vor.u32 %v568_v57, %v567_v4  ;;  %v571_v17 = vrot.slane %v567_v4, 4  ;;  %v578_v19 = vor.u32 %v576_v59, %v575_v5  ;;  %v6071_v25 = vld [vmem:[%s7863_s1 + $0x38] sm:$0xff]   ;;  %v943_v32 = vld [vmem:[#allocation2 + $0x68] sm:$0x1]  ;;  %5359 = vmatpush3.bf16.msra.mxu0 %v5808_v60  ;;  %5791 = vmatpush3.bf16.msra.mxu1 %v5808_v60  ;;  %s235_s13 = scalar_lea.vmem %s7867_s5, %s4547_s26 }
  0x2a   : > { %vm6064_vm10 = vmand %vm885_vm2, %vm886_vm7  ;;  %v580_v20 = vrot.slane %v575_v5, 4  ;;  %v686_v22 = vrot.slane %v684_v12, 7  ;;  %v694_v24 = vrot.slane %v692_v14, 7  ;;  %v395_v27 = vmax.f32 %v363_v2, 0.0  ;;  %v6083_v33 = vld [vmem:[%s7863_s1 + $0xb8] sm:$0xff]   ;;  %v6088_v43 = vld [vmem:[%s5997_s6 + $0x48] sm:$0xff]   ;;  %5392 = vmatprep.subr.bf16.mxu1 %v6071_v25 }
  0x2b   : > { %5360 = vmatprep.mubr.bf16.mxu0 %v4598_v47  ;;  %v579_v29 = vsel %vm6057_vm9, %v571_v17, %v578_v19  ;;  %v889_v30 = vsel %vm6064_vm10, %v570_v16, %v888_v61  ;;  %v4964_v34 = vunpack.c.l.bf16 %v5099_v10  ;;  %v396_v39 = vmax.f32 %v364_v26, 0.0  ;;  %5440 = vmatprep.subr.bf16.mxu0 %v6083_v33  ;;  %v6105_v60 = vld [vmem:[%s5997_s6 + $0x50] sm:$0xff]   ;;  %v946_v63 = vld [vmem:[#allocation2 + $0x6c] sm:$0xf]  ;;  %v5857_v3 = vld [vmem:[%s7863_s1 + $0x178] sm:$0xff]  }
  0x2c   : > { %v895_v31 = vsel %vm6049_vm8, %v580_v20, %v894_v6  ;;  %890 = vst [vmem:[#allocation2 + $0xc] sm:$0xf] %v889_v30  ;;  %891 = vst [vmem:[#allocation2 + $0x10] sm:$0xf] %v579_v29  ;;  %v689_v35 = vor.u32 %v687_v13, %v686_v22  ;;  %v690_v36 = vrot.slane %v686_v22, 4  ;;  %v697_v37 = vor.u32 %v695_v15, %v694_v24  ;;  %v5887_v28 = vld [vmem:[%s7863_s1 + $0x208] sm:$0xff]  }
  0x2d   : > { %896 = vst [vmem:[#allocation2 + $0x14] sm:$0x1] %v895_v31  ;;  %v699_v38 = vrot.slane %v694_v24, 4  ;;  %v4906_v40 = vpack.c.bf16 %v395_v27, %v395_v27  ;;  %v310_v41 = vmul.f32 %v4960_v8, %v6006_v18  ;;  %v311_v42 = vmul.f32 %v4961_v9, %v6006_v18 }
  0x2e   : > { %v698_v44 = vsel %vm6057_vm9, %v690_v36, %v697_v37  ;;  %v940_v45 = vsel %vm6064_vm10, %v689_v35, %v939_v21  ;;  %v4965_v47 = vunpack.c.h.bf16 %v5099_v10  ;;  %v4907_v48 = vpack.c.bf16 %v396_v39, %v396_v39 }
  0x2f   : > { %v944_v46 = vsel %vm6049_vm8, %v699_v38, %v943_v32  ;;  %941 = vst [vmem:[#allocation2 + $0x60] sm:$0xf] %v940_v45  ;;  %942 = vst [vmem:[#allocation2 + $0x64] sm:$0xf] %v698_v44  ;;  %v701_v49 = vshrl.u32 %v4906_v40, 16  ;;  %v704_v50 = vshll.u32 %v4906_v40, 16  ;;  %v349_v51 = vadd.f32 %v6015_v23, %v310_v41 }
  0x30   : > { %945 = vst [vmem:[#allocation2 + $0x68] sm:$0x1] %v944_v46  ;;  %v350_v52 = vadd.f32 %v6015_v23, %v311_v42  ;;  %v312_v53 = vmul.f32 %v4964_v34, %v6006_v18  ;;  %v313_v54 = vmul.f32 %v4965_v47, %v6006_v18  ;;  %v4992_v55 = vunpack.c.l.bf16 %v6088_v43  ;;  %v950_v45 = vld [vmem:[#allocation2 + $0x74] sm:$0x1] }
  0x31   : > { %v703_v57 = vrot.slane %v701_v49, 7  ;;  %v709_v58 = vshrl.u32 %v4907_v48, 16  ;;  %v381_v59 = vmax.f32 %v349_v51, 0.0  ;;  %v712_v61 = vshll.u32 %v4907_v48, 16 }
  0x32   : > { %v382_v0 = vmax.f32 %v350_v52, 0.0  ;;  %v6108_v1 = vadd.f32 %v6015_v23, %v312_v53  ;;  %v6111_v2 = vadd.f32 %v6015_v23, %v313_v54  ;;  %v4993_v10 = vunpack.c.h.bf16 %v6088_v43 }
  0x33   : > { %v1005_v4 = vld [vmem:[#allocation2 + $0xc] sm:$0xf]  ;;  %v1006_v5 = vld [vmem:[#allocation2 + $0x10] sm:$0xf]  ;;  %v706_v8 = vor.u32 %v704_v50, %v703_v57  ;;  %v6113_v9 = vpack.c.bf16 %v381_v59, %v381_v59  ;;  %v6117_v12 = vmul.f32 %v4992_v55, %v6006_v18  ;;  %v707_v19 = vrot.slane %v703_v57, 4 }
  0x34   : > { %v1007_v6 = vld [vmem:[#allocation2 + $0x14] sm:$0x1]  ;;  %v1100_v13 = vshrl.u32 %v1005_v4, 16  ;;  %v1103_v14 = vshll.u32 %v1005_v4, 16  ;;  %v1109_v15 = vshll.u32 %v1006_v5, 16  ;;  %v1113_v16 = vshrl.u32 %v1006_v5, 16 }
  0x35   : > { %v1119_v17 = vshll.u32 %v1007_v6, 16  ;;  %v711_v20 = vrot.slane %v709_v58, 7  ;;  %v4996_v21 = vunpack.c.l.bf16 %v6105_v60  ;;  %v947_v36 = vsel %vm6064_vm10, %v706_v8, %v946_v63  ;;  %v5812_v4 = vld [vmem:[%s7863_s1 + $0xb0] sm:$0xff]  }
  0x36   : > { %v1102_v22 = vrot.slane %v1100_v13, 4  ;;  %v1105_v24 = vrot.slane %v1103_v14, 5  ;;  %v1111_v26 = vrot.slane %v1109_v15, 5  ;;  %v1115_v27 = vrot.slane %v1113_v16, 4  ;;  %v1026_v29 = vld [vmem:[#allocation2 + $0x60] sm:$0xf] }
  0x37   : > { %v1121_v30 = vrot.slane %v1119_v17, 5  ;;  %v1027_v31 = vld [vmem:[#allocation2 + $0x64] sm:$0xf]  ;;  %v1028_v32 = vld [vmem:[#allocation2 + $0x68] sm:$0x1]  ;;  %v1268_v34 = vshrl.u32 %v1026_v29, 16  ;;  %v714_v35 = vor.u32 %v712_v61, %v711_v20  ;;  %v4893_v53 = vpack.c.bf16 %v382_v0, %v382_v0 }
  0x38   : > { %v1106_v37 = vor.u32 %v1105_v24, %v1102_v22  ;;  %v1116_v38 = vor.u32 %v1115_v27, %v1111_v26  ;;  %v1271_v39 = vshll.u32 %v1026_v29, 16  ;;  %v1277_v40 = vshll.u32 %v1027_v31, 16  ;;  %948 = vst [vmem:[#allocation2 + $0x6c] sm:$0xf] %v947_v36  ;;  %v901_v27 = vld [vmem:[#allocation2 + $0x20] sm:$0x1] }
  0x39   : > { %v1270_v41 = vrot.slane %v1268_v34, 4  ;;  %v1281_v42 = vshrl.u32 %v1027_v31, 16  ;;  %v1287_v43 = vshll.u32 %v1028_v32, 16  ;;  %v715_v44 = vsel %vm6057_vm9, %v707_v19, %v714_v35 }
  0x3a   : > { %v1107_v46 = vrot.slane %v1106_v37, 4  ;;  %v1117_v47 = vrot.slane %v1116_v38, 4  ;;  %v1273_v48 = vrot.slane %v1271_v39, 5  ;;  %v1279_v49 = vrot.slane %v1277_v40, 5  ;;  %949 = vst [vmem:[#allocation2 + $0x70] sm:$0xf] %v715_v44 }
  0x3b   : > { %v1283_v50 = vrot.slane %v1281_v42, 4  ;;  %v1289_v51 = vrot.slane %v1287_v43, 5  ;;  %v716_v52 = vrot.slane %v711_v20, 4  ;;  %v582_v58 = vshrl.u32 %v6113_v9, 16 }
  0x3c   : > { %v1112_v54 = vsel %vm6021_vm3, %v1107_v46, %v1111_v26  ;;  %v1122_v55 = vsel %vm6021_vm3, %v1117_v47, %v1121_v30  ;;  %v1274_v57 = vor.u32 %v1273_v48, %v1270_v41  ;;  %v585_v0 = vshll.u32 %v6113_v9, 16  ;;  %v897_v26 = vld [vmem:[#allocation2 + $0x18] sm:$0xf] }
  0x3d   : > { %v6129_v59 = vcombine.low %v1112_v54, %v1122_v55  ;;  %v1284_v61 = vor.u32 %v1283_v50, %v1279_v49  ;;  %v951_v63 = vsel %vm6049_vm8, %v716_v52, %v950_v45  ;;  %v584_v6 = vrot.slane %v582_v58, 7  ;;  %v904_v54 = vld [vmem:[#allocation2 + $0x24] sm:$0xf] }
  0x3e   : > { %v1275_v5 = vrot.slane %v1274_v57, 4  ;;  %952 = vst [vmem:[#allocation2 + $0x74] sm:$0x1] %v951_v63  ;;  %v590_v8 = vshrl.u32 %v4893_v53, 16  ;;  %v593_v13 = vshll.u32 %v4893_v53, 16  ;;  %v383_v16 = vmax.f32 %v6108_v1, 0.0 }
  0x3f   : > { %5361 = vmatmul.mubr.bf16.vlgmr.msra.gmra.mxu0 %v6129_v59  ;;  %v1285_v14 = vrot.slane %v1284_v61, 4  ;;  %v1029_v15 = vld [vmem:[#allocation2 + $0x6c] sm:$0xf]  ;;  %v384_v17 = vmax.f32 %v6111_v2, 0.0  ;;  %v327_v19 = vmul.f32 %v4993_v10, %v6006_v18  ;;  %v587_v24 = vor.u32 %v585_v0, %v584_v6  ;;  %v6165_v63 = vld [vmem:[%s5997_s6 + $0x18] sm:$0xff]  }
  0x40   : > { %v1280_v20 = vsel %vm6021_vm3, %v1275_v5, %v1279_v49  ;;  %v1292_v22 = vshrl.u32 %v1029_v15, 16  ;;  %v1295_v9 = vshll.u32 %v1029_v15, 16  ;;  %5441 = vmatpush3.bf16.msra.mxu0 %v6083_v33  ;;  %v588_v1 = vrot.slane %v584_v6, 4  ;;  %v5814_v10 = vld [vmem:[%s7863_s1 + $0xa8] sm:$0xff]   ;;  %v5816_v49 = vld [vmem:[%s7863_s1 + $0xa0] sm:$0xff]  }
  0x41   : > { %v1290_v29 = vsel %vm6021_vm3, %v1285_v14, %v1289_v51  ;;  %v1030_v30 = vld [vmem:[#allocation2 + $0x70] sm:$0xf]  ;;  %5442 = vmatprep.subr.bf16.mxu0 %v5812_v4  ;;  %v592_v31 = vrot.slane %v590_v8, 7  ;;  %v4894_v2 = vpack.c.bf16 %v383_v16, %v383_v16  ;;  %v898_v39 = vsel %vm6064_vm10, %v587_v24, %v897_v26  ;;  %v908_v8 = vld [vmem:[#allocation2 + $0x2c] sm:$0x1] }
  0x42   : > { %v6149_v32 = vcombine.low %v1280_v20, %v1290_v29  ;;  %v1294_v34 = vrot.slane %v1292_v22, 4  ;;  %v1297_v35 = vrot.slane %v1295_v9, 5  ;;  %v1301_v33 = vshll.u32 %v1030_v30, 16  ;;  %899 = vst [vmem:[#allocation2 + $0x18] sm:$0xf] %v898_v39 }
  0x43   : > { %v1305_v36 = vshrl.u32 %v1030_v30, 16  ;;  %v595_v37 = vor.u32 %v593_v13, %v592_v31  ;;  %v597_v38 = vrot.slane %v592_v31, 4  ;;  %v4895_v42 = vpack.c.bf16 %v384_v17, %v384_v17  ;;  %v5811_v17 = vld [vmem:[%s7863_s1 + $0x30] sm:$0xff]  }
  0x44   : > { %7909 = vst [vmem:[#allocation3_spill] sm:$0xff] %v6149_v32  ;;  %5376 = vmatprep.mubr.bf16.mxu1 %v6149_v32  ;;  %v1298_v40 = vor.u32 %v1297_v35, %v1294_v34  ;;  %v1303_v41 = vrot.slane %v1301_v33, 5  ;;  %5443 = vmatpush3.bf16.msra.mxu0 %v5812_v4  ;;  %v599_v43 = vshrl.u32 %v4894_v2, 16  ;;  %v602_v48 = vshll.u32 %v4894_v2, 16 }
  0x45   : > { %v1031_v44 = vld [vmem:[#allocation2 + $0x74] sm:$0x1]  ;;  %v1307_v45 = vrot.slane %v1305_v36, 4  ;;  %v596_v46 = vsel %vm6057_vm9, %v588_v1, %v595_v37  ;;  %v902_v47 = vsel %vm6049_vm8, %v597_v38, %v901_v27  ;;  %5444 = vmatprep.subr.bf16.mxu0 %v5814_v10  ;;  %v607_v53 = vshrl.u32 %v4895_v42, 16 }
  0x46   : > { %v1299_v50 = vrot.slane %v1298_v40, 4  ;;  %v1311_v51 = vshll.u32 %v1031_v44, 16  ;;  %900 = vst [vmem:[#allocation2 + $0x1c] sm:$0xf] %v596_v46  ;;  %903 = vst [vmem:[#allocation2 + $0x20] sm:$0x1] %v902_v47  ;;  %v365_v58 = vadd.f32 %v6015_v23, %v6117_v12  ;;  %v366_v61 = vadd.f32 %v6015_v23, %v327_v19 }
  0x47   : > { %v601_v52 = vrot.slane %v599_v43, 7  ;;  %v1308_v55 = vor.u32 %v1307_v45, %v1303_v41  ;;  %v610_v57 = vshll.u32 %v4895_v42, 16  ;;  %v609_v14 = vrot.slane %v607_v53, 7  ;;  %v5818_v12 = vld [vmem:[%s7863_s1 + $0x98] sm:$0xff]   ;;  %v5820_v1 = vld [vmem:[%s7863_s1 + $0x90] sm:$0xff]   ;;  %v5813_v47 = vld [vmem:[%s7863_s1 + $0x28] sm:$0xff]  }
  0x48   : > { %v1304_v4 = vsel %vm6021_vm3, %v1299_v50, %v1303_v41  ;;  %v1313_v0 = vrot.slane %v1311_v51, 5  ;;  %5445 = vmatpush3.bf16.msra.mxu0 %v5814_v10  ;;  %v397_v15 = vmax.f32 %v365_v58, 0.0  ;;  %v398_v16 = vmax.f32 %v366_v61, 0.0  ;;  %v953_v46 = vld [vmem:[#allocation2 + $0x78] sm:$0xf] }
  0x49   : > { %v604_v5 = vor.u32 %v602_v48, %v601_v52  ;;  %v605_v6 = vrot.slane %v601_v52, 4  ;;  %v1309_v13 = vrot.slane %v1308_v55, 4  ;;  %5446 = vmatprep.subr.bf16.mxu0 %v5816_v49  ;;  %v4997_v20 = vunpack.c.h.bf16 %v6105_v60  ;;  %v1008_v26 = vld [vmem:[#allocation2 + $0x18] sm:$0xf]  ;;  %v957_v51 = vld [vmem:[#allocation2 + $0x80] sm:$0x1] }
  0x4a   : > { %v328_v22 = vmul.f32 %v4996_v21, %v6006_v18  ;;  %v4968_v9 = vunpack.c.l.bf16 %v6165_v63  ;;  %v612_v27 = vor.u32 %v610_v57, %v609_v14  ;;  %v614_v29 = vrot.slane %v609_v14, 4  ;;  %v5822_v57 = vld [vmem:[%s7863_s1 + $0x88] sm:$0xff]  }
  0x4b   : > { %v905_v19 = vsel %vm6064_vm10, %v604_v5, %v904_v54  ;;  %v1314_v24 = vsel %vm6021_vm3, %v1309_v13, %v1313_v0  ;;  %v4908_v30 = vpack.c.bf16 %v397_v15, %v397_v15  ;;  %v1124_v2 = vshrl.u32 %v1008_v26, 16 }
  0x4c   : > { %906 = vst [vmem:[#allocation2 + $0x24] sm:$0xf] %v905_v19  ;;  %v6187_v31 = vcombine.low %v1304_v4, %v1314_v24  ;;  %v1127_v10 = vshll.u32 %v1008_v26, 16  ;;  %v4909_v60 = vpack.c.bf16 %v398_v16, %v398_v16  ;;  %5447 = vmatpush3.bf16.msra.mxu0 %v5816_v49  ;;  %v613_v35 = vsel %vm6057_vm9, %v605_v6, %v612_v27  ;;  %v5815_v6 = vld [vmem:[%s7863_s1 + $0x20] sm:$0xff]  }
  0x4d   : > { %v1009_v21 = vld [vmem:[#allocation2 + $0x1c] sm:$0xf]  ;;  %v1010_v34 = vld [vmem:[#allocation2 + $0x20] sm:$0x1]  ;;  %v909_v33 = vsel %vm6049_vm8, %v614_v29, %v908_v8  ;;  %v718_v36 = vshrl.u32 %v4908_v30, 16  ;;  %v721_v37 = vshll.u32 %v4908_v30, 16  ;;  %5448 = vmatprep.subr.bf16.mxu0 %v5818_v12  ;;  %v329_v52 = vmul.f32 %v4997_v20, %v6006_v18 }
  0x4e   : > { %7910 = vst [vmem:[#allocation4_spill] sm:$0xff] %v6187_v31  ;;  %5377 = vmatmul.mubr.bf16.vlgmr.msra.gmra.mxu1 %v6187_v31  ;;  %v1126_v38 = vrot.slane %v1124_v2, 4  ;;  %v1129_v39 = vrot.slane %v1127_v10, 5  ;;  %v1133_v40 = vshll.u32 %v1009_v21, 16  ;;  %v1137_v41 = vshrl.u32 %v1009_v21, 16  ;;  %v5824_v16 = vld [vmem:[%s7863_s1 + $0x80] sm:$0xff]  }
  0x4f   : > { %907 = vst [vmem:[#allocation2 + $0x28] sm:$0xf] %v613_v35  ;;  %910 = vst [vmem:[#allocation2 + $0x2c] sm:$0x1] %v909_v33  ;;  %5393 = vmatpush3.bf16.msra.mxu1 %v6071_v25  ;;  %v1143_v42 = vshll.u32 %v1010_v34, 16  ;;  %v720_v43 = vrot.slane %v718_v36, 7  ;;  %v367_v0 = vadd.f32 %v6015_v23, %v328_v22  ;;  %v368_v5 = vadd.f32 %v6015_v23, %v329_v52 }
  0x50   : > { %v726_v44 = vshrl.u32 %v4909_v60, 16  ;;  %v729_v45 = vshll.u32 %v4909_v60, 16  ;;  %5394 = vmatprep.subr.bf16.mxu1 %v5811_v17  ;;  %v1130_v48 = vor.u32 %v1129_v39, %v1126_v38  ;;  %v1135_v49 = vrot.slane %v1133_v40, 5  ;;  %5449 = vmatpush3.bf16.msra.mxu0 %v5818_v12  ;;  %v6223_v36 = vld [vmem:[%s5997_s6 + $0x20] sm:$0xff]  }
  0x51   : > { %v1139_v50 = vrot.slane %v1137_v41, 4  ;;  %v1145_v53 = vrot.slane %v1143_v42, 5  ;;  %v723_v54 = vor.u32 %v721_v37, %v720_v43  ;;  %v724_v25 = vrot.slane %v720_v43, 4  ;;  %5450 = vmatprep.subr.bf16.mxu0 %v5820_v1  ;;  %v5817_v41 = vld [vmem:[%s7863_s1 + $0x18] sm:$0xff]  }
  0x52   : > { %v728_v55 = vrot.slane %v726_v44, 7  ;;  %v1131_v58 = vrot.slane %v1130_v48, 4  ;;  %v399_v22 = vmax.f32 %v367_v0, 0.0  ;;  %v400_v35 = vmax.f32 %v368_v5, 0.0 }
  0x53   : > { %v1140_v61 = vor.u32 %v1139_v50, %v1135_v49  ;;  %v1011_v4 = vld [vmem:[#allocation2 + $0x24] sm:$0xf]  ;;  %5395 = vmatpush3.bf16.msra.mxu1 %v5811_v17  ;;  %v954_v20 = vsel %vm6064_vm10, %v723_v54, %v953_v46  ;;  %v4969_v40 = vunpack.c.h.bf16 %v6165_v63  ;;  %v5828_v46 = vld [vmem:[%s7863_s1 + $0x138] sm:$0xff]   ;;  %v314_v48 = vmul.f32 %v4968_v9, %v6006_v18  ;;  %v5819_v9 = vld [vmem:[%s7863_s1 + $0x10] sm:$0xff]  }
  0x54   : > { %v1148_v8 = vshrl.u32 %v1011_v4, 16  ;;  %v1151_v13 = vshll.u32 %v1011_v4, 16  ;;  %v731_v14 = vor.u32 %v729_v45, %v728_v55  ;;  %v733_v15 = vrot.slane %v728_v55, 4  ;;  %5396 = vmatprep.subr.bf16.mxu1 %v5813_v47  ;;  %5451 = vmatpush3.bf16.msra.mxu0 %v5820_v1  ;;  %955 = vst [vmem:[#allocation2 + $0x78] sm:$0xf] %v954_v20 }
  0x55   : > { %v1136_v12 = vsel %vm6021_vm3, %v1131_v58, %v1135_v49  ;;  %v1141_v19 = vrot.slane %v1140_v61, 4  ;;  %5452 = vmatprep.subr.bf16.mxu0 %v5822_v57  ;;  %v4910_v33 = vpack.c.bf16 %v399_v22, %v399_v22  ;;  %v4911_v43 = vpack.c.bf16 %v400_v35, %v400_v35 }
  0x56   : > { %v1012_v24 = vld [vmem:[#allocation2 + $0x28] sm:$0xf]  ;;  %v1013_v17 = vld [vmem:[#allocation2 + $0x2c] sm:$0x1]  ;;  %v1150_v26 = vrot.slane %v1148_v8, 4  ;;  %v1153_v27 = vrot.slane %v1151_v13, 5  ;;  %v732_v29 = vsel %vm6057_vm9, %v724_v25, %v731_v14  ;;  %v958_v30 = vsel %vm6049_vm8, %v733_v15, %v957_v51 }
  0x57   : > { %v1146_v2 = vsel %vm6021_vm3, %v1141_v19, %v1145_v53  ;;  %v1157_v10 = vshll.u32 %v1012_v24, 16  ;;  %v1161_v60 = vshrl.u32 %v1012_v24, 16  ;;  %v1167_v21 = vshll.u32 %v1013_v17, 16  ;;  %956 = vst [vmem:[#allocation2 + $0x7c] sm:$0xf] %v732_v29  ;;  %5397 = vmatpush3.bf16.msra.mxu1 %v5813_v47 }
  0x58   : > { %959 = vst [vmem:[#allocation2 + $0x80] sm:$0x1] %v958_v30  ;;  %v6220_v1 = vcombine.low %v1136_v12, %v1146_v2  ;;  %v1154_v34 = vor.u32 %v1153_v27, %v1150_v26  ;;  %5398 = vmatprep.subr.bf16.mxu1 %v5815_v6  ;;  %5453 = vmatpush3.bf16.msra.mxu0 %v5822_v57  ;;  %v735_v44 = vshrl.u32 %v4910_v33, 16  ;;  %v738_v45 = vshll.u32 %v4910_v33, 16  ;;  %v960_v57 = vld [vmem:[#allocation2 + $0x84] sm:$0xf] }
  0x59   : > { %v1159_v37 = vrot.slane %v1157_v10, 5  ;;  %v1163_v38 = vrot.slane %v1161_v60, 4  ;;  %v1169_v39 = vrot.slane %v1167_v21, 5  ;;  %5454 = vmatprep.subr.bf16.mxu0 %v5824_v16  ;;  %v315_v49 = vmul.f32 %v4969_v40, %v6006_v18  ;;  %v5821_v26 = vld [vmem:[%s7863_s1 + $0x8] sm:$0xff]  }
  0x5a   : > { %5364 = vmatprep.mubr.bf16.mxu0 %v6220_v1  ;;  %v1155_v42 = vrot.slane %v1154_v34, 4  ;;  %v4972_v50 = vunpack.c.l.bf16 %v6223_v36  ;;  %v737_v52 = vrot.slane %v735_v44, 7  ;;  %v743_v53 = vshrl.u32 %v4911_v43, 16 }
  0x5b   : > { %v1164_v47 = vor.u32 %v1163_v38, %v1159_v37  ;;  %v746_v54 = vshll.u32 %v4911_v43, 16  ;;  %5399 = vmatpush3.bf16.msra.mxu1 %v5815_v6  ;;  %v1032_v55 = vld [vmem:[#allocation2 + $0x78] sm:$0xf]  ;;  %v353_v58 = vadd.f32 %v6015_v23, %v314_v48  ;;  %v354_v61 = vadd.f32 %v6015_v23, %v315_v49 }
  0x5c   : > { %v1160_v51 = vsel %vm6021_vm3, %v1155_v42, %v1159_v37  ;;  %v4973_v63 = vunpack.c.h.bf16 %v6223_v36  ;;  %5400 = vmatprep.subr.bf16.mxu1 %v5817_v41  ;;  %5455 = vmatpush3.bf16.msra.mxu0 %v5824_v16  ;;  %v1316_v5 = vshrl.u32 %v1032_v55, 16  ;;  %v1319_v8 = vshll.u32 %v1032_v55, 16  ;;  %v964_v16 = vld [vmem:[#allocation2 + $0x8c] sm:$0x1]  ;;  %v5108_v42 = vld [vmem:[%s5997_s6 + $0x58] sm:$0xff]  }
  0x5d   : > { %v1165_v25 = vrot.slane %v1164_v47, 4  ;;  %v740_v6 = vor.u32 %v738_v45, %v737_v52  ;;  %v316_v13 = vmul.f32 %v4972_v50, %v6006_v18  ;;  %5536 = vmatprep.subr.bf16.mxu0 %v5828_v46  ;;  %v741_v17 = vrot.slane %v737_v52, 4 }
  0x5e   : > { %v1033_v4 = vld [vmem:[#allocation2 + $0x7c] sm:$0xf]  ;;  %v1318_v22 = vrot.slane %v1316_v5, 4  ;;  %v1321_v24 = vrot.slane %v1319_v8, 5  ;;  %v745_v2 = vrot.slane %v743_v53, 7  ;;  %v385_v21 = vmax.f32 %v353_v58, 0.0 }
  0x5f   : > { %v1034_v0 = vld [vmem:[#allocation2 + $0x80] sm:$0x1]  ;;  %v1170_v14 = vsel %vm6021_vm3, %v1165_v25, %v1169_v39  ;;  %v1325_v15 = vshll.u32 %v1033_v4, 16  ;;  %v1329_v12 = vshrl.u32 %v1033_v4, 16  ;;  %5401 = vmatpush3.bf16.msra.mxu1 %v5817_v41  ;;  %v961_v60 = vsel %vm6064_vm10, %v740_v6, %v960_v57 }
  0x60   : > { %v1335_v19 = vshll.u32 %v1034_v0, 16  ;;  %v6249_v20 = vcombine.low %v1160_v51, %v1170_v14  ;;  %5402 = vmatprep.subr.bf16.mxu1 %v5819_v9  ;;  %v1322_v10 = vor.u32 %v1321_v24, %v1318_v22  ;;  %v386_v34 = vmax.f32 %v354_v61, 0.0  ;;  %962 = vst [vmem:[#allocation2 + $0x84] sm:$0xf] %v961_v60  ;;  %v6271_v51 = vld [vmem:[%s5997_s6 + $0x60] sm:$0xff]  }
  0x61   : > { %v1327_v27 = vrot.slane %v1325_v15, 5  ;;  %v1331_v29 = vrot.slane %v1329_v12, 4  ;;  %v748_v33 = vor.u32 %v746_v54, %v745_v2  ;;  %v750_v36 = vrot.slane %v745_v2, 4  ;;  %v915_v54 = vld [vmem:[#allocation2 + $0x38] sm:$0x1] }
  0x62   : > { %v1337_v30 = vrot.slane %v1335_v19, 5  ;;  %5365 = vmatmul.mubr.bf16.gmra.mxu0 %v6249_v20  ;;  %v317_v37 = vmul.f32 %v4973_v63, %v6006_v18  ;;  %v1323_v38 = vrot.slane %v1322_v10, 4  ;;  %v4896_v39 = vpack.c.bf16 %v385_v21, %v385_v21  ;;  %v5823_v18 = vld [vmem:[%s7863_s1] sm:$0xff]   ;;  %v918_v21 = vld [vmem:[#allocation2 + $0x3c] sm:$0xf] }
  0x63   : > { %v1332_v35 = vor.u32 %v1331_v29, %v1327_v27  ;;  %v4897_v40 = vpack.c.bf16 %v386_v34, %v386_v34  ;;  %v355_v41 = vadd.f32 %v6015_v23, %v316_v13  ;;  %5403 = vmatpush3.bf16.msra.mxu1 %v5819_v9  ;;  %v749_v44 = vsel %vm6057_vm9, %v741_v17, %v748_v33  ;;  %v5826_v9 = vld [vmem:[%s7863_s1 + $0xf8] sm:$0xff]   ;;  %v6291_v34 = vld [vmem:[%s7864_s2] ss:$0 sm:$0xff] }
  0x64   : > { %v965_v45 = vsel %vm6049_vm8, %v750_v36, %v964_v16  ;;  %v356_v46 = vadd.f32 %v6015_v23, %v317_v37  ;;  %5404 = vmatprep.subr.bf16.mxu1 %v5821_v26  ;;  %v1328_v47 = vsel %vm6021_vm3, %v1323_v38, %v1327_v27  ;;  %963 = vst [vmem:[#allocation2 + $0x88] sm:$0xf] %v749_v44  ;;  %v616_v48 = vshrl.u32 %v4896_v39, 16  ;;  %v911_v23 = vld [vmem:[#allocation2 + $0x30] sm:$0xf] }
  0x65   : > { %v1333_v43 = vrot.slane %v1332_v35, 4  ;;  %966 = vst [vmem:[#allocation2 + $0x8c] sm:$0x1] %v965_v45  ;;  %v619_v49 = vshll.u32 %v4896_v39, 16  ;;  %v624_v50 = vshrl.u32 %v4897_v40, 16  ;;  %v627_v53 = vshll.u32 %v4897_v40, 16 }
  0x66   : > { %v387_v25 = vmax.f32 %v355_v41, 0.0  ;;  %v388_v55 = vmax.f32 %v356_v46, 0.0  ;;  %v618_v58 = vrot.slane %v616_v48, 7  ;;  %v5000_v63 = vunpack.c.l.bf16 %v5108_v42  ;;  %v6298_v44 = vld [vmem:[%s7865_s3] ss:$0 sm:$0xff] }
  0x67   : > { %v1338_v52 = vsel %vm6021_vm3, %v1333_v43, %v1337_v30  ;;  %v626_v61 = vrot.slane %v624_v50, 7  ;;  %5405 = vmatpush3.bf16.msra.mxu1 %v5821_v26  ;;  %v5001_v5 = vunpack.c.h.bf16 %v5108_v42  ;;  %v5004_v8 = vunpack.c.l.bf16 %v6271_v51  ;;  %v1035_v6 = vld [vmem:[#allocation2 + $0x84] sm:$0xf] }
  0x68   : > { %v6275_v57 = vcombine.low %v1328_v47, %v1338_v52  ;;  %v4898_v4 = vpack.c.bf16 %v387_v25, %v387_v25  ;;  %v4899_v0 = vpack.c.bf16 %v388_v55, %v388_v55  ;;  %5406 = vmatprep.subr.bf16.mxu1 %v5823_v18  ;;  %v621_v13 = vor.u32 %v619_v49, %v618_v58  ;;  %v922_v43 = vld [vmem:[#allocation2 + $0x44] sm:$0x1] }
  0x69   : > { %v622_v14 = vrot.slane %v618_v58, 4  ;;  %v629_v15 = vor.u32 %v627_v53, %v626_v61  ;;  %v631_v12 = vrot.slane %v626_v61, 4  ;;  %v1340_v19 = vshrl.u32 %v1035_v6, 16 }
  0x6a   : > { %7911 = vst [vmem:[#allocation5_spill] sm:$0xff] %v6275_v57  ;;  %5380 = vmatprep.mubr.bf16.mxu1 %v6275_v57  ;;  %v1343_v22 = vshll.u32 %v1035_v6, 16  ;;  %v633_v24 = vshrl.u32 %v4898_v4, 16  ;;  %v636_v17 = vshll.u32 %v4898_v4, 16  ;;  %v912_v26 = vsel %vm6064_vm10, %v621_v13, %v911_v23 }
  0x6b   : > { %v630_v16 = vsel %vm6057_vm9, %v622_v14, %v629_v15  ;;  %v916_v27 = vsel %vm6049_vm8, %v631_v12, %v915_v54  ;;  %v641_v29 = vshrl.u32 %v4899_v0, 16  ;;  %5407 = vmatpush3.bf16.msra.mxu1 %v5823_v18  ;;  %v1036_v30 = vld [vmem:[#allocation2 + $0x88] sm:$0xf]  ;;  %v1342_v10 = vrot.slane %v1340_v19, 4  ;;  %913 = vst [vmem:[#allocation2 + $0x30] sm:$0xf] %v912_v26 }
  0x6c   : > { %v1037_v2 = vld [vmem:[#allocation2 + $0x8c] sm:$0x1]  ;;  %v1345_v60 = vrot.slane %v1343_v22, 5  ;;  %914 = vst [vmem:[#allocation2 + $0x34] sm:$0xf] %v630_v16  ;;  %v330_v35 = vmul.f32 %v6291_v34, %v5000_v63  ;;  %v331_v33 = vmul.f32 %v6291_v34, %v5001_v5  ;;  %5488 = vmatprep.subr.bf16.mxu1 %v5826_v9  ;;  %v1349_v36 = vshll.u32 %v1036_v30, 16 }
  0x6d   : > { %917 = vst [vmem:[#allocation2 + $0x38] sm:$0x1] %v916_v27  ;;  %v1353_v37 = vshrl.u32 %v1036_v30, 16  ;;  %v1359_v38 = vshll.u32 %v1037_v2, 16  ;;  %v635_v39 = vrot.slane %v633_v24, 7  ;;  %v643_v41 = vrot.slane %v641_v29, 7 }
  0x6e   : > { %v1346_v40 = vor.u32 %v1345_v60, %v1342_v10  ;;  %v644_v42 = vshll.u32 %v4899_v0, 16  ;;  %v369_v45 = vadd.f32 %v6298_v44, %v330_v35  ;;  %v1351_v46 = vrot.slane %v1349_v36, 5  ;;  %v5102_v35 = vld [vmem:[%s5997_s6 + $0x28] sm:$0xff]  }
  0x6f   : > { %v1355_v18 = vrot.slane %v1353_v37, 4  ;;  %v1361_v47 = vrot.slane %v1359_v38, 5  ;;  %v638_v48 = vor.u32 %v636_v17, %v635_v39  ;;  %v639_v50 = vrot.slane %v635_v39, 4 }
  0x70   : > { %v1347_v49 = vrot.slane %v1346_v40, 4  ;;  %v646_v52 = vor.u32 %v644_v42, %v643_v41  ;;  %v648_v53 = vrot.slane %v643_v41, 4  ;;  %v370_v25 = vadd.f32 %v6298_v44, %v331_v33 }
  0x71   : > { %v1356_v23 = vor.u32 %v1355_v18, %v1351_v46  ;;  %v919_v54 = vsel %vm6064_vm10, %v638_v48, %v918_v21  ;;  %v401_v55 = vmax.f32 %v369_v45, 0.0  ;;  %v5005_v9 = vunpack.c.h.bf16 %v6271_v51  ;;  %v967_v48 = vld [vmem:[#allocation2 + $0x90] sm:$0xf] }
  0x72   : > { %v1352_v58 = vsel %vm6021_vm3, %v1347_v49, %v1351_v46  ;;  %v647_v61 = vsel %vm6057_vm9, %v639_v50, %v646_v52  ;;  %920 = vst [vmem:[#allocation2 + $0x3c] sm:$0xf] %v919_v54  ;;  %v923_v63 = vsel %vm6049_vm8, %v648_v53, %v922_v43  ;;  %v6311_v0 = vld [vmem:[#allocation2 + $0x30] sm:$0xf]  ;;  %v402_v6 = vmax.f32 %v370_v25, 0.0 }
  0x73   : > { %v1357_v4 = vrot.slane %v1356_v23, 4  ;;  %v6313_v5 = vld [vmem:[#allocation2 + $0x34] sm:$0xf]  ;;  %921 = vst [vmem:[#allocation2 + $0x40] sm:$0xf] %v647_v61  ;;  %v4912_v13 = vpack.c.bf16 %v401_v55, %v401_v55  ;;  %v332_v14 = vmul.f32 %v6291_v34, %v5004_v8  ;;  %v1172_v12 = vshrl.u32 %v6311_v0, 16 }
  0x74   : > { %924 = vst [vmem:[#allocation2 + $0x44] sm:$0x1] %v923_v63  ;;  %v6318_v15 = vld [vmem:[#allocation2 + $0x38] sm:$0x1]  ;;  %v1175_v19 = vshll.u32 %v6311_v0, 16  ;;  %v1181_v22 = vshll.u32 %v6313_v5, 16  ;;  %v4913_v26 = vpack.c.bf16 %v402_v6, %v402_v6  ;;  %v333_v38 = vmul.f32 %v6291_v34, %v5005_v9 }
  0x75   : > { %v1185_v24 = vshrl.u32 %v6313_v5, 16  ;;  %v1362_v17 = vsel %vm6021_vm3, %v1357_v4, %v1361_v47  ;;  %v1191_v16 = vshll.u32 %v6318_v15, 16  ;;  %v752_v51 = vshrl.u32 %v4912_v13, 16  ;;  %v971_v25 = vld [vmem:[#allocation2 + $0x98] sm:$0x1] }
  0x76   : > { %v6327_v27 = vcombine.low %v1352_v58, %v1362_v17  ;;  %v1174_v8 = vrot.slane %v1172_v12, 4  ;;  %v1177_v29 = vrot.slane %v1175_v19, 5  ;;  %v1183_v30 = vrot.slane %v1181_v22, 5 }
  0x77   : > { %v1187_v2 = vrot.slane %v1185_v24, 4  ;;  %v1193_v10 = vrot.slane %v1191_v16, 5  ;;  %v754_v60 = vrot.slane %v752_v51, 7  ;;  %v755_v21 = vshll.u32 %v4912_v13, 16  ;;  %v5103_v51 = vld [vmem:[%s5997_s6 + $0x30] sm:$0xff]  }
  0x78   : > { %7912 = vst [vmem:[#allocation6_spill] sm:$0xff] %v6327_v27  ;;  %5381 = vmatmul.mubr.bf16.gmra.mxu1 %v6327_v27  ;;  %v1178_v33 = vor.u32 %v1177_v29, %v1174_v8  ;;  %v760_v36 = vshrl.u32 %v4913_v26, 16  ;;  %v763_v37 = vshll.u32 %v4913_v26, 16  ;;  %v371_v43 = vadd.f32 %v6298_v44, %v332_v14  ;;  %v992_v27 = vld [vmem:[#allocation2 + $0xbc] sm:$0x1] }
  0x79   : > { %v1188_v39 = vor.u32 %v1187_v2, %v1183_v30  ;;  %v6332_v40 = vld [vmem:[#allocation2 + $0x3c] sm:$0xf]  ;;  %v757_v41 = vor.u32 %v755_v21, %v754_v60  ;;  %v758_v42 = vrot.slane %v754_v60, 4  ;;  %v372_v49 = vadd.f32 %v6298_v44, %v333_v38 }
  0x7a   : > { %v1179_v45 = vrot.slane %v1178_v33, 4  ;;  %v6335_v46 = vld [vmem:[#allocation2 + $0x40] sm:$0xf]  ;;  %v1196_v47 = vshrl.u32 %v6332_v40, 16  ;;  %v4976_v50 = vunpack.c.l.bf16 %v5102_v35  ;;  %v1199_v53 = vshll.u32 %v6332_v40, 16 }
  0x7b   : > { %v6337_v18 = vld [vmem:[#allocation2 + $0x44] sm:$0x1]  ;;  %v1189_v52 = vrot.slane %v1188_v39, 4  ;;  %v1205_v23 = vshll.u32 %v6335_v46, 16  ;;  %v1209_v54 = vshrl.u32 %v6335_v46, 16  ;;  %v762_v63 = vrot.slane %v760_v36, 7 }
  0x7c   : > { %v1184_v55 = vsel %vm6021_vm3, %v1179_v45, %v1183_v30  ;;  %v1198_v58 = vrot.slane %v1196_v47, 4  ;;  %v1215_v61 = vshll.u32 %v6337_v18, 16  ;;  %v1201_v4 = vrot.slane %v1199_v53, 5  ;;  %v6361_v36 = vld [vmem:[%s5997_s6 + $0x68] sm:$0xff]  }
  0x7d   : > { %v1194_v9 = vsel %vm6021_vm3, %v1189_v52, %v1193_v10  ;;  %v1207_v6 = vrot.slane %v1205_v23, 5  ;;  %v1211_v13 = vrot.slane %v1209_v54, 4  ;;  %v765_v19 = vor.u32 %v763_v37, %v762_v63 }
  0x7e   : > { %v6349_v14 = vcombine.low %v1184_v55, %v1194_v9  ;;  %v1217_v12 = vrot.slane %v1215_v61, 5  ;;  %v767_v22 = vrot.slane %v762_v63, 4  ;;  %v1202_v24 = vor.u32 %v1201_v4, %v1198_v58  ;;  %v974_v55 = vld [vmem:[#allocation2 + $0x9c] sm:$0xf] }
  0x7f   : > { %v1212_v17 = vor.u32 %v1211_v13, %v1207_v6  ;;  %v968_v16 = vsel %vm6064_vm10, %v757_v41, %v967_v48  ;;  %v403_v26 = vmax.f32 %v371_v43, 0.0  ;;  %v766_v8 = vsel %vm6057_vm9, %v758_v42, %v765_v19  ;;  %v978_v13 = vld [vmem:[#allocation2 + $0xa4] sm:$0x1] }
  0x80   : > { %7913 = vst [vmem:[#allocation7_spill] sm:$0xff] %v6349_v14  ;;  %5368 = vmatprep.mubr.bf16.mxu0 %v6349_v14  ;;  %969 = vst [vmem:[#allocation2 + $0x90] sm:$0xf] %v968_v16  ;;  %v972_v29 = vsel %vm6049_vm8, %v767_v22, %v971_v25  ;;  %v404_v30 = vmax.f32 %v372_v49, 0.0  ;;  %v4977_v2 = vunpack.c.h.bf16 %v5102_v35  ;;  %v1203_v10 = vrot.slane %v1202_v24, 4 }
  0x81   : > { %v1213_v60 = vrot.slane %v1212_v17, 4  ;;  %970 = vst [vmem:[#allocation2 + $0x94] sm:$0xf] %v766_v8  ;;  %973 = vst [vmem:[#allocation2 + $0x98] sm:$0x1] %v972_v29  ;;  %v4914_v21 = vpack.c.bf16 %v403_v26, %v403_v26  ;;  %v318_v33 = vmul.f32 %v6291_v34, %v4976_v50  ;;  %v4980_v39 = vunpack.c.l.bf16 %v5103_v51 }
  0x82   : > { %v4915_v37 = vpack.c.bf16 %v404_v30, %v404_v30  ;;  %v319_v38 = vmul.f32 %v6291_v34, %v4977_v2  ;;  %v4981_v41 = vunpack.c.h.bf16 %v5103_v51  ;;  %v1208_v42 = vsel %vm6021_vm3, %v1203_v10, %v1207_v6 }
  0x83   : > { %v1218_v35 = vsel %vm6021_vm3, %v1213_v60, %v1217_v12  ;;  %v769_v43 = vshrl.u32 %v4914_v21, 16  ;;  %v772_v45 = vshll.u32 %v4914_v21, 16  ;;  %v357_v50 = vadd.f32 %v6298_v44, %v318_v33 }
  0x84   : > { %v6368_v47 = vcombine.low %v1208_v42, %v1218_v35  ;;  %v777_v48 = vshrl.u32 %v4915_v37, 16  ;;  %v780_v49 = vshll.u32 %v4915_v37, 16  ;;  %v358_v53 = vadd.f32 %v6298_v44, %v319_v38 }
  0x85   : > { %v771_v52 = vrot.slane %v769_v43, 7  ;;  %v320_v23 = vmul.f32 %v6291_v34, %v4980_v39  ;;  %v321_v54 = vmul.f32 %v6291_v34, %v4981_v41  ;;  %v389_v58 = vmax.f32 %v357_v50, 0.0 }
  0x86   : > { %7914 = vst [vmem:[#allocation8_spill] sm:$0xff] %v6368_v47  ;;  %5369 = vmatmul.mubr.bf16.gmra.mxu0 %v6368_v47  ;;  %v779_v25 = vrot.slane %v777_v48, 7  ;;  %v5008_v61 = vunpack.c.l.bf16 %v6361_v36  ;;  %v5009_v63 = vunpack.c.h.bf16 %v6361_v36  ;;  %v390_v12 = vmax.f32 %v358_v53, 0.0  ;;  %v925_v48 = vld [vmem:[#allocation2 + $0x48] sm:$0xf] }
  0x87   : > { %v6377_v9 = vld [vmem:[#allocation2 + $0x90] sm:$0xf]  ;;  %v774_v4 = vor.u32 %v772_v45, %v771_v52  ;;  %v775_v6 = vrot.slane %v771_v52, 4  ;;  %v359_v19 = vadd.f32 %v6298_v44, %v320_v23  ;;  %v4900_v51 = vpack.c.bf16 %v389_v58, %v389_v58 }
  0x88   : > { %v6380_v22 = vld [vmem:[#allocation2 + $0x94] sm:$0xf]  ;;  %v6382_v24 = vld [vmem:[#allocation2 + $0x98] sm:$0x1]  ;;  %v1364_v17 = vshrl.u32 %v6377_v9, 16  ;;  %v1367_v16 = vshll.u32 %v6377_v9, 16  ;;  %v782_v26 = vor.u32 %v780_v49, %v779_v25  ;;  %v4901_v42 = vpack.c.bf16 %v390_v12, %v390_v12 }
  0x89   : > { %v1373_v8 = vshll.u32 %v6380_v22, 16  ;;  %v1377_v29 = vshrl.u32 %v6380_v22, 16  ;;  %v1383_v30 = vshll.u32 %v6382_v24, 16  ;;  %v784_v2 = vrot.slane %v779_v25, 4 }
  0x8a   : > { %v1366_v10 = vrot.slane %v1364_v17, 4  ;;  %v1369_v60 = vrot.slane %v1367_v16, 5  ;;  %v783_v21 = vsel %vm6057_vm9, %v775_v6, %v782_v26  ;;  %v975_v33 = vsel %vm6064_vm10, %v774_v4, %v974_v55  ;;  %v929_v4 = vld [vmem:[#allocation2 + $0x50] sm:$0x1] }
  0x8b   : > { %v1375_v36 = vrot.slane %v1373_v8, 5  ;;  %v1379_v37 = vrot.slane %v1377_v29, 4  ;;  %v1385_v38 = vrot.slane %v1383_v30, 5  ;;  %976 = vst [vmem:[#allocation2 + $0x9c] sm:$0xf] %v975_v33  ;;  %v979_v39 = vsel %vm6049_vm8, %v784_v2, %v978_v13 }
  0x8c   : > { %977 = vst [vmem:[#allocation2 + $0xa0] sm:$0xf] %v783_v21  ;;  %v1370_v41 = vor.u32 %v1369_v60, %v1366_v10  ;;  %980 = vst [vmem:[#allocation2 + $0xa4] sm:$0x1] %v979_v39  ;;  %v650_v35 = vshrl.u32 %v4900_v51, 16  ;;  %v653_v43 = vshll.u32 %v4900_v51, 16  ;;  %v360_v49 = vadd.f32 %v6298_v44, %v321_v54 }
  0x8d   : > { %v1380_v45 = vor.u32 %v1379_v37, %v1375_v36  ;;  %v391_v50 = vmax.f32 %v359_v19, 0.0  ;;  %v334_v52 = vmul.f32 %v6291_v34, %v5008_v61  ;;  %v658_v25 = vshrl.u32 %v4901_v42, 16  ;;  %v932_v39 = vld [vmem:[#allocation2 + $0x54] sm:$0xf] }
  0x8e   : > { %v1371_v53 = vrot.slane %v1370_v41, 4  ;;  %v652_v23 = vrot.slane %v650_v35, 7  ;;  %v661_v55 = vshll.u32 %v4901_v42, 16  ;;  %v392_v6 = vmax.f32 %v360_v49, 0.0 }
  0x8f   : > { %v1381_v58 = vrot.slane %v1380_v45, 4  ;;  %v4902_v13 = vpack.c.bf16 %v391_v50, %v391_v50  ;;  %v335_v17 = vmul.f32 %v6291_v34, %v5009_v63  ;;  %v660_v51 = vrot.slane %v658_v25, 7 }
  0x90   : > { %v1376_v12 = vsel %vm6021_vm3, %v1371_v53, %v1375_v36  ;;  %v655_v16 = vor.u32 %v653_v43, %v652_v23  ;;  %v656_v26 = vrot.slane %v652_v23, 4  ;;  %v4903_v61 = vpack.c.bf16 %v392_v6, %v392_v6  ;;  %v5111_v53 = vld [vmem:[%s5997_s6 + $0x70] sm:$0xff]  }
  0x91   : > { %v1386_v54 = vsel %vm6021_vm3, %v1381_v58, %v1385_v38  ;;  %v667_v19 = vshrl.u32 %v4902_v13, 16  ;;  %v670_v8 = vshll.u32 %v4902_v13, 16  ;;  %v663_v10 = vor.u32 %v661_v55, %v660_v51 }
  0x92   : > { %v6402_v29 = vcombine.low %v1376_v12, %v1386_v54  ;;  %v6404_v30 = vld [vmem:[#allocation2 + $0x9c] sm:$0xf]  ;;  %v665_v63 = vrot.slane %v660_v51, 4  ;;  %v926_v60 = vsel %vm6064_vm10, %v655_v16, %v925_v48  ;;  %v675_v58 = vshrl.u32 %v4903_v61, 16 }
  0x93   : > { %v6406_v2 = vld [vmem:[#allocation2 + $0xa0] sm:$0xf]  ;;  %v6410_v21 = vld [vmem:[#allocation2 + $0xa4] sm:$0x1]  ;;  %v1388_v33 = vshrl.u32 %v6404_v30, 16  ;;  %v1391_v36 = vshll.u32 %v6404_v30, 16  ;;  %v664_v42 = vsel %vm6057_vm9, %v656_v26, %v663_v10  ;;  %v373_v16 = vadd.f32 %v6298_v44, %v334_v52 }
  0x94   : > { %7915 = vst [vmem:[#allocation9_spill] sm:$0xff] %v6402_v29  ;;  %v1397_v37 = vshll.u32 %v6406_v2, 16  ;;  %v1401_v38 = vshrl.u32 %v6406_v2, 16  ;;  %927 = vst [vmem:[#allocation2 + $0x48] sm:$0xf] %v926_v60  ;;  %5384 = vmatprep.mubr.bf16.mxu1 %v6402_v29  ;;  %v1407_v41 = vshll.u32 %v6410_v21, 16  ;;  %v930_v35 = vsel %vm6049_vm8, %v665_v63, %v929_v4 }
  0x95   : > { %v669_v43 = vrot.slane %v667_v19, 7  ;;  %v1390_v45 = vrot.slane %v1388_v33, 4  ;;  %v1393_v48 = vrot.slane %v1391_v36, 5  ;;  %928 = vst [vmem:[#allocation2 + $0x4c] sm:$0xf] %v664_v42  ;;  %v678_v12 = vshll.u32 %v4903_v61, 16 }
  0x96   : > { %v1399_v49 = vrot.slane %v1397_v37, 5  ;;  %v1403_v50 = vrot.slane %v1401_v38, 4  ;;  %931 = vst [vmem:[#allocation2 + $0x50] sm:$0x1] %v930_v35  ;;  %v1409_v23 = vrot.slane %v1407_v41, 5  ;;  %v677_v26 = vrot.slane %v675_v58, 7 }
  0x97   : > { %v672_v25 = vor.u32 %v670_v8, %v669_v43  ;;  %v673_v55 = vrot.slane %v669_v43, 4  ;;  %v1394_v6 = vor.u32 %v1393_v48, %v1390_v45  ;;  %v374_v51 = vadd.f32 %v6298_v44, %v335_v17  ;;  %v936_v63 = vld [vmem:[#allocation2 + $0x5c] sm:$0x1] }
  0x98   : > { %v1404_v13 = vor.u32 %v1403_v50, %v1399_v49  ;;  %v5012_v54 = vunpack.c.l.bf16 %v5111_v53  ;;  %v405_v60 = vmax.f32 %v373_v16, 0.0  ;;  %v5013_v8 = vunpack.c.h.bf16 %v5111_v53 }
  0x99   : > { %v933_v4 = vsel %vm6064_vm10, %v672_v25, %v932_v39  ;;  %v1395_v19 = vrot.slane %v1394_v6, 4  ;;  %v680_v36 = vor.u32 %v678_v12, %v677_v26  ;;  %v682_v37 = vrot.slane %v677_v26, 4 }
  0x9a   : > { %v1405_v10 = vrot.slane %v1404_v13, 4  ;;  %934 = vst [vmem:[#allocation2 + $0x54] sm:$0xf] %v933_v4  ;;  %v406_v61 = vmax.f32 %v374_v51, 0.0  ;;  %v336_v52 = vmul.f32 %v6291_v34, %v5012_v54  ;;  %v337_v4 = vmul.f32 %v6291_v34, %v5013_v8 }
  0x9b   : > { %v6427_v33 = vld [vmem:[#allocation2 + $0x48] sm:$0xf]  ;;  %v1400_v38 = vsel %vm6021_vm3, %v1395_v19, %v1399_v49  ;;  %v681_v45 = vsel %vm6057_vm9, %v673_v55, %v680_v36  ;;  %v937_v48 = vsel %vm6049_vm8, %v682_v37, %v936_v63  ;;  %v4916_v49 = vpack.c.bf16 %v405_v60, %v405_v60 }
  0x9c   : > { %v1410_v17 = vsel %vm6021_vm3, %v1405_v10, %v1409_v23  ;;  %v1220_v39 = vshrl.u32 %v6427_v33, 16  ;;  %v1223_v41 = vshll.u32 %v6427_v33, 16  ;;  %v6438_v35 = vld [vmem:[#allocation2 + $0x4c] sm:$0xf]  ;;  %935 = vst [vmem:[#allocation2 + $0x58] sm:$0xf] %v681_v45  ;;  %v4917_v6 = vpack.c.bf16 %v406_v61, %v406_v61 }
  0x9d   : > { %v6436_v42 = vcombine.low %v1400_v38, %v1410_v17  ;;  %v6440_v43 = vld [vmem:[#allocation2 + $0x50] sm:$0x1]  ;;  %v1229_v23 = vshll.u32 %v6438_v35, 16  ;;  %v1233_v25 = vshrl.u32 %v6438_v35, 16  ;;  %938 = vst [vmem:[#allocation2 + $0x5c] sm:$0x1] %v937_v48  ;;  %v375_v45 = vadd.f32 %v6298_v44, %v336_v52 }
  0x9e   : > { %v1222_v50 = vrot.slane %v1220_v39, 4  ;;  %v1225_v53 = vrot.slane %v1223_v41, 5  ;;  %v1239_v58 = vshll.u32 %v6440_v43, 16  ;;  %v786_v13 = vshrl.u32 %v4916_v49, 16  ;;  %v981_v61 = vld [vmem:[#allocation2 + $0xa8] sm:$0xf] }
  0x9f   : > { %7916 = vst [vmem:[#allocation10_spill] sm:$0xff] %v6436_v42  ;;  %5385 = vmatmul.mubr.bf16.gmra.mxu1 %v6436_v42  ;;  %v789_v12 = vshll.u32 %v4916_v49, 16  ;;  %v1231_v16 = vrot.slane %v1229_v23, 5  ;;  %v1235_v26 = vrot.slane %v1233_v25, 4  ;;  %v794_v10 = vshrl.u32 %v4917_v6, 16 }
  0xa0   : > { %v1226_v55 = vor.u32 %v1225_v53, %v1222_v50  ;;  %v1241_v51 = vrot.slane %v1239_v58, 5  ;;  %v788_v19 = vrot.slane %v786_v13, 7  ;;  %v797_v63 = vshll.u32 %v4917_v6, 16  ;;  %v985_v50 = vld [vmem:[#allocation2 + $0xb0] sm:$0x1] }
  0xa1   : > { %v6451_v54 = vld [vmem:[#allocation2 + $0x54] sm:$0xf]  ;;  %v1236_v36 = vor.u32 %v1235_v26, %v1231_v16  ;;  %v796_v41 = vrot.slane %v794_v10, 7  ;;  %v376_v13 = vadd.f32 %v6298_v44, %v337_v4  ;;  %vm2070_vm11 = vcmask 1042432  }
  0xa2   : > { %v1227_v60 = vrot.slane %v1226_v55, 4  ;;  %v1244_v37 = vshrl.u32 %v6451_v54, 16  ;;  %v1247_v38 = vshll.u32 %v6451_v54, 16  ;;  %v791_v17 = vor.u32 %v789_v12, %v788_v19 }
  0xa3   : > { %v792_v39 = vrot.slane %v788_v19, 4  ;;  %v1237_v8 = vrot.slane %v1236_v36, 4  ;;  %v6458_v53 = vld [vmem:[#allocation2 + $0x58] sm:$0xf]  ;;  %v799_v25 = vor.u32 %v797_v63, %v796_v41  ;;  %v801_v58 = vrot.slane %v796_v41, 4 }
  0xa4   : > { %v1232_v34 = vsel %vm6021_vm3, %v1227_v60, %v1231_v16  ;;  %v1246_v48 = vrot.slane %v1244_v37, 4  ;;  %v1249_v49 = vrot.slane %v1247_v38, 5  ;;  %v6460_v23 = vld [vmem:[#allocation2 + $0x5c] sm:$0x1]  ;;  %v982_v6 = vsel %vm6064_vm10, %v791_v17, %v981_v61  ;;  %v6476_v36 = vld [vmem:[#allocation2 + $0x14] sm:$0x1] }
  0xa5   : > { %v1242_v52 = vsel %vm6021_vm3, %v1237_v8, %v1241_v51  ;;  %v1253_v55 = vshll.u32 %v6458_v53, 16  ;;  %v1257_v16 = vshrl.u32 %v6458_v53, 16  ;;  %983 = vst [vmem:[#allocation2 + $0xa8] sm:$0xf] %v982_v6  ;;  %v1263_v19 = vshll.u32 %v6460_v23, 16 }
  0xa6   : > { %v1250_v12 = vor.u32 %v1249_v49, %v1246_v48  ;;  %v6469_v26 = vcombine.low %v1232_v34, %v1242_v52  ;;  %v800_v10 = vsel %vm6057_vm9, %v792_v39, %v799_v25  ;;  %v986_v63 = vsel %vm6049_vm8, %v801_v58, %v985_v50  ;;  %v6484_v34 = vld [vmem:[#allocation2] sm:$0xf]  ;;  %v6489_v49 = vld [vmem:[#allocation2 + $0x4] sm:$0xf]  ;;  %v6492_v25 = vld [vmem:[#allocation2 + $0xc] sm:$0xf] }
  0xa7   : > { %v1255_v4 = vrot.slane %v1253_v55, 5  ;;  %v1259_v60 = vrot.slane %v1257_v16, 4  ;;  %984 = vst [vmem:[#allocation2 + $0xac] sm:$0xf] %v800_v10  ;;  %987 = vst [vmem:[#allocation2 + $0xb0] sm:$0x1] %v986_v63 }
  0xa8   : > { %7917 = vst [vmem:[#allocation11_spill] sm:$0xff] %v6469_v26  ;;  %v1251_v44 = vrot.slane %v1250_v12, 4  ;;  %v407_v51 = vmax.f32 %v375_v45, 0.0  ;;  %5372 = vmatprep.mubr.bf16.mxu0 %v6469_v26  ;;  %v408_v38 = vmax.f32 %v376_v13, 0.0  ;;  %vm2071_vm12 = vcmask 1046532  }
  0xa9   : > { %v1260_v61 = vor.u32 %v1259_v60, %v1255_v4  ;;  %v1265_v17 = vrot.slane %v1263_v19, 5  ;;  %vm6480_vm13 = vmor %vm2070_vm11, %vm2071_vm12  ;;  %v4646_v45 = vrot.slane %v6484_v34, 9  ;;  %v2075_v50 = vrot.slane %v6489_v49, 5  ;;  %v6495_v12 = vld [vmem:[#allocation2 + $0x10] sm:$0xf] }
  0xaa   : > { %v4918_v39 = vpack.c.bf16 %v407_v51, %v407_v51  ;;  %v1256_v8 = vsel %vm6021_vm3, %v1251_v44, %v1255_v4  ;;  %v4919_v48 = vpack.c.bf16 %v408_v38, %v408_v38  ;;  %v4647_v58 = vrot.slane %v6492_v25, 9 }
  0xab   : > { %v1261_v6 = vrot.slane %v1260_v61, 4  ;;  %v2082_v55 = vrot.slane %v6495_v12, 5  ;;  %v2076_v63 = vsel %vm6480_vm13, %v4646_v45, %v2075_v50  ;;  %v2077_v44 = vrot.slane %v2075_v50, 4 }
  0xac   : > { %v803_v13 = vshrl.u32 %v4918_v39, 16  ;;  %v806_v52 = vshll.u32 %v4918_v39, 16  ;;  %v6498_v16 = vld [vmem:[#allocation2 + $0xa8] sm:$0xf]  ;;  %v811_v19 = vshrl.u32 %v4919_v48, 16  ;;  %v814_v10 = vshll.u32 %v4919_v48, 16 }
  0xad   : > { %v1266_v4 = vsel %vm6021_vm3, %v1261_v6, %v1265_v17  ;;  %v1412_v60 = vshrl.u32 %v6498_v16, 16  ;;  %v1415_v51 = vshll.u32 %v6498_v16, 16  ;;  %v7921_v48 = vrot.slane %v5999_v7, 5 }
  0xae   : > { %v805_v38 = vrot.slane %v803_v13, 7  ;;  %v6506_v61 = vcombine.low %v1256_v8, %v1266_v4  ;;  %v6508_v39 = vld [vmem:[#allocation2 + $0xac] sm:$0xf]  ;;  %v6510_v37 = vld [vmem:[#allocation2 + $0xb0] sm:$0x1]  ;;  %v813_v56 = vrot.slane %v811_v19, 7  ;;  %v2083_v17 = vsel %vm6480_vm13, %v4647_v58, %v2082_v55 }
  0xaf   : > { %v2079_v45 = vsel %vm6480_vm13, %v2077_v44, %v7921_v48  ;;  %v1414_v50 = vrot.slane %v1412_v60, 4  ;;  %v1417_v6 = vrot.slane %v1415_v51, 5  ;;  %v1421_v42 = vshll.u32 %v6508_v39, 16  ;;  %v988_v13 = vld [vmem:[#allocation2 + $0xb4] sm:$0xf] }
  0xb0   : > { %7920 = vst [vmem:[#allocation12_spill] sm:$0xff] %v6506_v61  ;;  %v1425_v8 = vshrl.u32 %v6508_v39, 16  ;;  %5373 = vmatmul.mubr.bf16.gmra.mxu0 %v6506_v61  ;;  %v1431_v4 = vshll.u32 %v6510_v37, 16  ;;  %v808_v19 = vor.u32 %v806_v52, %v805_v38  ;;  %v809_v29 = vrot.slane %v805_v38, 4  ;;  %v6531_v38 = vld [vmem:[#allocation2 + $0x1c] sm:$0xf] }
  0xb1   : > { %v816_v7 = vor.u32 %v814_v10, %v813_v56  ;;  %v1418_v57 = vor.u32 %v1417_v6, %v1414_v50  ;;  %v1423_v44 = vrot.slane %v1421_v42, 5  ;;  %v818_v31 = vrot.slane %v813_v56, 4  ;;  %v6528_v42 = vld [vmem:[#allocation2 + $0x18] sm:$0xf]  ;;  %v5900_v50 = vld [vmem:[#allocation2 + $0x20] sm:$0x1] }
  0xb2   : > { %v1427_v48 = vrot.slane %v1425_v8, 4  ;;  %v1433_v58 = vrot.slane %v1431_v4, 5  ;;  %v989_v51 = vsel %vm6064_vm10, %v808_v19, %v988_v13  ;;  %v4678_v32 = vcombine.low %v2076_v63, %v2079_v45  ;;  %v6544_v8 = vld [vmem:[#allocation2 + $0x24] sm:$0xf]  ;;  %v5903_v4 = vld [vmem:[#allocation2 + $0x2c] sm:$0x1] }
  0xb3   : > { %v817_v60 = vsel %vm6057_vm9, %v809_v29, %v816_v7  ;;  %v1419_v26 = vrot.slane %v1418_v57, 4  ;;  %990 = vst [vmem:[#allocation2 + $0xb4] sm:$0xf] %v989_v51  ;;  %v993_v52 = vsel %vm6049_vm8, %v818_v31, %v992_v27  ;;  %v2084_v10 = vrot.slane %v2082_v55, 4 }
  0xb4   : > { %v1428_v61 = vor.u32 %v1427_v48, %v1423_v44  ;;  %991 = vst [vmem:[#allocation2 + $0xb8] sm:$0xf] %v817_v60  ;;  %994 = vst [vmem:[#allocation2 + $0xbc] sm:$0x1] %v993_v52  ;;  %5456 = vmatprep.mubr.bf16.mxu0 %v4678_v32  ;;  %v4648_v56 = vrot.slane %v6528_v42, 9  ;;  %v2089_v29 = vrot.slane %v6531_v38, 5 }
  0xb5   : > { %v2092_v63 = vrot.slane %v5900_v50, 5  ;;  %v1424_v57 = vsel %vm6021_vm3, %v1419_v26, %v1423_v44  ;;  %v7922_v6 = vrot.slane %v6476_v36, 5  ;;  %v4649_v13 = vrot.slane %v6544_v8, 9  ;;  %v5832_v26 = vld [vmem:[%s7863_s1 + $0x130] sm:$0xff]  }
  0xb6   : > { %v1429_v45 = vrot.slane %v1428_v61, 4  ;;  %v2090_v27 = vsel %vm6480_vm13, %v4648_v56, %v2089_v29  ;;  %v2091_v55 = vrot.slane %v2089_v29, 4  ;;  %v6552_v61 = vld [vmem:[#allocation2 + $0x28] sm:$0xf]  ;;  %v2099_v19 = vrot.slane %v5903_v4, 5 }
  0xb7   : > { %v2086_v31 = vsel %vm6480_vm13, %v2084_v10, %v7922_v6  ;;  %v4650_v48 = vrot.slane %v6311_v0, 9  ;;  %v2103_v60 = vrot.slane %v6313_v5, 5  ;;  %v2106_v10 = vrot.slane %v6318_v15, 5  ;;  %v5836_v56 = vld [vmem:[%s7863_s1 + $0x128] sm:$0xff]  }
  0xb8   : > { %v6540_v32 = vcombine.low %v2083_v17, %v2086_v31  ;;  %v1434_v36 = vsel %vm6021_vm3, %v1429_v45, %v1433_v58  ;;  %v2096_v17 = vrot.slane %v6552_v61, 5  ;;  %v2093_v44 = vsel %vm6480_vm13, %v2091_v55, %v2092_v63  ;;  %v5904_v58 = vld [vmem:[%s7863_s1 + $0x138] sm:$0xff]  }
  0xb9   : > { %v6555_v7 = vcombine.low %v1424_v57, %v1434_v36  ;;  %v6565_v51 = vcombine.low %v2090_v27, %v2093_v44  ;;  %v2104_v57 = vsel %vm6480_vm13, %v4650_v48, %v2103_v60  ;;  %v2105_v45 = vrot.slane %v2103_v60, 4 }
  0xba   : > { %7923 = vst [vmem:[#allocation13_spill] sm:$0xff] %v6540_v32  ;;  %5457 = vmatmul.mubr.bf16.vlgmr.msra.gmra.mxu0 %v6540_v32  ;;  %v2098_v52 = vrot.slane %v2096_v17, 4  ;;  %v6572_v29 = vld [vmem:[#allocation2 + $0xb4] sm:$0xf]  ;;  %v2097_v63 = vsel %vm6480_vm13, %v4649_v13, %v2096_v17  ;;  %v4651_v15 = vrot.slane %v6332_v40, 9  ;;  %v2110_v44 = vrot.slane %v6335_v46, 5 }
  0xbb   : > { %7924 = vst [vmem:[#allocation14_spill] sm:$0xff] %v6555_v7  ;;  %5537 = vmatpush3.bf16.msra.mxu0 %v5904_v58  ;;  %7925 = vst [vmem:[#allocation15_spill] sm:$0xff] %v6565_v51  ;;  %5388 = vmatprep.mubr.bf16.mxu1 %v6555_v7  ;;  %v6574_v50 = vld [vmem:[#allocation2 + $0xb8] sm:$0xf]  ;;  %v6581_v6 = vld [vmem:[#allocation2 + $0xbc] sm:$0x1]  ;;  %v2107_v4 = vsel %vm6480_vm13, %v2105_v45, %v2106_v10 }
  0xbc   : > { %5538 = vmatprep.subr.bf16.mxu0 %v5832_v26  ;;  %v1436_v31 = vshrl.u32 %v6572_v29, 16  ;;  %v1439_v27 = vshll.u32 %v6572_v29, 16  ;;  %v1445_v55 = vshll.u32 %v6574_v50, 16  ;;  %v1449_v36 = vshrl.u32 %v6574_v50, 16  ;;  %5460 = vmatprep.mubr.bf16.mxu0 %v6565_v51 }
  0xbd   : > { %v1455_v13 = vshll.u32 %v6581_v6, 16  ;;  %v2100_v17 = vsel %vm6480_vm13, %v2098_v52, %v2099_v19  ;;  %v6596_v14 = vcombine.low %v2104_v57, %v2107_v4  ;;  %v5840_v19 = vld [vmem:[%s7863_s1 + $0x120] sm:$0xff]   ;;  %v2112_v10 = vrot.slane %v2110_v44, 4 }
  0xbe   : > { %v1438_v48 = vrot.slane %v1436_v31, 4  ;;  %v1441_v60 = vrot.slane %v1439_v27, 5  ;;  %v1447_v58 = vrot.slane %v1445_v55, 5  ;;  %v1451_v32 = vrot.slane %v1449_v36, 4 }
  0xbf   : > { %5539 = vmatpush3.bf16.msra.mxu0 %v5832_v26  ;;  %v1457_v7 = vrot.slane %v1455_v13, 5  ;;  %v6594_v47 = vcombine.low %v2097_v63, %v2100_v17  ;;  %v2113_v45 = vrot.slane %v6337_v18, 5  ;;  %v2111_v26 = vsel %vm6480_vm13, %v4651_v15, %v2110_v44 }
  0xc0   : > { %5540 = vmatprep.subr.bf16.mxu0 %v5836_v56  ;;  %v1442_v52 = vor.u32 %v1441_v60, %v1438_v48  ;;  %v1452_v51 = vor.u32 %v1451_v32, %v1447_v58  ;;  %v4652_v63 = vrot.slane %v6427_v33, 9  ;;  %v2117_v57 = vrot.slane %v6438_v35, 5 }
  0xc1   : > { %v2120_v31 = vrot.slane %v6440_v43, 5  ;;  %v2114_v32 = vsel %vm6480_vm13, %v2112_v10, %v2113_v45  ;;  %v6613_v18 = vcombine.low %v6427_v33, %v6438_v35  ;;  %v5844_v43 = vld [vmem:[%s7863_s1 + $0x118] sm:$0xff]   ;;  %v2124_v33 = vrot.slane %v6458_v53, 5  ;;  %v5907_v10 = vld [vmem:[#allocation2 + $0x68] sm:$0x1] }
  0xc2   : > { %5461 = vmatmul.mubr.bf16.gmra.mxu0 %v6594_v47  ;;  %v1443_v27 = vrot.slane %v1442_v52, 4  ;;  %v1453_v55 = vrot.slane %v1452_v51, 4  ;;  %v2118_v15 = vsel %vm6480_vm13, %v4652_v63, %v2117_v57  ;;  %v2119_v36 = vrot.slane %v2117_v57, 4  ;;  %v6653_v57 = vld [vmem:[#allocation2 + $0x70] sm:$0xf] }
  0xc3   : > { %5464 = vmatprep.mubr.bf16.mxu0 %v6596_v14  ;;  %5541 = vmatpush3.bf16.msra.mxu0 %v5836_v56  ;;  %v4622_v56 = vcombine.low %v6484_v34, %v6489_v49  ;;  %v6629_v17 = vcombine.low %v2111_v26, %v2114_v32  ;;  %v4653_v44 = vrot.slane %v6451_v54, 9  ;;  %v2126_v60 = vrot.slane %v2124_v33, 4  ;;  %v6641_v49 = vld [vmem:[#allocation2 + $0x60] sm:$0xf]  ;;  %v5848_v26 = vld [vmem:[%s7863_s1 + $0x110] sm:$0xff]  }
  0xc4   : > { %5542 = vmatprep.subr.bf16.mxu0 %v5840_v19  ;;  %v1448_v51 = vsel %vm6021_vm3, %v1443_v27, %v1447_v58  ;;  %v1458_v13 = vsel %vm6021_vm3, %v1453_v55, %v1457_v7  ;;  %v2121_v4 = vsel %vm6480_vm13, %v2119_v36, %v2120_v31  ;;  %v2127_v58 = vrot.slane %v6460_v23, 5  ;;  %v6637_v7 = vld [vmem:[#allocation2 + $0x64] sm:$0xf] }
  0xc5   : > { %v6627_v35 = vcombine.low %v1448_v51, %v1458_v13  ;;  %v6634_v48 = vcombine.low %v2118_v15, %v2121_v4  ;;  %v2131_v34 = vrot.slane %v6637_v7, 5  ;;  %v4654_v52 = vrot.slane %v6641_v49, 9  ;;  %v6664_v15 = vld [vmem:[#allocation2 + $0x7c] sm:$0xf]  ;;  %v5852_v51 = vld [vmem:[%s7863_s1 + $0x108] sm:$0xff]  }
  0xc6   : > { %v2134_v45 = vrot.slane %v5907_v10, 5  ;;  %v2128_v63 = vsel %vm6480_vm13, %v2126_v60, %v2127_v58  ;;  %v2138_v31 = vrot.slane %v6653_v57, 5  ;;  %v6658_v27 = vcombine.low %v6492_v25, %v6495_v12  ;;  %v5830_v25 = vld [vmem:[%s7863_s1 + $0xf0] sm:$0xff]   ;;  %v6679_v13 = vld [vmem:[#allocation2 + $0x6c] sm:$0xf]  ;;  %v5856_v10 = vld [vmem:[%s7863_s1 + $0x100] sm:$0xff]  }
  0xc7   : > { %7926 = vst [vmem:[#allocation16_spill] sm:$0xff] %v6627_v35  ;;  %7927 = vst [vmem:[#allocation17_spill] sm:$0xff] %v6634_v48  ;;  %5543 = vmatpush3.bf16.msra.mxu0 %v5840_v19  ;;  %5389 = vmatmul.mubr.bf16.gmra.mxu1 %v6627_v35  ;;  %v2133_v23 = vrot.slane %v2131_v34, 4  ;;  %v2125_v19 = vsel %vm6480_vm13, %v4653_v44, %v2124_v33  ;;  %v2132_v55 = vsel %vm6480_vm13, %v4654_v52, %v2131_v34  ;;  %v5911_v44 = vld [vmem:[#allocation2 + $0x74] sm:$0x1]  ;;  %vm4449_vm14 = vcmask 1041408  }
  0xc8   : > { %5544 = vmatprep.subr.bf16.mxu0 %v5844_v43  ;;  %5408 = vmatprep.mubr.bf16.mxu1 %v4622_v56  ;;  %v2145_v36 = vrot.slane %v6664_v15, 5  ;;  %v6677_v12 = vcombine.low %v2125_v19, %v2128_v63  ;;  %v4655_v56 = vrot.slane %v6679_v13, 9  ;;  %v2140_v4 = vrot.slane %v2138_v31, 4  ;;  %v5913_v34 = vld [vmem:[#allocation2 + $0x80] sm:$0x1] }
  0xc9   : > { %v2135_v32 = vsel %vm6480_vm13, %v2133_v23, %v2134_v45  ;;  %v2141_v60 = vrot.slane %v5911_v44, 5  ;;  %v2148_v52 = vrot.slane %v5913_v34, 5  ;;  %v5914_v45 = vld [vmem:[%s7863_s1 + $0xf8] sm:$0xff]   ;;  %v2166_v23 = vrot.slane %v6406_v2, 5 }
  0xca   : > { %5465 = vmatmul.mubr.bf16.gmra.mxu0 %v6629_v17  ;;  %7928 = vst [vmem:[#allocation18_spill] sm:$0xff] %v6677_v12  ;;  %v6682_v33 = vcombine.low %v2132_v55, %v2135_v32  ;;  %v2147_v58 = vrot.slane %v2145_v36, 4  ;;  %v2169_v19 = vrot.slane %v6410_v21, 5  ;;  %v6700_v63 = vcombine.low %v6544_v8, %v6552_v61  ;;  %v5834_v55 = vld [vmem:[%s7863_s1 + $0xe8] sm:$0xff]  }
  0xcb   : > { %5468 = vmatprep.mubr.bf16.mxu0 %v6634_v48  ;;  %5545 = vmatpush3.bf16.msra.mxu0 %v5844_v43  ;;  %v6672_v43 = vcombine.low %v6528_v42, %v6531_v38  ;;  %v6685_v42 = vld [vmem:[#allocation2 + $0x78] sm:$0xf]  ;;  %v2139_v32 = vsel %vm6480_vm13, %v4655_v56, %v2138_v31  ;;  %v6710_v44 = vcombine.low %v6404_v30, %v6406_v2  ;;  %v6715_v8 = vld [vmem:[#allocation2 + $0x88] sm:$0xf]  ;;  %v2159_v2 = vrot.slane %v6380_v22, 5 }
  0xcc   : > { %5546 = vmatprep.subr.bf16.mxu0 %v5848_v26  ;;  %7929 = vst [vmem:[#allocation19_spill] sm:$0xff] %v6682_v33  ;;  %v4656_v38 = vrot.slane %v6685_v42, 9  ;;  %v2142_v21 = vsel %vm6480_vm13, %v2140_v4, %v2141_v60  ;;  %v2152_v61 = vrot.slane %v6715_v8, 5  ;;  %v6727_v56 = vcombine.low %v6498_v16, %v6508_v39  ;;  %v6732_v4 = vld [vmem:[%s7863_s1 + $0x1b8] sm:$0xff]  }
  0xcd   : > { %v5112_v60 = vld [vmem:[%s5997_s6 + $0x78] sm:$0xff]   ;;  %v4658_v48 = vrot.slane %v6377_v9, 9 }
  0xce   : > { %v2146_v31 = vsel %vm6480_vm13, %v4656_v38, %v2145_v36  ;;  %v6737_v36 = vcombine.low %v6311_v0, %v6313_v5  ;;  %v6753_v0 = vcombine.low %v6572_v29, %v6574_v50 }
  0xcf   : > { %5547 = vmatpush3.bf16.msra.mxu0 %v5848_v26  ;;  %5409 = vmatmul.mubr.bf16.vlgmr.msra.gmra.mxu1 %v6658_v27  ;;  %v4659_v26 = vrot.slane %v6404_v30, 9  ;;  %v2149_v30 = vsel %vm6480_vm13, %v2147_v58, %v2148_v52  ;;  %v5838_v52 = vld [vmem:[%s7863_s1 + $0xe0] sm:$0xff]  }
  0xd0   : > { %5548 = vmatprep.subr.bf16.mxu0 %v5852_v51  ;;  %5489 = vmatpush3.bf16.msra.mxu1 %v5914_v45  ;;  %v2168_v45 = vrot.slane %v2166_v23, 4  ;;  %v6755_v5 = vcombine.low %v2146_v31, %v2149_v30  ;;  %v5842_v30 = vld [vmem:[%s7863_s1 + $0xd8] sm:$0xff]  }
  0xd1   : > { %5412 = vmatprep.mubr.bf16.mxu1 %v6672_v43  ;;  %5490 = vmatprep.subr.bf16.mxu1 %v5830_v25  ;;  %v2167_v34 = vsel %vm6480_vm13, %v4659_v26, %v2166_v23  ;;  %v6747_v26 = vcombine.low %v2139_v32, %v2142_v21  ;;  %v5917_v23 = vld [vmem:[#allocation2 + $0x8c] sm:$0x1]  ;;  %v2161_v32 = vrot.slane %v2159_v2, 4  ;;  %v2162_v21 = vrot.slane %v6382_v24, 5 }
  0xd2   : > { %5469 = vmatmul.mubr.bf16.gmra.mxu0 %v6677_v12  ;;  %v2170_v58 = vsel %vm6480_vm13, %v2168_v45, %v2169_v19  ;;  %v2154_v12 = vrot.slane %v2152_v61, 4  ;;  %v5016_v19 = vunpack.c.l.bf16 %v5112_v60  ;;  %v5017_v45 = vunpack.c.h.bf16 %v5112_v60  ;;  %v5919_v60 = vld [vmem:[%s7865_s3] ss:$0 sm:$0xff] }
  0xd3   : > { %5472 = vmatprep.mubr.bf16.mxu0 %v6682_v33  ;;  %5549 = vmatpush3.bf16.msra.mxu0 %v5852_v51  ;;  %v6739_v51 = vld [vmem:[#allocation2 + $0x84] sm:$0xf]  ;;  %v6749_v33 = vcombine.low %v2167_v34, %v2170_v58  ;;  %v5918_v34 = vld [vmem:[%s7864_s2] ss:$0 sm:$0xff] }
  0xd4   : > { %5550 = vmatprep.subr.bf16.mxu0 %v5856_v10  ;;  %5491 = vmatpush3.bf16.msra.mxu1 %v5830_v25  ;;  %v4657_v38 = vrot.slane %v6739_v51, 9  ;;  %v2155_v25 = vrot.slane %v5917_v23, 5  ;;  %v338_v31 = vmul.f32 %v5918_v34, %v5016_v19  ;;  %v6779_v19 = vcombine.low %v6332_v40, %v6335_v46 }
  0xd5   : > { %5492 = vmatprep.subr.bf16.mxu1 %v5834_v55 }
  0xd6   : > { %v2153_v24 = vsel %vm6480_vm13, %v4657_v38, %v2152_v61  ;;  %v377_v58 = vadd.f32 %v5919_v60, %v338_v31  ;;  %v2173_v61 = vrot.slane %v6508_v39, 5  ;;  %v5846_v31 = vld [vmem:[%s7863_s1 + $0xd0] sm:$0xff]   ;;  %v2176_v39 = vrot.slane %v6510_v37, 5 }
  0xd7   : > { %5551 = vmatpush3.bf16.msra.mxu0 %v5856_v10  ;;  %5413 = vmatmul.mubr.bf16.gmra.mxu1 %v6700_v63  ;;  %v339_v10 = vmul.f32 %v5918_v34, %v5017_v45  ;;  %v2160_v45 = vsel %vm6480_vm13, %v4658_v48, %v2159_v2  ;;  %v2163_v34 = vsel %vm6480_vm13, %v2161_v32, %v2162_v21  ;;  %v4660_v48 = vrot.slane %v6498_v16, 9 }
  0xd8   : > { %5632 = vmatprep.subr.bf16.mxu0 %v6732_v4  ;;  %5416 = vmatprep.mubr.bf16.mxu1 %v6737_v36  ;;  %v6791_v40 = vcombine.low %v2160_v45, %v2163_v34  ;;  %v2175_v2 = vrot.slane %v2173_v61, 4  ;;  %v995_v34 = vld [vmem:[#allocation2 + $0xc0] sm:$0xf] }
  0xd9   : > { %5493 = vmatpush3.bf16.msra.mxu1 %v5834_v55  ;;  %v2156_v55 = vsel %vm6480_vm13, %v2154_v12, %v2155_v25  ;;  %v378_v23 = vadd.f32 %v5919_v60, %v339_v10  ;;  %v409_v12 = vmax.f32 %v377_v58, 0.0  ;;  %v2180_v60 = vrot.slane %v6574_v50, 5  ;;  %v999_v50 = vld [vmem:[#allocation2 + $0xc8] sm:$0x1] }
  0xda   : > { %5494 = vmatprep.subr.bf16.mxu1 %v5838_v52  ;;  %5473 = vmatmul.mubr.bf16.gmra.mxu0 %v6747_v26  ;;  %v6786_v25 = vcombine.low %v2153_v24, %v2156_v55  ;;  %v5850_v55 = vld [vmem:[%s7863_s1 + $0xc8] sm:$0xff]   ;;  %v6809_v58 = vcombine.low %v6641_v49, %v6637_v7  ;;  %v2177_v45 = vsel %vm6480_vm13, %v2175_v2, %v2176_v39  ;;  %v2183_v7 = vrot.slane %v6581_v6, 5  ;;  %v5854_v49 = vld [vmem:[%s7863_s1 + $0xc0] sm:$0xff]  }
  0xdb   : > { %5476 = vmatprep.mubr.bf16.mxu0 %v6755_v5  ;;  %v410_v38 = vmax.f32 %v378_v23, 0.0  ;;  %v4920_v46 = vpack.c.bf16 %v409_v12, %v409_v12  ;;  %v2174_v23 = vsel %vm6480_vm13, %v4660_v48, %v2173_v61  ;;  %v6845_v6 = vcombine.low %v6685_v42, %v6664_v15 }
  0xdc   : > { %v6820_v61 = vcombine.low %v2174_v23, %v2177_v45  ;;  %v6859_v15 = vcombine.low %v6377_v9, %v6380_v22  ;;  %v5864_v9 = vld [vmem:[%s7863_s1 + $0x1a0] sm:$0xff]   ;;  %v7932_v45 = vld [vmem:[#allocation11_spill] sm:$0xff] }
  0xdd   : > { %5495 = vmatpush3.bf16.msra.mxu1 %v5838_v52  ;;  %v4921_v10 = vpack.c.bf16 %v410_v38, %v410_v38  ;;  %v820_v52 = vshrl.u32 %v4920_v46, 16  ;;  %v823_v32 = vshll.u32 %v4920_v46, 16 }
  0xde   : > { %5496 = vmatprep.subr.bf16.mxu1 %v5842_v30 }
  0xdf   : > { %5417 = vmatmul.mubr.bf16.gmra.mxu1 %v6779_v19  ;;  %v828_v21 = vshrl.u32 %v4921_v10, 16  ;;  %v831_v24 = vshll.u32 %v4921_v10, 16  ;;  %v822_v16 = vrot.slane %v820_v52, 7 }
  0xe0   : > { %5420 = vmatprep.mubr.bf16.mxu1 %v6613_v18 }
  0xe1   : > { %5497 = vmatpush3.bf16.msra.mxu1 %v5842_v30  ;;  %v830_v37 = vrot.slane %v828_v21, 7  ;;  %v6805_v30 = vcombine.low %v6451_v54, %v6458_v53  ;;  %v825_v12 = vor.u32 %v823_v32, %v822_v16  ;;  %v826_v38 = vrot.slane %v822_v16, 4  ;;  %v5866_v32 = vld [vmem:[%s7863_s1 + $0x198] sm:$0xff]  }
  0xe2   : > { %5477 = vmatmul.mubr.bf16.gmra.mxu0 %v6786_v25  ;;  %5498 = vmatprep.subr.bf16.mxu1 %v5846_v31  ;;  %v4661_v54 = vrot.slane %v6572_v29, 9  ;;  %v2182_v53 = vrot.slane %v2180_v60, 4  ;;  %v6841_v29 = vcombine.low %v6679_v13, %v6653_v57  ;;  %v6855_v57 = vcombine.low %v6739_v51, %v6715_v8  ;;  %v5860_v13 = vld [vmem:[%s7863_s1 + $0x1b0] sm:$0xff]   ;;  %v7930_v8 = vld [vmem:[#allocation7_spill] sm:$0xff]  ;;  %v7931_v51 = vld [vmem:[#allocation8_spill] sm:$0xff] }
  0xe3   : > { %5480 = vmatprep.mubr.bf16.mxu0 %v6791_v40  ;;  %v833_v46 = vor.u32 %v831_v24, %v830_v37  ;;  %v835_v10 = vrot.slane %v830_v37, 4  ;;  %v5868_v37 = vld [vmem:[%s7863_s1 + $0x190] sm:$0xff]  }
  0xe4   : > { %v2181_v62 = vsel %vm6480_vm13, %v4661_v54, %v2180_v60  ;;  %v2184_v11 = vsel %vm6480_vm13, %v2182_v53, %v2183_v7  ;;  %v6923_v54 = vld [vmem:[%s7863_s1 + $0x238] sm:$0xff]   ;;  %v5863_v53 = vld [vmem:[%s7863_s1 + $0x160] sm:$0xff]   ;;  %v7936_v7 = vld [vmem:[#allocation5_spill] sm:$0xff] }
  0xe5   : > { %5499 = vmatpush3.bf16.msra.mxu1 %v5846_v31  ;;  %v834_v48 = vsel %vm6057_vm9, %v826_v38, %v833_v46  ;;  %v996_v31 = vsel %vm6064_vm10, %v825_v12, %v995_v34  ;;  %v1000_v2 = vsel %vm6049_vm8, %v835_v10, %v999_v50  ;;  %v6847_v39 = vcombine.low %v2181_v62, %v2184_v11  ;;  %v7933_v34 = vld [vmem:[#allocation12_spill] sm:$0xff]  ;;  %v5870_v50 = vld [vmem:[%s7863_s1 + $0x188] sm:$0xff]   ;;  %v5859_v12 = vld [vmem:[%s7863_s1 + $0x170] sm:$0xff]  }
  0xe6   : > { %5500 = vmatprep.subr.bf16.mxu1 %v5850_v55  ;;  %997 = vst [vmem:[#allocation2 + $0xc0] sm:$0xf] %v996_v31  ;;  %998 = vst [vmem:[#allocation2 + $0xc4] sm:$0xf] %v834_v48  ;;  %v5861_v38 = vld [vmem:[%s7863_s1 + $0x168] sm:$0xff]   ;;  %v7934_v46 = vld [vmem:[#allocation3_spill] sm:$0xff] }
  0xe7   : > { %5421 = vmatmul.mubr.bf16.gmra.mxu1 %v6805_v30  ;;  %1001 = vst [vmem:[#allocation2 + $0xc8] sm:$0x1] %v1000_v2  ;;  %v7935_v10 = vld [vmem:[#allocation4_spill] sm:$0xff]  ;;  %v7937_v48 = vld [vmem:[#allocation6_spill] sm:$0xff] }
  0xe8   : > { %5424 = vmatprep.mubr.bf16.mxu1 %v6809_v58  ;;  %v5867_v11 = vld [vmem:[%s7863_s1 + $0x150] sm:$0xff]  }
  0xe9   : > { %5501 = vmatpush3.bf16.msra.mxu1 %v5850_v55 }
  0xea   : > { %5481 = vmatmul.mubr.bf16.gmra.mxu0 %v6749_v33  ;;  %5502 = vmatprep.subr.bf16.mxu1 %v5854_v49 }
  0xeb   : > { %5484 = vmatprep.mubr.bf16.mxu0 %v6820_v61 }
  0xed   : > { %5503 = vmatpush3.bf16.msra.mxu1 %v5854_v49  ;;  %v6876_v22 = vld [vmem:[#allocation2 + $0xc4] sm:$0xf]  ;;  %v5865_v49 = vld [vmem:[%s7863_s1 + $0x158] sm:$0xff]  }
  0xee   : > { %5584 = vmatprep.subr.bf16.mxu1 %v5857_v3  ;;  %v3060_v42 = vrot.slane %v6876_v22, 5  ;;  %v6888_v21 = vld [vmem:[#allocation2 + $0xc8] sm:$0x1]  ;;  %v2785_v62 = vshrl.u32 %v6876_v22, 16 }
  0xef   : > { %5425 = vmatmul.mubr.bf16.gmra.mxu1 %v6841_v29  ;;  %v3063_v60 = vrot.slane %v6888_v21, 5 }
  0xf0   : > { %5428 = vmatprep.mubr.bf16.mxu1 %v6845_v6  ;;  %v3062_v24 = vrot.slane %v3060_v42, 4 }
  0xf2   : > { %5485 = vmatmul.mubr.bf16.gmra.mxu0 %v6847_v39  ;;  %v3064_v16 = vsel %vm6480_vm13, %v3062_v24, %v3063_v60  ;;  %v7939_v24 = vld [vmem:[#allocation10_spill] sm:$0xff] }
  0xf3   : > { %5552 = vmatprep.mubr.bf16.mxu0 %v6129_v59  ;;  %v5862_v59 = vld [vmem:[%s7863_s1 + $0x1a8] sm:$0xff]  }
  0xf7   : > { %5429 = vmatmul.mubr.bf16.gmra.mxu1 %v6855_v57 }
  0xf8   : > { %5432 = vmatprep.mubr.bf16.mxu1 %v6859_v15 }
  0xfa   : > { %5553 = vmatmul.mubr.bf16.vlgmr.msra.gmra.mxu0 %v6220_v1 }
  0xfb   : > { %5633 = vmatpush3.bf16.msra.mxu0 %v6732_v4  ;;  %5556 = vmatprep.mubr.bf16.mxu0 %v6249_v20  ;;  %v6881_v4 = vld [vmem:[#allocation2 + $0xc0] sm:$0xf] }
  0xfc   : > { %5634 = vmatprep.subr.bf16.mxu0 %v5860_v13  ;;  %v4752_v52 = vrot.slane %v6881_v4, 9  ;;  %v2772_v31 = vshrl.u32 %v6881_v4, 16  ;;  %v2775_v2 = vshll.u32 %v6881_v4, 16 }
  0xfe   : > { %v3061_v55 = vsel %vm6480_vm13, %v4752_v52, %v3060_v42  ;;  %v2787_v42 = vrot.slane %v2785_v62, 4  ;;  %v7938_v52 = vld [vmem:[#allocation9_spill] sm:$0xff]  ;;  %v6980_v62 = vld [vmem:[#allocation2 + $0xd0] sm:$0xf] }
  0xff   : > { %5635 = vmatpush3.bf16.msra.mxu0 %v5860_v13  ;;  %5433 = vmatmul.mubr.bf16.gmra.mxu1 %v6710_v44  ;;  %v6899_v23 = vcombine.low %v3061_v55, %v3064_v16  ;;  %v2774_v13 = vrot.slane %v2772_v31, 4  ;;  %v2791_v16 = vshll.u32 %v6888_v21, 16  ;;  %v6960_v21 = vld [vmem:[%s7863_s1 + $0x1f8] sm:$0xff]  }
 0x100   : > { %5636 = vmatprep.subr.bf16.mxu0 %v5862_v59  ;;  %5436 = vmatprep.mubr.bf16.mxu1 %v6727_v56 }
 0x102   : > { %5557 = vmatmul.mubr.bf16.gmra.mxu0 %v7930_v8 }
 0x103   : > { %5560 = vmatprep.mubr.bf16.mxu0 %v7931_v51  ;;  %5637 = vmatpush3.bf16.msra.mxu0 %v5862_v59  ;;  %v2777_v59 = vrot.slane %v2775_v2, 5  ;;  %v5877_v2 = vld [vmem:[%s7863_s1 + $0x230] sm:$0xff]  }
 0x104   : > { %5638 = vmatprep.subr.bf16.mxu0 %v5864_v9 }
 0x105   : > { %v2778_v55 = vor.u32 %v2777_v59, %v2774_v13  ;;  %v3601_v59 = vshll.u32 %v6980_v62, 16 }
 0x107   : > { %5639 = vmatpush3.bf16.msra.mxu0 %v5864_v9  ;;  %5437 = vmatmul.mubr.bf16.gmra.mxu1 %v6753_v0 }
 0x108   : > { %5640 = vmatprep.subr.bf16.mxu0 %v5866_v32  ;;  %5504 = vmatprep.mubr.bf16.mxu1 %v6658_v27  ;;  %v5873_v27 = vld [vmem:[%s7863_s1 + $0x180] sm:$0xff]  }
 0x10a   : > { %5561 = vmatmul.mubr.bf16.gmra.mxu0 %v7932_v45 }
 0x10b   : > { %5564 = vmatprep.mubr.bf16.mxu0 %v7933_v34  ;;  %5641 = vmatpush3.bf16.msra.mxu0 %v5866_v32  ;;  %v5869_v32 = vld [vmem:[%s7863_s1 + $0x148] sm:$0xff]  }
 0x10c   : > { %5642 = vmatprep.subr.bf16.mxu0 %v5868_v37 }
 0x10f   : > { %5643 = vmatpush3.bf16.msra.mxu0 %v5868_v37  ;;  %5505 = vmatmul.mubr.bf16.vlgmr.msra.gmra.mxu1 %v6672_v43  ;;  %v5871_v37 = vld [vmem:[%s7863_s1 + $0x140] sm:$0xff]  }
 0x110   : > { %5644 = vmatprep.subr.bf16.mxu0 %v5870_v50  ;;  %5585 = vmatpush3.bf16.msra.mxu1 %v5857_v3  ;;  %v2781_v3 = vshll.u32 %v6876_v22, 16 }
 0x111   : > { %5508 = vmatprep.mubr.bf16.mxu1 %v6700_v63  ;;  %5586 = vmatprep.subr.bf16.mxu1 %v5859_v12 }
 0x112   : > { %5565 = vmatmul.mubr.bf16.gmra.mxu0 %v7934_v46  ;;  %v2783_v9 = vrot.slane %v2781_v3, 5  ;;  %v6978_v3 = vld [vmem:[#allocation2 + $0xcc] sm:$0xf] }
 0x113   : > { %5568 = vmatprep.mubr.bf16.mxu0 %v7935_v10  ;;  %5645 = vmatpush3.bf16.msra.mxu0 %v5870_v50  ;;  %v2779_v50 = vrot.slane %v2778_v55, 4  ;;  %v3595_v13 = vshll.u32 %v6978_v3, 16  ;;  %v3603_v55 = vrot.slane %v3601_v59, 5 }
 0x114   : > { %5646 = vmatprep.subr.bf16.mxu0 %v5873_v27  ;;  %5587 = vmatpush3.bf16.msra.mxu1 %v5859_v12  ;;  %v2788_v60 = vor.u32 %v2787_v42, %v2783_v9 }
 0x115   : > { %5588 = vmatprep.subr.bf16.mxu1 %v5861_v38 }
 0x116   : > { %v2789_v12 = vrot.slane %v2788_v60, 4 }
 0x117   : > { %5647 = vmatpush3.bf16.msra.mxu0 %v5873_v27  ;;  %5509 = vmatmul.mubr.bf16.gmra.mxu1 %v6737_v36  ;;  %v2793_v27 = vrot.slane %v2791_v16, 5 }
 0x118   : > { %5728 = vmatprep.subr.bf16.mxu0 %v6923_v54  ;;  %5512 = vmatprep.mubr.bf16.mxu1 %v6779_v19 }
 0x119   : > { %5589 = vmatpush3.bf16.msra.mxu1 %v5861_v38  ;;  %v7940_v38 = vld [vmem:[#allocation14_spill] sm:$0xff] }
 0x11a   : > { %5590 = vmatprep.subr.bf16.mxu1 %v5863_v53  ;;  %5569 = vmatmul.mubr.bf16.gmra.mxu0 %v7936_v7 }
 0x11b   : > { %5572 = vmatprep.mubr.bf16.mxu0 %v7937_v48 }
 0x11d   : > { %5591 = vmatpush3.bf16.msra.mxu1 %v5863_v53  ;;  %v2784_v53 = vsel %vm6021_vm3, %v2779_v50, %v2783_v9  ;;  %v5879_v9 = vld [vmem:[%s7863_s1 + $0x228] sm:$0xff]   ;;  %v7002_v50 = vpop.f32.mrf.mxu0 }
 0x11e   : > { %5592 = vmatprep.subr.bf16.mxu1 %v5865_v49 }
 0x11f   : > { %5513 = vmatmul.mubr.bf16.gmra.mxu1 %v6613_v18 }
 0x120   : > { %5516 = vmatprep.mubr.bf16.mxu1 %v6805_v30 }
 0x121   : > { %5593 = vmatpush3.bf16.msra.mxu1 %v5865_v49  ;;  %v2794_v49 = vsel %vm6021_vm3, %v2789_v12, %v2793_v27 }
 0x122   : > { %5573 = vmatmul.mubr.bf16.gmra.mxu0 %v7938_v52  ;;  %5594 = vmatprep.subr.bf16.mxu1 %v5867_v11  ;;  %v6967_v31 = vcombine.low %v2784_v53, %v2794_v49  ;;  %v7007_v49 = vcombine.low %v6881_v4, %v6876_v22  ;;  %v5885_v22 = vld [vmem:[%s7863_s1 + $0x210] sm:$0xff]   ;;  %v7943_v4 = vld [vmem:[#allocation13_spill] sm:$0xff] }
 0x123   : > { %5576 = vmatprep.mubr.bf16.mxu0 %v7939_v24 }
 0x124   : > { %7941 = vst [vmem:[#allocation7_spill] sm:$0xff] %v6967_v31 }
 0x125   : > { %5595 = vmatpush3.bf16.msra.mxu1 %v5867_v11  ;;  %v3592_v11 = vshrl.u32 %v6978_v3, 16 }
 0x126   : > { %5596 = vmatprep.subr.bf16.mxu1 %v5869_v32 }
 0x127   : > { %5517 = vmatmul.mubr.bf16.gmra.mxu1 %v6809_v58  ;;  %v3594_v42 = vrot.slane %v3592_v11, 4 }
 0x128   : > { %5520 = vmatprep.mubr.bf16.mxu1 %v6841_v29 }
 0x129   : > { %5597 = vmatpush3.bf16.msra.mxu1 %v5869_v32  ;;  %v3597_v32 = vrot.slane %v3595_v13, 5 }
 0x12a   : > { %5577 = vmatmul.mubr.bf16.gmra.mxu0 %v7940_v38  ;;  %5598 = vmatprep.subr.bf16.mxu1 %v5871_v37 }
 0x12b   : > { %5580 = vmatprep.mubr.bf16.mxu0 %v6627_v35 }
 0x12d   : > { %5599 = vmatpush3.bf16.msra.mxu1 %v5871_v37 }
 0x12e   : > { %5680 = vmatprep.subr.bf16.mxu1 %v6960_v21 }
 0x12f   : > { %5521 = vmatmul.mubr.bf16.gmra.mxu1 %v6845_v6 }
 0x130   : > { %5524 = vmatprep.mubr.bf16.mxu1 %v6855_v57 }
 0x132   : > { %5581 = vmatmul.mubr.bf16.gmra.mxu0 %v6967_v31 }
 0x133   : > { %5648 = vmatprep.mubr.bf16.mxu0 %v6672_v43  ;;  %v3605_v43 = vshrl.u32 %v6980_v62, 16 }
 0x135   : > { %v3607_v60 = vrot.slane %v3605_v43, 4  ;;  %v5876_v43 = vld [vmem:[%s7863_s1 + $0x1f0] sm:$0xff]  }
 0x137   : > { %5525 = vmatmul.mubr.bf16.gmra.mxu1 %v6859_v15  ;;  %v3608_v16 = vor.u32 %v3607_v60, %v3603_v55  ;;  %v7056_v60 = vpop.f32.mrf.mxu1 }
 0x138   : > { %5528 = vmatprep.mubr.bf16.mxu1 %v6710_v44 }
 0x139   : > { %v3609_v27 = vrot.slane %v3608_v16, 4 }
 0x13a   : > { %5649 = vmatmul.mubr.bf16.vlgmr.msra.gmra.mxu0 %v6700_v63  ;;  %v5881_v63 = vld [vmem:[%s7863_s1 + $0x220] sm:$0xff]  }
 0x13b   : > { %5729 = vmatpush3.bf16.msra.mxu0 %v6923_v54  ;;  %5652 = vmatprep.mubr.bf16.mxu0 %v6737_v36  ;;  %v6997_v54 = vld [vmem:[#allocation2 + $0xd4] sm:$0x1]  ;;  %v3598_v36 = vor.u32 %v3597_v32, %v3594_v42  ;;  %v7944_v42 = vld [vmem:[#allocation15_spill] sm:$0xff] }
 0x13c   : > { %5730 = vmatprep.subr.bf16.mxu0 %v5877_v2  ;;  %v3611_v37 = vshll.u32 %v6997_v54, 16 }
 0x13d   : > { %v3599_v12 = vrot.slane %v3598_v36, 4  ;;  %v5884_v36 = vld [vmem:[%s7863_s1 + $0x1d0] sm:$0xff]  }
 0x13e   : > { %v3613_v53 = vrot.slane %v3611_v37, 5  ;;  %v7945_v37 = vld [vmem:[#allocation17_spill] sm:$0xff] }
 0x13f   : > { %5731 = vmatpush3.bf16.msra.mxu0 %v5877_v2  ;;  %5529 = vmatmul.mubr.bf16.gmra.mxu1 %v6727_v56  ;;  %v5883_v2 = vld [vmem:[%s7863_s1 + $0x218] sm:$0xff]  }
 0x140   : > { %5732 = vmatprep.subr.bf16.mxu0 %v5879_v9  ;;  %5532 = vmatprep.mubr.bf16.mxu1 %v6753_v0  ;;  %v3614_v11 = vsel %vm6021_vm3, %v3609_v27, %v3613_v53  ;;  %v5886_v27 = vld [vmem:[%s7863_s1 + $0x1c8] sm:$0xff]  }
 0x142   : > { %5653 = vmatmul.mubr.bf16.gmra.mxu0 %v6779_v19  ;;  %v3604_v19 = vsel %vm6021_vm3, %v3599_v12, %v3603_v55  ;;  %v7946_v12 = vld [vmem:[#allocation18_spill] sm:$0xff] }
 0x143   : > { %5656 = vmatprep.mubr.bf16.mxu0 %v6613_v18  ;;  %5733 = vmatpush3.bf16.msra.mxu0 %v5879_v9  ;;  %v7016_v18 = vpop.f32.mrf.mxu0  ;;  %v7018_v13 = vcombine.low %v3604_v19, %v3614_v11  ;;  %v5889_v19 = vld [vmem:[%s7863_s1 + $0x1c0] sm:$0xff]  }
 0x144   : > { %5734 = vmatprep.subr.bf16.mxu0 %v5881_v63 }
 0x145   : > { %7942 = vst [vmem:[#allocation8_spill] sm:$0xff] %v7018_v13  ;;  %v7026_v59 = vpop.f32.mrf.mxu0 }
 0x147   : > { %5735 = vmatpush3.bf16.msra.mxu0 %v5881_v63  ;;  %5533 = vmatmul.mubr.bf16.gmra.mxu1 %v7007_v49  ;;  %v7035_v9 = vpop.f32.mrf.mxu0  ;;  %v7066_v63 = vpop.f32.mrf.mxu1 }
 0x148   : > { %5736 = vmatprep.subr.bf16.mxu0 %v5883_v2  ;;  %5600 = vmatprep.mubr.bf16.mxu1 %v7943_v4 }
 0x149   : > { %v7047_v32 = vpop.f32.mrf.mxu0 }
 0x14a   : > { %5657 = vmatmul.mubr.bf16.gmra.mxu0 %v6805_v30  ;;  %v5890_v30 = vld [vmem:[%s7863_s1 + $0x200] sm:$0xff]  }
 0x14b   : > { %5660 = vmatprep.mubr.bf16.mxu0 %v6809_v58  ;;  %5737 = vmatpush3.bf16.msra.mxu0 %v5883_v2  ;;  %v5878_v58 = vld [vmem:[%s7863_s1 + $0x1e8] sm:$0xff]   ;;  %v7053_v55 = vpop.f32.mrf.mxu0 }
 0x14c   : > { %5738 = vmatprep.subr.bf16.mxu0 %v5885_v22 }
 0x14f   : > { %5739 = vmatpush3.bf16.msra.mxu0 %v5885_v22  ;;  %5601 = vmatmul.mubr.bf16.vlgmr.msra.gmra.mxu1 %v7944_v42 }
 0x150   : > { %5740 = vmatprep.subr.bf16.mxu0 %v5887_v28  ;;  %5681 = vmatpush3.bf16.msra.mxu1 %v6960_v21  ;;  %v5880_v21 = vld [vmem:[%s7863_s1 + $0x1e0] sm:$0xff]  }
 0x151   : > { %5604 = vmatprep.mubr.bf16.mxu1 %v6594_v47  ;;  %5682 = vmatprep.subr.bf16.mxu1 %v5876_v43 }
 0x152   : > { %5661 = vmatmul.mubr.bf16.gmra.mxu0 %v6841_v29  ;;  %v5882_v29 = vld [vmem:[%s7863_s1 + $0x1d8] sm:$0xff]  }
 0x153   : > { %5664 = vmatprep.mubr.bf16.mxu0 %v6845_v6  ;;  %5741 = vmatpush3.bf16.msra.mxu0 %v5887_v28  ;;  %v7063_v6 = vpop.f32.mrf.mxu0  ;;  %v4794_v28 = vcombine.low %v6978_v3, %v6980_v62 }
 0x154   : > { %5742 = vmatprep.subr.bf16.mxu0 %v5890_v30  ;;  %5683 = vmatpush3.bf16.msra.mxu1 %v5876_v43 }
 0x155   : > { %5684 = vmatprep.subr.bf16.mxu1 %v5878_v58  ;;  %v7071_v16 = vpop.f32.mrf.mxu0 }
 0x157   : > { %5743 = vmatpush3.bf16.msra.mxu0 %v5890_v30  ;;  %5605 = vmatmul.mubr.bf16.gmra.mxu1 %v6596_v14 }
 0x158   : > { %5608 = vmatprep.mubr.bf16.mxu1 %v6629_v17  ;;  %5685 = vmatpush3.bf16.msra.mxu1 %v5878_v58 }
 0x159   : > { %5686 = vmatprep.subr.bf16.mxu1 %v5880_v21 }
 0x15a   : > { %5665 = vmatmul.mubr.bf16.gmra.mxu0 %v6855_v57  ;;  %v7074_v57 = vpop.f32.mrf.mxu1 }
 0x15b   : > { %5668 = vmatprep.mubr.bf16.mxu0 %v6859_v15  ;;  %v7078_v15 = vpop.f32.mrf.mxu0 }
 0x15c   : > { %5687 = vmatpush3.bf16.msra.mxu1 %v5880_v21  ;;  %v7084_v53 = vpop.f32.mrf.mxu1 }
 0x15d   : > { %5688 = vmatprep.subr.bf16.mxu1 %v5882_v29  ;;  %v7086_v2 = vpop.f32.mrf.mxu0 }
 0x15e   : > { %v7092_v11 = vpop.f32.mrf.mxu1 }
 0x15f   : > { %5609 = vmatmul.mubr.bf16.gmra.mxu1 %v7945_v37  ;;  %7948 = vst [vmem:[#allocation11_spill] sm:$0xff] %v7092_v11 }
 0x160   : > { %5612 = vmatprep.mubr.bf16.mxu1 %v7946_v12  ;;  %5689 = vmatpush3.bf16.msra.mxu1 %v5882_v29  ;;  %v7099_v22 = vpop.f32.mrf.mxu1 }
 0x161   : > { %5690 = vmatprep.subr.bf16.mxu1 %v5884_v36  ;;  %7949 = vst [vmem:[#allocation12_spill] sm:$0xff] %v7099_v22 }
 0x162   : > { %5669 = vmatmul.mubr.bf16.gmra.mxu0 %v6710_v44  ;;  %v7947_v44 = vld [vmem:[#allocation19_spill] sm:$0xff]  ;;  %v7106_v43 = vpop.f32.mrf.mxu1 }
 0x163   : > { %5672 = vmatprep.mubr.bf16.mxu0 %v6727_v56  ;;  %v7096_v56 = vpop.f32.mrf.mxu0  ;;  %7950 = vst [vmem:[#allocation3_spill] sm:$0xff] %v7106_v43 }
 0x164   : > { %5691 = vmatpush3.bf16.msra.mxu1 %v5884_v36 }
 0x165   : > { %5692 = vmatprep.subr.bf16.mxu1 %v5886_v27  ;;  %v7101_v4 = vpop.f32.mrf.mxu0 }
 0x167   : > { %5613 = vmatmul.mubr.bf16.gmra.mxu1 %v7947_v44 }
 0x168   : > { %5616 = vmatprep.mubr.bf16.mxu1 %v6747_v26  ;;  %5693 = vmatpush3.bf16.msra.mxu1 %v5886_v27 }
 0x169   : > { %5694 = vmatprep.subr.bf16.mxu1 %v5889_v19 }
 0x16a   : > { %5673 = vmatmul.mubr.bf16.gmra.mxu0 %v6753_v0 }
 0x16b   : > { %5676 = vmatprep.mubr.bf16.mxu0 %v7007_v49  ;;  %v7112_v49 = vpop.f32.mrf.mxu1 }
 0x16c   : > { %5695 = vmatpush3.bf16.msra.mxu1 %v5889_v19  ;;  %7951 = vst [vmem:[#allocation4_spill] sm:$0xff] %v7112_v49 }
 0x16d   : > { %v7119_v21 = vpop.f32.mrf.mxu1 }
 0x16e   : > { %7952 = vst [vmem:[#allocation5_spill] sm:$0xff] %v7119_v21 }
 0x16f   : > { %5617 = vmatmul.mubr.bf16.gmra.mxu1 %v6755_v5 }
 0x170   : > { %5620 = vmatprep.mubr.bf16.mxu1 %v6786_v25  ;;  %v7109_v0 = vpop.f32.mrf.mxu0 }
 0x172   : > { %5677 = vmatmul.mubr.bf16.gmra.mxu0 %v4794_v28  ;;  %v7114_v30 = vpop.f32.mrf.mxu0 }
 0x173   : > { %5744 = vmatprep.mubr.bf16.mxu0 %v7944_v42  ;;  %v7126_v42 = vpop.f32.mrf.mxu1 }
 0x174   : > { %v7116_v58 = vpop.f32.mrf.mxu0  ;;  %7953 = vst [vmem:[#allocation6_spill] sm:$0xff] %v7126_v42 }
 0x175   : > { %v7129_v28 = vpop.f32.mrf.mxu1 }
 0x176   : > { %v7121_v29 = vpop.f32.mrf.mxu0  ;;  %7954 = vst [vmem:[#allocation9_spill] sm:$0xff] %v7129_v28 }
 0x177   : > { %5621 = vmatmul.mubr.bf16.gmra.mxu1 %v6791_v40  ;;  %v7134_v21 = vpop.f32.mrf.mxu1 }
 0x178   : > { %5624 = vmatprep.mubr.bf16.mxu1 %v6749_v33  ;;  %7955 = vst [vmem:[#allocation13_spill] sm:$0xff] %v7134_v21 }
 0x17a   : > { %v5458_v36 = vpop.f32.mrf.mxu0  ;;  %5745 = vmatmul.mubr.bf16.vlgmr.msra.gmra.mxu0 %v6594_v47 }
 0x17b   : > { %5748 = vmatprep.mubr.bf16.mxu0 %v6596_v14 }
 0x17c   : > { %v2348_v27 = vpop.f32.mrf.mxu0 }
 0x17e   : > { %v5459_v19 = vpop.f32.mrf.mxu0 }
 0x17f   : > { %5625 = vmatmul.mubr.bf16.gmra.mxu1 %v6820_v61 }
 0x180   : > { %v2351_v13 = vpop.f32.mrf.mxu0  ;;  %5628 = vmatprep.mubr.bf16.mxu1 %v6847_v39 }
 0x182   : > { %v5462_v31 = vpop.f32.mrf.mxu0  ;;  %5749 = vmatmul.mubr.bf16.gmra.mxu0 %v6629_v17 }
 0x183   : > { %5752 = vmatprep.mubr.bf16.mxu0 %v7945_v37 }
 0x184   : > { %v2364_v47 = vpop.f32.mrf.mxu0 }
 0x186   : > { %v5463_v14 = vpop.f32.mrf.mxu0 }
 0x187   : > { %v7136_v35 = vpop.f32.mrf.mxu1  ;;  %5629 = vmatmul.mubr.bf16.gmra.mxu1 %v6899_v23 }
 0x188   : > { %7956 = vst [vmem:[#allocation15_spill] sm:$0xff] %v7136_v35  ;;  %v2367_v42 = vpop.f32.mrf.mxu0  ;;  %5696 = vmatprep.mubr.bf16.mxu1 %v6220_v1 }
 0x189   : > { %v7140_v28 = vpop.f32.mrf.mxu1 }
 0x18a   : > { %7957 = vst [vmem:[#allocation17_spill] sm:$0xff] %v7140_v28  ;;  %v5466_v49 = vpop.f32.mrf.mxu0  ;;  %5753 = vmatmul.mubr.bf16.gmra.mxu0 %v7946_v12 }
 0x18b   : > { %5756 = vmatprep.mubr.bf16.mxu0 %v7947_v44  ;;  %v7144_v17 = vpop.f32.mrf.mxu1 }
 0x18c   : > { %7958 = vst [vmem:[#allocation18_spill] sm:$0xff] %v7144_v17  ;;  %v2380_v37 = vpop.f32.mrf.mxu0 }
 0x18d   : > { %v7146_v21 = vpop.f32.mrf.mxu1 }
 0x18e   : > { %7959 = vst [vmem:[#allocation19_spill] sm:$0xff] %v7146_v21  ;;  %v7148_v43 = vpop.f32.mrf.mxu0 }
 0x18f   : > { %v5410_v35 = vpop.f32.mrf.mxu1  ;;  %5697 = vmatmul.mubr.bf16.vlgmr.msra.gmra.mxu1 %v6249_v20 }
 0x190   : > { %v7151_v22 = vpop.f32.mrf.mxu0  ;;  %v1936_v1 = vadd.f32 %v5410_v35, %v7002_v50  ;;  %5700 = vmatprep.mubr.bf16.mxu1 %v7930_v8 }
 0x191   : > { %v1927_v28 = vpop.f32.mrf.mxu1 }
 0x192   : > { %v7155_v12 = vpop.f32.mrf.mxu0  ;;  %5757 = vmatmul.mubr.bf16.gmra.mxu0 %v6747_v26  ;;  %v1928_v44 = vadd.f32 %v1927_v28, %v7016_v18  ;;  %v7160_v21 = vadd.f32 %v5458_v36, %v1936_v1 }
 0x193   : > { %5760 = vmatprep.mubr.bf16.mxu0 %v6755_v5  ;;  %v5411_v17 = vpop.f32.mrf.mxu1 }
 0x194   : > { %v7162_v38 = vpop.f32.mrf.mxu0  ;;  %v1939_v20 = vadd.f32 %v5411_v17, %v7026_v59  ;;  %v7165_v11 = vadd.f32 %v2348_v27, %v1928_v44 }
 0x195   : > { %v1930_v35 = vpop.f32.mrf.mxu1 }
 0x196   : > { %v7167_v8 = vpop.f32.mrf.mxu0  ;;  %v1931_v50 = vadd.f32 %v1930_v35, %v7035_v9  ;;  %v7170_v24 = vadd.f32 %v5459_v19, %v1939_v20 }
 0x197   : > { %v5414_v26 = vpop.f32.mrf.mxu1  ;;  %5701 = vmatmul.mubr.bf16.gmra.mxu1 %v7931_v51 }
 0x198   : > { %v7173_v5 = vpop.f32.mrf.mxu0  ;;  %v1952_v18 = vadd.f32 %v5414_v26, %v7047_v32  ;;  %5704 = vmatprep.mubr.bf16.mxu1 %v7932_v45  ;;  %v7177_v36 = vadd.f32 %v2351_v13, %v1931_v50 }
 0x199   : > { %v1943_v59 = vpop.f32.mrf.mxu1 }
 0x19a   : > { %v7179_v27 = vpop.f32.mrf.mxu0  ;;  %5761 = vmatmul.mubr.bf16.gmra.mxu0 %v6786_v25  ;;  %v1944_v9 = vadd.f32 %v1943_v59, %v7053_v55  ;;  %v7184_v19 = vadd.f32 %v5462_v31, %v1952_v18 }
 0x19b   : > { %5764 = vmatprep.mubr.bf16.mxu0 %v6791_v40  ;;  %v5415_v51 = vpop.f32.mrf.mxu1 }
 0x19c   : > { %v7186_v28 = vpop.f32.mrf.mxu0  ;;  %v1955_v32 = vadd.f32 %v5415_v51, %v7063_v6  ;;  %v7189_v17 = vadd.f32 %v2364_v47, %v1944_v9 }
 0x19d   : > { %v1946_v45 = vpop.f32.mrf.mxu1 }
 0x19e   : > { %v7191_v13 = vpop.f32.mrf.mxu0  ;;  %v1947_v1 = vadd.f32 %v1946_v45, %v7071_v16  ;;  %v7194_v44 = vadd.f32 %v5463_v14, %v1955_v32  ;;  %v3880_v16 = vrot.slane %v6980_v62, 5 }
 0x19f   : > { %v5418_v25 = vpop.f32.mrf.mxu1  ;;  %5705 = vmatmul.mubr.bf16.gmra.mxu1 %v7933_v34 }
 0x1a0   : > { %v7197_v40 = vpop.f32.mrf.mxu0  ;;  %v1968_v31 = vadd.f32 %v5418_v25, %v7078_v15  ;;  %5708 = vmatprep.mubr.bf16.mxu1 %v7934_v46  ;;  %v7201_v55 = vadd.f32 %v2367_v42, %v1947_v1  ;;  %v4828_v42 = vrot.slane %v6978_v3, 9  ;;  %v3882_v62 = vrot.slane %v3880_v16, 4 }
 0x1a1   : > { %v1959_v6 = vpop.f32.mrf.mxu1 }
 0x1a2   : > { %v7203_v47 = vpop.f32.mrf.mxu0  ;;  %5765 = vmatmul.mubr.bf16.gmra.mxu0 %v6749_v33  ;;  %v1960_v14 = vadd.f32 %v1959_v6, %v7086_v2  ;;  %v7209_v34 = vadd.f32 %v5466_v49, %v1968_v31  ;;  %v3883_v2 = vrot.slane %v6997_v54, 5 }
 0x1a3   : > { %5768 = vmatprep.mubr.bf16.mxu0 %v6820_v61  ;;  %v5419_v20 = vpop.f32.mrf.mxu1 }
 0x1a4   : > { %v7211_v35 = vpop.f32.mrf.mxu0  ;;  %v1971_v46 = vadd.f32 %v5419_v20, %v7096_v56  ;;  %v7214_v15 = vadd.f32 %v2380_v37, %v1960_v14  ;;  %v7960_v20 = vld [vmem:[#allocation10_spill] sm:$0xff] }
 0x1a5   : > { %v1962_v50 = vpop.f32.mrf.mxu1 }
 0x1a6   : > { %v7217_v26 = vpop.f32.mrf.mxu0  ;;  %v1963_v33 = vadd.f32 %v1962_v50, %v7101_v4  ;;  %v7222_v61 = vadd.f32 %v7148_v43, %v1971_v46  ;;  %v3884_v43 = vsel %vm6480_vm13, %v3882_v62, %v3883_v2 }
 0x1a7   : > { %v5422_v49 = vpop.f32.mrf.mxu1  ;;  %5709 = vmatmul.mubr.bf16.gmra.mxu1 %v7935_v10  ;;  %v3881_v10 = vsel %vm6480_vm13, %v4828_v42, %v3880_v16  ;;  %v7962_v42 = vld [vmem:[#allocation14_spill] sm:$0xff] }
 0x1a8   : > { %v7225_v18 = vpop.f32.mrf.mxu0  ;;  %v1984_v56 = vadd.f32 %v5422_v49, %v7109_v0  ;;  %5712 = vmatprep.mubr.bf16.mxu1 %v7936_v7  ;;  %v7230_v3 = vadd.f32 %v7151_v22, %v1963_v33  ;;  %v4845_v51 = vcombine.low %v3881_v10, %v3884_v43  ;;  %v7963_v33 = vld [vmem:[#allocation12_spill] sm:$0xff]  ;;  %v7964_v49 = vld [vmem:[#allocation3_spill] sm:$0xff] }
 0x1a9   : > { %v1975_v37 = vpop.f32.mrf.mxu1  ;;  %v7965_v43 = vld [vmem:[#allocation4_spill] sm:$0xff] }
 0x1aa   : > { %v5482_v4 = vpop.f32.mrf.mxu0  ;;  %5769 = vmatmul.mubr.bf16.gmra.mxu0 %v6847_v39  ;;  %v1976_v54 = vadd.f32 %v1975_v37, %v7114_v30  ;;  %v7240_v0 = vadd.f32 %v7155_v12, %v1984_v56 }
 0x1ab   : > { %5772 = vmatprep.mubr.bf16.mxu0 %v6899_v23  ;;  %v5423_v7 = vpop.f32.mrf.mxu1 }
 0x1ac   : > { %v2444_v22 = vpop.f32.mrf.mxu0  ;;  %v1987_v59 = vadd.f32 %v5423_v7, %v7116_v58  ;;  %v7244_v9 = vadd.f32 %v7162_v38, %v1976_v54 }
 0x1ad   : > { %v1978_v39 = vpop.f32.mrf.mxu1 }
 0x1ae   : > { %v5483_v30 = vpop.f32.mrf.mxu0  ;;  %v1979_v23 = vadd.f32 %v1978_v39, %v7121_v29  ;;  %v7248_v32 = vadd.f32 %v7167_v8, %v1987_v59  ;;  %v7966_v39 = vld [vmem:[#allocation16_spill] sm:$0xff] }
 0x1af   : > { %v5426_v41 = vpop.f32.mrf.mxu1  ;;  %5713 = vmatmul.mubr.bf16.gmra.mxu1 %v7937_v48 }
 0x1b0   : > { %v2447_v12 = vpop.f32.mrf.mxu0  ;;  %v2000_v45 = vadd.f32 %v5426_v41, %v7056_v60  ;;  %5716 = vmatprep.mubr.bf16.mxu1 %v7938_v52  ;;  %v7254_v58 = vadd.f32 %v7173_v5, %v1979_v23  ;;  %v7968_v41 = vld [vmem:[#allocation7_spill] sm:$0xff] }
 0x1b1   : > { %v1991_v38 = vpop.f32.mrf.mxu1 }
 0x1b2   : > { %v5486_v1 = vpop.f32.mrf.mxu0  ;;  %5773 = vmatmul.mubr.bf16.gmra.mxu0 %v4845_v51  ;;  %v1992_v25 = vadd.f32 %v1991_v38, %v7066_v63  ;;  %v7258_v29 = vadd.f32 %v7179_v27, %v2000_v45  ;;  %v7961_v27 = vld [vmem:[#allocation11_spill] sm:$0xff] }
 0x1b3   : > { %v5427_v8 = vpop.f32.mrf.mxu1 }
 0x1b4   : > { %v2460_v31 = vpop.f32.mrf.mxu0  ;;  %v2003_v48 = vadd.f32 %v5427_v8, %v7074_v57  ;;  %v7262_v6 = vadd.f32 %v7186_v28, %v1992_v25  ;;  %v7969_v25 = vld [vmem:[#allocation6_spill] sm:$0xff] }
 0x1b5   : > { %v1994_v60 = vpop.f32.mrf.mxu1 }
 0x1b6   : > { %v5487_v52 = vpop.f32.mrf.mxu0  ;;  %v1995_v5 = vadd.f32 %v1994_v60, %v7084_v53  ;;  %v7266_v16 = vadd.f32 %v7191_v13, %v2003_v48 }
 0x1b7   : > { %v5430_v14 = vpop.f32.mrf.mxu1  ;;  %5717 = vmatmul.mubr.bf16.gmra.mxu1 %v7960_v20 }
 0x1b8   : > { %v2463_v63 = vpop.f32.mrf.mxu0  ;;  %v2016_v46 = vadd.f32 %v5430_v14, %v7961_v27  ;;  %5720 = vmatprep.mubr.bf16.mxu1 %v7962_v42  ;;  %v7272_v57 = vadd.f32 %v7197_v40, %v1995_v5  ;;  %v7970_v5 = vld [vmem:[#allocation9_spill] sm:$0xff] }
 0x1b9   : > { %v2007_v28 = vpop.f32.mrf.mxu1  ;;  %v7971_v42 = vld [vmem:[#allocation13_spill] sm:$0xff] }
 0x1ba   : > { %v5554_v50 = vpop.f32.mrf.mxu0  ;;  %v2008_v62 = vadd.f32 %v2007_v28, %v7963_v33  ;;  %v7276_v53 = vadd.f32 %v7203_v47, %v2016_v46  ;;  %v7967_v47 = vld [vmem:[#allocation5_spill] sm:$0xff] }
 0x1bb   : > { %v5431_v13 = vpop.f32.mrf.mxu1 }
 0x1bc   : > { %v2898_v2 = vpop.f32.mrf.mxu0  ;;  %v2019_v56 = vadd.f32 %v5431_v13, %v7964_v49  ;;  %v7280_v37 = vadd.f32 %v7211_v35, %v2008_v62  ;;  %v7972_v62 = vld [vmem:[#allocation8_spill] sm:$0xff]  ;;  %v7973_v49 = vld [vmem:[#allocation15_spill] sm:$0xff] }
 0x1bd   : > { %v2010_v54 = vpop.f32.mrf.mxu1 }
 0x1be   : > { %v5555_v10 = vpop.f32.mrf.mxu0  ;;  %v2011_v7 = vadd.f32 %v2010_v54, %v7965_v43  ;;  %v7284_v40 = vadd.f32 %v7217_v26, %v2019_v56 }
 0x1bf   : > { %v5434_v59 = vpop.f32.mrf.mxu1  ;;  %5721 = vmatmul.mubr.bf16.gmra.mxu1 %v7966_v39 }
 0x1c0   : > { %v2901_v51 = vpop.f32.mrf.mxu0  ;;  %v2032_v23 = vadd.f32 %v5434_v59, %v7967_v47  ;;  %5724 = vmatprep.mubr.bf16.mxu1 %v7968_v41  ;;  %v7290_v45 = vadd.f32 %v7225_v18, %v2011_v7  ;;  %v7974_v7 = vld [vmem:[#allocation17_spill] sm:$0xff] }
 0x1c1   : > { %v2023_v35 = vpop.f32.mrf.mxu1 }
 0x1c2   : > { %v5558_v38 = vpop.f32.mrf.mxu0  ;;  %v2024_v8 = vadd.f32 %v2023_v35, %v7969_v25  ;;  %v7293_v48 = vadd.f32 %v5482_v4, %v2032_v23  ;;  %v7975_v23 = vld [vmem:[#allocation18_spill] sm:$0xff] }
 0x1c3   : > { %v5435_v60 = vpop.f32.mrf.mxu1 }
 0x1c4   : > { %v2914_v26 = vpop.f32.mrf.mxu0  ;;  %v2035_v14 = vadd.f32 %v5435_v60, %v7970_v5  ;;  %v7296_v20 = vadd.f32 %v2444_v22, %v2024_v8  ;;  %v7976_v8 = vld [vmem:[#allocation19_spill] sm:$0xff] }
 0x1c5   : > { %v2026_v27 = vpop.f32.mrf.mxu1 }
 0x1c6   : > { %v5559_v46 = vpop.f32.mrf.mxu0  ;;  %v2027_v28 = vadd.f32 %v2026_v27, %v7971_v42  ;;  %v7299_v33 = vadd.f32 %v5483_v30, %v2035_v14 }
 0x1c7   : > { %v5438_v18 = vpop.f32.mrf.mxu1  ;;  %5725 = vmatmul.mubr.bf16.gmra.mxu1 %v7972_v62 }
 0x1c8   : > { %v2917_v13 = vpop.f32.mrf.mxu0  ;;  %v2048_v56 = vadd.f32 %v5438_v18, %v7973_v49  ;;  %v7303_v4 = vadd.f32 %v2447_v12, %v2027_v28 }
 0x1c9   : > { %v2039_v54 = vpop.f32.mrf.mxu1 }
 0x1ca   : > { %v5562_v43 = vpop.f32.mrf.mxu0  ;;  %v2040_v59 = vadd.f32 %v2039_v54, %v7974_v7  ;;  %v7306_v22 = vadd.f32 %v5486_v1, %v2048_v56 }
 0x1cb   : > { %v5439_v39 = vpop.f32.mrf.mxu1 }
 0x1cc   : > { %v2930_v47 = vpop.f32.mrf.mxu0  ;;  %v2051_v41 = vadd.f32 %v5439_v39, %v7975_v23  ;;  %v7309_v30 = vadd.f32 %v2460_v31, %v2040_v59 }
 0x1cd   : > { %v2042_v35 = vpop.f32.mrf.mxu1 }
 0x1ce   : > { %v5563_v25 = vpop.f32.mrf.mxu0  ;;  %v2043_v60 = vadd.f32 %v2042_v35, %v7976_v8  ;;  %v7312_v5 = vadd.f32 %v5487_v52, %v2051_v41 }
 0x1cf   : > { %v5506_v12 = vpop.f32.mrf.mxu1 }
 0x1d0   : > { %v2933_v14 = vpop.f32.mrf.mxu0  ;;  %v2741_v27 = vadd.f32 %v5506_v12, %v7160_v21  ;;  %v7315_v42 = vadd.f32 %v2463_v63, %v2043_v60 }
 0x1d1   : > { %v2612_v1 = vpop.f32.mrf.mxu1 }
 0x1d2   : > { %v5566_v28 = vpop.f32.mrf.mxu0  ;;  %v2739_v18 = vadd.f32 %v2612_v1, %v7165_v11  ;;  %v7318_v62 = vadd.f32 %v5554_v50, %v2741_v27 }
 0x1d3   : > { %v5507_v31 = vpop.f32.mrf.mxu1 }
 0x1d4   : > { %v2946_v49 = vpop.f32.mrf.mxu0  ;;  %v2742_v56 = vadd.f32 %v5507_v31, %v7170_v24  ;;  %v7321_v54 = vadd.f32 %v2898_v2, %v2739_v18 }
 0x1d5   : > { %v2615_v52 = vpop.f32.mrf.mxu1 }
 0x1d6   : > { %v5567_v7 = vpop.f32.mrf.mxu0  ;;  %v2740_v59 = vadd.f32 %v2615_v52, %v7177_v36  ;;  %v7324_v39 = vadd.f32 %v5555_v10, %v2742_v56 }
 0x1d7   : > { %v5510_v21 = vpop.f32.mrf.mxu1 }
 0x1d8   : > { %v2949_v63 = vpop.f32.mrf.mxu0  ;;  %v2745_v23 = vadd.f32 %v5510_v21, %v7184_v19  ;;  %v7327_v41 = vadd.f32 %v2901_v51, %v2740_v59 }
 0x1d9   : > { %v2628_v11 = vpop.f32.mrf.mxu1 }
 0x1da   : > { %v5570_v50 = vpop.f32.mrf.mxu0  ;;  %v2743_v35 = vadd.f32 %v2628_v11, %v7189_v17  ;;  %v7330_v8 = vadd.f32 %v5558_v38, %v2745_v23 }
 0x1db   : > { %v5511_v24 = vpop.f32.mrf.mxu1 }
 0x1dc   : > { %v2962_v2 = vpop.f32.mrf.mxu0  ;;  %v2746_v60 = vadd.f32 %v5511_v24, %v7194_v44  ;;  %v7333_v12 = vadd.f32 %v2914_v26, %v2743_v35 }
 0x1dd   : > { %v2631_v36 = vpop.f32.mrf.mxu1 }
 0x1de   : > { %v5571_v10 = vpop.f32.mrf.mxu0  ;;  %v2744_v27 = vadd.f32 %v2631_v36, %v7201_v55  ;;  %v7336_v1 = vadd.f32 %v5559_v46, %v2746_v60 }
 0x1df   : > { %v5514_v19 = vpop.f32.mrf.mxu1 }
 0x1e0   : > { %v2965_v51 = vpop.f32.mrf.mxu0  ;;  %v2749_v18 = vadd.f32 %v5514_v19, %v7209_v34  ;;  %v7339_v31 = vadd.f32 %v2917_v13, %v2744_v27 }
 0x1e1   : > { %v2644_v17 = vpop.f32.mrf.mxu1 }
 0x1e2   : > { %v5574_v38 = vpop.f32.mrf.mxu0  ;;  %v2747_v56 = vadd.f32 %v2644_v17, %v7214_v15  ;;  %v7342_v52 = vadd.f32 %v5562_v43, %v2749_v18 }
 0x1e3   : > { %v5515_v44 = vpop.f32.mrf.mxu1 }
 0x1e4   : > { %v2978_v26 = vpop.f32.mrf.mxu0  ;;  %v2750_v59 = vadd.f32 %v5515_v44, %v7222_v61  ;;  %v7345_v21 = vadd.f32 %v2930_v47, %v2747_v56 }
 0x1e5   : > { %v2647_v55 = vpop.f32.mrf.mxu1 }
 0x1e6   : > { %v5575_v46 = vpop.f32.mrf.mxu0  ;;  %v2748_v23 = vadd.f32 %v2647_v55, %v7230_v3  ;;  %v7348_v11 = vadd.f32 %v5563_v25, %v2750_v59 }
 0x1e7   : > { %v5518_v34 = vpop.f32.mrf.mxu1 }
 0x1e8   : > { %v2981_v13 = vpop.f32.mrf.mxu0  ;;  %v2753_v35 = vadd.f32 %v5518_v34, %v7240_v0  ;;  %v7351_v24 = vadd.f32 %v2933_v14, %v2748_v23 }
 0x1e9   : > { %v2660_v15 = vpop.f32.mrf.mxu1 }
 0x1ea   : > { %v5578_v43 = vpop.f32.mrf.mxu0  ;;  %v2751_v60 = vadd.f32 %v2660_v15, %v7244_v9  ;;  %v7354_v36 = vadd.f32 %v5566_v28, %v2753_v35 }
 0x1eb   : > { %v5519_v61 = vpop.f32.mrf.mxu1 }
 0x1ec   : > { %v2994_v47 = vpop.f32.mrf.mxu0  ;;  %v2754_v27 = vadd.f32 %v5519_v61, %v7248_v32  ;;  %v7357_v19 = vadd.f32 %v2946_v49, %v2751_v60 }
 0x1ed   : > { %v2663_v3 = vpop.f32.mrf.mxu1 }
 0x1ee   : > { %v5579_v25 = vpop.f32.mrf.mxu0  ;;  %v2752_v18 = vadd.f32 %v2663_v3, %v7254_v58  ;;  %v7360_v17 = vadd.f32 %v5567_v7, %v2754_v27 }
 0x1ef   : > { %v5522_v0 = vpop.f32.mrf.mxu1 }
 0x1f0   : > { %v2997_v14 = vpop.f32.mrf.mxu0  ;;  %v2757_v56 = vadd.f32 %v5522_v0, %v7258_v29  ;;  %v7363_v44 = vadd.f32 %v2949_v63, %v2752_v18 }
 0x1f1   : > { %v2676_v9 = vpop.f32.mrf.mxu1 }
 0x1f2   : > { %v5582_v28 = vpop.f32.mrf.mxu0  ;;  %v2755_v59 = vadd.f32 %v2676_v9, %v7262_v6  ;;  %v7366_v55 = vadd.f32 %v5570_v50, %v2757_v56 }
 0x1f3   : > { %v5523_v32 = vpop.f32.mrf.mxu1 }
 0x1f4   : > { %v3010_v49 = vpop.f32.mrf.mxu0  ;;  %v2758_v23 = vadd.f32 %v5523_v32, %v7266_v16  ;;  %v7369_v34 = vadd.f32 %v2962_v2, %v2755_v59 }
 0x1f5   : > { %v2679_v58 = vpop.f32.mrf.mxu1 }
 0x1f6   : > { %v5583_v7 = vpop.f32.mrf.mxu0  ;;  %v2756_v35 = vadd.f32 %v2679_v58, %v7272_v57  ;;  %v7372_v15 = vadd.f32 %v5571_v10, %v2758_v23 }
 0x1f7   : > { %v5526_v29 = vpop.f32.mrf.mxu1 }
 0x1f8   : > { %v3013_v63 = vpop.f32.mrf.mxu0  ;;  %v2761_v60 = vadd.f32 %v5526_v29, %v7276_v53  ;;  %v7375_v61 = vadd.f32 %v2965_v51, %v2756_v35 }
 0x1f9   : > { %v2692_v6 = vpop.f32.mrf.mxu1 }
 0x1fa   : > { %v5650_v50 = vpop.f32.mrf.mxu0  ;;  %v2759_v27 = vadd.f32 %v2692_v6, %v7280_v37  ;;  %v7378_v3 = vadd.f32 %v5574_v38, %v2761_v60 }
 0x1fb   : > { %v5527_v16 = vpop.f32.mrf.mxu1 }
 0x1fc   : > { %v3432_v2 = vpop.f32.mrf.mxu0  ;;  %v2762_v18 = vadd.f32 %v5527_v16, %v7284_v40  ;;  %v7381_v0 = vadd.f32 %v2978_v26, %v2759_v27 }
 0x1fd   : > { %v2695_v57 = vpop.f32.mrf.mxu1 }
 0x1fe   : > { %v7383_v10 = vpop.f32.mrf.mxu0  ;;  %v2760_v56 = vadd.f32 %v2695_v57, %v7290_v45  ;;  %v7386_v53 = vadd.f32 %v5575_v46, %v2762_v18 }
 0x1ff   : > { %v5530_v51 = vpop.f32.mrf.mxu1 }
 0x200   : > { %7977 = vst [vmem:[#allocation10_spill] sm:$0xff] %v7386_v53  ;;  %v7388_v9 = vpop.f32.mrf.mxu0  ;;  %v2765_v37 = vadd.f32 %v5530_v51, %v7293_v48  ;;  %v7391_v38 = vadd.f32 %v2981_v13, %v2760_v56 }
 0x201   : > { %v2708_v59 = vpop.f32.mrf.mxu1 }
 0x202   : > { %7978 = vst [vmem:[#allocation11_spill] sm:$0xff] %v7391_v38  ;;  %v5654_v32 = vpop.f32.mrf.mxu0  ;;  %v2763_v40 = vadd.f32 %v2708_v59, %v7296_v20  ;;  %v7394_v26 = vadd.f32 %v5578_v43, %v2765_v37 }
 0x203   : > { %v5531_v23 = vpop.f32.mrf.mxu1 }
 0x204   : > { %v3448_v58 = vpop.f32.mrf.mxu0  ;;  %v2766_v35 = vadd.f32 %v5531_v23, %v7299_v33  ;;  %v7397_v45 = vadd.f32 %v2994_v47, %v2763_v40 }
 0x205   : > { %v2711_v46 = vpop.f32.mrf.mxu1 }
 0x206   : > { %v7399_v29 = vpop.f32.mrf.mxu0  ;;  %v2764_v60 = vadd.f32 %v2711_v46, %v7303_v4  ;;  %v7402_v48 = vadd.f32 %v5579_v25, %v2766_v35 }
 0x207   : > { %v5534_v13 = vpop.f32.mrf.mxu1 }
 0x208   : > { %7979 = vst [vmem:[#allocation14_spill] sm:$0xff] %v7402_v48  ;;  %v7404_v6 = vpop.f32.mrf.mxu0  ;;  %v2769_v20 = vadd.f32 %v5534_v13, %v7306_v22  ;;  %v7407_v43 = vadd.f32 %v2997_v14, %v2764_v60 }
 0x209   : > { %v2724_v27 = vpop.f32.mrf.mxu1 }
 0x20a   : > { %7980 = vst [vmem:[#allocation12_spill] sm:$0xff] %v7407_v43  ;;  %v5658_v16 = vpop.f32.mrf.mxu0  ;;  %v2767_v33 = vadd.f32 %v2724_v27, %v7309_v30  ;;  %v7410_v47 = vadd.f32 %v5582_v28, %v2769_v20 }
 0x20b   : > { %v5535_v18 = vpop.f32.mrf.mxu1 }
 0x20c   : > { %v3464_v57 = vpop.f32.mrf.mxu0  ;;  %v2770_v56 = vadd.f32 %v5535_v18, %v7312_v5  ;;  %v7413_v4 = vadd.f32 %v3010_v49, %v2767_v33 }
 0x20d   : > { %v2727_v25 = vpop.f32.mrf.mxu1 }
 0x20e   : > { %v7415_v51 = vpop.f32.mrf.mxu0  ;;  %v2768_v37 = vadd.f32 %v2727_v25, %v7315_v42  ;;  %v7418_v22 = vadd.f32 %v5583_v7, %v2770_v56 }
 0x20f   : > { %v5602_v14 = vpop.f32.mrf.mxu1 }
 0x210   : > { %7981 = vst [vmem:[#allocation3_spill] sm:$0xff] %v7418_v22  ;;  %v7420_v59 = vpop.f32.mrf.mxu0  ;;  %v3297_v30 = vadd.f32 %v5602_v14, %v7318_v62  ;;  %v7423_v28 = vadd.f32 %v3013_v63, %v2768_v37 }
 0x211   : > { %v3168_v40 = vpop.f32.mrf.mxu1 }
 0x212   : > { %7982 = vst [vmem:[#allocation4_spill] sm:$0xff] %v7423_v28  ;;  %v5662_v23 = vpop.f32.mrf.mxu0  ;;  %v3295_v5 = vadd.f32 %v3168_v40, %v7321_v54  ;;  %v7426_v49 = vadd.f32 %v5650_v50, %v3297_v30 }
 0x213   : > { %v7428_v35 = vpop.f32.mrf.mxu1 }
 0x214   : > { %v3480_v46 = vpop.f32.mrf.mxu0  ;;  %v7430_v60 = vadd.f32 %v3432_v2, %v3295_v5 }
 0x215   : > { %v7432_v42 = vpop.f32.mrf.mxu1 }
 0x216   : > { %v7434_v7 = vpop.f32.mrf.mxu0 }
 0x217   : > { %v5606_v13 = vpop.f32.mrf.mxu1 }
 0x218   : > { %v7436_v20 = vpop.f32.mrf.mxu0  ;;  %v3301_v62 = vadd.f32 %v5606_v13, %v7330_v8 }
 0x219   : > { %v3184_v63 = vpop.f32.mrf.mxu1 }
 0x21a   : > { %v5666_v27 = vpop.f32.mrf.mxu0  ;;  %v3299_v54 = vadd.f32 %v3184_v63, %v7333_v12  ;;  %v7440_v50 = vadd.f32 %v5654_v32, %v3301_v62 }
 0x21b   : > { %v7442_v33 = vpop.f32.mrf.mxu1 }
 0x21c   : > { %v3496_v18 = vpop.f32.mrf.mxu0  ;;  %v7444_v2 = vadd.f32 %v3448_v58, %v3299_v54 }
 0x21d   : > { %v7446_v56 = vpop.f32.mrf.mxu1 }
 0x21e   : > { %v7448_v25 = vpop.f32.mrf.mxu0 }
 0x21f   : > { %7983 = vst [vmem:[#allocation16_spill] sm:$0xff] %v7448_v25  ;;  %v5610_v37 = vpop.f32.mrf.mxu1 }
 0x220   : > { %v7450_v14 = vpop.f32.mrf.mxu0  ;;  %v3305_v8 = vadd.f32 %v5610_v37, %v7342_v52 }
 0x221   : > { %7984 = vst [vmem:[#allocation5_spill] sm:$0xff] %v7450_v14  ;;  %v3200_v30 = vpop.f32.mrf.mxu1 }
 0x222   : > { %v5670_v40 = vpop.f32.mrf.mxu0  ;;  %v3303_v12 = vadd.f32 %v3200_v30, %v7345_v21  ;;  %v7454_v32 = vadd.f32 %v5658_v16, %v3305_v8 }
 0x223   : > { %v7456_v5 = vpop.f32.mrf.mxu1 }
 0x224   : > { %v3512_v13 = vpop.f32.mrf.mxu0  ;;  %v7458_v58 = vadd.f32 %v3464_v57, %v3303_v12 }
 0x225   : > { %v7460_v62 = vpop.f32.mrf.mxu1 }
 0x226   : > { %v7462_v63 = vpop.f32.mrf.mxu0 }
 0x227   : > { %7985 = vst [vmem:[#allocation7_spill] sm:$0xff] %v7462_v63  ;;  %v5614_v54 = vpop.f32.mrf.mxu1 }
 0x228   : > { %v7464_v28 = vpop.f32.mrf.mxu0  ;;  %v3309_v52 = vadd.f32 %v5614_v54, %v7354_v36 }
 0x229   : > { %7986 = vst [vmem:[#allocation6_spill] sm:$0xff] %v7464_v28  ;;  %v3216_v37 = vpop.f32.mrf.mxu1 }
 0x22a   : > { %v5674_v22 = vpop.f32.mrf.mxu0  ;;  %v3307_v21 = vadd.f32 %v3216_v37, %v7357_v19  ;;  %v7468_v16 = vadd.f32 %v5662_v23, %v3309_v52 }
 0x22b   : > { %v7470_v8 = vpop.f32.mrf.mxu1 }
 0x22c   : > { %v3528_v30 = vpop.f32.mrf.mxu0  ;;  %v7472_v57 = vadd.f32 %v3480_v46, %v3307_v21 }
 0x22d   : > { %v7474_v12 = vpop.f32.mrf.mxu1 }
 0x22e   : > { %v7476_v43 = vpop.f32.mrf.mxu0 }
 0x22f   : > { %7987 = vst [vmem:[#allocation9_spill] sm:$0xff] %v7476_v43  ;;  %v5618_v48 = vpop.f32.mrf.mxu1 }
 0x230   : > { %v7478_v63 = vpop.f32.mrf.mxu0  ;;  %v3313_v36 = vadd.f32 %v5618_v48, %v7366_v55 }
 0x231   : > { %7988 = vst [vmem:[#allocation13_spill] sm:$0xff] %v7478_v63  ;;  %v3232_v54 = vpop.f32.mrf.mxu1 }
 0x232   : > { %v5678_v28 = vpop.f32.mrf.mxu0  ;;  %v3311_v19 = vadd.f32 %v3232_v54, %v7369_v34  ;;  %v7482_v23 = vadd.f32 %v5666_v27, %v3313_v36 }
 0x233   : > { %v7484_v52 = vpop.f32.mrf.mxu1 }
 0x234   : > { %7989 = vst [vmem:[#allocation8_spill] sm:$0xff] %v7482_v23  ;;  %v3544_v37 = vpop.f32.mrf.mxu0  ;;  %v7486_v46 = vadd.f32 %v3496_v18, %v3311_v19 }
 0x235   : > { %v7488_v21 = vpop.f32.mrf.mxu1 }
 0x236   : > { %7990 = vst [vmem:[#allocation15_spill] sm:$0xff] %v7486_v46  ;;  %v7490_v38 = vpop.f32.mrf.mxu0 }
 0x237   : > { %7991 = vst [vmem:[#allocation17_spill] sm:$0xff] %v7490_v38  ;;  %v5622_v43 = vpop.f32.mrf.mxu1 }
 0x238   : > { %v7492_v53 = vpop.f32.mrf.mxu0  ;;  %v3317_v55 = vadd.f32 %v5622_v43, %v7378_v3 }
 0x239   : > { %7992 = vst [vmem:[#allocation18_spill] sm:$0xff] %v7492_v53  ;;  %v3248_v48 = vpop.f32.mrf.mxu1 }
 0x23a   : > { %v5746_v63 = vpop.f32.mrf.mxu0  ;;  %v3315_v34 = vadd.f32 %v3248_v48, %v7381_v0  ;;  %v7496_v27 = vadd.f32 %v5670_v40, %v3317_v55 }
 0x23b   : > { %v7498_v36 = vpop.f32.mrf.mxu1 }
 0x23c   : > { %7993 = vst [vmem:[#allocation19_spill] sm:$0xff] %v7496_v27  ;;  %v3988_v54 = vpop.f32.mrf.mxu0  ;;  %v7500_v18 = vadd.f32 %v3512_v13, %v3315_v34 }
 0x23d   : > { %v7502_v19 = vpop.f32.mrf.mxu1 }
 0x23e   : > { %7994 = vst [vmem:[#allocation20_spill] sm:$0xff] %v7500_v18  ;;  %v5747_v14 = vpop.f32.mrf.mxu0 }
 0x23f   : > { %v5626_v38 = vpop.f32.mrf.mxu1 }
 0x240   : > { %v3991_v25 = vpop.f32.mrf.mxu0  ;;  %v3321_v53 = vadd.f32 %v5626_v38, %v7394_v26 }
 0x241   : > { %v3264_v46 = vpop.f32.mrf.mxu1 }
 0x242   : > { %v5750_v3 = vpop.f32.mrf.mxu0  ;;  %v3319_v43 = vadd.f32 %v3264_v46, %v7397_v45  ;;  %v7506_v23 = vadd.f32 %v5674_v22, %v3321_v53 }
 0x243   : > { %v7508_v0 = vpop.f32.mrf.mxu1 }
 0x244   : > { %7995 = vst [vmem:[#allocation21_spill] sm:$0xff] %v7506_v23  ;;  %v4004_v40 = vpop.f32.mrf.mxu0  ;;  %v7510_v55 = vadd.f32 %v3528_v30, %v3319_v43 }
 0x245   : > { %v7512_v13 = vpop.f32.mrf.mxu1 }
 0x246   : > { %7996 = vst [vmem:[#allocation22_spill] sm:$0xff] %v7510_v55  ;;  %7997 = vst [vmem:[#allocation23_spill] sm:$0xff] %v7512_v13  ;;  %v5751_v48 = vpop.f32.mrf.mxu0 }
 0x247   : > { %v5630_v34 = vpop.f32.mrf.mxu1 }
 0x248   : > { %v7514_v18 = vpop.f32.mrf.mxu0  ;;  %v3325_v27 = vadd.f32 %v5630_v34, %v7410_v47  ;;  %v3298_v47 = vadd.f32 %v7428_v35, %v7324_v39 }
 0x249   : > { %v3280_v38 = vpop.f32.mrf.mxu1 }
 0x24a   : > { %v7517_v26 = vpop.f32.mrf.mxu0  ;;  %v3323_v45 = vadd.f32 %v3280_v38, %v7413_v4  ;;  %v7520_v53 = vadd.f32 %v5678_v28, %v3325_v27  ;;  %v3296_v4 = vadd.f32 %v7432_v42, %v7327_v41  ;;  %v3562_v38 = vadd.f32 %v7383_v10, %v3298_v47 }
 0x24b   : > { %v7522_v22 = vpop.f32.mrf.mxu1  ;;  %v3302_v41 = vadd.f32 %v7442_v33, %v7336_v1 }
 0x24c   : > { %7998 = vst [vmem:[#allocation24_spill] sm:$0xff] %v7520_v53  ;;  %7999 = vst [vmem:[#allocation25_spill] sm:$0xff] %v7522_v22  ;;  %v7524_v46 = vpop.f32.mrf.mxu0  ;;  %v7526_v30 = vadd.f32 %v3544_v37, %v3323_v45  ;;  %v3560_v35 = vadd.f32 %v7388_v9, %v3296_v4 }
 0x24d   : > { %v7528_v43 = vpop.f32.mrf.mxu1 }
 0x24e   : > { %8000 = vst [vmem:[#allocation26_spill] sm:$0xff] %v7526_v30  ;;  %8001 = vst [vmem:[#allocation27_spill] sm:$0xff] %v7528_v43  ;;  %v7530_v55 = vpop.f32.mrf.mxu0 }
 0x24f   : > { %v5698_v34 = vpop.f32.mrf.mxu1 }
 0x250   : > { %v7534_v23 = vpop.f32.mrf.mxu0  ;;  %v3847_v37 = vadd.f32 %v5698_v34, %v7426_v49 }
 0x251   : > { %v3718_v28 = vpop.f32.mrf.mxu1 }
 0x252   : > { %v7538_v27 = vpop.f32.mrf.mxu0  ;;  %v3845_v53 = vadd.f32 %v3718_v28, %v7430_v60  ;;  %v7550_v42 = vadd.f32 %v5746_v63, %v3847_v37  ;;  %v3300_v60 = vadd.f32 %v7446_v56, %v7339_v31  ;;  %v3566_v56 = vadd.f32 %v7399_v29, %v3302_v41 }
 0x253   : > { %v5699_v45 = vpop.f32.mrf.mxu1  ;;  %v3306_v37 = vadd.f32 %v7456_v5, %v7348_v11  ;;  %v3304_v11 = vadd.f32 %v7460_v62, %v7351_v24 }
 0x254   : > { %v7542_v30 = vpop.f32.mrf.mxu0  ;;  %v3848_v39 = vadd.f32 %v5699_v45, %v3562_v38  ;;  %v7565_v1 = vadd.f32 %v3988_v54, %v3845_v53  ;;  %v3564_v28 = vadd.f32 %v7404_v6, %v3300_v60 }
 0x255   : > { %v3721_v43 = vpop.f32.mrf.mxu1  ;;  %v3570_v24 = vadd.f32 %v7415_v51, %v3306_v37 }
 0x256   : > { %v7546_v22 = vpop.f32.mrf.mxu0  ;;  %v7552_v13 = vadd.f32 %v5747_v14, %v3848_v39  ;;  %v3846_v49 = vadd.f32 %v3721_v43, %v3560_v35 }
 0x257   : > { %v5702_v10 = vpop.f32.mrf.mxu1 }
 0x258   : > { %v7561_v9 = vpop.f32.mrf.mxu0  ;;  %v5026_v33 = vpack.c.bf16 %v7552_v13, %v7550_v42  ;;  %v7569_v14 = vadd.f32 %v3991_v25, %v3846_v49  ;;  %v3851_v63 = vadd.f32 %v5702_v10, %v7440_v50 }
 0x259   : > { %v3734_v43 = vpop.f32.mrf.mxu1 }
 0x25a   : > { %v7572_v47 = vpop.f32.mrf.mxu0  ;;  %5113 = vst [vmem:[%s7559_s10 + $0x8] sm:$0xff] %v5026_v33   ;;  %v5021_v34 = vpack.c.bf16 %v7569_v14, %v7565_v1  ;;  %v4307_v4 = vadd.f32 %v7569_v14, %v7565_v1  ;;  %v3849_v31 = vadd.f32 %v3734_v43, %v7444_v2  ;;  %v7588_v38 = vadd.f32 %v5750_v3, %v3851_v63 }
 0x25b   : > { %v5703_v54 = vpop.f32.mrf.mxu1 }
 0x25c   : > { %v7581_v53 = vpop.f32.mrf.mxu0  ;;  %5022 = vst [vmem:[%s7559_s10] sm:$0xff] %v5021_v34   ;;  %v4308_v50 = vadd.f32 %v4307_v4, %v7550_v42  ;;  %v3852_v25 = vadd.f32 %v5703_v54, %v3566_v56  ;;  %v7592_v2 = vadd.f32 %v4004_v40, %v3849_v31  ;;  %v3310_v4 = vadd.f32 %v7470_v8, %v7360_v17 }
 0x25d   : > { %v3737_v45 = vpop.f32.mrf.mxu1  ;;  %v3308_v17 = vadd.f32 %v7474_v12, %v7363_v44 }
 0x25e   : > { %v7590_v39 = vpop.f32.mrf.mxu0  ;;  %v4309_v29 = vadd.f32 %v4308_v50, %v7552_v13  ;;  %v7595_v35 = vadd.f32 %v5751_v48, %v3852_v25  ;;  %v3850_v41 = vadd.f32 %v3737_v45, %v3564_v28  ;;  %v3574_v44 = vadd.f32 %v7434_v7, %v3310_v4 }
 0x25f   : > { %v5706_v49 = vpop.f32.mrf.mxu1 }
 0x260   : > { %v7597_v10 = vpop.f32.mrf.mxu0  ;;  %v4310_v6 = vadd.f32 %v4309_v29, %v7592_v2  ;;  %v5036_v5 = vpack.c.bf16 %v7595_v35, %v7588_v38  ;;  %v7605_v3 = vadd.f32 %v7514_v18, %v3850_v41  ;;  %v3855_v40 = vadd.f32 %v5706_v49, %v7454_v32 }
 0x261   : > { %v3750_v48 = vpop.f32.mrf.mxu1  ;;  %v3568_v32 = vadd.f32 %v7420_v59, %v3304_v11  ;;  %v3572_v11 = vadd.f32 %v7436_v20, %v3308_v17 }
 0x262   : > { %5115 = vst [vmem:[%s7559_s10 + $0x18] sm:$0xff] %v5036_v5   ;;  %v5031_v60 = vpack.c.bf16 %v7605_v3, %v7592_v2  ;;  %v4311_v33 = vadd.f32 %v4310_v6, %v7605_v3  ;;  %v3853_v63 = vadd.f32 %v3750_v48, %v7458_v58  ;;  %v7614_v43 = vpop.f32.mrf.mxu0  ;;  %v7622_v31 = vadd.f32 %v7517_v26, %v3855_v40 }
 0x263   : > { %v5707_v62 = vpop.f32.mrf.mxu1 }
 0x264   : > { %5114 = vst [vmem:[%s7559_s10 + $0x10] sm:$0xff] %v5031_v60   ;;  %v4312_v18 = vadd.f32 %v4311_v33, %v7588_v38  ;;  %v3856_v34 = vadd.f32 %v5707_v62, %v3570_v24  ;;  %v7625_v58 = vadd.f32 %v7524_v46, %v3853_v63  ;;  %v7631_v59 = vpop.f32.mrf.mxu0  ;;  %v3312_v33 = vadd.f32 %v7488_v21, %v7375_v61  ;;  %v8004_v61 = vld [vmem:[#allocation16_spill] sm:$0xff] }
 0x265   : > { %v3753_v56 = vpop.f32.mrf.mxu1 }
 0x266   : > { %v4313_v51 = vadd.f32 %v4312_v18, %v7595_v35  ;;  %v7629_v54 = vadd.f32 %v7530_v55, %v3856_v34  ;;  %v3854_v50 = vadd.f32 %v3753_v56, %v3568_v32  ;;  %v5767_v41 = vpop.f32.mrf.mxu0  ;;  %v8003_v18 = vld [vmem:[#allocation15_spill] sm:$0xff] }
 0x267   : > { %v5710_v25 = vpop.f32.mrf.mxu1 }
 0x268   : > { %v4314_v8 = vadd.f32 %v4313_v51, %v7625_v58  ;;  %v5046_v26 = vpack.c.bf16 %v7629_v54, %v7622_v31  ;;  %v7639_v46 = vadd.f32 %v7534_v23, %v3854_v50  ;;  %v3859_v28 = vadd.f32 %v5710_v25, %v7468_v16  ;;  %v4071_v20 = vpop.f32.mrf.mxu0  ;;  %v8005_v51 = vld [vmem:[#allocation5_spill] sm:$0xff]  ;;  %v8006_v25 = vld [vmem:[#allocation10_spill] sm:$0xff] }
 0x269   : > { %v3766_v55 = vpop.f32.mrf.mxu1  ;;  %v3314_v16 = vadd.f32 %v7484_v52, %v7372_v15  ;;  %v3576_v50 = vadd.f32 %v8005_v51, %v3312_v33  ;;  %v3318_v17 = vadd.f32 %v7498_v36, %v8006_v25  ;;  %v8013_v51 = vld [vmem:[#allocation12_spill] sm:$0xff] }
 0x26a   : > { %5117 = vst [vmem:[%s7559_s10 + $0x28] sm:$0xff] %v5046_v26   ;;  %v5041_v37 = vpack.c.bf16 %v7639_v46, %v7625_v58  ;;  %v4315_v45 = vadd.f32 %v4314_v8, %v7639_v46  ;;  %v3857_v29 = vadd.f32 %v3766_v55, %v7472_v57  ;;  %v7654_v6 = vadd.f32 %v7538_v27, %v3859_v28  ;;  %v8002_v27 = vld [vmem:[#allocation8_spill] sm:$0xff]  ;;  %v5770_v4 = vpop.f32.mrf.mxu0 }
 0x26b   : > { %v5711_v12 = vpop.f32.mrf.mxu1  ;;  %v3578_v21 = vadd.f32 %v8004_v61, %v3314_v16 }
 0x26c   : > { %5116 = vst [vmem:[%s7559_s10 + $0x20] sm:$0xff] %v5041_v37   ;;  %v4316_v49 = vadd.f32 %v4315_v45, %v7622_v31  ;;  %v3860_v23 = vadd.f32 %v5711_v12, %v3574_v44  ;;  %v7657_v57 = vadd.f32 %v7542_v30, %v3857_v29  ;;  %v4084_v44 = vpop.f32.mrf.mxu0  ;;  %v8007_v12 = vld [vmem:[#allocation11_spill] sm:$0xff] }
 0x26d   : > { %v3769_v5 = vpop.f32.mrf.mxu1 }
 0x26e   : > { %v4317_v7 = vadd.f32 %v4316_v49, %v7629_v54  ;;  %v7661_v40 = vadd.f32 %v7546_v22, %v3860_v23  ;;  %v3858_v48 = vadd.f32 %v3769_v5, %v3572_v11  ;;  %v3316_v49 = vadd.f32 %v7502_v19, %v8007_v12  ;;  %v8008_v23 = vld [vmem:[#allocation19_spill] sm:$0xff] }
 0x26f   : > { %v5714_v60 = vpop.f32.mrf.mxu1  ;;  %v8010_v19 = vld [vmem:[#allocation7_spill] sm:$0xff] }
 0x270   : > { %v4318_v15 = vadd.f32 %v4317_v7, %v7657_v57  ;;  %v5056_v52 = vpack.c.bf16 %v7661_v40, %v7654_v6  ;;  %v7669_v30 = vadd.f32 %v7561_v9, %v3858_v48  ;;  %v3863_v63 = vadd.f32 %v5714_v60, %v8002_v27  ;;  %v8009_v7 = vld [vmem:[#allocation20_spill] sm:$0xff]  ;;  %v8011_v27 = vld [vmem:[#allocation6_spill] sm:$0xff] }
 0x271   : > { %v3782_v24 = vpop.f32.mrf.mxu1  ;;  %v3582_v60 = vadd.f32 %v8010_v19, %v3318_v17 }
 0x272   : > { %5119 = vst [vmem:[%s7559_s10 + $0x38] sm:$0xff] %v5056_v52   ;;  %v5051_v22 = vpack.c.bf16 %v7669_v30, %v7657_v57  ;;  %v4319_v62 = vadd.f32 %v4318_v15, %v7669_v30  ;;  %v3861_v34 = vadd.f32 %v3782_v24, %v8003_v18  ;;  %v7684_v8 = vadd.f32 %v7572_v47, %v3863_v63  ;;  %v5771_v15 = vpop.f32.mrf.mxu0  ;;  %v8012_v24 = vld [vmem:[#allocation14_spill] sm:$0xff] }
 0x273   : > { %v5715_v32 = vpop.f32.mrf.mxu1  ;;  %v3580_v63 = vadd.f32 %v8011_v27, %v3316_v49  ;;  %v8017_v49 = vld [vmem:[#allocation9_spill] sm:$0xff] }
 0x274   : > { %5118 = vst [vmem:[%s7559_s10 + $0x30] sm:$0xff] %v5051_v22   ;;  %v4320_v56 = vadd.f32 %v4319_v62, %v7654_v6  ;;  %v3864_v9 = vadd.f32 %v5715_v32, %v3578_v21  ;;  %v7687_v28 = vadd.f32 %v7581_v53, %v3861_v34  ;;  %v3322_v22 = vadd.f32 %v7508_v0, %v8012_v24 }
 0x275   : > { %v3785_v26 = vpop.f32.mrf.mxu1 }
 0x276   : > { %v4321_v55 = vadd.f32 %v4320_v56, %v7661_v40  ;;  %v7691_v37 = vadd.f32 %v7590_v39, %v3864_v9  ;;  %v3862_v45 = vadd.f32 %v3785_v26, %v3576_v50  ;;  %v4087_v9 = vpop.f32.mrf.mxu0  ;;  %v8014_v50 = vld [vmem:[#allocation23_spill] sm:$0xff] }
 0x277   : > { %v5718_v29 = vpop.f32.mrf.mxu1  ;;  %v3320_v25 = vadd.f32 %v8014_v50, %v8013_v51 }
 0x278   : > { %v4322_v36 = vadd.f32 %v4321_v55, %v7687_v28  ;;  %v5066_v47 = vpack.c.bf16 %v7691_v37, %v7684_v8  ;;  %v7699_v53 = vadd.f32 %v7597_v10, %v3862_v45  ;;  %v3867_v11 = vadd.f32 %v5718_v29, %v8008_v23  ;;  %v8016_v29 = vld [vmem:[#allocation22_spill] sm:$0xff]  ;;  %v5774_v23 = vpop.f32.mrf.mxu0 }
 0x279   : > { %v3798_v16 = vpop.f32.mrf.mxu1 }
 0x27a   : > { %5121 = vst [vmem:[%s7559_s10 + $0x48] sm:$0xff] %v5066_v47   ;;  %v5061_v39 = vpack.c.bf16 %v7699_v53, %v7687_v28  ;;  %v4323_v5 = vadd.f32 %v4322_v36, %v7699_v53  ;;  %v3865_v48 = vadd.f32 %v3798_v16, %v8009_v7  ;;  %v7714_v62 = vadd.f32 %v7614_v43, %v3867_v11  ;;  %v8018_v16 = vld [vmem:[#allocation13_spill] sm:$0xff]  ;;  %v4100_v24 = vpop.f32.mrf.mxu0 }
 0x27b   : > { %v5719_v33 = vpop.f32.mrf.mxu1  ;;  %v3586_v36 = vadd.f32 %v8017_v49, %v3322_v22  ;;  %v8020_v7 = vld [vmem:[#allocation25_spill] sm:$0xff]  ;;  %v8021_v22 = vld [vmem:[#allocation4_spill] sm:$0xff] }
 0x27c   : > { %5120 = vst [vmem:[%s7559_s10 + $0x40] sm:$0xff] %v5061_v39   ;;  %v4324_v52 = vadd.f32 %v4323_v5, %v7684_v8  ;;  %v3868_v10 = vadd.f32 %v5719_v33, %v3582_v60  ;;  %v7717_v34 = vadd.f32 %v7631_v59, %v3865_v48  ;;  %v8015_v59 = vld [vmem:[#allocation21_spill] sm:$0xff]  ;;  %v3584_v39 = vadd.f32 %v8018_v16, %v3320_v25  ;;  %v8019_v5 = vld [vmem:[#allocation3_spill] sm:$0xff] }
 0x27d   : > { %v3801_v18 = vpop.f32.mrf.mxu1  ;;  %v3326_v48 = vadd.f32 %v8020_v7, %v8019_v5 }
 0x27e   : > { %v4325_v61 = vadd.f32 %v4324_v52, %v7691_v37  ;;  %v7720_v21 = vadd.f32 %v5767_v41, %v3868_v10  ;;  %v3866_v32 = vadd.f32 %v3801_v18, %v3580_v63  ;;  %v8022_v18 = vld [vmem:[#allocation27_spill] sm:$0xff] }
 0x27f   : > { %v5722_v56 = vpop.f32.mrf.mxu1 }
 0x280   : > { %v4326_v0 = vadd.f32 %v4325_v61, %v7717_v34  ;;  %v5076_v43 = vpack.c.bf16 %v7720_v21, %v7714_v62  ;;  %v7727_v17 = vadd.f32 %v4071_v20, %v3866_v32  ;;  %v3871_v26 = vadd.f32 %v5722_v56, %v8015_v59  ;;  %v8025_v59 = vld [vmem:[#allocation17_spill] sm:$0xff] }
 0x281   : > { %v3814_v55 = vpop.f32.mrf.mxu1  ;;  %v3324_v61 = vadd.f32 %v8022_v18, %v8021_v22 }
 0x282   : > { %5123 = vst [vmem:[%s7559_s10 + $0x58] sm:$0xff] %v5076_v43   ;;  %v5071_v41 = vpack.c.bf16 %v7727_v17, %v7717_v34  ;;  %v4327_v45 = vadd.f32 %v4326_v0, %v7727_v17  ;;  %v3869_v12 = vadd.f32 %v3814_v55, %v8016_v29  ;;  %v7741_v19 = vadd.f32 %v5770_v4, %v3871_v26  ;;  %v8024_v0 = vld [vmem:[#allocation26_spill] sm:$0xff]  ;;  %v5775_v55 = vpop.f32.mrf.mxu0 }
 0x283   : > { %v5723_v47 = vpop.f32.mrf.mxu1  ;;  %v3590_v26 = vadd.f32 %v8025_v59, %v3326_v48  ;;  %v8026_v29 = vld [vmem:[#allocation18_spill] sm:$0xff] }
 0x284   : > { %5122 = vst [vmem:[%s7559_s10 + $0x50] sm:$0xff] %v5071_v41   ;;  %v4328_v11 = vadd.f32 %v4327_v45, %v7714_v62  ;;  %v3872_v20 = vadd.f32 %v5723_v47, %v3586_v36  ;;  %v7743_v33 = vadd.f32 %v4084_v44, %v3869_v12  ;;  %v8023_v44 = vld [vmem:[#allocation24_spill] sm:$0xff]  ;;  %v3588_v12 = vadd.f32 %v8026_v29, %v3324_v61 }
 0x285   : > { %v3817_v60 = vpop.f32.mrf.mxu1 }
 0x286   : > { %v4329_v52 = vadd.f32 %v4328_v11, %v7720_v21  ;;  %v7746_v10 = vadd.f32 %v5771_v15, %v3872_v20  ;;  %v3870_v27 = vadd.f32 %v3817_v60, %v3584_v39  ;;  %v4103_v39 = vpop.f32.mrf.mxu0 }
 0x287   : > { %v5726_v63 = vpop.f32.mrf.mxu1 }
 0x288   : > { %v4330_v32 = vadd.f32 %v4329_v52, %v7743_v33  ;;  %v5086_v4 = vpack.c.bf16 %v7746_v10, %v7741_v19  ;;  %v7753_v56 = vadd.f32 %v4087_v9, %v3870_v27  ;;  %v3875_v51 = vadd.f32 %v5726_v63, %v8023_v44 }
 0x289   : > { %v3830_v50 = vpop.f32.mrf.mxu1 }
 0x28a   : > { %5125 = vst [vmem:[%s7559_s10 + $0x68] sm:$0xff] %v5086_v4   ;;  %v5081_v15 = vpack.c.bf16 %v7753_v56, %v7743_v33  ;;  %v4331_v25 = vadd.f32 %v4330_v32, %v7753_v56  ;;  %v3873_v43 = vadd.f32 %v3830_v50, %v8024_v0  ;;  %v7765_v49 = vadd.f32 %v5774_v23, %v3875_v51 }
 0x28b   : > { %v5727_v41 = vpop.f32.mrf.mxu1 }
 0x28c   : > { %5124 = vst [vmem:[%s7559_s10 + $0x60] sm:$0xff] %v5081_v15   ;;  %v4332_v9 = vadd.f32 %v4331_v25, %v7741_v19  ;;  %v3876_v45 = vadd.f32 %v5727_v41, %v3590_v26  ;;  %v7767_v47 = vadd.f32 %v4100_v24, %v3873_v43 }
 0x28d   : > { %v3833_v36 = vpop.f32.mrf.mxu1 }
 0x28e   : > { %v4333_v11 = vadd.f32 %v4332_v9, %v7746_v10  ;;  %v7770_v20 = vadd.f32 %v5775_v55, %v3876_v45  ;;  %v3874_v16 = vadd.f32 %v3833_v36, %v3588_v12 }
 0x290   : > { %v4334_v5 = vadd.f32 %v4333_v11, %v7767_v47  ;;  %v5096_v7 = vpack.c.bf16 %v7770_v20, %v7765_v49  ;;  %v7775_v48 = vadd.f32 %v4103_v39, %v3874_v16 }
 0x292   : > { %5127 = vst [vmem:[%s7559_s10 + $0x78] sm:$0xff] %v5096_v7   ;;  %v5091_v23 = vpack.c.bf16 %v7775_v48, %v7767_v47  ;;  %v4335_v60 = vadd.f32 %v4334_v5, %v7775_v48 }
 0x294   : > { %5126 = vst [vmem:[%s7559_s10 + $0x70] sm:$0xff] %v5091_v23   ;;  %v4336_v52 = vadd.f32 %v4335_v60, %v7765_v49 }
 0x296   : > { %v4337_v27 = vadd.f32 %v4336_v52, %v7770_v20 }
 0x298   : > { %v4338_v63 = vrot.slane %v4337_v27, 4 }
 0x29a   : > { %v4339_v24 = vadd.f32 %v4338_v63, %v4337_v27 }
 0x29c   : > { %v4340_v22 = vrot.slane %v4339_v24, 2 }
 0x29e   : > { %v4341_v18 = vadd.f32 %v4340_v22, %v4339_v24 }
 0x2a0   : > { %v4342_v61 = vrot.slane %v4341_v18, 1 }
 0x2a2   : > { %v7784_v32 = vadd.f32 %v4342_v61, %v4341_v18 }
 0x2a4   : > { %v7787_v4 = vmul.f32 0.00390625, %v7784_v32 }
 0x2a6   : > { %v4346_v44 = vsub.f32 %v7565_v1, %v7787_v4  ;;  %v4347_v51 = vsub.f32 %v7569_v14, %v7787_v4  ;;  %v4348_v50 = vsub.f32 %v7550_v42, %v7787_v4  ;;  %v4349_v0 = vsub.f32 %v7552_v13, %v7787_v4 }
 0x2a7   : > { %v4350_v43 = vsub.f32 %v7592_v2, %v7787_v4  ;;  %v4351_v55 = vsub.f32 %v7605_v3, %v7787_v4  ;;  %v4352_v14 = vsub.f32 %v7588_v38, %v7787_v4  ;;  %v4353_v45 = vsub.f32 %v7595_v35, %v7787_v4 }
 0x2a8   : > { %v4378_v15 = vmul.f32 %v4346_v44, %v4346_v44  ;;  %v4379_v25 = vmul.f32 %v4347_v51, %v4347_v51  ;;  %v4380_v59 = vmul.f32 %v4348_v50, %v4348_v50  ;;  %v4381_v1 = vmul.f32 %v4349_v0, %v4349_v0 }
 0x2a9   : > { %v4382_v9 = vmul.f32 %v4350_v43, %v4350_v43  ;;  %v4383_v29 = vmul.f32 %v4351_v55, %v4351_v55  ;;  %v4354_v2 = vsub.f32 %v7625_v58, %v7787_v4  ;;  %v4384_v12 = vmul.f32 %v4352_v14, %v4352_v14 }
 0x2aa   : > { %v4410_v26 = vadd.f32 %v4379_v25, %v4378_v15  ;;  %v4355_v3 = vsub.f32 %v7639_v46, %v7787_v4  ;;  %v4385_v11 = vmul.f32 %v4353_v45, %v4353_v45  ;;  %v4356_v38 = vsub.f32 %v7622_v31, %v7787_v4 }
 0x2ab   : > { %v4386_v39 = vmul.f32 %v4354_v2, %v4354_v2  ;;  %v4357_v35 = vsub.f32 %v7629_v54, %v7787_v4  ;;  %v4358_v58 = vsub.f32 %v7657_v57, %v7787_v4  ;;  %v4359_v46 = vsub.f32 %v7669_v30, %v7787_v4 }
 0x2ac   : > { %v4411_v41 = vadd.f32 %v4410_v26, %v4380_v59  ;;  %v4387_v7 = vmul.f32 %v4355_v3, %v4355_v3  ;;  %v4388_v60 = vmul.f32 %v4356_v38, %v4356_v38  ;;  %v4360_v31 = vsub.f32 %v7654_v6, %v7787_v4 }
 0x2ad   : > { %v4389_v27 = vmul.f32 %v4357_v35, %v4357_v35  ;;  %v4390_v24 = vmul.f32 %v4358_v58, %v4358_v58  ;;  %v4361_v54 = vsub.f32 %v7661_v40, %v7787_v4  ;;  %v4391_v18 = vmul.f32 %v4359_v46, %v4359_v46 }
 0x2ae   : > { %v4412_v42 = vadd.f32 %v4411_v41, %v4381_v1  ;;  %v4362_v57 = vsub.f32 %v7687_v28, %v7787_v4  ;;  %v4392_v44 = vmul.f32 %v4360_v31, %v4360_v31  ;;  %v4363_v30 = vsub.f32 %v7699_v53, %v7787_v4 }
 0x2af   : > { %v4393_v50 = vmul.f32 %v4361_v54, %v4361_v54  ;;  %v4364_v6 = vsub.f32 %v7684_v8, %v7787_v4  ;;  %v4365_v40 = vsub.f32 %v7691_v37, %v7787_v4  ;;  %v4366_v28 = vsub.f32 %v7717_v34, %v7787_v4 }
 0x2b0   : > { %v4413_v13 = vadd.f32 %v4412_v42, %v4382_v9  ;;  %v4394_v25 = vmul.f32 %v4362_v57, %v4362_v57  ;;  %v4395_v43 = vmul.f32 %v4363_v30, %v4363_v30  ;;  %v4367_v53 = vsub.f32 %v7727_v17, %v7787_v4 }
 0x2b1   : > { %v4396_v26 = vmul.f32 %v4364_v6, %v4364_v6  ;;  %v4397_v1 = vmul.f32 %v4365_v40, %v4365_v40  ;;  %v4368_v8 = vsub.f32 %v7714_v62, %v7787_v4  ;;  %v4398_v14 = vmul.f32 %v4366_v28, %v4366_v28 }
 0x2b2   : > { %v4414_v36 = vadd.f32 %v4413_v13, %v4383_v29  ;;  %v4369_v37 = vsub.f32 %v7720_v21, %v7787_v4  ;;  %v4399_v42 = vmul.f32 %v4367_v53, %v4367_v53  ;;  %v4370_v34 = vsub.f32 %v7743_v33, %v7787_v4 }
 0x2b3   : > { %v4400_v29 = vmul.f32 %v4368_v8, %v4368_v8  ;;  %v4371_v17 = vsub.f32 %v7753_v56, %v7787_v4  ;;  %v4372_v62 = vsub.f32 %v7741_v19, %v7787_v4  ;;  %v4373_v21 = vsub.f32 %v7746_v10, %v7787_v4 }
 0x2b4   : > { %v4415_v16 = vadd.f32 %v4414_v36, %v4384_v12  ;;  %v4401_v2 = vmul.f32 %v4369_v37, %v4369_v37  ;;  %v4402_v36 = vmul.f32 %v4370_v34, %v4370_v34  ;;  %v4374_v33 = vsub.f32 %v7767_v47, %v7787_v4 }
 0x2b5   : > { %v4404_v38 = vmul.f32 %v4372_v62, %v4372_v62  ;;  %v4375_v56 = vsub.f32 %v7775_v48, %v7787_v4  ;;  %v4376_v19 = vsub.f32 %v7765_v49, %v7787_v4  ;;  %v4377_v10 = vsub.f32 %v7770_v20, %v7787_v4 }
 0x2b6   : > { %v4416_v5 = vadd.f32 %v4415_v16, %v4385_v11  ;;  %v4403_v11 = vmul.f32 %v4371_v17, %v4371_v17 }
 0x2b7   : > { %v4407_v58 = vmul.f32 %v4375_v56, %v4375_v56  ;;  %v4409_v46 = vmul.f32 %v4377_v10, %v4377_v10 }
 0x2b8   : > { %v4417_v23 = vadd.f32 %v4416_v5, %v4386_v39  ;;  %v4405_v5 = vmul.f32 %v4373_v21, %v4373_v21 }
 0x2ba   : > { %v4418_v52 = vadd.f32 %v4417_v23, %v4387_v7  ;;  %v4406_v7 = vmul.f32 %v4374_v33, %v4374_v33 }
 0x2bc   : > { %v4419_v63 = vadd.f32 %v4418_v52, %v4388_v60  ;;  %v4408_v52 = vmul.f32 %v4376_v19, %v4376_v19 }
 0x2be   : > { %v4420_v22 = vadd.f32 %v4419_v63, %v4389_v27 }
 0x2c0   : > { %v4421_v61 = vadd.f32 %v4420_v22, %v4390_v24 }
 0x2c2   : > { %v4422_v51 = vadd.f32 %v4421_v61, %v4391_v18 }
 0x2c4   : > { %v4423_v15 = vadd.f32 %v4422_v51, %v4392_v44 }
 0x2c6   : > { %v4424_v0 = vadd.f32 %v4423_v15, %v4393_v50 }
 0x2c8   : > { %v4425_v59 = vadd.f32 %v4424_v0, %v4394_v25 }
 0x2ca   : > { %v4426_v55 = vadd.f32 %v4425_v59, %v4395_v43 }
 0x2cc   : > { %v4427_v41 = vadd.f32 %v4426_v55, %v4396_v26 }
 0x2ce   : > { %v4428_v9 = vadd.f32 %v4427_v41, %v4397_v1 }
 0x2d0   : > { %v4429_v45 = vadd.f32 %v4428_v9, %v4398_v14 }
 0x2d2   : > { %v4430_v13 = vadd.f32 %v4429_v45, %v4399_v42 }
 0x2d4   : > { %v4431_v12 = vadd.f32 %v4430_v13, %v4400_v29 }
 0x2d6   : > { %v4432_v3 = vadd.f32 %v4431_v12, %v4401_v2 }
 0x2d8   : > { %v4433_v16 = vadd.f32 %v4432_v3, %v4402_v36 }
 0x2da   : > { %v4434_v39 = vadd.f32 %v4433_v16, %v4403_v11 }
 0x2dc   : > { %v4435_v35 = vadd.f32 %v4434_v39, %v4404_v38 }
 0x2de   : > { %v4436_v23 = vadd.f32 %v4435_v35, %v4405_v5 }
 0x2e0   : > { %v4437_v60 = vadd.f32 %v4436_v23, %v4406_v7 }
 0x2e2   : > { %v4438_v47 = vadd.f32 %v4437_v60, %v4407_v58 }
 0x2e4   : > { %v4439_v27 = vadd.f32 %v4438_v47, %v4408_v52 }
 0x2e6   : > { %v4440_v63 = vadd.f32 %v4439_v27, %v4409_v46 }
 0x2e8   : > { %v4441_v31 = vrot.slane %v4440_v63, 4 }
 0x2ea   : > { %v4442_v48 = vadd.f32 %v4441_v31, %v4440_v63 }
 0x2ec   : > { %v4443_v24 = vrot.slane %v4442_v48, 2 }
 0x2ee   : > { %v4444_v22 = vadd.f32 %v4443_v24, %v4442_v48 }
 0x2f0   : > { %v4445_v54 = vrot.slane %v4444_v22, 1 }
 0x2f2   : > { %v4446_v18 = vadd.f32 %v4445_v54, %v4444_v22 }
 0x2f4   : > { %v4448_v49 = vsel %vm892_vm5, %v7784_v32, %v4446_v18 }
 0x2f5   : > { %v4450_v20 = vsel %vm4449_vm14, %v4448_v49, 0.0 }
 0x2f6   : > { %4451 = vst [vmem:[%s235_s13] sm:$0xff] %v4450_v20 }
 0x2f7 PF: > { %s16_s18 = sadd.s32 1, %s5926_s18  }
 0x2f8   : > { %p13_p4 = scmp.ge.s32.totalorder %s16_s18, 4  }
 0x2fa   :  { %15 = sbr.rel (!%p13_p4) target bundleno = 1 (0x1), region = 87 }

</bundles_post_ra>
